<compile_context>
chip_gen: v6e
topology: v6e:2x2x1
jax: 0.10.0
libtpu: 0.0.40
codegen_flags: <defaults>
</compile_context>

<pallas_src>
import functools

import jax
import jax.numpy as jnp
from jax.experimental import pallas as pl
from jax.experimental.pallas import tpu as pltpu

CIN0_PAD = 4                       # first conv's input channels padded 3 -> 4
VMEM_LIMIT = 32 * 1024 * 1024


# ------------------------------------------------------------------
# In-kernel helpers (traced inside the Pallas kernel body)
# ------------------------------------------------------------------

def _pool2x2(y, pitch, H, W, hp_ref, dst_ref):
    """2x2 / stride-2 max pool of a row-flat conv slab.

    y:   (Pc, C) f32 value; row o = h*pitch + w holds the conv output at (h, w)
         (columns w >= W, if any, are never read).
    hp_ref: (Pc - pitch - 1, C) f32 scratch for the dense pairwise maxima.
    dst_ref: next layer's zero-padded flat slab ((H/2+2)*(W/2+2), C) or None.
    Returns the pooled (Ho*Wo, C) value when dst_ref is None, else writes dst_ref.
    """
    Pc = y.shape[0]
    Ho, Wo = H // 2, W // 2
    # vertical pairwise max, then dense horizontal pairwise max (VPU only)
    v = jnp.maximum(y[:Pc - pitch, :], y[pitch:, :])
    hp_ref[...] = jnp.maximum(v[:-1, :], v[1:, :])
    # one stride-2 extraction per output row
    rows = []
    for ho in range(Ho):
        base = 2 * ho * pitch
        if Wo == 1:
            rows.append(hp_ref[base:base + 1, :])
        else:
            rows.append(hp_ref[pl.ds(base, Wo, stride=2), :])
    if dst_ref is None:
        return rows[0] if Ho == 1 else jnp.concatenate(rows, axis=0)
    Wpo = Wo + 2
    # tiny VMEM slab: zero the ring (and interior) once, then write interior rows
    dst_ref[...] = jnp.zeros_like(dst_ref)
    for ho in range(Ho):
        dst = (ho + 1) * Wpo + 1
        dst_ref[dst:dst + Wo, :] = rows[ho]
    return None


def _plainconv_kernel(*refs, dims):
    (x0_ref, w0_ref, b0_ref,
     w1_ref, b1_ref, w2_ref, b2_ref, w3_ref, b3_ref, w4_ref, b4_ref,
     w5_ref, b5_ref, wf_ref, bf_ref,
     o_ref,
     hp0, a1, hp1, a2, hp2, a3, hp3, a4, hp4) = refs

    # ---------- layer 0: single K = 9*Cin0 im2col contraction ----------
    H0, W0 = dims[0]
    y = jnp.dot(x0_ref[...], w0_ref[...], preferred_element_type=jnp.float32)
    y = jnp.maximum(y + b0_ref[...], 0.0)              # bias + ReLU, f32
    _pool2x2(y, W0, H0, W0, hp0, a1)                   # write layer-1 padded slab

    # ---------- layers 1..4: padded-flat shifted-tap conv, all in VMEM ----------
    w_refs = (w1_ref, w2_ref, w3_ref, w4_ref)
    b_refs = (b1_ref, b2_ref, b3_ref, b4_ref)
    a_refs = (a1, a2, a3, a4)
    hp_refs = (hp1, hp2, hp3, hp4)
    dst_refs = (a2, a3, a4, None)
    pooled = None
    for l in range(4):
        H, W = dims[l + 1]
        Wp = W + 2
        Pc = H * Wp - 2
        xa = a_refs[l][...].astype(jnp.bfloat16)       # ONE bf16 cast per layer slab
        acc = None
        for t in range(9):                             # 9 row-shifted MXU dots
            off = (t // 3) * Wp + (t % 3)
            d = jnp.dot(xa[off:off + Pc, :], w_refs[l][t],
                        preferred_element_type=jnp.float32)
            acc = d if acc is None else acc + d
        y = jnp.maximum(acc + b_refs[l][...], 0.0)     # bias + ReLU, f32
        pooled = _pool2x2(y, Wp, H, W, hp_refs[l], dst_refs[l])

    # ---------- tail: conv1x1 + ReLU + AdaptiveMaxPool2d((1,1)) + Linear + ReLU ----------
    h1 = jnp.dot(pooled.astype(jnp.bfloat16), w5_ref[...],
                 preferred_element_type=jnp.float32)
    h1 = jnp.maximum(h1 + b5_ref[...], 0.0)
    g = jnp.max(h1, axis=0, keepdims=True)             # global spatial max
    o = jnp.dot(g.astype(jnp.bfloat16), wf_ref[...],
                preferred_element_type=jnp.float32)
    o_ref[...] = jnp.maximum(o + bf_ref[...], 0.0)


# ------------------------------------------------------------------
# Parameters (deterministic synthetic weights; biases zero per reset_parameters)
# ------------------------------------------------------------------

def init_params(key, in_channels=3, out_dim=256):
    assert in_channels <= CIN0_PAD
    chans = [(in_channels, 16), (16, 16), (16, 32), (32, 64), (64, 128)]
    keys = jax.random.split(key, 7)
    params = {}
    # layer 0 packed for the single K = 9*CIN0_PAD im2col contraction
    ci, co = chans[0]
    w = jax.random.normal(keys[0], (3, 3, ci, co), jnp.float32) * jnp.sqrt(2.0 / (9 * ci))
    w0 = jnp.zeros((3, 3, CIN0_PAD, co), jnp.float32).at[:, :, :ci, :].set(w)
    params["conv0_w"] = w0.reshape(9 * CIN0_PAD, co).astype(jnp.bfloat16)
    params["conv0_b"] = jnp.zeros((1, co), jnp.float32)
    for i in range(1, 5):
        ci, co = chans[i]
        w = jax.random.normal(keys[i], (3, 3, ci, co), jnp.float32) * jnp.sqrt(2.0 / (9 * ci))
        params[f"conv{i}_w"] = w.reshape(9, ci, co).astype(jnp.bfloat16)
        params[f"conv{i}_b"] = jnp.zeros((1, co), jnp.float32)
    params["conv5_w"] = (jax.random.normal(keys[5], (128, 128), jnp.float32)
                         * jnp.sqrt(2.0 / 128.0)).astype(jnp.bfloat16)
    params["conv5_b"] = jnp.zeros((1, 128), jnp.float32)
    params["fc_w"] = (jax.random.normal(keys[6], (128, out_dim), jnp.float32)
                      * jnp.sqrt(2.0 / 128.0)).astype(jnp.bfloat16)
    params["fc_b"] = jnp.zeros((1, out_dim), jnp.float32)
    return params


# ------------------------------------------------------------------
# Full forward (PlainConv.forward, max_pooling=True, inactivated_output=False)
# ------------------------------------------------------------------

def plain_conv_forward(params, image_nchw):
    N, C, H, W = image_nchw.shape
    assert C <= CIN0_PAD
    couts = [16, 16, 32, 64, 128]
    cins = [CIN0_PAD, 16, 16, 32, 64]

    dims = []
    h, w = H, W
    for _ in range(5):
        # TODO(synk): requires even H, W at every stage (true for 32x32); odd sizes
        # would need MaxPool2d's floor behaviour which this fused path drops.
        assert h % 2 == 0 and w % 2 == 0
        dims.append((h, w))
        h, w = h // 2, w // 2
    Ht, Wt = h, w
    dims = tuple(dims)
    out_dim = params["fc_w"].shape[1]

    # layer-0 im2col built host-side (tiny), delivered bf16 / MXU-ready
    x = jnp.transpose(image_nchw, (0, 2, 3, 1)).astype(jnp.float32)      # NHWC
    xp = jnp.pad(x, ((0, 0), (1, 1), (1, 1), (0, CIN0_PAD - C)))
    cols = [xp[:, dh:dh + H, dw:dw + W, :] for dh in range(3) for dw in range(3)]
    x0 = jnp.concatenate(cols, axis=-1).reshape(N, H * W, 9 * CIN0_PAD)
    x0 = x0.astype(jnp.bfloat16)

    # specs / args
    in_specs = [pl.BlockSpec((None, H * W, 9 * CIN0_PAD), lambda n: (n, 0, 0)),
                pl.BlockSpec((9 * CIN0_PAD, couts[0]), lambda n: (0, 0)),
                pl.BlockSpec((1, couts[0]), lambda n: (0, 0))]
    args = [x0, params["conv0_w"], params["conv0_b"]]
    for i in range(1, 5):
        in_specs += [pl.BlockSpec((9, cins[i], couts[i]), lambda n: (0, 0, 0)),
                     pl.BlockSpec((1, couts[i]), lambda n: (0, 0))]
        args += [params[f"conv{i}_w"], params[f"conv{i}_b"]]
    in_specs += [pl.BlockSpec((128, 128), lambda n: (0, 0)),
                 pl.BlockSpec((1, 128), lambda n: (0, 0)),
                 pl.BlockSpec((128, out_dim), lambda n: (0, 0)),
                 pl.BlockSpec((1, out_dim), lambda n: (0, 0))]
    args += [params["conv5_w"], params["conv5_b"], params["fc_w"], params["fc_b"]]

    # VMEM scratch: pairwise-max slabs (hp_i) + next-layer padded-flat inputs (a_i)
    scratch = [pltpu.VMEM((H * W - W - 1, couts[0]), jnp.float32)]        # hp0
    for i in range(1, 5):
        hi, wi = dims[i]
        wpi = wi + 2
        scratch.append(pltpu.VMEM(((hi + 2) * wpi, cins[i]), jnp.float32))    # a_i
        scratch.append(pltpu.VMEM(((hi - 1) * wpi - 3, couts[i]), jnp.float32))  # hp_i

    flops = 0
    for i in range(5):
        hi, wi = dims[i]
        flops += 2 * hi * wi * 9 * cins[i] * couts[i]
    flops += 2 * Ht * Wt * 128 * 128 + 2 * 128 * out_dim
    flops *= N
    bytes_accessed = sum(int(a.size) * a.dtype.itemsize for a in args) + N * out_dim * 4

    out = pl.pallas_call(
        functools.partial(_plainconv_kernel, dims=dims),
        out_shape=jax.ShapeDtypeStruct((N, 1, out_dim), jnp.float32),
        grid_spec=pltpu.PrefetchScalarGridSpec(
            num_scalar_prefetch=0,
            grid=(N,),                                  # one image / step; parallel for v7x
            in_specs=in_specs,
            out_specs=pl.BlockSpec((None, 1, out_dim), lambda n: (n, 0, 0)),
            scratch_shapes=scratch),
        compiler_params=pltpu.CompilerParams(
            dimension_semantics=("parallel",),
            vmem_limit_bytes=VMEM_LIMIT),
        cost_estimate=pl.CostEstimate(flops=flops, transcendentals=0,
                                      bytes_accessed=bytes_accessed),
    )(*args)
    return out.reshape(N, out_dim)


# ------------------------------------------------------------------
# Pure-JAX reference (same bf16-input / f32-accumulate contraction scheme)
# ------------------------------------------------------------------

def _ref_conv3x3(x_nhwc, w_33cico, b_1c):
    N, H, W, _ = x_nhwc.shape
    xp = jnp.pad(x_nhwc, ((0, 0), (1, 1), (1, 1), (0, 0))).astype(jnp.bfloat16)
    y = jnp.zeros((N, H, W, w_33cico.shape[-1]), jnp.float32)
    for dh in range(3):
        for dw in range(3):
            y = y + jnp.einsum('nhwc,co->nhwo', xp[:, dh:dh + H, dw:dw + W, :],
                               w_33cico[dh, dw], preferred_element_type=jnp.float32)
    return jnp.maximum(y + b_1c.reshape(1, 1, 1, -1), 0.0)


def _ref_pool2(y):
    N, H, W, C = y.shape
    return jnp.max(y.reshape(N, H // 2, 2, W // 2, 2, C), axis=(2, 4))


def plain_conv_reference(params, image_nchw):
    N, C, _, _ = image_nchw.shape
    x = jnp.transpose(image_nchw, (0, 2, 3, 1)).astype(jnp.float32)
    x = jnp.pad(x, ((0, 0), (0, 0), (0, 0), (0, CIN0_PAD - C)))
    w0 = params["conv0_w"].reshape(3, 3, CIN0_PAD, -1)
    x = _ref_pool2(_ref_conv3x3(x, w0, params["conv0_b"]))
    for i in range(1, 5):
        w9 = params[f"conv{i}_w"]
        w = w9.reshape(3, 3, w9.shape[1], w9.shape[2])
        x = _ref_pool2(_ref_conv3x3(x, w, params[f"conv{i}_b"]))
    h1 = jnp.maximum(jnp.einsum('nhwc,co->nhwo', x.astype(jnp.bfloat16),
                                params["conv5_w"], preferred_element_type=jnp.float32)
                     + params["conv5_b"], 0.0)
    g = jnp.max(h1, axis=(1, 2))
    out = jnp.dot(g.astype(jnp.bfloat16), params["fc_w"],
                  preferred_element_type=jnp.float32) + params["fc_b"]
    return jnp.maximum(out, 0.0)


if __name__ == "__main__":
    key = jax.random.PRNGKey(0)
    pkey, xkey = jax.random.split(key)
    params = init_params(pkey, in_channels=3, out_dim=256)

    # batch=2, channels=3, 32x32 spatial (5 maxpools -> 1x1), as the module implies.
    image = jax.random.uniform(xkey, (2, 3, 32, 32), jnp.float32)

    fwd = jax.jit(plain_conv_forward)
    out = jax.block_until_ready(fwd(params, image))

    assert out.shape == (2, 256), out.shape
    assert bool(jnp.all(jnp.isfinite(out)))
    assert bool(jnp.all(out >= 0.0))           # last activation is ReLU

    ref = jax.block_until_ready(jax.jit(plain_conv_reference)(params, image))
    rel_err = float(jnp.max(jnp.abs(out - ref)) / (jnp.max(jnp.abs(ref)) + 1e-6))
    assert rel_err < 2e-2, f"mismatch vs reference: rel_err={rel_err}"

    print("KERNEL_OK")
</pallas_src>

<mosaic_0001>
module attributes {stable_mosaic.version = 11 : i64} {
  func.func @_plainconv_kernel(%arg0: i32, %arg1: memref<1x1024x36xbf16, #tpu.memory_space<vmem>>, %arg2: memref<36x16xbf16, #tpu.memory_space<vmem>>, %arg3: memref<1x16xf32, #tpu.memory_space<vmem>>, %arg4: memref<9x16x16xbf16, #tpu.memory_space<vmem>>, %arg5: memref<1x16xf32, #tpu.memory_space<vmem>>, %arg6: memref<9x16x32xbf16, #tpu.memory_space<vmem>>, %arg7: memref<1x32xf32, #tpu.memory_space<vmem>>, %arg8: memref<9x32x64xbf16, #tpu.memory_space<vmem>>, %arg9: memref<1x64xf32, #tpu.memory_space<vmem>>, %arg10: memref<9x64x128xbf16, #tpu.memory_space<vmem>>, %arg11: memref<1x128xf32, #tpu.memory_space<vmem>>, %arg12: memref<128x128xbf16, #tpu.memory_space<vmem>>, %arg13: memref<1x128xf32, #tpu.memory_space<vmem>>, %arg14: memref<128x256xbf16, #tpu.memory_space<vmem>>, %arg15: memref<1x256xf32, #tpu.memory_space<vmem>>, %arg16: memref<1x1x256xf32, #tpu.memory_space<vmem>>, %arg17: memref<991x16xf32, #tpu.memory_space<vmem>>, %arg18: memref<324x16xf32, #tpu.memory_space<vmem>>, %arg19: memref<267x16xf32, #tpu.memory_space<vmem>>, %arg20: memref<100x16xf32, #tpu.memory_space<vmem>>, %arg21: memref<67x32xf32, #tpu.memory_space<vmem>>, %arg22: memref<36x32xf32, #tpu.memory_space<vmem>>, %arg23: memref<15x64xf32, #tpu.memory_space<vmem>>, %arg24: memref<16x64xf32, #tpu.memory_space<vmem>>, %arg25: memref<1x128xf32, #tpu.memory_space<vmem>>) attributes {dimension_semantics = [#tpu.dimension_semantics<parallel>], iteration_bounds = array<i64: 2>, scalar_prefetch = 0 : i64, scratch_operands = 9 : i64, tpu.core_type = #tpu.core_type<tc>, window_params = [{transform_indices = @transform_0, window_bounds = array<i64: 1, 1024, 36>}, {pipeline_mode = #tpu.pipeline_mode<synchronous>, transform_indices = @transform_1, window_bounds = array<i64: 36, 16>}, {pipeline_mode = #tpu.pipeline_mode<synchronous>, transform_indices = @transform_2, window_bounds = array<i64: 1, 16>}, {pipeline_mode = #tpu.pipeline_mode<synchronous>, transform_indices = @transform_3, window_bounds = array<i64: 9, 16, 16>}, {pipeline_mode = #tpu.pipeline_mode<synchronous>, transform_indices = @transform_4, window_bounds = array<i64: 1, 16>}, {pipeline_mode = #tpu.pipeline_mode<synchronous>, transform_indices = @transform_5, window_bounds = array<i64: 9, 16, 32>}, {pipeline_mode = #tpu.pipeline_mode<synchronous>, transform_indices = @transform_6, window_bounds = array<i64: 1, 32>}, {pipeline_mode = #tpu.pipeline_mode<synchronous>, transform_indices = @transform_7, window_bounds = array<i64: 9, 32, 64>}, {pipeline_mode = #tpu.pipeline_mode<synchronous>, transform_indices = @transform_8, window_bounds = array<i64: 1, 64>}, {pipeline_mode = #tpu.pipeline_mode<synchronous>, transform_indices = @transform_9, window_bounds = array<i64: 9, 64, 128>}, {pipeline_mode = #tpu.pipeline_mode<synchronous>, transform_indices = @transform_10, window_bounds = array<i64: 1, 128>}, {pipeline_mode = #tpu.pipeline_mode<synchronous>, transform_indices = @transform_11, window_bounds = array<i64: 128, 128>}, {pipeline_mode = #tpu.pipeline_mode<synchronous>, transform_indices = @transform_12, window_bounds = array<i64: 1, 128>}, {pipeline_mode = #tpu.pipeline_mode<synchronous>, transform_indices = @transform_13, window_bounds = array<i64: 128, 256>}, {pipeline_mode = #tpu.pipeline_mode<synchronous>, transform_indices = @transform_14, window_bounds = array<i64: 1, 256>}, {transform_indices = @transform_15, window_bounds = array<i64: 1, 1, 256>}]} {
    %c0 = arith.constant 0 : index
    %c0_0 = arith.constant 0 : index
    %c0_1 = arith.constant 0 : index
    %0 = vector.load %arg1[%c0, %c0_0, %c0_1] : memref<1x1024x36xbf16, #tpu.memory_space<vmem>>, vector<1x1024x36xbf16>
    %1 = vector.shape_cast %0 : vector<1x1024x36xbf16> to vector<1024x36xbf16>
    %c0_2 = arith.constant 0 : index
    %c0_3 = arith.constant 0 : index
    %2 = vector.load %arg2[%c0_2, %c0_3] : memref<36x16xbf16, #tpu.memory_space<vmem>>, vector<36x16xbf16>
    %cst = arith.constant dense<0.000000e+00> : vector<1024x16xf32>
    %3 = tpu.matmul %1, %2, %cst {dimension_numbers = #tpu.dot_dimension_numbers<[1], [0], [0], [1], [0, 0, 1, 1], [], []>} : vector<1024x36xbf16>, vector<36x16xbf16>, vector<1024x16xf32> -> vector<1024x16xf32>
    %c0_4 = arith.constant 0 : index
    %c0_5 = arith.constant 0 : index
    %4 = vector.load %arg3[%c0_4, %c0_5] : memref<1x16xf32, #tpu.memory_space<vmem>>, vector<1x16xf32>
    %5 = vector.broadcast %4 : vector<1x16xf32> to vector<1024x16xf32>
    %6 = arith.addf %3, %5 : vector<1024x16xf32>
    %cst_6 = arith.constant 0.000000e+00 : f32
    %7 = vector.broadcast %cst_6 : f32 to vector<1024x16xf32>
    %8 = arith.maximumf %6, %7 : vector<1024x16xf32>
    %9 = vector.extract_strided_slice %8 {offsets = [0, 0], sizes = [992, 16], strides = [1, 1]} : vector<1024x16xf32> to vector<992x16xf32>
    %10 = vector.extract_strided_slice %8 {offsets = [32, 0], sizes = [992, 16], strides = [1, 1]} : vector<1024x16xf32> to vector<992x16xf32>
    %11 = arith.maximumf %9, %10 : vector<992x16xf32>
    %12 = vector.extract_strided_slice %11 {offsets = [0, 0], sizes = [991, 16], strides = [1, 1]} : vector<992x16xf32> to vector<991x16xf32>
    %13 = vector.extract_strided_slice %11 {offsets = [1, 0], sizes = [991, 16], strides = [1, 1]} : vector<992x16xf32> to vector<991x16xf32>
    %14 = arith.maximumf %12, %13 : vector<991x16xf32>
    %c0_7 = arith.constant 0 : index
    %c0_8 = arith.constant 0 : index
    %15 = vector.load %arg17[%c0_7, %c0_8] : memref<991x16xf32, #tpu.memory_space<vmem>>, vector<991x16xf32>
    tpu.vector_store %arg17[%c0_7, %c0_8], %14 {strides = array<i32>} : memref<991x16xf32, #tpu.memory_space<vmem>>, vector<991x16xf32>,
    %c0_9 = arith.constant 0 : index
    %c0_10 = arith.constant 0 : index
    %16 = tpu.strided_load %arg17[%c0_9, %c0_10] {strides = array<i32: 2, 1>} : memref<991x16xf32, #tpu.memory_space<vmem>>, vector<16x16xf32>
    %c64 = arith.constant 64 : index
    %c0_11 = arith.constant 0 : index
    %17 = tpu.strided_load %arg17[%c64, %c0_11] {strides = array<i32: 2, 1>} : memref<991x16xf32, #tpu.memory_space<vmem>>, vector<16x16xf32>
    %c128 = arith.constant 128 : index
    %c0_12 = arith.constant 0 : index
    %18 = tpu.strided_load %arg17[%c128, %c0_12] {strides = array<i32: 2, 1>} : memref<991x16xf32, #tpu.memory_space<vmem>>, vector<16x16xf32>
    %c192 = arith.constant 192 : index
    %c0_13 = arith.constant 0 : index
    %19 = tpu.strided_load %arg17[%c192, %c0_13] {strides = array<i32: 2, 1>} : memref<991x16xf32, #tpu.memory_space<vmem>>, vector<16x16xf32>
    %c256 = arith.constant 256 : index
    %c0_14 = arith.constant 0 : index
    %20 = tpu.strided_load %arg17[%c256, %c0_14] {strides = array<i32: 2, 1>} : memref<991x16xf32, #tpu.memory_space<vmem>>, vector<16x16xf32>
    %c320 = arith.constant 320 : index
    %c0_15 = arith.constant 0 : index
    %21 = tpu.strided_load %arg17[%c320, %c0_15] {strides = array<i32: 2, 1>} : memref<991x16xf32, #tpu.memory_space<vmem>>, vector<16x16xf32>
    %c384 = arith.constant 384 : index
    %c0_16 = arith.constant 0 : index
    %22 = tpu.strided_load %arg17[%c384, %c0_16] {strides = array<i32: 2, 1>} : memref<991x16xf32, #tpu.memory_space<vmem>>, vector<16x16xf32>
    %c448 = arith.constant 448 : index
    %c0_17 = arith.constant 0 : index
    %23 = tpu.strided_load %arg17[%c448, %c0_17] {strides = array<i32: 2, 1>} : memref<991x16xf32, #tpu.memory_space<vmem>>, vector<16x16xf32>
    %c512 = arith.constant 512 : index
    %c0_18 = arith.constant 0 : index
    %24 = tpu.strided_load %arg17[%c512, %c0_18] {strides = array<i32: 2, 1>} : memref<991x16xf32, #tpu.memory_space<vmem>>, vector<16x16xf32>
    %c576 = arith.constant 576 : index
    %c0_19 = arith.constant 0 : index
    %25 = tpu.strided_load %arg17[%c576, %c0_19] {strides = array<i32: 2, 1>} : memref<991x16xf32, #tpu.memory_space<vmem>>, vector<16x16xf32>
    %c640 = arith.constant 640 : index
    %c0_20 = arith.constant 0 : index
    %26 = tpu.strided_load %arg17[%c640, %c0_20] {strides = array<i32: 2, 1>} : memref<991x16xf32, #tpu.memory_space<vmem>>, vector<16x16xf32>
    %c704 = arith.constant 704 : index
    %c0_21 = arith.constant 0 : index
    %27 = tpu.strided_load %arg17[%c704, %c0_21] {strides = array<i32: 2, 1>} : memref<991x16xf32, #tpu.memory_space<vmem>>, vector<16x16xf32>
    %c768 = arith.constant 768 : index
    %c0_22 = arith.constant 0 : index
    %28 = tpu.strided_load %arg17[%c768, %c0_22] {strides = array<i32: 2, 1>} : memref<991x16xf32, #tpu.memory_space<vmem>>, vector<16x16xf32>
    %c832 = arith.constant 832 : index
    %c0_23 = arith.constant 0 : index
    %29 = tpu.strided_load %arg17[%c832, %c0_23] {strides = array<i32: 2, 1>} : memref<991x16xf32, #tpu.memory_space<vmem>>, vector<16x16xf32>
    %c896 = arith.constant 896 : index
    %c0_24 = arith.constant 0 : index
    %30 = tpu.strided_load %arg17[%c896, %c0_24] {strides = array<i32: 2, 1>} : memref<991x16xf32, #tpu.memory_space<vmem>>, vector<16x16xf32>
    %c960 = arith.constant 960 : index
    %c0_25 = arith.constant 0 : index
    %31 = tpu.strided_load %arg17[%c960, %c0_25] {strides = array<i32: 2, 1>} : memref<991x16xf32, #tpu.memory_space<vmem>>, vector<16x16xf32>
    %cst_26 = arith.constant 0.000000e+00 : f32
    %32 = vector.broadcast %cst_26 : f32 to vector<324x16xf32>
    %c0_27 = arith.constant 0 : index
    %c0_28 = arith.constant 0 : index
    %33 = vector.load %arg18[%c0_27, %c0_28] : memref<324x16xf32, #tpu.memory_space<vmem>>, vector<324x16xf32>
    tpu.vector_store %arg18[%c0_27, %c0_28], %32 {strides = array<i32>} : memref<324x16xf32, #tpu.memory_space<vmem>>, vector<324x16xf32>,
    %c19 = arith.constant 19 : index
    %c0_29 = arith.constant 0 : index
    %34 = vector.load %arg18[%c19, %c0_29] : memref<324x16xf32, #tpu.memory_space<vmem>>, vector<16x16xf32>
    tpu.vector_store %arg18[%c19, %c0_29], %16 {strides = array<i32>} : memref<324x16xf32, #tpu.memory_space<vmem>>, vector<16x16xf32>,
    %c37 = arith.constant 37 : index
    %c0_30 = arith.constant 0 : index
    %35 = vector.load %arg18[%c37, %c0_30] : memref<324x16xf32, #tpu.memory_space<vmem>>, vector<16x16xf32>
    tpu.vector_store %arg18[%c37, %c0_30], %17 {strides = array<i32>} : memref<324x16xf32, #tpu.memory_space<vmem>>, vector<16x16xf32>,
    %c55 = arith.constant 55 : index
    %c0_31 = arith.constant 0 : index
    %36 = vector.load %arg18[%c55, %c0_31] : memref<324x16xf32, #tpu.memory_space<vmem>>, vector<16x16xf32>
    tpu.vector_store %arg18[%c55, %c0_31], %18 {strides = array<i32>} : memref<324x16xf32, #tpu.memory_space<vmem>>, vector<16x16xf32>,
    %c73 = arith.constant 73 : index
    %c0_32 = arith.constant 0 : index
    %37 = vector.load %arg18[%c73, %c0_32] : memref<324x16xf32, #tpu.memory_space<vmem>>, vector<16x16xf32>
    tpu.vector_store %arg18[%c73, %c0_32], %19 {strides = array<i32>} : memref<324x16xf32, #tpu.memory_space<vmem>>, vector<16x16xf32>,
    %c91 = arith.constant 91 : index
    %c0_33 = arith.constant 0 : index
    %38 = vector.load %arg18[%c91, %c0_33] : memref<324x16xf32, #tpu.memory_space<vmem>>, vector<16x16xf32>
    tpu.vector_store %arg18[%c91, %c0_33], %20 {strides = array<i32>} : memref<324x16xf32, #tpu.memory_space<vmem>>, vector<16x16xf32>,
    %c109 = arith.constant 109 : index
    %c0_34 = arith.constant 0 : index
    %39 = vector.load %arg18[%c109, %c0_34] : memref<324x16xf32, #tpu.memory_space<vmem>>, vector<16x16xf32>
    tpu.vector_store %arg18[%c109, %c0_34], %21 {strides = array<i32>} : memref<324x16xf32, #tpu.memory_space<vmem>>, vector<16x16xf32>,
    %c127 = arith.constant 127 : index
    %c0_35 = arith.constant 0 : index
    %40 = vector.load %arg18[%c127, %c0_35] : memref<324x16xf32, #tpu.memory_space<vmem>>, vector<16x16xf32>
    tpu.vector_store %arg18[%c127, %c0_35], %22 {strides = array<i32>} : memref<324x16xf32, #tpu.memory_space<vmem>>, vector<16x16xf32>,
    %c145 = arith.constant 145 : index
    %c0_36 = arith.constant 0 : index
    %41 = vector.load %arg18[%c145, %c0_36] : memref<324x16xf32, #tpu.memory_space<vmem>>, vector<16x16xf32>
    tpu.vector_store %arg18[%c145, %c0_36], %23 {strides = array<i32>} : memref<324x16xf32, #tpu.memory_space<vmem>>, vector<16x16xf32>,
    %c163 = arith.constant 163 : index
    %c0_37 = arith.constant 0 : index
    %42 = vector.load %arg18[%c163, %c0_37] : memref<324x16xf32, #tpu.memory_space<vmem>>, vector<16x16xf32>
    tpu.vector_store %arg18[%c163, %c0_37], %24 {strides = array<i32>} : memref<324x16xf32, #tpu.memory_space<vmem>>, vector<16x16xf32>,
    %c181 = arith.constant 181 : index
    %c0_38 = arith.constant 0 : index
    %43 = vector.load %arg18[%c181, %c0_38] : memref<324x16xf32, #tpu.memory_space<vmem>>, vector<16x16xf32>
    tpu.vector_store %arg18[%c181, %c0_38], %25 {strides = array<i32>} : memref<324x16xf32, #tpu.memory_space<vmem>>, vector<16x16xf32>,
    %c199 = arith.constant 199 : index
    %c0_39 = arith.constant 0 : index
    %44 = vector.load %arg18[%c199, %c0_39] : memref<324x16xf32, #tpu.memory_space<vmem>>, vector<16x16xf32>
    tpu.vector_store %arg18[%c199, %c0_39], %26 {strides = array<i32>} : memref<324x16xf32, #tpu.memory_space<vmem>>, vector<16x16xf32>,
    %c217 = arith.constant 217 : index
    %c0_40 = arith.constant 0 : index
    %45 = vector.load %arg18[%c217, %c0_40] : memref<324x16xf32, #tpu.memory_space<vmem>>, vector<16x16xf32>
    tpu.vector_store %arg18[%c217, %c0_40], %27 {strides = array<i32>} : memref<324x16xf32, #tpu.memory_space<vmem>>, vector<16x16xf32>,
    %c235 = arith.constant 235 : index
    %c0_41 = arith.constant 0 : index
    %46 = vector.load %arg18[%c235, %c0_41] : memref<324x16xf32, #tpu.memory_space<vmem>>, vector<16x16xf32>
    tpu.vector_store %arg18[%c235, %c0_41], %28 {strides = array<i32>} : memref<324x16xf32, #tpu.memory_space<vmem>>, vector<16x16xf32>,
    %c253 = arith.constant 253 : index
    %c0_42 = arith.constant 0 : index
    %47 = vector.load %arg18[%c253, %c0_42] : memref<324x16xf32, #tpu.memory_space<vmem>>, vector<16x16xf32>
    tpu.vector_store %arg18[%c253, %c0_42], %29 {strides = array<i32>} : memref<324x16xf32, #tpu.memory_space<vmem>>, vector<16x16xf32>,
    %c271 = arith.constant 271 : index
    %c0_43 = arith.constant 0 : index
    %48 = vector.load %arg18[%c271, %c0_43] : memref<324x16xf32, #tpu.memory_space<vmem>>, vector<16x16xf32>
    tpu.vector_store %arg18[%c271, %c0_43], %30 {strides = array<i32>} : memref<324x16xf32, #tpu.memory_space<vmem>>, vector<16x16xf32>,
    %c289 = arith.constant 289 : index
    %c0_44 = arith.constant 0 : index
    %49 = vector.load %arg18[%c289, %c0_44] : memref<324x16xf32, #tpu.memory_space<vmem>>, vector<16x16xf32>
    tpu.vector_store %arg18[%c289, %c0_44], %31 {strides = array<i32>} : memref<324x16xf32, #tpu.memory_space<vmem>>, vector<16x16xf32>,
    %c0_45 = arith.constant 0 : index
    %c0_46 = arith.constant 0 : index
    %50 = vector.load %arg18[%c0_45, %c0_46] : memref<324x16xf32, #tpu.memory_space<vmem>>, vector<324x16xf32>
    %51 = arith.truncf %50 : vector<324x16xf32> to vector<324x16xbf16>
    %52 = vector.extract_strided_slice %51 {offsets = [0, 0], sizes = [286, 16], strides = [1, 1]} : vector<324x16xbf16> to vector<286x16xbf16>
    %c0_47 = arith.constant 0 : index
    %c0_48 = arith.constant 0 : index
    %c0_49 = arith.constant 0 : index
    %53 = vector.load %arg4[%c0_47, %c0_48, %c0_49] : memref<9x16x16xbf16, #tpu.memory_space<vmem>>, vector<1x16x16xbf16>
    %54 = vector.shape_cast %53 : vector<1x16x16xbf16> to vector<16x16xbf16>
    %cst_50 = arith.constant dense<0.000000e+00> : vector<286x16xf32>
    %55 = tpu.matmul %52, %54, %cst_50 {dimension_numbers = #tpu.dot_dimension_numbers<[1], [0], [0], [1], [0, 0, 1, 1], [], []>} : vector<286x16xbf16>, vector<16x16xbf16>, vector<286x16xf32> -> vector<286x16xf32>
    %56 = vector.extract_strided_slice %51 {offsets = [1, 0], sizes = [286, 16], strides = [1, 1]} : vector<324x16xbf16> to vector<286x16xbf16>
    %c1 = arith.constant 1 : index
    %c0_51 = arith.constant 0 : index
    %c0_52 = arith.constant 0 : index
    %57 = vector.load %arg4[%c1, %c0_51, %c0_52] : memref<9x16x16xbf16, #tpu.memory_space<vmem>>, vector<1x16x16xbf16>
    %58 = vector.shape_cast %57 : vector<1x16x16xbf16> to vector<16x16xbf16>
    %cst_53 = arith.constant dense<0.000000e+00> : vector<286x16xf32>
    %59 = tpu.matmul %56, %58, %cst_53 {dimension_numbers = #tpu.dot_dimension_numbers<[1], [0], [0], [1], [0, 0, 1, 1], [], []>} : vector<286x16xbf16>, vector<16x16xbf16>, vector<286x16xf32> -> vector<286x16xf32>
    %60 = arith.addf %55, %59 : vector<286x16xf32>
    %61 = vector.extract_strided_slice %51 {offsets = [2, 0], sizes = [286, 16], strides = [1, 1]} : vector<324x16xbf16> to vector<286x16xbf16>
    %c2 = arith.constant 2 : index
    %c0_54 = arith.constant 0 : index
    %c0_55 = arith.constant 0 : index
    %62 = vector.load %arg4[%c2, %c0_54, %c0_55] : memref<9x16x16xbf16, #tpu.memory_space<vmem>>, vector<1x16x16xbf16>
    %63 = vector.shape_cast %62 : vector<1x16x16xbf16> to vector<16x16xbf16>
    %cst_56 = arith.constant dense<0.000000e+00> : vector<286x16xf32>
    %64 = tpu.matmul %61, %63, %cst_56 {dimension_numbers = #tpu.dot_dimension_numbers<[1], [0], [0], [1], [0, 0, 1, 1], [], []>} : vector<286x16xbf16>, vector<16x16xbf16>, vector<286x16xf32> -> vector<286x16xf32>
    %65 = arith.addf %60, %64 : vector<286x16xf32>
    %66 = vector.extract_strided_slice %51 {offsets = [18, 0], sizes = [286, 16], strides = [1, 1]} : vector<324x16xbf16> to vector<286x16xbf16>
    %c3 = arith.constant 3 : index
    %c0_57 = arith.constant 0 : index
    %c0_58 = arith.constant 0 : index
    %67 = vector.load %arg4[%c3, %c0_57, %c0_58] : memref<9x16x16xbf16, #tpu.memory_space<vmem>>, vector<1x16x16xbf16>
    %68 = vector.shape_cast %67 : vector<1x16x16xbf16> to vector<16x16xbf16>
    %cst_59 = arith.constant dense<0.000000e+00> : vector<286x16xf32>
    %69 = tpu.matmul %66, %68, %cst_59 {dimension_numbers = #tpu.dot_dimension_numbers<[1], [0], [0], [1], [0, 0, 1, 1], [], []>} : vector<286x16xbf16>, vector<16x16xbf16>, vector<286x16xf32> -> vector<286x16xf32>
    %70 = arith.addf %65, %69 : vector<286x16xf32>
    %71 = vector.extract_strided_slice %51 {offsets = [19, 0], sizes = [286, 16], strides = [1, 1]} : vector<324x16xbf16> to vector<286x16xbf16>
    %c4 = arith.constant 4 : index
    %c0_60 = arith.constant 0 : index
    %c0_61 = arith.constant 0 : index
    %72 = vector.load %arg4[%c4, %c0_60, %c0_61] : memref<9x16x16xbf16, #tpu.memory_space<vmem>>, vector<1x16x16xbf16>
    %73 = vector.shape_cast %72 : vector<1x16x16xbf16> to vector<16x16xbf16>
    %cst_62 = arith.constant dense<0.000000e+00> : vector<286x16xf32>
    %74 = tpu.matmul %71, %73, %cst_62 {dimension_numbers = #tpu.dot_dimension_numbers<[1], [0], [0], [1], [0, 0, 1, 1], [], []>} : vector<286x16xbf16>, vector<16x16xbf16>, vector<286x16xf32> -> vector<286x16xf32>
    %75 = arith.addf %70, %74 : vector<286x16xf32>
    %76 = vector.extract_strided_slice %51 {offsets = [20, 0], sizes = [286, 16], strides = [1, 1]} : vector<324x16xbf16> to vector<286x16xbf16>
    %c5 = arith.constant 5 : index
    %c0_63 = arith.constant 0 : index
    %c0_64 = arith.constant 0 : index
    %77 = vector.load %arg4[%c5, %c0_63, %c0_64] : memref<9x16x16xbf16, #tpu.memory_space<vmem>>, vector<1x16x16xbf16>
    %78 = vector.shape_cast %77 : vector<1x16x16xbf16> to vector<16x16xbf16>
    %cst_65 = arith.constant dense<0.000000e+00> : vector<286x16xf32>
    %79 = tpu.matmul %76, %78, %cst_65 {dimension_numbers = #tpu.dot_dimension_numbers<[1], [0], [0], [1], [0, 0, 1, 1], [], []>} : vector<286x16xbf16>, vector<16x16xbf16>, vector<286x16xf32> -> vector<286x16xf32>
    %80 = arith.addf %75, %79 : vector<286x16xf32>
    %81 = vector.extract_strided_slice %51 {offsets = [36, 0], sizes = [286, 16], strides = [1, 1]} : vector<324x16xbf16> to vector<286x16xbf16>
    %c6 = arith.constant 6 : index
    %c0_66 = arith.constant 0 : index
    %c0_67 = arith.constant 0 : index
    %82 = vector.load %arg4[%c6, %c0_66, %c0_67] : memref<9x16x16xbf16, #tpu.memory_space<vmem>>, vector<1x16x16xbf16>
    %83 = vector.shape_cast %82 : vector<1x16x16xbf16> to vector<16x16xbf16>
    %cst_68 = arith.constant dense<0.000000e+00> : vector<286x16xf32>
    %84 = tpu.matmul %81, %83, %cst_68 {dimension_numbers = #tpu.dot_dimension_numbers<[1], [0], [0], [1], [0, 0, 1, 1], [], []>} : vector<286x16xbf16>, vector<16x16xbf16>, vector<286x16xf32> -> vector<286x16xf32>
    %85 = arith.addf %80, %84 : vector<286x16xf32>
    %86 = vector.extract_strided_slice %51 {offsets = [37, 0], sizes = [286, 16], strides = [1, 1]} : vector<324x16xbf16> to vector<286x16xbf16>
    %c7 = arith.constant 7 : index
    %c0_69 = arith.constant 0 : index
    %c0_70 = arith.constant 0 : index
    %87 = vector.load %arg4[%c7, %c0_69, %c0_70] : memref<9x16x16xbf16, #tpu.memory_space<vmem>>, vector<1x16x16xbf16>
    %88 = vector.shape_cast %87 : vector<1x16x16xbf16> to vector<16x16xbf16>
    %cst_71 = arith.constant dense<0.000000e+00> : vector<286x16xf32>
    %89 = tpu.matmul %86, %88, %cst_71 {dimension_numbers = #tpu.dot_dimension_numbers<[1], [0], [0], [1], [0, 0, 1, 1], [], []>} : vector<286x16xbf16>, vector<16x16xbf16>, vector<286x16xf32> -> vector<286x16xf32>
    %90 = arith.addf %85, %89 : vector<286x16xf32>
    %91 = vector.extract_strided_slice %51 {offsets = [38, 0], sizes = [286, 16], strides = [1, 1]} : vector<324x16xbf16> to vector<286x16xbf16>
    %c8 = arith.constant 8 : index
    %c0_72 = arith.constant 0 : index
    %c0_73 = arith.constant 0 : index
    %92 = vector.load %arg4[%c8, %c0_72, %c0_73] : memref<9x16x16xbf16, #tpu.memory_space<vmem>>, vector<1x16x16xbf16>
    %93 = vector.shape_cast %92 : vector<1x16x16xbf16> to vector<16x16xbf16>
    %cst_74 = arith.constant dense<0.000000e+00> : vector<286x16xf32>
    %94 = tpu.matmul %91, %93, %cst_74 {dimension_numbers = #tpu.dot_dimension_numbers<[1], [0], [0], [1], [0, 0, 1, 1], [], []>} : vector<286x16xbf16>, vector<16x16xbf16>, vector<286x16xf32> -> vector<286x16xf32>
    %95 = arith.addf %90, %94 : vector<286x16xf32>
    %c0_75 = arith.constant 0 : index
    %c0_76 = arith.constant 0 : index
    %96 = vector.load %arg5[%c0_75, %c0_76] : memref<1x16xf32, #tpu.memory_space<vmem>>, vector<1x16xf32>
    %97 = vector.broadcast %96 : vector<1x16xf32> to vector<286x16xf32>
    %98 = arith.addf %95, %97 : vector<286x16xf32>
    %cst_77 = arith.constant 0.000000e+00 : f32
    %99 = vector.broadcast %cst_77 : f32 to vector<286x16xf32>
    %100 = arith.maximumf %98, %99 : vector<286x16xf32>
    %101 = vector.extract_strided_slice %100 {offsets = [0, 0], sizes = [268, 16], strides = [1, 1]} : vector<286x16xf32> to vector<268x16xf32>
    %102 = vector.extract_strided_slice %100 {offsets = [18, 0], sizes = [268, 16], strides = [1, 1]} : vector<286x16xf32> to vector<268x16xf32>
    %103 = arith.maximumf %101, %102 : vector<268x16xf32>
    %104 = vector.extract_strided_slice %103 {offsets = [0, 0], sizes = [267, 16], strides = [1, 1]} : vector<268x16xf32> to vector<267x16xf32>
    %105 = vector.extract_strided_slice %103 {offsets = [1, 0], sizes = [267, 16], strides = [1, 1]} : vector<268x16xf32> to vector<267x16xf32>
    %106 = arith.maximumf %104, %105 : vector<267x16xf32>
    %c0_78 = arith.constant 0 : index
    %c0_79 = arith.constant 0 : index
    %107 = vector.load %arg19[%c0_78, %c0_79] : memref<267x16xf32, #tpu.memory_space<vmem>>, vector<267x16xf32>
    tpu.vector_store %arg19[%c0_78, %c0_79], %106 {strides = array<i32>} : memref<267x16xf32, #tpu.memory_space<vmem>>, vector<267x16xf32>,
    %c0_80 = arith.constant 0 : index
    %c0_81 = arith.constant 0 : index
    %108 = tpu.strided_load %arg19[%c0_80, %c0_81] {strides = array<i32: 2, 1>} : memref<267x16xf32, #tpu.memory_space<vmem>>, vector<8x16xf32>
    %c36 = arith.constant 36 : index
    %c0_82 = arith.constant 0 : index
    %109 = tpu.strided_load %arg19[%c36, %c0_82] {strides = array<i32: 2, 1>} : memref<267x16xf32, #tpu.memory_space<vmem>>, vector<8x16xf32>
    %c72 = arith.constant 72 : index
    %c0_83 = arith.constant 0 : index
    %110 = tpu.strided_load %arg19[%c72, %c0_83] {strides = array<i32: 2, 1>} : memref<267x16xf32, #tpu.memory_space<vmem>>, vector<8x16xf32>
    %c108 = arith.constant 108 : index
    %c0_84 = arith.constant 0 : index
    %111 = tpu.strided_load %arg19[%c108, %c0_84] {strides = array<i32: 2, 1>} : memref<267x16xf32, #tpu.memory_space<vmem>>, vector<8x16xf32>
    %c144 = arith.constant 144 : index
    %c0_85 = arith.constant 0 : index
    %112 = tpu.strided_load %arg19[%c144, %c0_85] {strides = array<i32: 2, 1>} : memref<267x16xf32, #tpu.memory_space<vmem>>, vector<8x16xf32>
    %c180 = arith.constant 180 : index
    %c0_86 = arith.constant 0 : index
    %113 = tpu.strided_load %arg19[%c180, %c0_86] {strides = array<i32: 2, 1>} : memref<267x16xf32, #tpu.memory_space<vmem>>, vector<8x16xf32>
    %c216 = arith.constant 216 : index
    %c0_87 = arith.constant 0 : index
    %114 = tpu.strided_load %arg19[%c216, %c0_87] {strides = array<i32: 2, 1>} : memref<267x16xf32, #tpu.memory_space<vmem>>, vector<8x16xf32>
    %c252 = arith.constant 252 : index
    %c0_88 = arith.constant 0 : index
    %115 = tpu.strided_load %arg19[%c252, %c0_88] {strides = array<i32: 2, 1>} : memref<267x16xf32, #tpu.memory_space<vmem>>, vector<8x16xf32>
    %cst_89 = arith.constant 0.000000e+00 : f32
    %116 = vector.broadcast %cst_89 : f32 to vector<100x16xf32>
    %c0_90 = arith.constant 0 : index
    %c0_91 = arith.constant 0 : index
    %117 = vector.load %arg20[%c0_90, %c0_91] : memref<100x16xf32, #tpu.memory_space<vmem>>, vector<100x16xf32>
    tpu.vector_store %arg20[%c0_90, %c0_91], %116 {strides = array<i32>} : memref<100x16xf32, #tpu.memory_space<vmem>>, vector<100x16xf32>,
    %c11 = arith.constant 11 : index
    %c0_92 = arith.constant 0 : index
    %118 = vector.load %arg20[%c11, %c0_92] : memref<100x16xf32, #tpu.memory_space<vmem>>, vector<8x16xf32>
    tpu.vector_store %arg20[%c11, %c0_92], %108 {strides = array<i32>} : memref<100x16xf32, #tpu.memory_space<vmem>>, vector<8x16xf32>,
    %c21 = arith.constant 21 : index
    %c0_93 = arith.constant 0 : index
    %119 = vector.load %arg20[%c21, %c0_93] : memref<100x16xf32, #tpu.memory_space<vmem>>, vector<8x16xf32>
    tpu.vector_store %arg20[%c21, %c0_93], %109 {strides = array<i32>} : memref<100x16xf32, #tpu.memory_space<vmem>>, vector<8x16xf32>,
    %c31 = arith.constant 31 : index
    %c0_94 = arith.constant 0 : index
    %120 = vector.load %arg20[%c31, %c0_94] : memref<100x16xf32, #tpu.memory_space<vmem>>, vector<8x16xf32>
    tpu.vector_store %arg20[%c31, %c0_94], %110 {strides = array<i32>} : memref<100x16xf32, #tpu.memory_space<vmem>>, vector<8x16xf32>,
    %c41 = arith.constant 41 : index
    %c0_95 = arith.constant 0 : index
    %121 = vector.load %arg20[%c41, %c0_95] : memref<100x16xf32, #tpu.memory_space<vmem>>, vector<8x16xf32>
    tpu.vector_store %arg20[%c41, %c0_95], %111 {strides = array<i32>} : memref<100x16xf32, #tpu.memory_space<vmem>>, vector<8x16xf32>,
    %c51 = arith.constant 51 : index
    %c0_96 = arith.constant 0 : index
    %122 = vector.load %arg20[%c51, %c0_96] : memref<100x16xf32, #tpu.memory_space<vmem>>, vector<8x16xf32>
    tpu.vector_store %arg20[%c51, %c0_96], %112 {strides = array<i32>} : memref<100x16xf32, #tpu.memory_space<vmem>>, vector<8x16xf32>,
    %c61 = arith.constant 61 : index
    %c0_97 = arith.constant 0 : index
    %123 = vector.load %arg20[%c61, %c0_97] : memref<100x16xf32, #tpu.memory_space<vmem>>, vector<8x16xf32>
    tpu.vector_store %arg20[%c61, %c0_97], %113 {strides = array<i32>} : memref<100x16xf32, #tpu.memory_space<vmem>>, vector<8x16xf32>,
    %c71 = arith.constant 71 : index
    %c0_98 = arith.constant 0 : index
    %124 = vector.load %arg20[%c71, %c0_98] : memref<100x16xf32, #tpu.memory_space<vmem>>, vector<8x16xf32>
    tpu.vector_store %arg20[%c71, %c0_98], %114 {strides = array<i32>} : memref<100x16xf32, #tpu.memory_space<vmem>>, vector<8x16xf32>,
    %c81 = arith.constant 81 : index
    %c0_99 = arith.constant 0 : index
    %125 = vector.load %arg20[%c81, %c0_99] : memref<100x16xf32, #tpu.memory_space<vmem>>, vector<8x16xf32>
    tpu.vector_store %arg20[%c81, %c0_99], %115 {strides = array<i32>} : memref<100x16xf32, #tpu.memory_space<vmem>>, vector<8x16xf32>,
    %c0_100 = arith.constant 0 : index
    %c0_101 = arith.constant 0 : index
    %126 = vector.load %arg20[%c0_100, %c0_101] : memref<100x16xf32, #tpu.memory_space<vmem>>, vector<100x16xf32>
    %127 = arith.truncf %126 : vector<100x16xf32> to vector<100x16xbf16>
    %128 = vector.extract_strided_slice %127 {offsets = [0, 0], sizes = [78, 16], strides = [1, 1]} : vector<100x16xbf16> to vector<78x16xbf16>
    %c0_102 = arith.constant 0 : index
    %c0_103 = arith.constant 0 : index
    %c0_104 = arith.constant 0 : index
    %129 = vector.load %arg6[%c0_102, %c0_103, %c0_104] : memref<9x16x32xbf16, #tpu.memory_space<vmem>>, vector<1x16x32xbf16>
    %130 = vector.shape_cast %129 : vector<1x16x32xbf16> to vector<16x32xbf16>
    %cst_105 = arith.constant dense<0.000000e+00> : vector<78x32xf32>
    %131 = tpu.matmul %128, %130, %cst_105 {dimension_numbers = #tpu.dot_dimension_numbers<[1], [0], [0], [1], [0, 0, 1, 1], [], []>} : vector<78x16xbf16>, vector<16x32xbf16>, vector<78x32xf32> -> vector<78x32xf32>
    %132 = vector.extract_strided_slice %127 {offsets = [1, 0], sizes = [78, 16], strides = [1, 1]} : vector<100x16xbf16> to vector<78x16xbf16>
    %c1_106 = arith.constant 1 : index
    %c0_107 = arith.constant 0 : index
    %c0_108 = arith.constant 0 : index
    %133 = vector.load %arg6[%c1_106, %c0_107, %c0_108] : memref<9x16x32xbf16, #tpu.memory_space<vmem>>, vector<1x16x32xbf16>
    %134 = vector.shape_cast %133 : vector<1x16x32xbf16> to vector<16x32xbf16>
    %cst_109 = arith.constant dense<0.000000e+00> : vector<78x32xf32>
    %135 = tpu.matmul %132, %134, %cst_109 {dimension_numbers = #tpu.dot_dimension_numbers<[1], [0], [0], [1], [0, 0, 1, 1], [], []>} : vector<78x16xbf16>, vector<16x32xbf16>, vector<78x32xf32> -> vector<78x32xf32>
    %136 = arith.addf %131, %135 : vector<78x32xf32>
    %137 = vector.extract_strided_slice %127 {offsets = [2, 0], sizes = [78, 16], strides = [1, 1]} : vector<100x16xbf16> to vector<78x16xbf16>
    %c2_110 = arith.constant 2 : index
    %c0_111 = arith.constant 0 : index
    %c0_112 = arith.constant 0 : index
    %138 = vector.load %arg6[%c2_110, %c0_111, %c0_112] : memref<9x16x32xbf16, #tpu.memory_space<vmem>>, vector<1x16x32xbf16>
    %139 = vector.shape_cast %138 : vector<1x16x32xbf16> to vector<16x32xbf16>
    %cst_113 = arith.constant dense<0.000000e+00> : vector<78x32xf32>
    %140 = tpu.matmul %137, %139, %cst_113 {dimension_numbers = #tpu.dot_dimension_numbers<[1], [0], [0], [1], [0, 0, 1, 1], [], []>} : vector<78x16xbf16>, vector<16x32xbf16>, vector<78x32xf32> -> vector<78x32xf32>
    %141 = arith.addf %136, %140 : vector<78x32xf32>
    %142 = vector.extract_strided_slice %127 {offsets = [10, 0], sizes = [78, 16], strides = [1, 1]} : vector<100x16xbf16> to vector<78x16xbf16>
    %c3_114 = arith.constant 3 : index
    %c0_115 = arith.constant 0 : index
    %c0_116 = arith.constant 0 : index
    %143 = vector.load %arg6[%c3_114, %c0_115, %c0_116] : memref<9x16x32xbf16, #tpu.memory_space<vmem>>, vector<1x16x32xbf16>
    %144 = vector.shape_cast %143 : vector<1x16x32xbf16> to vector<16x32xbf16>
    %cst_117 = arith.constant dense<0.000000e+00> : vector<78x32xf32>
    %145 = tpu.matmul %142, %144, %cst_117 {dimension_numbers = #tpu.dot_dimension_numbers<[1], [0], [0], [1], [0, 0, 1, 1], [], []>} : vector<78x16xbf16>, vector<16x32xbf16>, vector<78x32xf32> -> vector<78x32xf32>
    %146 = arith.addf %141, %145 : vector<78x32xf32>
    %147 = vector.extract_strided_slice %127 {offsets = [11, 0], sizes = [78, 16], strides = [1, 1]} : vector<100x16xbf16> to vector<78x16xbf16>
    %c4_118 = arith.constant 4 : index
    %c0_119 = arith.constant 0 : index
    %c0_120 = arith.constant 0 : index
    %148 = vector.load %arg6[%c4_118, %c0_119, %c0_120] : memref<9x16x32xbf16, #tpu.memory_space<vmem>>, vector<1x16x32xbf16>
    %149 = vector.shape_cast %148 : vector<1x16x32xbf16> to vector<16x32xbf16>
    %cst_121 = arith.constant dense<0.000000e+00> : vector<78x32xf32>
    %150 = tpu.matmul %147, %149, %cst_121 {dimension_numbers = #tpu.dot_dimension_numbers<[1], [0], [0], [1], [0, 0, 1, 1], [], []>} : vector<78x16xbf16>, vector<16x32xbf16>, vector<78x32xf32> -> vector<78x32xf32>
    %151 = arith.addf %146, %150 : vector<78x32xf32>
    %152 = vector.extract_strided_slice %127 {offsets = [12, 0], sizes = [78, 16], strides = [1, 1]} : vector<100x16xbf16> to vector<78x16xbf16>
    %c5_122 = arith.constant 5 : index
    %c0_123 = arith.constant 0 : index
    %c0_124 = arith.constant 0 : index
    %153 = vector.load %arg6[%c5_122, %c0_123, %c0_124] : memref<9x16x32xbf16, #tpu.memory_space<vmem>>, vector<1x16x32xbf16>
    %154 = vector.shape_cast %153 : vector<1x16x32xbf16> to vector<16x32xbf16>
    %cst_125 = arith.constant dense<0.000000e+00> : vector<78x32xf32>
    %155 = tpu.matmul %152, %154, %cst_125 {dimension_numbers = #tpu.dot_dimension_numbers<[1], [0], [0], [1], [0, 0, 1, 1], [], []>} : vector<78x16xbf16>, vector<16x32xbf16>, vector<78x32xf32> -> vector<78x32xf32>
    %156 = arith.addf %151, %155 : vector<78x32xf32>
    %157 = vector.extract_strided_slice %127 {offsets = [20, 0], sizes = [78, 16], strides = [1, 1]} : vector<100x16xbf16> to vector<78x16xbf16>
    %c6_126 = arith.constant 6 : index
    %c0_127 = arith.constant 0 : index
    %c0_128 = arith.constant 0 : index
    %158 = vector.load %arg6[%c6_126, %c0_127, %c0_128] : memref<9x16x32xbf16, #tpu.memory_space<vmem>>, vector<1x16x32xbf16>
    %159 = vector.shape_cast %158 : vector<1x16x32xbf16> to vector<16x32xbf16>
    %cst_129 = arith.constant dense<0.000000e+00> : vector<78x32xf32>
    %160 = tpu.matmul %157, %159, %cst_129 {dimension_numbers = #tpu.dot_dimension_numbers<[1], [0], [0], [1], [0, 0, 1, 1], [], []>} : vector<78x16xbf16>, vector<16x32xbf16>, vector<78x32xf32> -> vector<78x32xf32>
    %161 = arith.addf %156, %160 : vector<78x32xf32>
    %162 = vector.extract_strided_slice %127 {offsets = [21, 0], sizes = [78, 16], strides = [1, 1]} : vector<100x16xbf16> to vector<78x16xbf16>
    %c7_130 = arith.constant 7 : index
    %c0_131 = arith.constant 0 : index
    %c0_132 = arith.constant 0 : index
    %163 = vector.load %arg6[%c7_130, %c0_131, %c0_132] : memref<9x16x32xbf16, #tpu.memory_space<vmem>>, vector<1x16x32xbf16>
    %164 = vector.shape_cast %163 : vector<1x16x32xbf16> to vector<16x32xbf16>
    %cst_133 = arith.constant dense<0.000000e+00> : vector<78x32xf32>
    %165 = tpu.matmul %162, %164, %cst_133 {dimension_numbers = #tpu.dot_dimension_numbers<[1], [0], [0], [1], [0, 0, 1, 1], [], []>} : vector<78x16xbf16>, vector<16x32xbf16>, vector<78x32xf32> -> vector<78x32xf32>
    %166 = arith.addf %161, %165 : vector<78x32xf32>
    %167 = vector.extract_strided_slice %127 {offsets = [22, 0], sizes = [78, 16], strides = [1, 1]} : vector<100x16xbf16> to vector<78x16xbf16>
    %c8_134 = arith.constant 8 : index
    %c0_135 = arith.constant 0 : index
    %c0_136 = arith.constant 0 : index
    %168 = vector.load %arg6[%c8_134, %c0_135, %c0_136] : memref<9x16x32xbf16, #tpu.memory_space<vmem>>, vector<1x16x32xbf16>
    %169 = vector.shape_cast %168 : vector<1x16x32xbf16> to vector<16x32xbf16>
    %cst_137 = arith.constant dense<0.000000e+00> : vector<78x32xf32>
    %170 = tpu.matmul %167, %169, %cst_137 {dimension_numbers = #tpu.dot_dimension_numbers<[1], [0], [0], [1], [0, 0, 1, 1], [], []>} : vector<78x16xbf16>, vector<16x32xbf16>, vector<78x32xf32> -> vector<78x32xf32>
    %171 = arith.addf %166, %170 : vector<78x32xf32>
    %c0_138 = arith.constant 0 : index
    %c0_139 = arith.constant 0 : index
    %172 = vector.load %arg7[%c0_138, %c0_139] : memref<1x32xf32, #tpu.memory_space<vmem>>, vector<1x32xf32>
    %173 = vector.broadcast %172 : vector<1x32xf32> to vector<78x32xf32>
    %174 = arith.addf %171, %173 : vector<78x32xf32>
    %cst_140 = arith.constant 0.000000e+00 : f32
    %175 = vector.broadcast %cst_140 : f32 to vector<78x32xf32>
    %176 = arith.maximumf %174, %175 : vector<78x32xf32>
    %177 = vector.extract_strided_slice %176 {offsets = [0, 0], sizes = [68, 32], strides = [1, 1]} : vector<78x32xf32> to vector<68x32xf32>
    %178 = vector.extract_strided_slice %176 {offsets = [10, 0], sizes = [68, 32], strides = [1, 1]} : vector<78x32xf32> to vector<68x32xf32>
    %179 = arith.maximumf %177, %178 : vector<68x32xf32>
    %180 = vector.extract_strided_slice %179 {offsets = [0, 0], sizes = [67, 32], strides = [1, 1]} : vector<68x32xf32> to vector<67x32xf32>
    %181 = vector.extract_strided_slice %179 {offsets = [1, 0], sizes = [67, 32], strides = [1, 1]} : vector<68x32xf32> to vector<67x32xf32>
    %182 = arith.maximumf %180, %181 : vector<67x32xf32>
    %c0_141 = arith.constant 0 : index
    %c0_142 = arith.constant 0 : index
    %183 = vector.load %arg21[%c0_141, %c0_142] : memref<67x32xf32, #tpu.memory_space<vmem>>, vector<67x32xf32>
    tpu.vector_store %arg21[%c0_141, %c0_142], %182 {strides = array<i32>} : memref<67x32xf32, #tpu.memory_space<vmem>>, vector<67x32xf32>,
    %c0_143 = arith.constant 0 : index
    %c0_144 = arith.constant 0 : index
    %184 = tpu.strided_load %arg21[%c0_143, %c0_144] {strides = array<i32: 2, 1>} : memref<67x32xf32, #tpu.memory_space<vmem>>, vector<4x32xf32>
    %c20 = arith.constant 20 : index
    %c0_145 = arith.constant 0 : index
    %185 = tpu.strided_load %arg21[%c20, %c0_145] {strides = array<i32: 2, 1>} : memref<67x32xf32, #tpu.memory_space<vmem>>, vector<4x32xf32>
    %c40 = arith.constant 40 : index
    %c0_146 = arith.constant 0 : index
    %186 = tpu.strided_load %arg21[%c40, %c0_146] {strides = array<i32: 2, 1>} : memref<67x32xf32, #tpu.memory_space<vmem>>, vector<4x32xf32>
    %c60 = arith.constant 60 : index
    %c0_147 = arith.constant 0 : index
    %187 = tpu.strided_load %arg21[%c60, %c0_147] {strides = array<i32: 2, 1>} : memref<67x32xf32, #tpu.memory_space<vmem>>, vector<4x32xf32>
    %cst_148 = arith.constant 0.000000e+00 : f32
    %188 = vector.broadcast %cst_148 : f32 to vector<36x32xf32>
    %c0_149 = arith.constant 0 : index
    %c0_150 = arith.constant 0 : index
    %189 = vector.load %arg22[%c0_149, %c0_150] : memref<36x32xf32, #tpu.memory_space<vmem>>, vector<36x32xf32>
    tpu.vector_store %arg22[%c0_149, %c0_150], %188 {strides = array<i32>} : memref<36x32xf32, #tpu.memory_space<vmem>>, vector<36x32xf32>,
    %c7_151 = arith.constant 7 : index
    %c0_152 = arith.constant 0 : index
    %190 = vector.load %arg22[%c7_151, %c0_152] : memref<36x32xf32, #tpu.memory_space<vmem>>, vector<4x32xf32>
    tpu.vector_store %arg22[%c7_151, %c0_152], %184 {strides = array<i32>} : memref<36x32xf32, #tpu.memory_space<vmem>>, vector<4x32xf32>,
    %c13 = arith.constant 13 : index
    %c0_153 = arith.constant 0 : index
    %191 = vector.load %arg22[%c13, %c0_153] : memref<36x32xf32, #tpu.memory_space<vmem>>, vector<4x32xf32>
    tpu.vector_store %arg22[%c13, %c0_153], %185 {strides = array<i32>} : memref<36x32xf32, #tpu.memory_space<vmem>>, vector<4x32xf32>,
    %c19_154 = arith.constant 19 : index
    %c0_155 = arith.constant 0 : index
    %192 = vector.load %arg22[%c19_154, %c0_155] : memref<36x32xf32, #tpu.memory_space<vmem>>, vector<4x32xf32>
    tpu.vector_store %arg22[%c19_154, %c0_155], %186 {strides = array<i32>} : memref<36x32xf32, #tpu.memory_space<vmem>>, vector<4x32xf32>,
    %c25 = arith.constant 25 : index
    %c0_156 = arith.constant 0 : index
    %193 = vector.load %arg22[%c25, %c0_156] : memref<36x32xf32, #tpu.memory_space<vmem>>, vector<4x32xf32>
    tpu.vector_store %arg22[%c25, %c0_156], %187 {strides = array<i32>} : memref<36x32xf32, #tpu.memory_space<vmem>>, vector<4x32xf32>,
    %c0_157 = arith.constant 0 : index
    %c0_158 = arith.constant 0 : index
    %194 = vector.load %arg22[%c0_157, %c0_158] : memref<36x32xf32, #tpu.memory_space<vmem>>, vector<36x32xf32>
    %195 = arith.truncf %194 : vector<36x32xf32> to vector<36x32xbf16>
    %196 = vector.extract_strided_slice %195 {offsets = [0, 0], sizes = [22, 32], strides = [1, 1]} : vector<36x32xbf16> to vector<22x32xbf16>
    %c0_159 = arith.constant 0 : index
    %c0_160 = arith.constant 0 : index
    %c0_161 = arith.constant 0 : index
    %197 = vector.load %arg8[%c0_159, %c0_160, %c0_161] : memref<9x32x64xbf16, #tpu.memory_space<vmem>>, vector<1x32x64xbf16>
    %198 = vector.shape_cast %197 : vector<1x32x64xbf16> to vector<32x64xbf16>
    %cst_162 = arith.constant dense<0.000000e+00> : vector<22x64xf32>
    %199 = tpu.matmul %196, %198, %cst_162 {dimension_numbers = #tpu.dot_dimension_numbers<[1], [0], [0], [1], [0, 0, 1, 1], [], []>} : vector<22x32xbf16>, vector<32x64xbf16>, vector<22x64xf32> -> vector<22x64xf32>
    %200 = vector.extract_strided_slice %195 {offsets = [1, 0], sizes = [22, 32], strides = [1, 1]} : vector<36x32xbf16> to vector<22x32xbf16>
    %c1_163 = arith.constant 1 : index
    %c0_164 = arith.constant 0 : index
    %c0_165 = arith.constant 0 : index
    %201 = vector.load %arg8[%c1_163, %c0_164, %c0_165] : memref<9x32x64xbf16, #tpu.memory_space<vmem>>, vector<1x32x64xbf16>
    %202 = vector.shape_cast %201 : vector<1x32x64xbf16> to vector<32x64xbf16>
    %cst_166 = arith.constant dense<0.000000e+00> : vector<22x64xf32>
    %203 = tpu.matmul %200, %202, %cst_166 {dimension_numbers = #tpu.dot_dimension_numbers<[1], [0], [0], [1], [0, 0, 1, 1], [], []>} : vector<22x32xbf16>, vector<32x64xbf16>, vector<22x64xf32> -> vector<22x64xf32>
    %204 = arith.addf %199, %203 : vector<22x64xf32>
    %205 = vector.extract_strided_slice %195 {offsets = [2, 0], sizes = [22, 32], strides = [1, 1]} : vector<36x32xbf16> to vector<22x32xbf16>
    %c2_167 = arith.constant 2 : index
    %c0_168 = arith.constant 0 : index
    %c0_169 = arith.constant 0 : index
    %206 = vector.load %arg8[%c2_167, %c0_168, %c0_169] : memref<9x32x64xbf16, #tpu.memory_space<vmem>>, vector<1x32x64xbf16>
    %207 = vector.shape_cast %206 : vector<1x32x64xbf16> to vector<32x64xbf16>
    %cst_170 = arith.constant dense<0.000000e+00> : vector<22x64xf32>
    %208 = tpu.matmul %205, %207, %cst_170 {dimension_numbers = #tpu.dot_dimension_numbers<[1], [0], [0], [1], [0, 0, 1, 1], [], []>} : vector<22x32xbf16>, vector<32x64xbf16>, vector<22x64xf32> -> vector<22x64xf32>
    %209 = arith.addf %204, %208 : vector<22x64xf32>
    %210 = vector.extract_strided_slice %195 {offsets = [6, 0], sizes = [22, 32], strides = [1, 1]} : vector<36x32xbf16> to vector<22x32xbf16>
    %c3_171 = arith.constant 3 : index
    %c0_172 = arith.constant 0 : index
    %c0_173 = arith.constant 0 : index
    %211 = vector.load %arg8[%c3_171, %c0_172, %c0_173] : memref<9x32x64xbf16, #tpu.memory_space<vmem>>, vector<1x32x64xbf16>
    %212 = vector.shape_cast %211 : vector<1x32x64xbf16> to vector<32x64xbf16>
    %cst_174 = arith.constant dense<0.000000e+00> : vector<22x64xf32>
    %213 = tpu.matmul %210, %212, %cst_174 {dimension_numbers = #tpu.dot_dimension_numbers<[1], [0], [0], [1], [0, 0, 1, 1], [], []>} : vector<22x32xbf16>, vector<32x64xbf16>, vector<22x64xf32> -> vector<22x64xf32>
    %214 = arith.addf %209, %213 : vector<22x64xf32>
    %215 = vector.extract_strided_slice %195 {offsets = [7, 0], sizes = [22, 32], strides = [1, 1]} : vector<36x32xbf16> to vector<22x32xbf16>
    %c4_175 = arith.constant 4 : index
    %c0_176 = arith.constant 0 : index
    %c0_177 = arith.constant 0 : index
    %216 = vector.load %arg8[%c4_175, %c0_176, %c0_177] : memref<9x32x64xbf16, #tpu.memory_space<vmem>>, vector<1x32x64xbf16>
    %217 = vector.shape_cast %216 : vector<1x32x64xbf16> to vector<32x64xbf16>
    %cst_178 = arith.constant dense<0.000000e+00> : vector<22x64xf32>
    %218 = tpu.matmul %215, %217, %cst_178 {dimension_numbers = #tpu.dot_dimension_numbers<[1], [0], [0], [1], [0, 0, 1, 1], [], []>} : vector<22x32xbf16>, vector<32x64xbf16>, vector<22x64xf32> -> vector<22x64xf32>
    %219 = arith.addf %214, %218 : vector<22x64xf32>
    %220 = vector.extract_strided_slice %195 {offsets = [8, 0], sizes = [22, 32], strides = [1, 1]} : vector<36x32xbf16> to vector<22x32xbf16>
    %c5_179 = arith.constant 5 : index
    %c0_180 = arith.constant 0 : index
    %c0_181 = arith.constant 0 : index
    %221 = vector.load %arg8[%c5_179, %c0_180, %c0_181] : memref<9x32x64xbf16, #tpu.memory_space<vmem>>, vector<1x32x64xbf16>
    %222 = vector.shape_cast %221 : vector<1x32x64xbf16> to vector<32x64xbf16>
    %cst_182 = arith.constant dense<0.000000e+00> : vector<22x64xf32>
    %223 = tpu.matmul %220, %222, %cst_182 {dimension_numbers = #tpu.dot_dimension_numbers<[1], [0], [0], [1], [0, 0, 1, 1], [], []>} : vector<22x32xbf16>, vector<32x64xbf16>, vector<22x64xf32> -> vector<22x64xf32>
    %224 = arith.addf %219, %223 : vector<22x64xf32>
    %225 = vector.extract_strided_slice %195 {offsets = [12, 0], sizes = [22, 32], strides = [1, 1]} : vector<36x32xbf16> to vector<22x32xbf16>
    %c6_183 = arith.constant 6 : index
    %c0_184 = arith.constant 0 : index
    %c0_185 = arith.constant 0 : index
    %226 = vector.load %arg8[%c6_183, %c0_184, %c0_185] : memref<9x32x64xbf16, #tpu.memory_space<vmem>>, vector<1x32x64xbf16>
    %227 = vector.shape_cast %226 : vector<1x32x64xbf16> to vector<32x64xbf16>
    %cst_186 = arith.constant dense<0.000000e+00> : vector<22x64xf32>
    %228 = tpu.matmul %225, %227, %cst_186 {dimension_numbers = #tpu.dot_dimension_numbers<[1], [0], [0], [1], [0, 0, 1, 1], [], []>} : vector<22x32xbf16>, vector<32x64xbf16>, vector<22x64xf32> -> vector<22x64xf32>
    %229 = arith.addf %224, %228 : vector<22x64xf32>
    %230 = vector.extract_strided_slice %195 {offsets = [13, 0], sizes = [22, 32], strides = [1, 1]} : vector<36x32xbf16> to vector<22x32xbf16>
    %c7_187 = arith.constant 7 : index
    %c0_188 = arith.constant 0 : index
    %c0_189 = arith.constant 0 : index
    %231 = vector.load %arg8[%c7_187, %c0_188, %c0_189] : memref<9x32x64xbf16, #tpu.memory_space<vmem>>, vector<1x32x64xbf16>
    %232 = vector.shape_cast %231 : vector<1x32x64xbf16> to vector<32x64xbf16>
    %cst_190 = arith.constant dense<0.000000e+00> : vector<22x64xf32>
    %233 = tpu.matmul %230, %232, %cst_190 {dimension_numbers = #tpu.dot_dimension_numbers<[1], [0], [0], [1], [0, 0, 1, 1], [], []>} : vector<22x32xbf16>, vector<32x64xbf16>, vector<22x64xf32> -> vector<22x64xf32>
    %234 = arith.addf %229, %233 : vector<22x64xf32>
    %235 = vector.extract_strided_slice %195 {offsets = [14, 0], sizes = [22, 32], strides = [1, 1]} : vector<36x32xbf16> to vector<22x32xbf16>
    %c8_191 = arith.constant 8 : index
    %c0_192 = arith.constant 0 : index
    %c0_193 = arith.constant 0 : index
    %236 = vector.load %arg8[%c8_191, %c0_192, %c0_193] : memref<9x32x64xbf16, #tpu.memory_space<vmem>>, vector<1x32x64xbf16>
    %237 = vector.shape_cast %236 : vector<1x32x64xbf16> to vector<32x64xbf16>
    %cst_194 = arith.constant dense<0.000000e+00> : vector<22x64xf32>
    %238 = tpu.matmul %235, %237, %cst_194 {dimension_numbers = #tpu.dot_dimension_numbers<[1], [0], [0], [1], [0, 0, 1, 1], [], []>} : vector<22x32xbf16>, vector<32x64xbf16>, vector<22x64xf32> -> vector<22x64xf32>
    %239 = arith.addf %234, %238 : vector<22x64xf32>
    %c0_195 = arith.constant 0 : index
    %c0_196 = arith.constant 0 : index
    %240 = vector.load %arg9[%c0_195, %c0_196] : memref<1x64xf32, #tpu.memory_space<vmem>>, vector<1x64xf32>
    %241 = vector.broadcast %240 : vector<1x64xf32> to vector<22x64xf32>
    %242 = arith.addf %239, %241 : vector<22x64xf32>
    %cst_197 = arith.constant 0.000000e+00 : f32
    %243 = vector.broadcast %cst_197 : f32 to vector<22x64xf32>
    %244 = arith.maximumf %242, %243 : vector<22x64xf32>
    %245 = vector.extract_strided_slice %244 {offsets = [0, 0], sizes = [16, 64], strides = [1, 1]} : vector<22x64xf32> to vector<16x64xf32>
    %246 = vector.extract_strided_slice %244 {offsets = [6, 0], sizes = [16, 64], strides = [1, 1]} : vector<22x64xf32> to vector<16x64xf32>
    %247 = arith.maximumf %245, %246 : vector<16x64xf32>
    %248 = vector.extract_strided_slice %247 {offsets = [0, 0], sizes = [15, 64], strides = [1, 1]} : vector<16x64xf32> to vector<15x64xf32>
    %249 = vector.extract_strided_slice %247 {offsets = [1, 0], sizes = [15, 64], strides = [1, 1]} : vector<16x64xf32> to vector<15x64xf32>
    %250 = arith.maximumf %248, %249 : vector<15x64xf32>
    %c0_198 = arith.constant 0 : index
    %c0_199 = arith.constant 0 : index
    %251 = vector.load %arg23[%c0_198, %c0_199] : memref<15x64xf32, #tpu.memory_space<vmem>>, vector<15x64xf32>
    tpu.vector_store %arg23[%c0_198, %c0_199], %250 {strides = array<i32>} : memref<15x64xf32, #tpu.memory_space<vmem>>, vector<15x64xf32>,
    %c0_200 = arith.constant 0 : index
    %c0_201 = arith.constant 0 : index
    %252 = tpu.strided_load %arg23[%c0_200, %c0_201] {strides = array<i32: 2, 1>} : memref<15x64xf32, #tpu.memory_space<vmem>>, vector<2x64xf32>
    %c12 = arith.constant 12 : index
    %c0_202 = arith.constant 0 : index
    %253 = tpu.strided_load %arg23[%c12, %c0_202] {strides = array<i32: 2, 1>} : memref<15x64xf32, #tpu.memory_space<vmem>>, vector<2x64xf32>
    %cst_203 = arith.constant 0.000000e+00 : f32
    %254 = vector.broadcast %cst_203 : f32 to vector<16x64xf32>
    %c0_204 = arith.constant 0 : index
    %c0_205 = arith.constant 0 : index
    %255 = vector.load %arg24[%c0_204, %c0_205] : memref<16x64xf32, #tpu.memory_space<vmem>>, vector<16x64xf32>
    tpu.vector_store %arg24[%c0_204, %c0_205], %254 {strides = array<i32>} : memref<16x64xf32, #tpu.memory_space<vmem>>, vector<16x64xf32>,
    %c5_206 = arith.constant 5 : index
    %c0_207 = arith.constant 0 : index
    %256 = vector.load %arg24[%c5_206, %c0_207] : memref<16x64xf32, #tpu.memory_space<vmem>>, vector<2x64xf32>
    tpu.vector_store %arg24[%c5_206, %c0_207], %252 {strides = array<i32>} : memref<16x64xf32, #tpu.memory_space<vmem>>, vector<2x64xf32>,
    %c9 = arith.constant 9 : index
    %c0_208 = arith.constant 0 : index
    %257 = vector.load %arg24[%c9, %c0_208] : memref<16x64xf32, #tpu.memory_space<vmem>>, vector<2x64xf32>
    tpu.vector_store %arg24[%c9, %c0_208], %253 {strides = array<i32>} : memref<16x64xf32, #tpu.memory_space<vmem>>, vector<2x64xf32>,
    %c0_209 = arith.constant 0 : index
    %c0_210 = arith.constant 0 : index
    %258 = vector.load %arg24[%c0_209, %c0_210] : memref<16x64xf32, #tpu.memory_space<vmem>>, vector<16x64xf32>
    %259 = arith.truncf %258 : vector<16x64xf32> to vector<16x64xbf16>
    %260 = vector.extract_strided_slice %259 {offsets = [0, 0], sizes = [6, 64], strides = [1, 1]} : vector<16x64xbf16> to vector<6x64xbf16>
    %c0_211 = arith.constant 0 : index
    %c0_212 = arith.constant 0 : index
    %c0_213 = arith.constant 0 : index
    %261 = vector.load %arg10[%c0_211, %c0_212, %c0_213] : memref<9x64x128xbf16, #tpu.memory_space<vmem>>, vector<1x64x128xbf16>
    %262 = vector.shape_cast %261 : vector<1x64x128xbf16> to vector<64x128xbf16>
    %cst_214 = arith.constant dense<0.000000e+00> : vector<6x128xf32>
    %263 = tpu.matmul %260, %262, %cst_214 {dimension_numbers = #tpu.dot_dimension_numbers<[1], [0], [0], [1], [0, 0, 1, 1], [], []>} : vector<6x64xbf16>, vector<64x128xbf16>, vector<6x128xf32> -> vector<6x128xf32>
    %264 = vector.extract_strided_slice %259 {offsets = [1, 0], sizes = [6, 64], strides = [1, 1]} : vector<16x64xbf16> to vector<6x64xbf16>
    %c1_215 = arith.constant 1 : index
    %c0_216 = arith.constant 0 : index
    %c0_217 = arith.constant 0 : index
    %265 = vector.load %arg10[%c1_215, %c0_216, %c0_217] : memref<9x64x128xbf16, #tpu.memory_space<vmem>>, vector<1x64x128xbf16>
    %266 = vector.shape_cast %265 : vector<1x64x128xbf16> to vector<64x128xbf16>
    %cst_218 = arith.constant dense<0.000000e+00> : vector<6x128xf32>
    %267 = tpu.matmul %264, %266, %cst_218 {dimension_numbers = #tpu.dot_dimension_numbers<[1], [0], [0], [1], [0, 0, 1, 1], [], []>} : vector<6x64xbf16>, vector<64x128xbf16>, vector<6x128xf32> -> vector<6x128xf32>
    %268 = arith.addf %263, %267 : vector<6x128xf32>
    %269 = vector.extract_strided_slice %259 {offsets = [2, 0], sizes = [6, 64], strides = [1, 1]} : vector<16x64xbf16> to vector<6x64xbf16>
    %c2_219 = arith.constant 2 : index
    %c0_220 = arith.constant 0 : index
    %c0_221 = arith.constant 0 : index
    %270 = vector.load %arg10[%c2_219, %c0_220, %c0_221] : memref<9x64x128xbf16, #tpu.memory_space<vmem>>, vector<1x64x128xbf16>
    %271 = vector.shape_cast %270 : vector<1x64x128xbf16> to vector<64x128xbf16>
    %cst_222 = arith.constant dense<0.000000e+00> : vector<6x128xf32>
    %272 = tpu.matmul %269, %271, %cst_222 {dimension_numbers = #tpu.dot_dimension_numbers<[1], [0], [0], [1], [0, 0, 1, 1], [], []>} : vector<6x64xbf16>, vector<64x128xbf16>, vector<6x128xf32> -> vector<6x128xf32>
    %273 = arith.addf %268, %272 : vector<6x128xf32>
    %274 = vector.extract_strided_slice %259 {offsets = [4, 0], sizes = [6, 64], strides = [1, 1]} : vector<16x64xbf16> to vector<6x64xbf16>
    %c3_223 = arith.constant 3 : index
    %c0_224 = arith.constant 0 : index
    %c0_225 = arith.constant 0 : index
    %275 = vector.load %arg10[%c3_223, %c0_224, %c0_225] : memref<9x64x128xbf16, #tpu.memory_space<vmem>>, vector<1x64x128xbf16>
    %276 = vector.shape_cast %275 : vector<1x64x128xbf16> to vector<64x128xbf16>
    %cst_226 = arith.constant dense<0.000000e+00> : vector<6x128xf32>
    %277 = tpu.matmul %274, %276, %cst_226 {dimension_numbers = #tpu.dot_dimension_numbers<[1], [0], [0], [1], [0, 0, 1, 1], [], []>} : vector<6x64xbf16>, vector<64x128xbf16>, vector<6x128xf32> -> vector<6x128xf32>
    %278 = arith.addf %273, %277 : vector<6x128xf32>
    %279 = vector.extract_strided_slice %259 {offsets = [5, 0], sizes = [6, 64], strides = [1, 1]} : vector<16x64xbf16> to vector<6x64xbf16>
    %c4_227 = arith.constant 4 : index
    %c0_228 = arith.constant 0 : index
    %c0_229 = arith.constant 0 : index
    %280 = vector.load %arg10[%c4_227, %c0_228, %c0_229] : memref<9x64x128xbf16, #tpu.memory_space<vmem>>, vector<1x64x128xbf16>
    %281 = vector.shape_cast %280 : vector<1x64x128xbf16> to vector<64x128xbf16>
    %cst_230 = arith.constant dense<0.000000e+00> : vector<6x128xf32>
    %282 = tpu.matmul %279, %281, %cst_230 {dimension_numbers = #tpu.dot_dimension_numbers<[1], [0], [0], [1], [0, 0, 1, 1], [], []>} : vector<6x64xbf16>, vector<64x128xbf16>, vector<6x128xf32> -> vector<6x128xf32>
    %283 = arith.addf %278, %282 : vector<6x128xf32>
    %284 = vector.extract_strided_slice %259 {offsets = [6, 0], sizes = [6, 64], strides = [1, 1]} : vector<16x64xbf16> to vector<6x64xbf16>
    %c5_231 = arith.constant 5 : index
    %c0_232 = arith.constant 0 : index
    %c0_233 = arith.constant 0 : index
    %285 = vector.load %arg10[%c5_231, %c0_232, %c0_233] : memref<9x64x128xbf16, #tpu.memory_space<vmem>>, vector<1x64x128xbf16>
    %286 = vector.shape_cast %285 : vector<1x64x128xbf16> to vector<64x128xbf16>
    %cst_234 = arith.constant dense<0.000000e+00> : vector<6x128xf32>
    %287 = tpu.matmul %284, %286, %cst_234 {dimension_numbers = #tpu.dot_dimension_numbers<[1], [0], [0], [1], [0, 0, 1, 1], [], []>} : vector<6x64xbf16>, vector<64x128xbf16>, vector<6x128xf32> -> vector<6x128xf32>
    %288 = arith.addf %283, %287 : vector<6x128xf32>
    %289 = vector.extract_strided_slice %259 {offsets = [8, 0], sizes = [6, 64], strides = [1, 1]} : vector<16x64xbf16> to vector<6x64xbf16>
    %c6_235 = arith.constant 6 : index
    %c0_236 = arith.constant 0 : index
    %c0_237 = arith.constant 0 : index
    %290 = vector.load %arg10[%c6_235, %c0_236, %c0_237] : memref<9x64x128xbf16, #tpu.memory_space<vmem>>, vector<1x64x128xbf16>
    %291 = vector.shape_cast %290 : vector<1x64x128xbf16> to vector<64x128xbf16>
    %cst_238 = arith.constant dense<0.000000e+00> : vector<6x128xf32>
    %292 = tpu.matmul %289, %291, %cst_238 {dimension_numbers = #tpu.dot_dimension_numbers<[1], [0], [0], [1], [0, 0, 1, 1], [], []>} : vector<6x64xbf16>, vector<64x128xbf16>, vector<6x128xf32> -> vector<6x128xf32>
    %293 = arith.addf %288, %292 : vector<6x128xf32>
    %294 = vector.extract_strided_slice %259 {offsets = [9, 0], sizes = [6, 64], strides = [1, 1]} : vector<16x64xbf16> to vector<6x64xbf16>
    %c7_239 = arith.constant 7 : index
    %c0_240 = arith.constant 0 : index
    %c0_241 = arith.constant 0 : index
    %295 = vector.load %arg10[%c7_239, %c0_240, %c0_241] : memref<9x64x128xbf16, #tpu.memory_space<vmem>>, vector<1x64x128xbf16>
    %296 = vector.shape_cast %295 : vector<1x64x128xbf16> to vector<64x128xbf16>
    %cst_242 = arith.constant dense<0.000000e+00> : vector<6x128xf32>
    %297 = tpu.matmul %294, %296, %cst_242 {dimension_numbers = #tpu.dot_dimension_numbers<[1], [0], [0], [1], [0, 0, 1, 1], [], []>} : vector<6x64xbf16>, vector<64x128xbf16>, vector<6x128xf32> -> vector<6x128xf32>
    %298 = arith.addf %293, %297 : vector<6x128xf32>
    %299 = vector.extract_strided_slice %259 {offsets = [10, 0], sizes = [6, 64], strides = [1, 1]} : vector<16x64xbf16> to vector<6x64xbf16>
    %c8_243 = arith.constant 8 : index
    %c0_244 = arith.constant 0 : index
    %c0_245 = arith.constant 0 : index
    %300 = vector.load %arg10[%c8_243, %c0_244, %c0_245] : memref<9x64x128xbf16, #tpu.memory_space<vmem>>, vector<1x64x128xbf16>
    %301 = vector.shape_cast %300 : vector<1x64x128xbf16> to vector<64x128xbf16>
    %cst_246 = arith.constant dense<0.000000e+00> : vector<6x128xf32>
    %302 = tpu.matmul %299, %301, %cst_246 {dimension_numbers = #tpu.dot_dimension_numbers<[1], [0], [0], [1], [0, 0, 1, 1], [], []>} : vector<6x64xbf16>, vector<64x128xbf16>, vector<6x128xf32> -> vector<6x128xf32>
    %303 = arith.addf %298, %302 : vector<6x128xf32>
    %c0_247 = arith.constant 0 : index
    %c0_248 = arith.constant 0 : index
    %304 = vector.load %arg11[%c0_247, %c0_248] : memref<1x128xf32, #tpu.memory_space<vmem>>, vector<1x128xf32>
    %305 = vector.broadcast %304 : vector<1x128xf32> to vector<6x128xf32>
    %306 = arith.addf %303, %305 : vector<6x128xf32>
    %cst_249 = arith.constant 0.000000e+00 : f32
    %307 = vector.broadcast %cst_249 : f32 to vector<6x128xf32>
    %308 = arith.maximumf %306, %307 : vector<6x128xf32>
    %309 = vector.extract_strided_slice %308 {offsets = [0, 0], sizes = [2, 128], strides = [1, 1]} : vector<6x128xf32> to vector<2x128xf32>
    %310 = vector.extract_strided_slice %308 {offsets = [4, 0], sizes = [2, 128], strides = [1, 1]} : vector<6x128xf32> to vector<2x128xf32>
    %311 = arith.maximumf %309, %310 : vector<2x128xf32>
    %312 = vector.extract_strided_slice %311 {offsets = [0, 0], sizes = [1, 128], strides = [1, 1]} : vector<2x128xf32> to vector<1x128xf32>
    %313 = vector.extract_strided_slice %311 {offsets = [1, 0], sizes = [1, 128], strides = [1, 1]} : vector<2x128xf32> to vector<1x128xf32>
    %314 = arith.maximumf %312, %313 : vector<1x128xf32>
    %c0_250 = arith.constant 0 : index
    %c0_251 = arith.constant 0 : index
    %315 = vector.load %arg25[%c0_250, %c0_251] : memref<1x128xf32, #tpu.memory_space<vmem>>, vector<1x128xf32>
    tpu.vector_store %arg25[%c0_250, %c0_251], %314 {strides = array<i32>} : memref<1x128xf32, #tpu.memory_space<vmem>>, vector<1x128xf32>,
    %c0_252 = arith.constant 0 : index
    %c0_253 = arith.constant 0 : index
    %316 = vector.load %arg25[%c0_252, %c0_253] : memref<1x128xf32, #tpu.memory_space<vmem>>, vector<1x128xf32>
    %317 = arith.truncf %316 : vector<1x128xf32> to vector<1x128xbf16>
    %c0_254 = arith.constant 0 : index
    %c0_255 = arith.constant 0 : index
    %318 = vector.load %arg12[%c0_254, %c0_255] : memref<128x128xbf16, #tpu.memory_space<vmem>>, vector<128x128xbf16>
    %cst_256 = arith.constant dense<0.000000e+00> : vector<1x128xf32>
    %319 = tpu.matmul %317, %318, %cst_256 {dimension_numbers = #tpu.dot_dimension_numbers<[1], [0], [0], [1], [0, 0, 1, 1], [], []>} : vector<1x128xbf16>, vector<128x128xbf16>, vector<1x128xf32> -> vector<1x128xf32>
    %c0_257 = arith.constant 0 : index
    %c0_258 = arith.constant 0 : index
    %320 = vector.load %arg13[%c0_257, %c0_258] : memref<1x128xf32, #tpu.memory_space<vmem>>, vector<1x128xf32>
    %321 = arith.addf %319, %320 : vector<1x128xf32>
    %cst_259 = arith.constant 0.000000e+00 : f32
    %322 = vector.broadcast %cst_259 : f32 to vector<1x128xf32>
    %323 = arith.maximumf %321, %322 : vector<1x128xf32>
    %cst_260 = arith.constant dense<0xFF800000> : vector<128xf32>
    %324 = vector.multi_reduction <maximumf>, %323, %cst_260 [0] : vector<1x128xf32> to vector<128xf32>
    %325 = vector.shape_cast %324 : vector<128xf32> to vector<1x128xf32>
    %326 = arith.truncf %325 : vector<1x128xf32> to vector<1x128xbf16>
    %c0_261 = arith.constant 0 : index
    %c0_262 = arith.constant 0 : index
    %327 = vector.load %arg14[%c0_261, %c0_262] : memref<128x256xbf16, #tpu.memory_space<vmem>>, vector<128x256xbf16>
    %cst_263 = arith.constant dense<0.000000e+00> : vector<1x256xf32>
    %328 = tpu.matmul %326, %327, %cst_263 {dimension_numbers = #tpu.dot_dimension_numbers<[1], [0], [0], [1], [0, 0, 1, 1], [], []>} : vector<1x128xbf16>, vector<128x256xbf16>, vector<1x256xf32> -> vector<1x256xf32>
    %c0_264 = arith.constant 0 : index
    %c0_265 = arith.constant 0 : index
    %329 = vector.load %arg15[%c0_264, %c0_265] : memref<1x256xf32, #tpu.memory_space<vmem>>, vector<1x256xf32>
    %330 = arith.addf %328, %329 : vector<1x256xf32>
    %cst_266 = arith.constant 0.000000e+00 : f32
    %331 = vector.broadcast %cst_266 : f32 to vector<1x256xf32>
    %332 = arith.maximumf %330, %331 : vector<1x256xf32>
    %c0_267 = arith.constant 0 : index
    %c0_268 = arith.constant 0 : index
    %c0_269 = arith.constant 0 : index
    %333 = vector.load %arg16[%c0_267, %c0_268, %c0_269] : memref<1x1x256xf32, #tpu.memory_space<vmem>>, vector<1x1x256xf32>
    %334 = vector.shape_cast %333 : vector<1x1x256xf32> to vector<1x256xf32>
    %335 = vector.shape_cast %332 : vector<1x256xf32> to vector<1x1x256xf32>
    tpu.vector_store %arg16[%c0_267, %c0_268, %c0_269], %335 {strides = array<i32>} : memref<1x1x256xf32, #tpu.memory_space<vmem>>, vector<1x1x256xf32>,
    return
  }
  func.func @transform_0(%arg0: i32) -> (i32, i32, i32) {
    %c0_i32 = arith.constant 0 : i32
    %c0_i32_0 = arith.constant 0 : i32
    %c0_i32_1 = arith.constant 0 : i32
    return %arg0, %c0_i32, %c0_i32_0 : i32, i32, i32
  }
  func.func @transform_1(%arg0: i32) -> (i32, i32) {
    %c0_i32 = arith.constant 0 : i32
    %c0_i32_0 = arith.constant 0 : i32
    %c0_i32_1 = arith.constant 0 : i32
    return %c0_i32, %c0_i32_0 : i32, i32
  }
  func.func @transform_2(%arg0: i32) -> (i32, i32) {
    %c0_i32 = arith.constant 0 : i32
    %c0_i32_0 = arith.constant 0 : i32
    %c0_i32_1 = arith.constant 0 : i32
    return %c0_i32, %c0_i32_0 : i32, i32
  }
  func.func @transform_3(%arg0: i32) -> (i32, i32, i32) {
    %c0_i32 = arith.constant 0 : i32
    %c0_i32_0 = arith.constant 0 : i32
    %c0_i32_1 = arith.constant 0 : i32
    %c0_i32_2 = arith.constant 0 : i32
    return %c0_i32, %c0_i32_0, %c0_i32_1 : i32, i32, i32
  }
  func.func @transform_4(%arg0: i32) -> (i32, i32) {
    %c0_i32 = arith.constant 0 : i32
    %c0_i32_0 = arith.constant 0 : i32
    %c0_i32_1 = arith.constant 0 : i32
    return %c0_i32, %c0_i32_0 : i32, i32
  }
  func.func @transform_5(%arg0: i32) -> (i32, i32, i32) {
    %c0_i32 = arith.constant 0 : i32
    %c0_i32_0 = arith.constant 0 : i32
    %c0_i32_1 = arith.constant 0 : i32
    %c0_i32_2 = arith.constant 0 : i32
    return %c0_i32, %c0_i32_0, %c0_i32_1 : i32, i32, i32
  }
  func.func @transform_6(%arg0: i32) -> (i32, i32) {
    %c0_i32 = arith.constant 0 : i32
    %c0_i32_0 = arith.constant 0 : i32
    %c0_i32_1 = arith.constant 0 : i32
    return %c0_i32, %c0_i32_0 : i32, i32
  }
  func.func @transform_7(%arg0: i32) -> (i32, i32, i32) {
    %c0_i32 = arith.constant 0 : i32
    %c0_i32_0 = arith.constant 0 : i32
    %c0_i32_1 = arith.constant 0 : i32
    %c0_i32_2 = arith.constant 0 : i32
    return %c0_i32, %c0_i32_0, %c0_i32_1 : i32, i32, i32
  }
  func.func @transform_8(%arg0: i32) -> (i32, i32) {
    %c0_i32 = arith.constant 0 : i32
    %c0_i32_0 = arith.constant 0 : i32
    %c0_i32_1 = arith.constant 0 : i32
    return %c0_i32, %c0_i32_0 : i32, i32
  }
  func.func @transform_9(%arg0: i32) -> (i32, i32, i32) {
    %c0_i32 = arith.constant 0 : i32
    %c0_i32_0 = arith.constant 0 : i32
    %c0_i32_1 = arith.constant 0 : i32
    %c0_i32_2 = arith.constant 0 : i32
    return %c0_i32, %c0_i32_0, %c0_i32_1 : i32, i32, i32
  }
  func.func @transform_10(%arg0: i32) -> (i32, i32) {
    %c0_i32 = arith.constant 0 : i32
    %c0_i32_0 = arith.constant 0 : i32
    %c0_i32_1 = arith.constant 0 : i32
    return %c0_i32, %c0_i32_0 : i32, i32
  }
  func.func @transform_11(%arg0: i32) -> (i32, i32) {
    %c0_i32 = arith.constant 0 : i32
    %c0_i32_0 = arith.constant 0 : i32
    %c0_i32_1 = arith.constant 0 : i32
    return %c0_i32, %c0_i32_0 : i32, i32
  }
  func.func @transform_12(%arg0: i32) -> (i32, i32) {
    %c0_i32 = arith.constant 0 : i32
    %c0_i32_0 = arith.constant 0 : i32
    %c0_i32_1 = arith.constant 0 : i32
    return %c0_i32, %c0_i32_0 : i32, i32
  }
  func.func @transform_13(%arg0: i32) -> (i32, i32) {
    %c0_i32 = arith.constant 0 : i32
    %c0_i32_0 = arith.constant 0 : i32
    %c0_i32_1 = arith.constant 0 : i32
    return %c0_i32, %c0_i32_0 : i32, i32
  }
  func.func @transform_14(%arg0: i32) -> (i32, i32) {
    %c0_i32 = arith.constant 0 : i32
    %c0_i32_0 = arith.constant 0 : i32
    %c0_i32_1 = arith.constant 0 : i32
    return %c0_i32, %c0_i32_0 : i32, i32
  }
  func.func @transform_15(%arg0: i32) -> (i32, i32, i32) {
    %c0_i32 = arith.constant 0 : i32
    %c0_i32_0 = arith.constant 0 : i32
    %c0_i32_1 = arith.constant 0 : i32
    return %arg0, %c0_i32, %c0_i32_0 : i32, i32, i32
  }
}

</mosaic_0001>

<bundles_post_ra>
// kernel: plain_conv_forward.1
= control target key start
LH: loop header
LB: loop body
LE: loop exit
PB: predicated region body
PF: predicated region fallthrough
CT: control target
= control target key end

     0   :  { %s11378_s18 = smov 0   ;;  %s14940_s0 = inlined_call_operand.vmem [shape: bf16[2,1024,36], index: 0, kind: input, shape index: {}]   ;;  %s14941_s1 = inlined_call_operand.vmem [shape: bf16[36,16], index: 1, kind: input, shape index: {}]   ;;  %s14942_s2 = inlined_call_operand.vmem [shape: f32[1,16], index: 2, kind: input, shape index: {}]   ;;  %s14943_s3 = inlined_call_operand.vmem [shape: bf16[9,16,16], index: 3, kind: input, shape index: {}]   ;;  %s14944_s4 = inlined_call_operand.vmem [shape: f32[1,16], index: 4, kind: input, shape index: {}]   ;;  %s14945_s5 = inlined_call_operand.vmem [shape: bf16[9,16,32], index: 5, kind: input, shape index: {}]   ;;  %s14946_s6 = inlined_call_operand.vmem [shape: f32[1,32], index: 6, kind: input, shape index: {}]   ;;  %s14947_s7 = inlined_call_operand.vmem [shape: bf16[9,32,64], index: 7, kind: input, shape index: {}]   ;;  %s14948_s8 = inlined_call_operand.vmem [shape: f32[1,64], index: 8, kind: input, shape index: {}]   ;;  %s14949_s9 = inlined_call_operand.vmem [shape: bf16[9,64,128], index: 9, kind: input, shape index: {}]   ;;  %s14950_s10 = inlined_call_operand.vmem [shape: f32[1,128], index: 10, kind: input, shape index: {}]   ;;  %s14951_s11 = inlined_call_operand.vmem [shape: bf16[128,128], index: 11, kind: input, shape index: {}]   ;;  %s14952_s12 = inlined_call_operand.vmem [shape: f32[1,128], index: 12, kind: input, shape index: {}]   ;;  %s14953_s13 = inlined_call_operand.vmem [shape: bf16[128,256], index: 13, kind: input, shape index: {}]   ;;  %s14954_s14 = inlined_call_operand.vmem [shape: f32[1,256], index: 14, kind: input, shape index: {}]   ;;  %s14955_s15 = inlined_call_operand.vmem [shape: f32[2,1,256], index: 15, kind: output, shape index: {}]  }
   0x1 LB: > { %s9235_s19 = sadd.s32 4294967295, %s11292_s18   ;;  %p9239_p0 = scmp.ge.s32.totalorder %s11292_s18, 1  ;;  %s11292_s18 = sphi %s11378_s18, %s25_s18  }
   0x2   : > { %p437_p1 = scmp.lt.s32.totalorder %s11292_s18, 3 }
   0x4   : > { %p438_p2 = pnand %p9239_p0, %p437_p1 }
   0x6   : > { %441 = sbr.rel (%p438_p2) target bundleno = 2474 (0x9aa), region = 80 }
   0xb   : > { %v11111_v0 = vld [vmem:[%s14941_s1 + $0x10] ss:$0 sps:$4 sm:$0x33]   ;;  %vm1162_vm0 = vcmask 1041408   ;;  %v11112_v1 = vld [vmem:[%s14941_s1 + $0x8] sm:$0xff]   ;;  %p484_p3 = scmp.lt.s32.totalorder %s9235_s19, 1 }
   0xc   : > { %11098 = vmatprep.subr.msk.bf16.mxu0 %vm1162_vm0, %v11111_v0  ;;  %v1164_v2 = vsel %vm1162_vm0, %v11111_v0, 0  ;;  %v11113_v3 = vld [vmem:[%s14941_s1] sm:$0xff]   ;;  %vm969_vm1 = vcmask 293888   ;;  %vm2583_vm2 = vcmask 130048   ;;  %v14956_v31 = vmov 0.0   ;;  %v11178_v40 = vld [vmem:[%s14943_s3 + $0x8] sm:$0xff]  }
   0xd   : > { %10223 = vmatpush3.bf16.msra.mxu0 %v1164_v2  ;;  %s15295_s19 = smov (!%p484_p3, %s9235_s19), 1  ;;  %2774 = vst.msk [vmem:[#allocation3 + $0x10] sm:$0xff] %vm2583_vm2, %v14956_v31  ;;  %2775 = vst.msk [vmem:[#allocation3 + $0x18] sm:$0xff] %vm2583_vm2, %v14956_v31  ;;  %10356 = vmatprep.subr.bf16.mxu1 %v11178_v40  ;;  %v11179_v47 = vld [vmem:[%s14943_s3 + $0x20] sm:$0xff]   ;;  %vm2087_vm3 = vcmask 1046528   ;;  %vm2812_vm6 = vcmask 125952  }
   0xe   : > { %10224 = vmatprep.subr.bf16.mxu0 %v11112_v1  ;;  %s9839_s26 = sshll.u32 %s15295_s19, 9  ;;  %2772 = vst.msk [vmem:[#allocation3] sm:$0xff] %vm2583_vm2, %v14956_v31  ;;  %2773 = vst.msk [vmem:[#allocation3 + $0x8] sm:$0xff] %vm2583_vm2, %v14956_v31  ;;  %10357 = vmatpush3.bf16.msra.mxu1 %v11178_v40  ;;  %v11621_v62 = vld [vmem:[%s14942_s2] ss:$0 sm:$0xff]  ;;  %vm2707_vm7 = vcmask 129024  }
   0xf   : > { %s11403_s29 = scalar_lea.vmem %s14940_s0, %s9839_s26  ;;  %2776 = vst.msk [vmem:[#allocation3 + $0x20] sm:$0xff] %vm2583_vm2, %v14956_v31  ;;  %2777 = vst.msk [vmem:[#allocation3 + $0x28] sm:$0xff] %vm2583_vm2, %v14956_v31  ;;  %vm2913_vm4 = vsmask.f32 7424  ;;  %vm4077_vm5 = vsmask.f32 6400 }
  0x10   : > { %v11114_v4 = vld [vmem:[%s11403_s29] sm:$0xff]   ;;  %v11115_v5 = vld [vmem:[%s11403_s29 + $0x8] sm:$0xff]   ;;  %v11116_v6 = vld [vmem:[%s11403_s29 + $0x10] sm:$0xff]   ;;  %2778 = vst.msk [vmem:[#allocation3 + $0x30] sm:$0xff] %vm2583_vm2, %v14956_v31  ;;  %vm4436_vm8 = vcmask 1045504   ;;  %vm5337_vm9 = vcmask 1044480  }
  0x11   : > { %10225 = vmatpush3.bf16.msra.mxu0 %v11112_v1  ;;  %10228 = vmatprep.mubr.msk.bf16.mxu0 %vm969_vm1, %v11114_v4  ;;  %v11117_v7 = vld [vmem:[%s11403_s29 + $0x18] sm:$0xff]   ;;  %v11118_v8 = vld [vmem:[%s11403_s29 + $0x20] sm:$0xff]   ;;  %v11119_v9 = vld [vmem:[%s11403_s29 + $0x28] sm:$0xff]   ;;  %2779 = vst.msk [vmem:[#allocation3 + $0x38] sm:$0xff] %vm2583_vm2, %v14956_v31  ;;  %vm4978_vm10 = vsmask.f32 5376 }
  0x12   : > { %10226 = vmatprep.subr.bf16.mxu0 %v11113_v3  ;;  %v11120_v10 = vld [vmem:[%s11403_s29 + $0x30] sm:$0xff]   ;;  %v11121_v11 = vld [vmem:[%s11403_s29 + $0x38] sm:$0xff]   ;;  %v11122_v12 = vld [vmem:[%s11403_s29 + $0x40] sm:$0xff]   ;;  %2780 = vst.msk [vmem:[#allocation3 + $0x40] sm:$0xff] %vm2583_vm2, %v14956_v31  ;;  %vm11295_vm11 = vmmov 0   ;;  %vm6099_vm12 = vcmask 124928  }
  0x13   : > { %v11123_v13 = vld [vmem:[%s11403_s29 + $0x48] sm:$0xff]   ;;  %v11124_v14 = vld [vmem:[%s11403_s29 + $0x50] sm:$0xff]   ;;  %v11125_v15 = vld [vmem:[%s11403_s29 + $0x58] sm:$0xff]   ;;  %2781 = vst.msk [vmem:[#allocation3 + $0x48] sm:$0xff] %vm2583_vm2, %v14956_v31  ;;  %vm6509_vm13 = vcmask 1042432   ;;  %vm7367_vm15 = vcmask 261120  }
  0x14   : > { %v11126_v16 = vld [vmem:[%s11403_s29 + $0x60] sm:$0xff]   ;;  %v11127_v17 = vld [vmem:[%s11403_s29 + $0x68] sm:$0xff]   ;;  %v11128_v18 = vld [vmem:[%s11403_s29 + $0x70] sm:$0xff]   ;;  %2782 = vst.msk [vmem:[#allocation3 + $0x50] sm:$0xff] %vm2583_vm2, %v14956_v31  ;;  %vm6628_vm14 = vsmask.f32 2304 }
  0x15   : > { %10227 = vmatpush3.bf16.msra.mxu0 %v11113_v3  ;;  %v11129_v19 = vld [vmem:[%s11403_s29 + $0x78] sm:$0xff]   ;;  %v11130_v20 = vld [vmem:[%s11403_s29 + $0x80] sm:$0xff]   ;;  %v11131_v21 = vld [vmem:[%s11403_s29 + $0x88] sm:$0xff]   ;;  %2783 = vst.msk [vmem:[#allocation3 + $0x58] sm:$0xff] %vm2583_vm2, %v14956_v31  ;;  %s9242_s23 = sshll.u32 %s15295_s19, 1 }
  0x16   : > { %v11132_v22 = vld [vmem:[%s11403_s29 + $0x90] sm:$0xff]   ;;  %v11133_v23 = vld [vmem:[%s11403_s29 + $0x98] sm:$0xff]   ;;  %v11134_v24 = vld [vmem:[%s11403_s29 + $0xa0] sm:$0xff]   ;;  %2784 = vst.msk [vmem:[#allocation3 + $0x60] sm:$0xff] %vm2583_vm2, %v14956_v31  ;;  %10508 = vmatprep.subr.bf16.mxu0 %v11179_v47  ;;  %s492_s26 = scalar_lea.vmem %s14955_s15, %s9242_s23 }
  0x17   : > { %v11135_v25 = vld [vmem:[%s11403_s29 + $0xa8] sm:$0xff]   ;;  %v11136_v26 = vld [vmem:[%s11403_s29 + $0xb0] sm:$0xff]   ;;  %v11137_v27 = vld [vmem:[%s11403_s29 + $0xb8] sm:$0xff]   ;;  %2785 = vst.msk [vmem:[#allocation3 + $0x68] sm:$0xff] %vm2583_vm2, %v14956_v31 }
  0x18   : > { %10229 = vmatmul.mubr.msk.bf16.vlgmr.msra.gmra.mxu0 %vm969_vm1, %v11115_v5  ;;  %v11138_v28 = vld [vmem:[%s11403_s29 + $0xc0] sm:$0xff]   ;;  %v11139_v29 = vld [vmem:[%s11403_s29 + $0xc8] sm:$0xff]   ;;  %v11140_v30 = vld [vmem:[%s11403_s29 + $0xd0] sm:$0xff]   ;;  %2786 = vst.msk [vmem:[#allocation3 + $0x70] sm:$0xff] %vm2583_vm2, %v14956_v31 }
  0x19   : > { %10232 = vmatprep.mubr.msk.bf16.mxu0 %vm969_vm1, %v11116_v6  ;;  %2787 = vst.msk [vmem:[#allocation3 + $0x78] sm:$0xff] %vm2583_vm2, %v14956_v31  ;;  %2788 = vst.msk [vmem:[#allocation3 + $0x80] sm:$0xff] %vm2583_vm2, %v14956_v31  ;;  %v11141_v32 = vld [vmem:[%s11403_s29 + $0xd8] sm:$0xff]   ;;  %v11142_v33 = vld [vmem:[%s11403_s29 + $0xe0] sm:$0xff]   ;;  %10509 = vmatpush3.bf16.msra.mxu0 %v11179_v47 }
  0x1a   : > { %2789 = vst.msk [vmem:[#allocation3 + $0x88] sm:$0xff] %vm2583_vm2, %v14956_v31  ;;  %2790 = vst.msk [vmem:[#allocation3 + $0x90] sm:$0xff] %vm2583_vm2, %v14956_v31  ;;  %v11143_v34 = vld [vmem:[%s11403_s29 + $0xe8] sm:$0xff]   ;;  %v11144_v35 = vld [vmem:[%s11403_s29 + $0xf0] sm:$0xff]  }
  0x1b   : > { %2791 = vst.msk [vmem:[#allocation3 + $0x98] sm:$0xff] %vm2583_vm2, %v14956_v31  ;;  %2792 = vst.msk [vmem:[#allocation3 + $0xa0] sm:$0xff] %vm2583_vm2, %v14956_v31  ;;  %v11145_v36 = vld [vmem:[%s11403_s29 + $0xf8] sm:$0xff]   ;;  %v11146_v37 = vld [vmem:[%s11403_s29 + $0x100] sm:$0xff]  }
  0x1c   : > { %2793 = vst.msk [vmem:[#allocation3 + $0xa8] sm:$0xff] %vm2583_vm2, %v14956_v31  ;;  %2794 = vst.msk [vmem:[#allocation3 + $0xb0] sm:$0xff] %vm2583_vm2, %v14956_v31  ;;  %v11147_v38 = vld [vmem:[%s11403_s29 + $0x108] sm:$0xff]   ;;  %v11148_v39 = vld [vmem:[%s11403_s29 + $0x110] sm:$0xff]  }
  0x1d   : > { %2795 = vst.msk [vmem:[#allocation3 + $0xb8] sm:$0xff] %vm2583_vm2, %v14956_v31  ;;  %2796 = vst.msk [vmem:[#allocation3 + $0xc0] sm:$0xff] %vm2583_vm2, %v14956_v31  ;;  %v11149_v41 = vld [vmem:[%s11403_s29 + $0x118] sm:$0xff]   ;;  %v11150_v42 = vld [vmem:[%s11403_s29 + $0x120] sm:$0xff]  }
  0x1e   : > { %2797 = vst.msk [vmem:[#allocation3 + $0xc8] sm:$0xff] %vm2583_vm2, %v14956_v31  ;;  %2798 = vst.msk [vmem:[#allocation3 + $0xd0] sm:$0xff] %vm2583_vm2, %v14956_v31  ;;  %v11151_v43 = vld [vmem:[%s11403_s29 + $0x128] sm:$0xff]   ;;  %v11152_v44 = vld [vmem:[%s11403_s29 + $0x130] sm:$0xff]  }
  0x1f   : > { %2799 = vst.msk [vmem:[#allocation3 + $0xd8] sm:$0xff] %vm2583_vm2, %v14956_v31  ;;  %2800 = vst.msk [vmem:[#allocation3 + $0xe0] sm:$0xff] %vm2583_vm2, %v14956_v31  ;;  %v11153_v45 = vld [vmem:[%s11403_s29 + $0x138] sm:$0xff]   ;;  %v11154_v46 = vld [vmem:[%s11403_s29 + $0x140] sm:$0xff]  }
  0x20   : > { %10233 = vmatmul.mubr.msk.bf16.gmra.mxu0 %vm969_vm1, %v11117_v7  ;;  %2801 = vst.msk [vmem:[#allocation3 + $0xe8] sm:$0xff] %vm2583_vm2, %v14956_v31  ;;  %2802 = vst.msk [vmem:[#allocation3 + $0xf0] sm:$0xff] %vm2583_vm2, %v14956_v31  ;;  %v11155_v48 = vld [vmem:[%s11403_s29 + $0x148] sm:$0xff]   ;;  %v11156_v49 = vld [vmem:[%s11403_s29 + $0x150] sm:$0xff]  }
  0x21   : > { %10236 = vmatprep.mubr.msk.bf16.mxu0 %vm969_vm1, %v11118_v8  ;;  %2803 = vst.msk [vmem:[#allocation3 + $0xf8] sm:$0xff] %vm2583_vm2, %v14956_v31  ;;  %2804 = vst.msk [vmem:[#allocation3 + $0x100] sm:$0xff] %vm2583_vm2, %v14956_v31  ;;  %v11157_v50 = vld [vmem:[%s11403_s29 + $0x158] sm:$0xff]   ;;  %v11158_v51 = vld [vmem:[%s11403_s29 + $0x160] sm:$0xff]  }
  0x22   : > { %2805 = vst.msk [vmem:[#allocation3 + $0x108] sm:$0xff] %vm2583_vm2, %v14956_v31  ;;  %2806 = vst.msk [vmem:[#allocation3 + $0x110] sm:$0xff] %vm2583_vm2, %v14956_v31  ;;  %v11159_v52 = vld [vmem:[%s11403_s29 + $0x168] sm:$0xff]   ;;  %v11160_v53 = vld [vmem:[%s11403_s29 + $0x170] sm:$0xff]  }
  0x23   : > { %2807 = vst.msk [vmem:[#allocation3 + $0x118] sm:$0xff] %vm2583_vm2, %v14956_v31  ;;  %2808 = vst.msk [vmem:[#allocation3 + $0x120] sm:$0xff] %vm2583_vm2, %v14956_v31  ;;  %v11161_v54 = vld [vmem:[%s11403_s29 + $0x178] sm:$0xff]   ;;  %v11162_v55 = vld [vmem:[%s11403_s29 + $0x180] sm:$0xff]  }
  0x24   : > { %2809 = vst.msk [vmem:[#allocation3 + $0x128] sm:$0xff] %vm2583_vm2, %v14956_v31  ;;  %2810 = vst.msk [vmem:[#allocation3 + $0x130] sm:$0xff] %vm2583_vm2, %v14956_v31  ;;  %v11163_v56 = vld [vmem:[%s11403_s29 + $0x188] sm:$0xff]   ;;  %v11164_v57 = vld [vmem:[%s11403_s29 + $0x190] sm:$0xff]  }
  0x25   : > { %2811 = vst.msk [vmem:[#allocation3 + $0x138] sm:$0xff] %vm2583_vm2, %v14956_v31  ;;  %6116 = vst.msk [vmem:[#allocation5] sm:$0xff] %vm2583_vm2, %v14956_v31  ;;  %v11165_v61 = vld [vmem:[%s11403_s29 + $0x198] sm:$0xff]   ;;  %v11166_v63 = vld [vmem:[%s11403_s29 + $0x1a0] sm:$0xff]  }
  0x26   : > { %6117 = vst.msk [vmem:[#allocation5 + $0x8] sm:$0xff] %vm2583_vm2, %v14956_v31  ;;  %6118 = vst.msk [vmem:[#allocation5 + $0x10] sm:$0xff] %vm2583_vm2, %v14956_v31 }
  0x27   : > { %6119 = vst.msk [vmem:[#allocation5 + $0x18] sm:$0xff] %vm2583_vm2, %v14956_v31  ;;  %6120 = vst.msk [vmem:[#allocation5 + $0x20] sm:$0xff] %vm2583_vm2, %v14956_v31 }
  0x28   : > { %10237 = vmatmul.mubr.msk.bf16.gmra.mxu0 %vm969_vm1, %v11119_v9  ;;  %6121 = vst.msk [vmem:[#allocation5 + $0x28] sm:$0xff] %vm2583_vm2, %v14956_v31  ;;  %6122 = vst.msk [vmem:[#allocation5 + $0x30] sm:$0xff] %vm2583_vm2, %v14956_v31 }
  0x29   : > { %10240 = vmatprep.mubr.msk.bf16.mxu0 %vm969_vm1, %v11120_v10  ;;  %6123 = vst.msk [vmem:[#allocation5 + $0x38] sm:$0xff] %vm2583_vm2, %v14956_v31  ;;  %6124 = vst.msk [vmem:[#allocation5 + $0x40] sm:$0xff] %vm2583_vm2, %v14956_v31 }
  0x2a   : > { %6125 = vst.msk [vmem:[#allocation5 + $0x48] sm:$0xff] %vm2583_vm2, %v14956_v31  ;;  %6126 = vst.msk [vmem:[#allocation5 + $0x50] sm:$0xff] %vm2583_vm2, %v14956_v31 }
  0x2b   : > { %6127 = vst.msk [vmem:[#allocation5 + $0x58] sm:$0xff] %vm2583_vm2, %v14956_v31 }
  0x2c   : > { %2813 = vst.msk [vmem:[#allocation3 + $0x140] sm:$0xf] %vm2812_vm6, %v14956_v31  ;;  %6128 = vst.msk [vmem:[#allocation5 + $0x60] sm:$0xf] %vm2812_vm6, %v14956_v31  ;;  %vm7958_vm6 = vsmask.f32 1280 }
  0x30   : > { %10241 = vmatmul.mubr.msk.bf16.gmra.mxu0 %vm969_vm1, %v11121_v11 }
  0x31   : > { %10244 = vmatprep.mubr.msk.bf16.mxu0 %vm969_vm1, %v11122_v12  ;;  %v11167_v12 = vld [vmem:[%s11403_s29 + $0x1a8] sm:$0xff]  }
  0x38   : > { %10245 = vmatmul.mubr.msk.bf16.gmra.mxu0 %vm969_vm1, %v11123_v13 }
  0x39   : > { %10248 = vmatprep.mubr.msk.bf16.mxu0 %vm969_vm1, %v11124_v14 }
  0x40   : > { %10249 = vmatmul.mubr.msk.bf16.gmra.mxu0 %vm969_vm1, %v11125_v15  ;;  %v11168_v15 = vld [vmem:[%s11403_s29 + $0x1b0] sm:$0xff]  }
  0x41   : > { %10252 = vmatprep.mubr.msk.bf16.mxu0 %vm969_vm1, %v11126_v16 }
  0x48   : > { %10253 = vmatmul.mubr.msk.bf16.gmra.mxu0 %vm969_vm1, %v11127_v17 }
  0x49   : > { %10256 = vmatprep.mubr.msk.bf16.mxu0 %vm969_vm1, %v11128_v18 }
  0x50   : > { %10257 = vmatmul.mubr.msk.bf16.gmra.mxu0 %vm969_vm1, %v11129_v19 }
  0x51   : > { %10260 = vmatprep.mubr.msk.bf16.mxu0 %vm969_vm1, %v11130_v20 }
  0x58   : > { %10261 = vmatmul.mubr.msk.bf16.gmra.mxu0 %vm969_vm1, %v11131_v21 }
  0x59   : > { %10264 = vmatprep.mubr.msk.bf16.mxu0 %vm969_vm1, %v11132_v22 }
  0x60   : > { %10265 = vmatmul.mubr.msk.bf16.gmra.mxu0 %vm969_vm1, %v11133_v23 }
  0x61   : > { %10268 = vmatprep.mubr.msk.bf16.mxu0 %vm969_vm1, %v11134_v24 }
  0x68   : > { %10269 = vmatmul.mubr.msk.bf16.gmra.mxu0 %vm969_vm1, %v11135_v25 }
  0x69   : > { %10272 = vmatprep.mubr.msk.bf16.mxu0 %vm969_vm1, %v11136_v26 }
  0x70   : > { %10273 = vmatmul.mubr.msk.bf16.gmra.mxu0 %vm969_vm1, %v11137_v27 }
  0x71   : > { %10276 = vmatprep.mubr.msk.bf16.mxu0 %vm969_vm1, %v11138_v28 }
  0x78   : > { %10277 = vmatmul.mubr.msk.bf16.gmra.mxu0 %vm969_vm1, %v11139_v29 }
  0x79   : > { %10280 = vmatprep.mubr.msk.bf16.mxu0 %vm969_vm1, %v11140_v30 }
  0x80   : > { %10281 = vmatmul.mubr.msk.bf16.gmra.mxu0 %vm969_vm1, %v11141_v32 }
  0x81   : > { %10284 = vmatprep.mubr.msk.bf16.mxu0 %vm969_vm1, %v11142_v33 }
  0x88   : > { %10285 = vmatmul.mubr.msk.bf16.gmra.mxu0 %vm969_vm1, %v11143_v34 }
  0x89   : > { %10288 = vmatprep.mubr.msk.bf16.mxu0 %vm969_vm1, %v11144_v35 }
  0x90   : > { %10289 = vmatmul.mubr.msk.bf16.gmra.mxu0 %vm969_vm1, %v11145_v36  ;;  %v11169_v36 = vld [vmem:[%s11403_s29 + $0x1b8] sm:$0xff]  }
  0x91   : > { %10292 = vmatprep.mubr.msk.bf16.mxu0 %vm969_vm1, %v11146_v37 }
  0x98   : > { %10293 = vmatmul.mubr.msk.bf16.gmra.mxu0 %vm969_vm1, %v11147_v38 }
  0x99   : > { %10296 = vmatprep.mubr.msk.bf16.mxu0 %vm969_vm1, %v11148_v39 }
  0xa0   : > { %10297 = vmatmul.mubr.msk.bf16.gmra.mxu0 %vm969_vm1, %v11149_v41  ;;  %v11170_v41 = vld [vmem:[%s11403_s29 + $0x1c0] sm:$0xff]  }
  0xa1   : > { %10300 = vmatprep.mubr.msk.bf16.mxu0 %vm969_vm1, %v11150_v42 }
  0xa8   : > { %10301 = vmatmul.mubr.msk.bf16.gmra.mxu0 %vm969_vm1, %v11151_v43 }
  0xa9   : > { %10304 = vmatprep.mubr.msk.bf16.mxu0 %vm969_vm1, %v11152_v44 }
  0xb0   : > { %10305 = vmatmul.mubr.msk.bf16.gmra.mxu0 %vm969_vm1, %v11153_v45 }
  0xb1   : > { %10308 = vmatprep.mubr.msk.bf16.mxu0 %vm969_vm1, %v11154_v46 }
  0xb8   : > { %10309 = vmatmul.mubr.msk.bf16.gmra.mxu0 %vm969_vm1, %v11155_v48 }
  0xb9   : > { %10312 = vmatprep.mubr.msk.bf16.mxu0 %vm969_vm1, %v11156_v49 }
  0xc0   : > { %10313 = vmatmul.mubr.msk.bf16.gmra.mxu0 %vm969_vm1, %v11157_v50 }
  0xc1   : > { %10316 = vmatprep.mubr.msk.bf16.mxu0 %vm969_vm1, %v11158_v51 }
  0xc8   : > { %10317 = vmatmul.mubr.msk.bf16.gmra.mxu0 %vm969_vm1, %v11159_v52 }
  0xc9   : > { %10320 = vmatprep.mubr.msk.bf16.mxu0 %vm969_vm1, %v11160_v53 }
  0xd0   : > { %10321 = vmatmul.mubr.msk.bf16.gmra.mxu0 %vm969_vm1, %v11161_v54 }
  0xd1   : > { %10324 = vmatprep.mubr.msk.bf16.mxu0 %vm969_vm1, %v11162_v55 }
  0xd8   : > { %v10230_v58 = vpop.f32.mrf.mxu0  ;;  %10325 = vmatmul.mubr.msk.bf16.gmra.mxu0 %vm969_vm1, %v11163_v56 }
  0xd9   : > { %10328 = vmatprep.mubr.msk.bf16.mxu0 %vm969_vm1, %v11164_v57  ;;  %v1209_v1 = vadd.f32 %v10230_v58, %v11621_v62 }
  0xda   : > { %v1200_v59 = vpop.f32.mrf.mxu0 }
  0xdb   : > { %v1201_v5 = vadd.f32 %v11621_v62, %v1200_v59  ;;  %v1713_v9 = vmax.f32 %v1209_v1, 0.0 }
  0xdc   : > { %v10231_v60 = vpop.f32.mrf.mxu0 }
  0xdd   : > { %v1212_v6 = vadd.f32 %v10231_v60, %v11621_v62  ;;  %v1711_v18 = vmax.f32 %v1201_v5, 0.0 }
  0xde   : > { %v1203_v0 = vpop.f32.mrf.mxu0 }
  0xdf   : > { %v1204_v10 = vadd.f32 %v11621_v62, %v1203_v0  ;;  %v1714_v19 = vmax.f32 %v1212_v6, 0.0 }
  0xe0   : > { %v10234_v2 = vpop.f32.mrf.mxu0  ;;  %10329 = vmatmul.mubr.msk.bf16.gmra.mxu0 %vm969_vm1, %v11165_v61 }
  0xe1   : > { %v1225_v3 = vadd.f32 %v10234_v2, %v11621_v62  ;;  %10332 = vmatprep.mubr.msk.bf16.mxu0 %vm969_vm1, %v11166_v63  ;;  %v1712_v22 = vmax.f32 %v1204_v10, 0.0  ;;  %v11171_v63 = vld [vmem:[%s11403_s29 + $0x1c8] sm:$0xff]   ;;  %v11172_v2 = vld [vmem:[%s11403_s29 + $0x1d0] sm:$0xff]  }
  0xe2   : > { %v1216_v4 = vpop.f32.mrf.mxu0 }
  0xe3   : > { %v1717_v7 = vmax.f32 %v1225_v3, 0.0  ;;  %v1217_v8 = vadd.f32 %v11621_v62, %v1216_v4 }
  0xe4   : > { %v10235_v11 = vpop.f32.mrf.mxu0 }
  0xe5   : > { %v1715_v13 = vmax.f32 %v1217_v8, 0.0  ;;  %v1228_v14 = vadd.f32 %v10235_v11, %v11621_v62  ;;  %v1841_v16 = vmax.f32 %v1713_v9, %v1717_v7  ;;  %v2846_v7 = vld [vmem:[#allocation3] sm:$0xff]  ;;  %v2847_v8 = vld [vmem:[#allocation3 + $0x8] sm:$0xff] }
  0xe6   : > { %v1219_v17 = vpop.f32.mrf.mxu0 }
  0xe7   : > { %v1718_v20 = vmax.f32 %v1228_v14, 0.0  ;;  %v1220_v21 = vadd.f32 %v11621_v62, %v1219_v17  ;;  %v1839_v24 = vmax.f32 %v1711_v18, %v1715_v13  ;;  %v2091_v28 = vrot.slane %v1841_v16, 1 }
  0xe8   : > { %v10238_v23 = vpop.f32.mrf.mxu0  ;;  %10333 = vmatmul.mubr.msk.bf16.gmra.mxu0 %vm969_vm1, %v11167_v12  ;;  %v11664_v17 = vpack.c.bf16 %v2847_v8, %v2846_v7 }
  0xe9   : > { %v1842_v25 = vmax.f32 %v1714_v19, %v1718_v20  ;;  %v1716_v26 = vmax.f32 %v1220_v21, 0.0  ;;  %v1241_v27 = vadd.f32 %v10238_v23, %v11621_v62  ;;  %10336 = vmatprep.mubr.msk.bf16.mxu0 %vm969_vm1, %v11168_v15  ;;  %v2088_v37 = vrot.slane %v1839_v24, 1 }
  0xea   : > { %v1232_v29 = vpop.f32.mrf.mxu0 }
  0xeb   : > { %v2093_v30 = vrot.slane %v1842_v25, 1  ;;  %v1840_v32 = vmax.f32 %v1712_v22, %v1716_v26  ;;  %v1721_v33 = vmax.f32 %v1241_v27, 0.0  ;;  %v1233_v34 = vadd.f32 %v11621_v62, %v1232_v29  ;;  %v11174_v29 = vld [vmem:[%s11403_s29 + $0x1e0] sm:$0xff]  }
  0xec   : > { %v10239_v35 = vpop.f32.mrf.mxu0 }
  0xed   : > { %v2094_v38 = vsel %vm2087_vm3, %v2091_v28, %v2093_v30  ;;  %v2089_v39 = vrot.slane %v1840_v32, 1  ;;  %v1719_v40 = vmax.f32 %v1233_v34, 0.0  ;;  %v1244_v43 = vadd.f32 %v10239_v35, %v11621_v62 }
  0xee   : > { %v2461_v42 = vmax.f32 %v1841_v16, %v2094_v38  ;;  %v1235_v44 = vpop.f32.mrf.mxu0  ;;  %v2917_v34 = vshll.u32 %v11664_v17, 16 }
  0xef   : > { %v2090_v45 = vsel %vm2087_vm3, %v2088_v37, %v2089_v39  ;;  %v2092_v46 = vsel %vm2087_vm3, %v2089_v39, %v2091_v28  ;;  %v1843_v47 = vmax.f32 %v1715_v13, %v1719_v40  ;;  %v1722_v50 = vmax.f32 %v1244_v43, 0.0 }
  0xf0   : > { %2586 = vst.msk [vmem:[#allocation2 + $0x10] sm:$0xff] %vm2583_vm2, %v2461_v42  ;;  %v2459_v48 = vmax.f32 %v1839_v24, %v2090_v45  ;;  %v2460_v49 = vmax.f32 %v1840_v32, %v2092_v46  ;;  %v1236_v51 = vadd.f32 %v11621_v62, %v1235_v44  ;;  %v10242_v52 = vpop.f32.mrf.mxu0  ;;  %10337 = vmatmul.mubr.msk.bf16.gmra.mxu0 %vm969_vm1, %v11169_v36  ;;  %v11173_v24 = vld [vmem:[%s11403_s29 + $0x1d8] sm:$0xff]  }
  0xf1   : > { %v2095_v53 = vrot.slane %v1843_v47, 1  ;;  %v1257_v54 = vadd.f32 %v10242_v52, %v11621_v62  ;;  %10340 = vmatprep.mubr.msk.bf16.mxu0 %vm969_vm1, %v11170_v41  ;;  %v2915_v47 = vshrl.u32 %v11664_v17, 16 }
  0xf2   : > { %2584 = vst.msk [vmem:[#allocation2] sm:$0xff] %vm2583_vm2, %v2459_v48  ;;  %2585 = vst.msk [vmem:[#allocation2 + $0x8] sm:$0xff] %vm2583_vm2, %v2460_v49  ;;  %v1720_v55 = vmax.f32 %v1236_v51, 0.0  ;;  %v1248_v56 = vpop.f32.mrf.mxu0  ;;  %v2919_v48 = vrot.slane %v2917_v34, 1 }
  0xf3   : > { %v2096_v57 = vsel %vm2087_vm3, %v2093_v30, %v2095_v53  ;;  %v1725_v58 = vmax.f32 %v1257_v54, 0.0  ;;  %v1249_v59 = vadd.f32 %v11621_v62, %v1248_v56  ;;  %v11175_v54 = vld [vmem:[%s11403_s29 + $0x1e8] sm:$0xff]  }
  0xf4   : > { %v2462_v60 = vmax.f32 %v1842_v25, %v2096_v57  ;;  %v10243_v61 = vpop.f32.mrf.mxu0 }
  0xf5   : > { %v1723_v0 = vmax.f32 %v1249_v59, 0.0  ;;  %v1260_v1 = vadd.f32 %v10243_v61, %v11621_v62  ;;  %v1849_v4 = vmax.f32 %v1721_v33, %v1725_v58  ;;  %v11176_v59 = vld [vmem:[%s11403_s29 + $0x1f0] sm:$0xff]  }
  0xf6   : > { %2587 = vst.msk [vmem:[#allocation2 + $0x18] sm:$0xff] %vm2583_vm2, %v2462_v60  ;;  %v1251_v3 = vpop.f32.mrf.mxu0 }
  0xf7   : > { %v1847_v5 = vmax.f32 %v1719_v40, %v1723_v0  ;;  %v1726_v6 = vmax.f32 %v1260_v1, 0.0  ;;  %v1252_v9 = vadd.f32 %v11621_v62, %v1251_v3  ;;  %v2107_v18 = vrot.slane %v1849_v4, 1 }
  0xf8   : > { %v10246_v10 = vpop.f32.mrf.mxu0  ;;  %10341 = vmatmul.mubr.msk.bf16.gmra.mxu0 %vm969_vm1, %v11171_v63  ;;  %v2920_v63 = vor.u32 %v2919_v48, %v2915_v47 }
  0xf9   : > { %v2709_v11 = vld [vmem:[#allocation2] ss:$2 sm:$0xff]  ;;  %v2103_v12 = vrot.slane %v1847_v5, 1  ;;  %v1850_v13 = vmax.f32 %v1722_v50, %v1726_v6  ;;  %10344 = vmatprep.mubr.msk.bf16.mxu0 %vm969_vm1, %v11172_v2  ;;  %v1724_v14 = vmax.f32 %v1252_v9, 0.0  ;;  %v1273_v15 = vadd.f32 %v10246_v10, %v11621_v62 }
  0xfa   : > { %2814 = vst.msk [vmem:[#allocation3 + $0x13] sm:$0xff] %vm2583_vm2, %v2709_v11  ;;  %v1264_v16 = vpop.f32.mrf.mxu0 }
  0xfb   : > { %v2109_v19 = vrot.slane %v1850_v13, 1  ;;  %v1265_v20 = vadd.f32 %v11621_v62, %v1264_v16  ;;  %v1848_v21 = vmax.f32 %v1720_v55, %v1724_v14  ;;  %v1729_v22 = vmax.f32 %v1273_v15, 0.0 }
  0xfc   : > { %v10247_v23 = vpop.f32.mrf.mxu0 }
  0xfd   : > { %v2711_v25 = vld [vmem:[#allocation2 + $0x10] ss:$2 sm:$0xff]  ;;  %v2110_v26 = vsel %vm2087_vm3, %v2107_v18, %v2109_v19  ;;  %v1727_v27 = vmax.f32 %v1265_v20, 0.0  ;;  %v1276_v28 = vadd.f32 %v10247_v23, %v11621_v62  ;;  %v2105_v32 = vrot.slane %v1848_v21, 1 }
  0xfe   : > { %2815 = vst.msk [vmem:[#allocation3 + $0x1b] sm:$0xff] %vm2583_vm2, %v2711_v25  ;;  %v2469_v30 = vmax.f32 %v1849_v4, %v2110_v26  ;;  %v1267_v33 = vpop.f32.mrf.mxu0 }
  0xff   : > { %v1851_v35 = vmax.f32 %v1723_v0, %v1727_v27  ;;  %v1730_v36 = vmax.f32 %v1276_v28, 0.0  ;;  %v1268_v37 = vadd.f32 %v11621_v62, %v1267_v33  ;;  %v2106_v38 = vsel %vm2087_vm3, %v2103_v12, %v2105_v32 }
 0x100   : > { %2594 = vst.msk [vmem:[#allocation2 + $0x50] sm:$0xff] %vm2583_vm2, %v2469_v30  ;;  %v2108_v39 = vsel %vm2087_vm3, %v2105_v32, %v2107_v18  ;;  %v10250_v40 = vpop.f32.mrf.mxu0  ;;  %10345 = vmatmul.mubr.msk.bf16.gmra.mxu0 %vm969_vm1, %v11173_v24  ;;  %v2467_v41 = vmax.f32 %v1847_v5, %v2106_v38 }
 0x101   : > { %v2468_v42 = vmax.f32 %v1848_v21, %v2108_v39  ;;  %v2111_v43 = vrot.slane %v1851_v35, 1  ;;  %10348 = vmatprep.mubr.msk.bf16.mxu0 %vm969_vm1, %v11174_v29  ;;  %v1728_v44 = vmax.f32 %v1268_v37, 0.0  ;;  %v1289_v45 = vadd.f32 %v10250_v40, %v11621_v62  ;;  %v2848_v57 = vld [vmem:[#allocation3 + $0x10] sm:$0xff]  ;;  %v11177_v21 = vld [vmem:[%s11403_s29 + $0x1f8] sm:$0xff]  }
 0x102   : > { %v1280_v46 = vpop.f32.mrf.mxu0  ;;  %2592 = vst.msk [vmem:[#allocation2 + $0x40] sm:$0xff] %vm2583_vm2, %v2467_v41 }
 0x103   : > { %2593 = vst.msk [vmem:[#allocation2 + $0x48] sm:$0xff] %vm2583_vm2, %v2468_v42  ;;  %v2112_v49 = vsel %vm2087_vm3, %v2109_v19, %v2111_v43  ;;  %v1281_v50 = vadd.f32 %v11621_v62, %v1280_v46  ;;  %v1733_v52 = vmax.f32 %v1289_v45, 0.0 }
 0x104   : > { %v2470_v51 = vmax.f32 %v1850_v13, %v2112_v49  ;;  %v10251_v53 = vpop.f32.mrf.mxu0 }
 0x105   : > { %v1731_v55 = vmax.f32 %v1281_v50, 0.0  ;;  %v1292_v56 = vadd.f32 %v10251_v53, %v11621_v62  ;;  %v2849_v58 = vld [vmem:[#allocation3 + $0x18] sm:$0xff]  ;;  %v1857_v0 = vmax.f32 %v1729_v22, %v1733_v52 }
 0x106   : > { %2595 = vst.msk [vmem:[#allocation2 + $0x58] sm:$0xff] %vm2583_vm2, %v2470_v51  ;;  %v1283_v60 = vpop.f32.mrf.mxu0  ;;  %v11689_v61 = vpack.c.bf16 %v2849_v58, %v2848_v57 }
 0x107   : > { %v1855_v1 = vmax.f32 %v1727_v27, %v1731_v55  ;;  %v1734_v2 = vmax.f32 %v1292_v56, 0.0  ;;  %v1284_v3 = vadd.f32 %v11621_v62, %v1283_v60  ;;  %v2123_v13 = vrot.slane %v1857_v0, 1 }
 0x108   : > { %v10254_v4 = vpop.f32.mrf.mxu0  ;;  %10349 = vmatmul.mubr.msk.bf16.gmra.mxu0 %vm969_vm1, %v11175_v54  ;;  %v2922_v5 = vshll.u32 %v11689_v61, 16  ;;  %v2926_v39 = vshrl.u32 %v11689_v61, 16 }
 0x109   : > { %v2119_v6 = vrot.slane %v1855_v1, 1  ;;  %v1858_v7 = vmax.f32 %v1730_v36, %v1734_v2  ;;  %10352 = vmatprep.mubr.msk.bf16.mxu0 %vm969_vm1, %v11176_v59  ;;  %v1732_v9 = vmax.f32 %v1284_v3, 0.0  ;;  %v1305_v10 = vadd.f32 %v10254_v4, %v11621_v62 }
 0x10a   : > { %v2713_v8 = vld [vmem:[#allocation2 + $0x40] ss:$2 sm:$0xff]  ;;  %v1296_v11 = vpop.f32.mrf.mxu0  ;;  %v2924_v12 = vrot.slane %v2922_v5, 1  ;;  %v4079_v46 = vrot.slane %v2922_v5, 2  ;;  %v4078_v60 = vrot.slane %v2926_v39, 1 }
 0x10b   : > { %2816 = vst.msk [vmem:[#allocation3 + $0x25] sm:$0xff] %vm2583_vm2, %v2713_v8  ;;  %v2125_v14 = vrot.slane %v1858_v7, 1  ;;  %v1297_v15 = vadd.f32 %v11621_v62, %v1296_v11  ;;  %v1856_v16 = vmax.f32 %v1728_v44, %v1732_v9  ;;  %v1737_v18 = vmax.f32 %v1305_v10, 0.0 }
 0x10c   : > { %v10255_v19 = vpop.f32.mrf.mxu0  ;;  %v2925_v20 = vsel %vm2913_vm4, %v2920_v63, %v2924_v12  ;;  %v2928_v49 = vor.u32 %v2926_v39, %v2924_v12 }
 0x10d   : > { %v2715_v22 = vld [vmem:[#allocation2 + $0x50] ss:$2 sm:$0xff]  ;;  %v2126_v23 = vsel %vm2087_vm3, %v2123_v13, %v2125_v14  ;;  %v1735_v24 = vmax.f32 %v1297_v15, 0.0  ;;  %v1308_v25 = vadd.f32 %v10255_v19, %v11621_v62  ;;  %10358 = vmatprep.mubr.msk.bf16.mxu1 %vm2583_vm2, %v2925_v20  ;;  %v2121_v27 = vrot.slane %v1856_v16, 1 }
 0x10e   : > { %2817 = vst.msk [vmem:[#allocation3 + $0x2d] sm:$0xff] %vm2583_vm2, %v2715_v22  ;;  %v2477_v26 = vmax.f32 %v1857_v0, %v2126_v23  ;;  %v1299_v28 = vpop.f32.mrf.mxu0 }
 0x10f   : > { %v1859_v29 = vmax.f32 %v1731_v55, %v1735_v24  ;;  %v1738_v30 = vmax.f32 %v1308_v25, 0.0  ;;  %v1300_v32 = vadd.f32 %v11621_v62, %v1299_v28  ;;  %v2122_v33 = vsel %vm2087_vm3, %v2119_v6, %v2121_v27 }
 0x110   : > { %2602 = vst.msk [vmem:[#allocation2 + $0x90] sm:$0xff] %vm2583_vm2, %v2477_v26  ;;  %v2124_v34 = vsel %vm2087_vm3, %v2121_v27, %v2123_v13  ;;  %v10258_v35 = vpop.f32.mrf.mxu0  ;;  %10353 = vmatmul.mubr.msk.bf16.gmra.mxu0 %vm969_vm1, %v11177_v21  ;;  %v2475_v36 = vmax.f32 %v1855_v1, %v2122_v33  ;;  %v4080_v33 = vor.u32 %v4079_v46, %v4078_v60  ;;  %vm7389_vm1 = vcmask 257024  }
 0x111   : > { %v2476_v37 = vmax.f32 %v1856_v16, %v2124_v34  ;;  %v2127_v38 = vrot.slane %v1859_v29, 1  ;;  %v1736_v40 = vmax.f32 %v1300_v32, 0.0  ;;  %v1321_v41 = vadd.f32 %v10258_v35, %v11621_v62 }
 0x112   : > { %v1312_v42 = vpop.f32.mrf.mxu0  ;;  %2600 = vst.msk [vmem:[#allocation2 + $0x80] sm:$0xff] %vm2583_vm2, %v2475_v36  ;;  %v2850_v52 = vld [vmem:[#allocation3 + $0x20] sm:$0xff] }
 0x113   : > { %2601 = vst.msk [vmem:[#allocation2 + $0x88] sm:$0xff] %vm2583_vm2, %v2476_v37  ;;  %v2128_v43 = vsel %vm2087_vm3, %v2125_v14, %v2127_v38  ;;  %v1313_v44 = vadd.f32 %v11621_v62, %v1312_v42  ;;  %v1741_v47 = vmax.f32 %v1321_v41, 0.0 }
 0x114   : > { %v2478_v45 = vmax.f32 %v1858_v7, %v2128_v43  ;;  %v10259_v48 = vpop.f32.mrf.mxu0 }
 0x115   : > { %v1739_v50 = vmax.f32 %v1313_v44, 0.0  ;;  %v1324_v51 = vadd.f32 %v10259_v48, %v11621_v62  ;;  %v2851_v53 = vld [vmem:[#allocation3 + $0x28] sm:$0xff]  ;;  %v1865_v54 = vmax.f32 %v1737_v18, %v1741_v47 }
 0x116   : > { %2603 = vst.msk [vmem:[#allocation2 + $0x98] sm:$0xff] %vm2583_vm2, %v2478_v45  ;;  %v1315_v55 = vpop.f32.mrf.mxu0  ;;  %v11717_v56 = vpack.c.bf16 %v2851_v53, %v2850_v52 }
 0x117   : > { %v1863_v57 = vmax.f32 %v1735_v24, %v1739_v50  ;;  %v1742_v58 = vmax.f32 %v1324_v51, 0.0  ;;  %v1316_v59 = vadd.f32 %v11621_v62, %v1315_v55  ;;  %v2139_v63 = vrot.slane %v1865_v54, 1 }
 0x118   : > { %v10262_v0 = vpop.f32.mrf.mxu0  ;;  %v11721_v1 = vshll.u32 %v11717_v56, 16  ;;  %v11726_v9 = vshrl.u32 %v11717_v56, 16 }
 0x119   : > { %v2135_v2 = vrot.slane %v1863_v57, 1  ;;  %v1866_v3 = vmax.f32 %v1738_v30, %v1742_v58  ;;  %v1740_v5 = vmax.f32 %v1316_v59, 0.0  ;;  %v1337_v6 = vadd.f32 %v10262_v0, %v11621_v62 }
 0x11a   : > { %15005 = vst [vmem:[#allocation11_spill] sm:$0xff] %v11721_v1  ;;  %v2717_v4 = vld [vmem:[#allocation2 + $0x80] ss:$2 sm:$0xff]  ;;  %v1328_v7 = vpop.f32.mrf.mxu0  ;;  %v2932_v8 = vrot.slane %v11721_v1, 1  ;;  %15006 = vst [vmem:[#allocation12_spill] sm:$0xff] %v11726_v9  ;;  %v4082_v12 = vrot.slane %v11721_v1, 2 }
 0x11b   : > { %2818 = vst.msk [vmem:[#allocation3 + $0x37] sm:$0xff] %vm2583_vm2, %v2717_v4  ;;  %v2141_v10 = vrot.slane %v1866_v3, 1  ;;  %v1329_v11 = vadd.f32 %v11621_v62, %v1328_v7  ;;  %v1864_v13 = vmax.f32 %v1736_v40, %v1740_v5  ;;  %v1745_v14 = vmax.f32 %v1337_v6, 0.0 }
 0x11c   : > { %v10263_v15 = vpop.f32.mrf.mxu0  ;;  %v2933_v16 = vsel %vm2913_vm4, %v2928_v49, %v2932_v8  ;;  %v4081_v22 = vrot.slane %v11726_v9, 1  ;;  %v2936_v58 = vor.u32 %v11726_v9, %v2932_v8 }
 0x11d   : > { %v2719_v18 = vld [vmem:[#allocation2 + $0x90] ss:$2 sm:$0xff]  ;;  %v2142_v19 = vsel %vm2087_vm3, %v2139_v63, %v2141_v10  ;;  %v1743_v20 = vmax.f32 %v1329_v11, 0.0  ;;  %v1340_v21 = vadd.f32 %v10263_v15, %v11621_v62  ;;  %10359 = vmatmul.mubr.msk.bf16.vlgmr.msra.gmra.mxu1 %vm2583_vm2, %v2933_v16  ;;  %v2137_v24 = vrot.slane %v1864_v13, 1 }
 0x11e   : > { %2819 = vst.msk [vmem:[#allocation3 + $0x3f] sm:$0xff] %vm2583_vm2, %v2719_v18  ;;  %v2485_v23 = vmax.f32 %v1865_v54, %v2142_v19  ;;  %v1331_v25 = vpop.f32.mrf.mxu0  ;;  %v11738_v29 = vor.u32 %v4082_v12, %v4081_v22 }
 0x11f   : > { %v1867_v26 = vmax.f32 %v1739_v50, %v1743_v20  ;;  %v1746_v27 = vmax.f32 %v1340_v21, 0.0  ;;  %v1332_v28 = vadd.f32 %v11621_v62, %v1331_v25  ;;  %v2138_v30 = vsel %vm2087_vm3, %v2135_v2, %v2137_v24 }
 0x120   : > { %2610 = vst.msk [vmem:[#allocation2 + $0xd0] sm:$0xff] %vm2583_vm2, %v2485_v23  ;;  %v2140_v32 = vsel %vm2087_vm3, %v2137_v24, %v2139_v63  ;;  %v10266_v34 = vpop.f32.mrf.mxu0  ;;  %v2483_v35 = vmax.f32 %v1863_v57, %v2138_v30  ;;  %v4084_v39 = vsel %vm4077_vm5, %v4080_v33, %v11738_v29 }
 0x121   : > { %v2484_v36 = vmax.f32 %v1864_v13, %v2140_v32  ;;  %v2143_v37 = vrot.slane %v1867_v26, 1  ;;  %v1744_v38 = vmax.f32 %v1332_v28, 0.0  ;;  %v1353_v40 = vadd.f32 %v10266_v34, %v11621_v62  ;;  %10510 = vmatprep.mubr.msk.bf16.mxu0 %vm2583_vm2, %v4084_v39 }
 0x122   : > { %v1344_v41 = vpop.f32.mrf.mxu0  ;;  %2608 = vst.msk [vmem:[#allocation2 + $0xc0] sm:$0xff] %vm2583_vm2, %v2483_v35  ;;  %v2852_v49 = vld [vmem:[#allocation3 + $0x30] sm:$0xff] }
 0x123   : > { %2609 = vst.msk [vmem:[#allocation2 + $0xc8] sm:$0xff] %vm2583_vm2, %v2484_v36  ;;  %v2144_v42 = vsel %vm2087_vm3, %v2141_v10, %v2143_v37  ;;  %v1345_v43 = vadd.f32 %v11621_v62, %v1344_v41  ;;  %v1749_v45 = vmax.f32 %v1353_v40, 0.0 }
 0x124   : > { %v2486_v44 = vmax.f32 %v1866_v3, %v2144_v42  ;;  %v10267_v46 = vpop.f32.mrf.mxu0 }
 0x125   : > { %v1747_v47 = vmax.f32 %v1345_v43, 0.0  ;;  %v1356_v48 = vadd.f32 %v10267_v46, %v11621_v62  ;;  %v2853_v50 = vld [vmem:[#allocation3 + $0x38] sm:$0xff]  ;;  %v1873_v51 = vmax.f32 %v1745_v14, %v1749_v45  ;;  %v2854_v42 = vld [vmem:[#allocation3 + $0x40] sm:$0xff] }
 0x126   : > { %2611 = vst.msk [vmem:[#allocation2 + $0xd8] sm:$0xff] %vm2583_vm2, %v2486_v44  ;;  %v1347_v52 = vpop.f32.mrf.mxu0  ;;  %v11753_v53 = vpack.c.bf16 %v2853_v50, %v2852_v49 }
 0x127   : > { %v1871_v54 = vmax.f32 %v1743_v20, %v1747_v47  ;;  %v1750_v55 = vmax.f32 %v1356_v48, 0.0  ;;  %v1348_v57 = vadd.f32 %v11621_v62, %v1347_v52  ;;  %v2155_v59 = vrot.slane %v1873_v51, 1 }
 0x128   : > { %v10270_v60 = vpop.f32.mrf.mxu0  ;;  %v11758_v63 = vshll.u32 %v11753_v53, 16  ;;  %v11766_v12 = vshrl.u32 %v11753_v53, 16 }
 0x129   : > { %v2151_v0 = vrot.slane %v1871_v54, 1  ;;  %v1874_v2 = vmax.f32 %v1746_v27, %v1750_v55  ;;  %v1748_v4 = vmax.f32 %v1348_v57, 0.0  ;;  %v1369_v5 = vadd.f32 %v10270_v60, %v11621_v62 }
 0x12a   : > { %v2721_v3 = vld [vmem:[#allocation2 + $0xc0] ss:$2 sm:$0xff]  ;;  %v1360_v6 = vpop.f32.mrf.mxu0  ;;  %v2940_v7 = vrot.slane %v11758_v63, 1  ;;  %v4086_v10 = vrot.slane %v11758_v63, 2  ;;  %v4085_v22 = vrot.slane %v11766_v12, 1 }
 0x12b   : > { %2820 = vst.msk [vmem:[#allocation3 + $0x49] sm:$0xff] %vm2583_vm2, %v2721_v3  ;;  %v2157_v11 = vrot.slane %v1874_v2, 1  ;;  %v1361_v8 = vadd.f32 %v11621_v62, %v1360_v6  ;;  %v1872_v13 = vmax.f32 %v1744_v38, %v1748_v4  ;;  %v1753_v14 = vmax.f32 %v1369_v5, 0.0 }
 0x12c   : > { %v10271_v15 = vpop.f32.mrf.mxu0  ;;  %v2941_v16 = vsel %vm2913_vm4, %v2936_v58, %v2940_v7  ;;  %v11775_v30 = vor.u32 %v4086_v10, %v4085_v22  ;;  %v2944_v3 = vor.u32 %v11766_v12, %v2940_v7 }
 0x12d   : > { %v2723_v18 = vld [vmem:[#allocation2 + $0xd0] ss:$2 sm:$0xff]  ;;  %v2158_v19 = vsel %vm2087_vm3, %v2155_v59, %v2157_v11  ;;  %v1751_v20 = vmax.f32 %v1361_v8, 0.0  ;;  %v1372_v21 = vadd.f32 %v10271_v15, %v11621_v62  ;;  %10362 = vmatprep.mubr.msk.bf16.mxu1 %vm2583_vm2, %v2941_v16  ;;  %v2153_v24 = vrot.slane %v1872_v13, 1 }
 0x12e   : > { %2821 = vst.msk [vmem:[#allocation3 + $0x51] sm:$0xff] %vm2583_vm2, %v2723_v18  ;;  %v2493_v23 = vmax.f32 %v1873_v51, %v2158_v19  ;;  %v1363_v25 = vpop.f32.mrf.mxu0  ;;  %v4088_v39 = vsel %vm4077_vm5, %v11738_v29, %v11775_v30 }
 0x12f   : > { %v1875_v26 = vmax.f32 %v1747_v47, %v1751_v20  ;;  %v1754_v27 = vmax.f32 %v1372_v21, 0.0  ;;  %v1364_v28 = vadd.f32 %v11621_v62, %v1363_v25  ;;  %v2154_v32 = vsel %vm2087_vm3, %v2151_v0, %v2153_v24  ;;  %10511 = vmatmul.mubr.msk.bf16.vlgmr.msra.gmra.mxu0 %vm2583_vm2, %v4088_v39 }
 0x130   : > { %2618 = vst.msk [vmem:[#allocation2 + $0x110] sm:$0xff] %vm2583_vm2, %v2493_v23  ;;  %v2156_v33 = vsel %vm2087_vm3, %v2153_v24, %v2155_v59  ;;  %v10274_v34 = vpop.f32.mrf.mxu0  ;;  %v2491_v35 = vmax.f32 %v1871_v54, %v2154_v32  ;;  %v11180_v32 = vld [vmem:[%s14943_s3] sm:$0xff]  }
 0x131   : > { %v2492_v36 = vmax.f32 %v1872_v13, %v2156_v33  ;;  %v2159_v37 = vrot.slane %v1875_v26, 1  ;;  %v1752_v38 = vmax.f32 %v1364_v28, 0.0  ;;  %v1385_v40 = vadd.f32 %v10274_v34, %v11621_v62  ;;  %10394 = vmatprep.subr.bf16.mxu1 %v11180_v32 }
 0x132   : > { %v1376_v41 = vpop.f32.mrf.mxu0  ;;  %v2855_v43 = vld [vmem:[#allocation3 + $0x48] sm:$0xff]  ;;  %2616 = vst.msk [vmem:[#allocation2 + $0x100] sm:$0xff] %vm2583_vm2, %v2491_v35  ;;  %10395 = vmatpush3.bf16.msra.mxu1 %v11180_v32 }
 0x133   : > { %2617 = vst.msk [vmem:[#allocation2 + $0x108] sm:$0xff] %vm2583_vm2, %v2492_v36  ;;  %v2160_v44 = vsel %vm2087_vm3, %v2157_v11, %v2159_v37  ;;  %v1377_v45 = vadd.f32 %v11621_v62, %v1376_v41  ;;  %v11789_v46 = vpack.c.bf16 %v2855_v43, %v2854_v42  ;;  %v1757_v48 = vmax.f32 %v1385_v40, 0.0 }
 0x134   : > { %v2494_v47 = vmax.f32 %v1874_v2, %v2160_v44  ;;  %v10275_v29 = vpop.f32.mrf.mxu0 }
 0x135   : > { %v1755_v49 = vmax.f32 %v1377_v45, 0.0  ;;  %v1388_v50 = vadd.f32 %v10275_v29, %v11621_v62  ;;  %v11793_v51 = vshll.u32 %v11789_v46, 16  ;;  %v1881_v52 = vmax.f32 %v1753_v14, %v1757_v48  ;;  %v2856_v45 = vld [vmem:[#allocation3 + $0x50] sm:$0xff] }
 0x136   : > { %2619 = vst.msk [vmem:[#allocation2 + $0x118] sm:$0xff] %vm2583_vm2, %v2494_v47  ;;  %v1379_v54 = vpop.f32.mrf.mxu0  ;;  %v11797_v55 = vshrl.u32 %v11789_v46, 16 }
 0x137   : > { %15007 = vst [vmem:[#allocation13_spill] sm:$0xff] %v11793_v51  ;;  %v1879_v57 = vmax.f32 %v1751_v20, %v1755_v49  ;;  %v1758_v58 = vmax.f32 %v1388_v50, 0.0  ;;  %v1380_v59 = vadd.f32 %v11621_v62, %v1379_v54  ;;  %v2948_v60 = vrot.slane %v11793_v51, 1 }
 0x138   : > { %15008 = vst [vmem:[#allocation14_spill] sm:$0xff] %v11797_v55  ;;  %v2171_v0 = vrot.slane %v1881_v52, 1  ;;  %v10278_v2 = vpop.f32.mrf.mxu0  ;;  %v4089_v14 = vrot.slane %v11797_v55, 1  ;;  %v4090_v16 = vrot.slane %v11793_v51, 2 }
 0x139   : > { %v2167_v4 = vrot.slane %v1879_v57, 1  ;;  %v1882_v5 = vmax.f32 %v1754_v27, %v1758_v58  ;;  %v1756_v10 = vmax.f32 %v1380_v59, 0.0  ;;  %v1401_v11 = vadd.f32 %v10278_v2, %v11621_v62 }
 0x13a   : > { %v2725_v6 = vld [vmem:[#allocation2 + $0x100] ss:$2 sm:$0xff]  ;;  %v2949_v8 = vsel %vm2913_vm4, %v2944_v3, %v2948_v60  ;;  %v1392_v13 = vpop.f32.mrf.mxu0  ;;  %v11812_v24 = vor.u32 %v4090_v16, %v4089_v14 }
 0x13b   : > { %2822 = vst.msk [vmem:[#allocation3 + $0x5b] sm:$0xff] %vm2583_vm2, %v2725_v6  ;;  %v2173_v15 = vrot.slane %v1882_v5, 1  ;;  %10363 = vmatmul.mubr.msk.bf16.gmra.mxu1 %vm2583_vm2, %v2949_v8  ;;  %v1393_v7 = vadd.f32 %v11621_v62, %v1392_v13  ;;  %v1880_v18 = vmax.f32 %v1752_v38, %v1756_v10  ;;  %v1761_v19 = vmax.f32 %v1401_v11, 0.0 }
 0x13c   : > { %v10279_v20 = vpop.f32.mrf.mxu0  ;;  %v4092_v34 = vsel %vm4077_vm5, %v11775_v30, %v11812_v24  ;;  %v2952_v8 = vor.u32 %v11797_v55, %v2948_v60 }
 0x13d   : > { %v2727_v21 = vld [vmem:[#allocation2 + $0x110] ss:$2 sm:$0xff]  ;;  %v2174_v22 = vsel %vm2087_vm3, %v2171_v0, %v2173_v15  ;;  %v1759_v23 = vmax.f32 %v1393_v7, 0.0  ;;  %v1404_v25 = vadd.f32 %v10279_v20, %v11621_v62  ;;  %v2169_v27 = vrot.slane %v1880_v18, 1  ;;  %10514 = vmatprep.mubr.msk.bf16.mxu0 %vm2583_vm2, %v4092_v34 }
 0x13e   : > { %2823 = vst.msk [vmem:[#allocation3 + $0x63] sm:$0xff] %vm2583_vm2, %v2727_v21  ;;  %v2501_v26 = vmax.f32 %v1881_v52, %v2174_v22  ;;  %v1395_v28 = vpop.f32.mrf.mxu0 }
 0x13f   : > { %v1883_v33 = vmax.f32 %v1755_v49, %v1759_v23  ;;  %v1762_v35 = vmax.f32 %v1404_v25, 0.0  ;;  %v1396_v36 = vadd.f32 %v11621_v62, %v1395_v28  ;;  %v2170_v37 = vsel %vm2087_vm3, %v2167_v4, %v2169_v27 }
 0x140   : > { %2626 = vst.msk [vmem:[#allocation2 + $0x150] sm:$0xff] %vm2583_vm2, %v2501_v26  ;;  %v2172_v38 = vsel %vm2087_vm3, %v2169_v27, %v2171_v0  ;;  %v10282_v39 = vpop.f32.mrf.mxu0  ;;  %v2499_v40 = vmax.f32 %v1879_v57, %v2170_v37 }
 0x141   : > { %v2500_v41 = vmax.f32 %v1880_v18, %v2172_v38  ;;  %v2175_v42 = vrot.slane %v1883_v33, 1  ;;  %v1760_v43 = vmax.f32 %v1396_v36, 0.0  ;;  %v1417_v30 = vadd.f32 %v10282_v39, %v11621_v62 }
 0x142   : > { %v1408_v44 = vpop.f32.mrf.mxu0  ;;  %v2857_v47 = vld [vmem:[#allocation3 + $0x58] sm:$0xff]  ;;  %2624 = vst.msk [vmem:[#allocation2 + $0x140] sm:$0xff] %vm2583_vm2, %v2499_v40 }
 0x143   : > { %2625 = vst.msk [vmem:[#allocation2 + $0x148] sm:$0xff] %vm2583_vm2, %v2500_v41  ;;  %v2176_v48 = vsel %vm2087_vm3, %v2173_v15, %v2175_v42  ;;  %v1409_v29 = vadd.f32 %v11621_v62, %v1408_v44  ;;  %v11832_v49 = vpack.c.bf16 %v2857_v47, %v2856_v45  ;;  %v1765_v52 = vmax.f32 %v1417_v30, 0.0 }
 0x144   : > { %v2502_v50 = vmax.f32 %v1882_v5, %v2176_v48  ;;  %v10283_v54 = vpop.f32.mrf.mxu0  ;;  %v11845_v5 = vld [vmem:[%s14942_s2] ss:$0 sm:$0xff] }
 0x145   : > { %v1763_v57 = vmax.f32 %v1409_v29, 0.0  ;;  %v1420_v58 = vadd.f32 %v10283_v54, %v11621_v62  ;;  %v11836_v59 = vshll.u32 %v11832_v49, 16  ;;  %v1889_v0 = vmax.f32 %v1761_v19, %v1765_v52  ;;  %v2858_v52 = vld [vmem:[#allocation3 + $0x60] sm:$0xff] }
 0x146   : > { %2627 = vst.msk [vmem:[#allocation2 + $0x158] sm:$0xff] %vm2583_vm2, %v2502_v50  ;;  %v1411_v2 = vpop.f32.mrf.mxu0  ;;  %v11840_v3 = vshrl.u32 %v11832_v49, 16 }
 0x147   : > { %15009 = vst [vmem:[#allocation15_spill] sm:$0xff] %v11836_v59  ;;  %v1887_v4 = vmax.f32 %v1759_v23, %v1763_v57  ;;  %v1766_v6 = vmax.f32 %v1420_v58, 0.0  ;;  %v1412_v10 = vadd.f32 %v11845_v5, %v1411_v2  ;;  %v2956_v62 = vrot.slane %v11836_v59, 1 }
 0x148   : > { %15010 = vst [vmem:[#allocation16_spill] sm:$0xff] %v11840_v3  ;;  %v10286_v11 = vpop.f32.mrf.mxu0  ;;  %v4093_v13 = vrot.slane %v11840_v3, 1  ;;  %v4094_v21 = vrot.slane %v11836_v59, 2  ;;  %v2187_v22 = vrot.slane %v1889_v0, 1 }
 0x149   : > { %v2183_v14 = vrot.slane %v1887_v4, 1  ;;  %v1890_v15 = vmax.f32 %v1762_v35, %v1766_v6  ;;  %v1764_v16 = vmax.f32 %v1412_v10, 0.0  ;;  %v1433_v18 = vadd.f32 %v11845_v5, %v10286_v11 }
 0x14a   : > { %v2729_v7 = vld [vmem:[#allocation2 + $0x140] ss:$2 sm:$0xff]  ;;  %v2957_v19 = vsel %vm2913_vm4, %v2952_v8, %v2956_v62  ;;  %v1424_v20 = vpop.f32.mrf.mxu0  ;;  %v11861_v27 = vor.u32 %v4094_v21, %v4093_v13  ;;  %v2960_v21 = vor.u32 %v11840_v3, %v2956_v62 }
 0x14b   : > { %2824 = vst.msk [vmem:[#allocation3 + $0x6d] sm:$0xff] %vm2583_vm2, %v2729_v7  ;;  %v2189_v23 = vrot.slane %v1890_v15, 1  ;;  %10366 = vmatprep.mubr.msk.bf16.mxu1 %vm2583_vm2, %v2957_v19  ;;  %v1425_v60 = vadd.f32 %v11845_v5, %v1424_v20  ;;  %v1888_v25 = vmax.f32 %v1760_v43, %v1764_v16  ;;  %v1769_v26 = vmax.f32 %v1433_v18, 0.0 }
 0x14c   : > { %v10287_v28 = vpop.f32.mrf.mxu0  ;;  %v4096_v38 = vsel %vm4077_vm5, %v11812_v24, %v11861_v27 }
 0x14d   : > { %v2731_v32 = vld [vmem:[#allocation2 + $0x150] ss:$2 sm:$0xff]  ;;  %v2190_v33 = vsel %vm2087_vm3, %v2187_v22, %v2189_v23  ;;  %v1767_v34 = vmax.f32 %v1425_v60, 0.0  ;;  %v1436_v35 = vadd.f32 %v11845_v5, %v10287_v28  ;;  %v2185_v37 = vrot.slane %v1888_v25, 1  ;;  %10515 = vmatmul.mubr.msk.bf16.gmra.mxu0 %vm2583_vm2, %v4096_v38 }
 0x14e   : > { %2825 = vst.msk [vmem:[#allocation3 + $0x75] sm:$0xff] %vm2583_vm2, %v2731_v32  ;;  %v2509_v36 = vmax.f32 %v1889_v0, %v2190_v33  ;;  %v1427_v39 = vpop.f32.mrf.mxu0 }
 0x14f   : > { %v1891_v40 = vmax.f32 %v1763_v57, %v1767_v34  ;;  %v1770_v41 = vmax.f32 %v1436_v35, 0.0  ;;  %v1428_v42 = vadd.f32 %v11845_v5, %v1427_v39  ;;  %v2186_v43 = vsel %vm2087_vm3, %v2183_v14, %v2185_v37 }
 0x150   : > { %2634 = vst.msk [vmem:[#allocation2 + $0x190] sm:$0xff] %vm2583_vm2, %v2509_v36  ;;  %v2188_v30 = vsel %vm2087_vm3, %v2185_v37, %v2187_v22  ;;  %v10290_v44 = vpop.f32.mrf.mxu0  ;;  %v2507_v45 = vmax.f32 %v1887_v4, %v2186_v43 }
 0x151   : > { %v2508_v47 = vmax.f32 %v1888_v25, %v2188_v30  ;;  %v2191_v48 = vrot.slane %v1891_v40, 1  ;;  %v1768_v29 = vmax.f32 %v1428_v42, 0.0  ;;  %v1449_v24 = vadd.f32 %v11845_v5, %v10290_v44 }
 0x152   : > { %v1440_v50 = vpop.f32.mrf.mxu0  ;;  %v2859_v54 = vld [vmem:[#allocation3 + $0x68] sm:$0xff]  ;;  %2632 = vst.msk [vmem:[#allocation2 + $0x180] sm:$0xff] %vm2583_vm2, %v2507_v45 }
 0x153   : > { %2633 = vst.msk [vmem:[#allocation2 + $0x188] sm:$0xff] %vm2583_vm2, %v2508_v47  ;;  %v2192_v57 = vsel %vm2087_vm3, %v2189_v23, %v2191_v48  ;;  %v1441_v58 = vadd.f32 %v11845_v5, %v1440_v50  ;;  %v11879_v0 = vpack.c.bf16 %v2859_v54, %v2858_v52  ;;  %v1773_v4 = vmax.f32 %v1449_v24, 0.0 }
 0x154   : > { %v2510_v2 = vmax.f32 %v1890_v15, %v2192_v57  ;;  %v10291_v6 = vpop.f32.mrf.mxu0 }
 0x155   : > { %v1771_v10 = vmax.f32 %v1441_v58, 0.0  ;;  %v1452_v11 = vadd.f32 %v11845_v5, %v10291_v6  ;;  %v11883_v8 = vshll.u32 %v11879_v0, 16  ;;  %v1897_v13 = vmax.f32 %v1769_v26, %v1773_v4 }
 0x156   : > { %2635 = vst.msk [vmem:[#allocation2 + $0x198] sm:$0xff] %vm2583_vm2, %v2510_v2  ;;  %v1443_v14 = vpop.f32.mrf.mxu0  ;;  %v11887_v7 = vshrl.u32 %v11879_v0, 16 }
 0x157   : > { %15011 = vst [vmem:[#allocation17_spill] sm:$0xff] %v11883_v8  ;;  %v1895_v16 = vmax.f32 %v1767_v34, %v1771_v10  ;;  %v1774_v18 = vmax.f32 %v1452_v11, 0.0  ;;  %v1444_v19 = vadd.f32 %v11845_v5, %v1443_v14  ;;  %v2964_v15 = vrot.slane %v11883_v8, 1 }
 0x158   : > { %15012 = vst [vmem:[#allocation18_spill] sm:$0xff] %v11887_v7  ;;  %v10294_v20 = vpop.f32.mrf.mxu0  ;;  %v4097_v22 = vrot.slane %v11887_v7, 1  ;;  %v4098_v34 = vrot.slane %v11883_v8, 2  ;;  %v2203_v35 = vrot.slane %v1897_v13, 1 }
 0x159   : > { %v2199_v23 = vrot.slane %v1895_v16, 1  ;;  %v1898_v60 = vmax.f32 %v1770_v41, %v1774_v18  ;;  %v1772_v26 = vmax.f32 %v1444_v19, 0.0  ;;  %v1465_v28 = vadd.f32 %v11845_v5, %v10294_v20 }
 0x15a   : > { %v2733_v25 = vld [vmem:[#allocation2 + $0x180] ss:$2 sm:$0xff]  ;;  %v2965_v32 = vsel %vm2913_vm4, %v2960_v21, %v2964_v15  ;;  %v1456_v33 = vpop.f32.mrf.mxu0  ;;  %v11901_v39 = vor.u32 %v4098_v34, %v4097_v22  ;;  %v2968_v22 = vor.u32 %v11887_v7, %v2964_v15 }
 0x15b   : > { %2826 = vst.msk [vmem:[#allocation3 + $0x7f] sm:$0xff] %vm2583_vm2, %v2733_v25  ;;  %v2205_v36 = vrot.slane %v1898_v60, 1  ;;  %10367 = vmatmul.mubr.msk.bf16.gmra.mxu1 %vm2583_vm2, %v2965_v32  ;;  %v1457_v62 = vadd.f32 %v11845_v5, %v1456_v33  ;;  %v1896_v37 = vmax.f32 %v1768_v29, %v1772_v26  ;;  %v1777_v38 = vmax.f32 %v1465_v28, 0.0 }
 0x15c   : > { %v10295_v40 = vpop.f32.mrf.mxu0  ;;  %v4100_v47 = vsel %vm4077_vm5, %v11861_v27, %v11901_v39 }
 0x15d   : > { %v2735_v41 = vld [vmem:[#allocation2 + $0x190] ss:$2 sm:$0xff]  ;;  %v2206_v42 = vsel %vm2087_vm3, %v2203_v35, %v2205_v36  ;;  %v1775_v43 = vmax.f32 %v1457_v62, 0.0  ;;  %v1468_v30 = vadd.f32 %v11845_v5, %v10295_v40  ;;  %v2201_v45 = vrot.slane %v1896_v37, 1  ;;  %10518 = vmatprep.mubr.msk.bf16.mxu0 %vm2583_vm2, %v4100_v47 }
 0x15e   : > { %2827 = vst.msk [vmem:[#allocation3 + $0x87] sm:$0xff] %vm2583_vm2, %v2735_v41  ;;  %v2517_v44 = vmax.f32 %v1897_v13, %v2206_v42  ;;  %v1459_v48 = vpop.f32.mrf.mxu0 }
 0x15f   : > { %v1899_v29 = vmax.f32 %v1771_v10, %v1775_v43  ;;  %v1778_v24 = vmax.f32 %v1468_v30, 0.0  ;;  %v1460_v50 = vadd.f32 %v11845_v5, %v1459_v48  ;;  %v2202_v52 = vsel %vm2087_vm3, %v2199_v23, %v2201_v45  ;;  %v2860_v10 = vld [vmem:[#allocation3 + $0x70] sm:$0xff] }
 0x160   : > { %2642 = vst.msk [vmem:[#allocation2 + $0x1d0] sm:$0xff] %vm2583_vm2, %v2517_v44  ;;  %v2204_v54 = vsel %vm2087_vm3, %v2201_v45, %v2203_v35  ;;  %v10298_v57 = vpop.f32.mrf.mxu0  ;;  %v2515_v58 = vmax.f32 %v1895_v16, %v2202_v52 }
 0x161   : > { %v2516_v2 = vmax.f32 %v1896_v37, %v2204_v54  ;;  %v2207_v4 = vrot.slane %v1899_v29, 1  ;;  %v1776_v6 = vmax.f32 %v1460_v50, 0.0  ;;  %v1481_v27 = vadd.f32 %v11845_v5, %v10298_v57 }
 0x162   : > { %v1472_v11 = vpop.f32.mrf.mxu0  ;;  %v2861_v13 = vld [vmem:[#allocation3 + $0x78] sm:$0xff]  ;;  %2640 = vst.msk [vmem:[#allocation2 + $0x1c0] sm:$0xff] %vm2583_vm2, %v2515_v58 }
 0x163   : > { %2641 = vst.msk [vmem:[#allocation2 + $0x1c8] sm:$0xff] %vm2583_vm2, %v2516_v2  ;;  %v2208_v14 = vsel %vm2087_vm3, %v2205_v36, %v2207_v4  ;;  %v1473_v18 = vadd.f32 %v11845_v5, %v1472_v11  ;;  %v11919_v19 = vpack.c.bf16 %v2861_v13, %v2860_v10  ;;  %v1781_v16 = vmax.f32 %v1481_v27, 0.0 }
 0x164   : > { %v2518_v20 = vmax.f32 %v1898_v60, %v2208_v14  ;;  %v10299_v21 = vpop.f32.mrf.mxu0 }
 0x165   : > { %v1779_v23 = vmax.f32 %v1473_v18, 0.0  ;;  %v1484_v25 = vadd.f32 %v11845_v5, %v10299_v21  ;;  %v11924_v26 = vshll.u32 %v11919_v19, 16  ;;  %v1905_v28 = vmax.f32 %v1777_v38, %v1781_v16  ;;  %v2862_v40 = vld [vmem:[#allocation3 + $0x80] sm:$0xff]  ;;  %v2863_v41 = vld [vmem:[#allocation3 + $0x88] sm:$0xff] }
 0x166   : > { %2643 = vst.msk [vmem:[#allocation2 + $0x1d8] sm:$0xff] %vm2583_vm2, %v2518_v20  ;;  %v1475_v32 = vpop.f32.mrf.mxu0  ;;  %v11928_v33 = vshrl.u32 %v11919_v19, 16  ;;  %v11939_v52 = vpack.c.bf16 %v2863_v41, %v2862_v40 }
 0x167   : > { %15013 = vst [vmem:[#allocation19_spill] sm:$0xff] %v11924_v26  ;;  %v1903_v34 = vmax.f32 %v1775_v43, %v1779_v23  ;;  %v1782_v35 = vmax.f32 %v1484_v25, 0.0  ;;  %v1476_v60 = vadd.f32 %v11845_v5, %v1475_v32  ;;  %v2972_v36 = vrot.slane %v11924_v26, 1 }
 0x168   : > { %15014 = vst [vmem:[#allocation20_spill] sm:$0xff] %v11928_v33  ;;  %v2219_v15 = vrot.slane %v1905_v28, 1  ;;  %v10302_v62 = vpop.f32.mrf.mxu0  ;;  %v4101_v37 = vrot.slane %v11928_v33, 1  ;;  %v4102_v48 = vrot.slane %v11924_v26, 2  ;;  %v11949_v21 = vshll.u32 %v11939_v52, 16 }
 0x169   : > { %v2215_v42 = vrot.slane %v1903_v34, 1  ;;  %v1906_v30 = vmax.f32 %v1778_v24, %v1782_v35  ;;  %v1780_v38 = vmax.f32 %v1476_v60, 0.0  ;;  %v1497_v45 = vadd.f32 %v11845_v5, %v10302_v62 }
 0x16a   : > { %v2737_v44 = vld [vmem:[#allocation2 + $0x1c0] ss:$2 sm:$0xff]  ;;  %v2973_v47 = vsel %vm2913_vm4, %v2968_v22, %v2972_v36  ;;  %v1488_v43 = vpop.f32.mrf.mxu0  ;;  %v4103_v57 = vor.u32 %v4102_v48, %v4101_v37  ;;  %v2976_v10 = vor.u32 %v11928_v33, %v2972_v36  ;;  %15015 = vst [vmem:[#allocation21_spill] sm:$0xff] %v11949_v21  ;;  %v11956_v32 = vshrl.u32 %v11939_v52, 16 }
 0x16b   : > { %2828 = vst.msk [vmem:[#allocation3 + $0x91] sm:$0xff] %vm2583_vm2, %v2737_v44  ;;  %v2221_v29 = vrot.slane %v1906_v30, 1  ;;  %10370 = vmatprep.mubr.msk.bf16.mxu1 %vm2583_vm2, %v2973_v47  ;;  %v1489_v50 = vadd.f32 %v11845_v5, %v1488_v43  ;;  %v1904_v54 = vmax.f32 %v1776_v6, %v1780_v38  ;;  %v1785_v24 = vmax.f32 %v1497_v45, 0.0 }
 0x16c   : > { %v10303_v58 = vpop.f32.mrf.mxu0  ;;  %v4104_v18 = vsel %vm4077_vm5, %v11901_v39, %v4103_v57  ;;  %15016 = vst [vmem:[#allocation22_spill] sm:$0xff] %v11956_v32  ;;  %v2980_v36 = vrot.slane %v11949_v21, 1  ;;  %v4105_v37 = vrot.slane %v11956_v32, 1  ;;  %v4106_v40 = vrot.slane %v11949_v21, 2 }
 0x16d   : > { %v2739_v2 = vld [vmem:[#allocation2 + $0x1d0] ss:$2 sm:$0xff]  ;;  %v2222_v4 = vsel %vm2087_vm3, %v2219_v15, %v2221_v29  ;;  %v1783_v27 = vmax.f32 %v1489_v50, 0.0  ;;  %v1500_v11 = vadd.f32 %v11845_v5, %v10303_v58  ;;  %v2217_v14 = vrot.slane %v1904_v54, 1  ;;  %10519 = vmatmul.mubr.msk.bf16.gmra.mxu0 %vm2583_vm2, %v4104_v18 }
 0x16e   : > { %2829 = vst.msk [vmem:[#allocation3 + $0x99] sm:$0xff] %vm2583_vm2, %v2739_v2  ;;  %v2525_v13 = vmax.f32 %v1905_v28, %v2222_v4  ;;  %v1491_v20 = vpop.f32.mrf.mxu0  ;;  %v2981_v38 = vsel %vm2913_vm4, %v2976_v10, %v2980_v36  ;;  %v11967_v45 = vor.u32 %v4106_v40, %v4105_v37  ;;  %v5341_v21 = vrot.slane %v11789_v46, 3 }
 0x16f   : > { %v1907_v6 = vmax.f32 %v1779_v23, %v1783_v27  ;;  %v1786_v16 = vmax.f32 %v1500_v11, 0.0  ;;  %v1492_v22 = vadd.f32 %v11845_v5, %v1491_v20  ;;  %v2218_v25 = vsel %vm2087_vm3, %v2215_v42, %v2217_v14  ;;  %10371 = vmatmul.mubr.msk.bf16.gmra.mxu1 %vm2583_vm2, %v2981_v38 }
 0x170   : > { %2650 = vst.msk [vmem:[#allocation2 + $0x210] sm:$0xff] %vm2583_vm2, %v2525_v13  ;;  %v2220_v28 = vsel %vm2087_vm3, %v2217_v14, %v2219_v15  ;;  %v10306_v39 = vpop.f32.mrf.mxu0  ;;  %v2523_v35 = vmax.f32 %v1903_v34, %v2218_v25  ;;  %v11181_v14 = vld [vmem:[%s14943_s3 + $0x30] sm:$0xff]   ;;  %v2984_v20 = vor.u32 %v11956_v32, %v2980_v36 }
 0x171   : > { %v2524_v23 = vmax.f32 %v1904_v54, %v2220_v28  ;;  %v2223_v60 = vrot.slane %v1907_v6, 1  ;;  %v1784_v62 = vmax.f32 %v1492_v22, 0.0  ;;  %v1513_v42 = vadd.f32 %v11845_v5, %v10306_v39  ;;  %10584 = vmatprep.subr.bf16.mxu0 %v11181_v14 }
 0x172   : > { %v1504_v41 = vpop.f32.mrf.mxu0  ;;  %2648 = vst.msk [vmem:[#allocation2 + $0x200] sm:$0xff] %vm2583_vm2, %v2523_v35  ;;  %v2864_v54 = vld [vmem:[#allocation3 + $0x90] sm:$0xff]  ;;  %10585 = vmatpush3.bf16.msra.mxu0 %v11181_v14 }
 0x173   : > { %2649 = vst.msk [vmem:[#allocation2 + $0x208] sm:$0xff] %vm2583_vm2, %v2524_v23  ;;  %v2224_v15 = vsel %vm2087_vm3, %v2221_v29, %v2223_v60  ;;  %v1505_v34 = vadd.f32 %v11845_v5, %v1504_v41  ;;  %v1789_v43 = vmax.f32 %v1513_v42, 0.0  ;;  %v4108_v29 = vsel %vm4077_vm5, %v4103_v57, %v11967_v45 }
 0x174   : > { %v2526_v44 = vmax.f32 %v1906_v30, %v2224_v15  ;;  %v10307_v47 = vpop.f32.mrf.mxu0  ;;  %10522 = vmatprep.mubr.msk.bf16.mxu0 %vm2583_vm2, %v4108_v29 }
 0x175   : > { %v1787_v48 = vmax.f32 %v1505_v34, 0.0  ;;  %v1516_v50 = vadd.f32 %v11845_v5, %v10307_v47  ;;  %v2865_v58 = vld [vmem:[#allocation3 + $0x98] sm:$0xff]  ;;  %v1913_v4 = vmax.f32 %v1785_v24, %v1789_v43  ;;  %v11182_v24 = vld [vmem:[%s14943_s3 + $0x10] sm:$0xff]  }
 0x176   : > { %2651 = vst.msk [vmem:[#allocation2 + $0x218] sm:$0xff] %vm2583_vm2, %v2526_v44  ;;  %v1507_v2 = vpop.f32.mrf.mxu0  ;;  %v11974_v30 = vpack.c.bf16 %v2865_v58, %v2864_v54  ;;  %10432 = vmatprep.subr.bf16.mxu1 %v11182_v24 }
 0x177   : > { %v1911_v11 = vmax.f32 %v1783_v27, %v1787_v48  ;;  %v1790_v10 = vmax.f32 %v1516_v50, 0.0  ;;  %v1508_v13 = vadd.f32 %v11845_v5, %v1507_v2  ;;  %v2235_v57 = vrot.slane %v1913_v4, 1 }
 0x178   : > { %v10310_v18 = vpop.f32.mrf.mxu0  ;;  %v11983_v6 = vshll.u32 %v11974_v30, 16  ;;  %v11993_v36 = vshrl.u32 %v11974_v30, 16  ;;  %v3552_v33 = vrot.slane %v11974_v30, 1 }
 0x179   : > { %v2231_v22 = vrot.slane %v1911_v11, 1  ;;  %v1914_v25 = vmax.f32 %v1786_v16, %v1790_v10  ;;  %v1788_v28 = vmax.f32 %v1508_v13, 0.0  ;;  %v1529_v39 = vadd.f32 %v11845_v5, %v10310_v18 }
 0x17a   : > { %15017 = vst [vmem:[#allocation23_spill] sm:$0xff] %v11983_v6  ;;  %v2741_v27 = vld [vmem:[#allocation2 + $0x200] ss:$2 sm:$0xff]  ;;  %v1520_v35 = vpop.f32.mrf.mxu0  ;;  %v2988_v23 = vrot.slane %v11983_v6, 1  ;;  %15018 = vst [vmem:[#allocation24_spill] sm:$0xff] %v11993_v36  ;;  %v4110_v37 = vrot.slane %v11983_v6, 2 }
 0x17b   : > { %2830 = vst.msk [vmem:[#allocation3 + $0xa3] sm:$0xff] %vm2583_vm2, %v2741_v27  ;;  %v1521_v60 = vadd.f32 %v11845_v5, %v1520_v35  ;;  %v2237_v40 = vrot.slane %v1914_v25, 1  ;;  %v1912_v41 = vmax.f32 %v1784_v62, %v1788_v28  ;;  %v1793_v16 = vmax.f32 %v1529_v39, 0.0 }
 0x17c   : > { %v10311_v15 = vpop.f32.mrf.mxu0  ;;  %v2989_v38 = vsel %vm2913_vm4, %v2984_v20, %v2988_v23  ;;  %v4109_v47 = vrot.slane %v11993_v36, 1 }
 0x17d   : > { %v2743_v42 = vld [vmem:[#allocation2 + $0x210] ss:$2 sm:$0xff]  ;;  %v1791_v34 = vmax.f32 %v1521_v60, 0.0  ;;  %v1532_v44 = vadd.f32 %v11845_v5, %v10311_v15  ;;  %v2238_v43 = vsel %vm2087_vm3, %v2235_v57, %v2237_v40  ;;  %v2233_v50 = vrot.slane %v1912_v41, 1  ;;  %10374 = vmatprep.mubr.msk.bf16.mxu1 %vm2583_vm2, %v2989_v38 }
 0x17e   : > { %2831 = vst.msk [vmem:[#allocation3 + $0xab] sm:$0xff] %vm2583_vm2, %v2743_v42  ;;  %v1523_v54 = vpop.f32.mrf.mxu0  ;;  %v2533_v58 = vmax.f32 %v1913_v4, %v2238_v43  ;;  %v12005_v14 = vor.u32 %v4110_v37, %v4109_v47 }
 0x17f   : > { %v1915_v62 = vmax.f32 %v1787_v48, %v1791_v34  ;;  %v1794_v29 = vmax.f32 %v1532_v44, 0.0  ;;  %v1524_v2 = vadd.f32 %v11845_v5, %v1523_v54  ;;  %v2234_v10 = vsel %vm2087_vm3, %v2231_v22, %v2233_v50 }
 0x180   : > { %v2236_v13 = vsel %vm2087_vm3, %v2233_v50, %v2235_v57  ;;  %v10314_v18 = vpop.f32.mrf.mxu0  ;;  %2658 = vst.msk [vmem:[#allocation2 + $0x250] sm:$0xff] %vm2583_vm2, %v2533_v58  ;;  %v2531_v20 = vmax.f32 %v1911_v11, %v2234_v10  ;;  %v4112_v48 = vsel %vm4077_vm5, %v11967_v45, %v12005_v14  ;;  %v2992_v50 = vor.u32 %v11993_v36, %v2988_v23 }
 0x181   : > { %v2532_v24 = vmax.f32 %v1912_v41, %v2236_v13  ;;  %v2239_v27 = vrot.slane %v1915_v62, 1  ;;  %v1792_v28 = vmax.f32 %v1524_v2, 0.0  ;;  %v1545_v4 = vadd.f32 %v11845_v5, %v10314_v18  ;;  %10523 = vmatmul.mubr.msk.bf16.gmra.mxu0 %vm2583_vm2, %v4112_v48 }
 0x182   : > { %v1536_v39 = vpop.f32.mrf.mxu0  ;;  %2656 = vst.msk [vmem:[#allocation2 + $0x240] sm:$0xff] %vm2583_vm2, %v2531_v20  ;;  %v2866_v45 = vld [vmem:[#allocation3 + $0xa0] sm:$0xff] }
 0x183   : > { %2657 = vst.msk [vmem:[#allocation2 + $0x248] sm:$0xff] %vm2583_vm2, %v2532_v24  ;;  %v2240_v57 = vsel %vm2087_vm3, %v2237_v40, %v2239_v27  ;;  %v1537_v11 = vadd.f32 %v11845_v5, %v1536_v39  ;;  %v1797_v35 = vmax.f32 %v1545_v4, 0.0 }
 0x184   : > { %v2534_v22 = vmax.f32 %v1914_v25, %v2240_v57  ;;  %v10315_v60 = vpop.f32.mrf.mxu0 }
 0x185   : > { %v1795_v37 = vmax.f32 %v1537_v11, 0.0  ;;  %v1548_v41 = vadd.f32 %v11845_v5, %v10315_v60  ;;  %v2867_v15 = vld [vmem:[#allocation3 + $0xa8] sm:$0xff]  ;;  %v1921_v42 = vmax.f32 %v1793_v16, %v1797_v35 }
 0x186   : > { %2659 = vst.msk [vmem:[#allocation2 + $0x258] sm:$0xff] %vm2583_vm2, %v2534_v22  ;;  %v1539_v44 = vpop.f32.mrf.mxu0  ;;  %v12019_v38 = vpack.c.bf16 %v2867_v15, %v2866_v45 }
 0x187   : > { %v1919_v47 = vmax.f32 %v1791_v34, %v1795_v37  ;;  %v1798_v40 = vmax.f32 %v1548_v41, 0.0  ;;  %v1540_v43 = vadd.f32 %v11845_v5, %v1539_v44  ;;  %v2251_v25 = vrot.slane %v1921_v42, 1 }
 0x188   : > { %v10318_v54 = vpop.f32.mrf.mxu0  ;;  %v12024_v58 = vshll.u32 %v12019_v38, 16  ;;  %v12029_v34 = vshrl.u32 %v12019_v38, 16 }
 0x189   : > { %v2247_v62 = vrot.slane %v1919_v47, 1  ;;  %v1922_v2 = vmax.f32 %v1794_v29, %v1798_v40  ;;  %v1796_v13 = vmax.f32 %v1540_v43, 0.0  ;;  %v1561_v16 = vadd.f32 %v11845_v5, %v10318_v54 }
 0x18a   : > { %15019 = vst [vmem:[#allocation25_spill] sm:$0xff] %v12024_v58  ;;  %v2745_v10 = vld [vmem:[#allocation2 + $0x240] ss:$2 sm:$0xff]  ;;  %v1552_v18 = vpop.f32.mrf.mxu0  ;;  %v2996_v20 = vrot.slane %v12024_v58, 1  ;;  %15020 = vst [vmem:[#allocation26_spill] sm:$0xff] %v12029_v34  ;;  %v4114_v27 = vrot.slane %v12024_v58, 2 }
 0x18b   : > { %2832 = vst.msk [vmem:[#allocation3 + $0xb5] sm:$0xff] %vm2583_vm2, %v2745_v10  ;;  %v2253_v23 = vrot.slane %v1922_v2, 1  ;;  %v1553_v24 = vadd.f32 %v11845_v5, %v1552_v18  ;;  %v1920_v48 = vmax.f32 %v1792_v28, %v1796_v13  ;;  %v1801_v4 = vmax.f32 %v1561_v16, 0.0 }
 0x18c   : > { %v10319_v29 = vpop.f32.mrf.mxu0  ;;  %v2997_v39 = vsel %vm2913_vm4, %v2992_v50, %v2996_v20  ;;  %v4113_v60 = vrot.slane %v12029_v34, 1 }
 0x18d   : > { %v2747_v57 = vld [vmem:[#allocation2 + $0x250] ss:$2 sm:$0xff]  ;;  %v2254_v11 = vsel %vm2087_vm3, %v2251_v25, %v2253_v23  ;;  %v1799_v22 = vmax.f32 %v1553_v24, 0.0  ;;  %v1564_v35 = vadd.f32 %v11845_v5, %v10319_v29  ;;  %10375 = vmatmul.mubr.msk.bf16.gmra.mxu1 %vm2583_vm2, %v2997_v39  ;;  %v2249_v45 = vrot.slane %v1920_v48, 1 }
 0x18e   : > { %2833 = vst.msk [vmem:[#allocation3 + $0xbd] sm:$0xff] %vm2583_vm2, %v2747_v57  ;;  %v2541_v41 = vmax.f32 %v1921_v42, %v2254_v11  ;;  %v1555_v15 = vpop.f32.mrf.mxu0  ;;  %v12041_v43 = vor.u32 %v4114_v27, %v4113_v60 }
 0x18f   : > { %v1923_v28 = vmax.f32 %v1795_v37, %v1799_v22  ;;  %v1802_v44 = vmax.f32 %v1564_v35, 0.0  ;;  %v1556_v40 = vadd.f32 %v11845_v5, %v1555_v15  ;;  %v2250_v50 = vsel %vm2087_vm3, %v2247_v62, %v2249_v45 }
 0x190   : > { %2666 = vst.msk [vmem:[#allocation2 + $0x290] sm:$0xff] %vm2583_vm2, %v2541_v41  ;;  %v2252_v54 = vsel %vm2087_vm3, %v2249_v45, %v2251_v25  ;;  %v10322_v10 = vpop.f32.mrf.mxu0  ;;  %v2539_v13 = vmax.f32 %v1919_v47, %v2250_v50  ;;  %v4116_v37 = vsel %vm4077_vm5, %v12005_v14, %v12041_v43  ;;  %v3000_v15 = vor.u32 %v12029_v34, %v2996_v20 }
 0x191   : > { %v2540_v16 = vmax.f32 %v1920_v48, %v2252_v54  ;;  %v2255_v18 = vrot.slane %v1923_v28, 1  ;;  %v1800_v24 = vmax.f32 %v1556_v40, 0.0  ;;  %v1577_v42 = vadd.f32 %v11845_v5, %v10322_v10  ;;  %10526 = vmatprep.mubr.msk.bf16.mxu0 %vm2583_vm2, %v4116_v37 }
 0x192   : > { %v1568_v29 = vpop.f32.mrf.mxu0  ;;  %2664 = vst.msk [vmem:[#allocation2 + $0x280] sm:$0xff] %vm2583_vm2, %v2539_v13  ;;  %v2868_v57 = vld [vmem:[#allocation3 + $0xb0] sm:$0xff]  ;;  %v3536_v34 = vrot.slane %v11689_v61, 1 }
 0x193   : > { %2665 = vst.msk [vmem:[#allocation2 + $0x288] sm:$0xff] %vm2583_vm2, %v2540_v16  ;;  %v2256_v62 = vsel %vm2087_vm3, %v2253_v23, %v2255_v18  ;;  %v1569_v47 = vadd.f32 %v11845_v5, %v1568_v29  ;;  %v1805_v27 = vmax.f32 %v1577_v42, 0.0 }
 0x194   : > { %v2542_v25 = vmax.f32 %v1922_v2, %v2256_v62  ;;  %v10323_v48 = vpop.f32.mrf.mxu0 }
 0x195   : > { %v1803_v14 = vmax.f32 %v1569_v47, 0.0  ;;  %v1580_v39 = vadd.f32 %v11845_v5, %v10323_v48  ;;  %v2869_v11 = vld [vmem:[#allocation3 + $0xb8] sm:$0xff]  ;;  %v1929_v23 = vmax.f32 %v1801_v4, %v1805_v27 }
 0x196   : > { %2667 = vst.msk [vmem:[#allocation2 + $0x298] sm:$0xff] %vm2583_vm2, %v2542_v25  ;;  %v1571_v35 = vpop.f32.mrf.mxu0  ;;  %v12059_v60 = vpack.c.bf16 %v2869_v11, %v2868_v57 }
 0x197   : > { %v1927_v41 = vmax.f32 %v1799_v22, %v1803_v14  ;;  %v1806_v45 = vmax.f32 %v1580_v39, 0.0  ;;  %v1572_v2 = vadd.f32 %v11845_v5, %v1571_v35  ;;  %v2267_v28 = vrot.slane %v1929_v23, 1 }
 0x198   : > { %v10326_v40 = vpop.f32.mrf.mxu0  ;;  %v12064_v50 = vshll.u32 %v12059_v60, 16  ;;  %v12069_v22 = vshrl.u32 %v12059_v60, 16 }
 0x199   : > { %v2263_v54 = vrot.slane %v1927_v41, 1  ;;  %v1930_v10 = vmax.f32 %v1802_v44, %v1806_v45  ;;  %v1804_v16 = vmax.f32 %v1572_v2, 0.0  ;;  %v1593_v4 = vadd.f32 %v11845_v5, %v10326_v40 }
 0x19a   : > { %15021 = vst [vmem:[#allocation27_spill] sm:$0xff] %v12064_v50  ;;  %v2749_v13 = vld [vmem:[#allocation2 + $0x280] ss:$2 sm:$0xff]  ;;  %v1584_v18 = vpop.f32.mrf.mxu0  ;;  %v3004_v37 = vrot.slane %v12064_v50, 1  ;;  %15022 = vst [vmem:[#allocation28_spill] sm:$0xff] %v12069_v22  ;;  %v4118_v29 = vrot.slane %v12064_v50, 2 }
 0x19b   : > { %2834 = vst.msk [vmem:[#allocation3 + $0xc7] sm:$0xff] %vm2583_vm2, %v2749_v13  ;;  %v2269_v20 = vrot.slane %v1930_v10, 1  ;;  %v1585_v42 = vadd.f32 %v11845_v5, %v1584_v18  ;;  %v1928_v62 = vmax.f32 %v1800_v24, %v1804_v16  ;;  %v1809_v47 = vmax.f32 %v1593_v4, 0.0 }
 0x19c   : > { %v10327_v44 = vpop.f32.mrf.mxu0  ;;  %v3005_v25 = vsel %vm2913_vm4, %v3000_v15, %v3004_v37  ;;  %v4117_v11 = vrot.slane %v12069_v22, 1 }
 0x19d   : > { %v2751_v27 = vld [vmem:[#allocation2 + $0x290] ss:$2 sm:$0xff]  ;;  %v2270_v48 = vsel %vm2087_vm3, %v2267_v28, %v2269_v20  ;;  %v1807_v39 = vmax.f32 %v1585_v42, 0.0  ;;  %v1596_v57 = vadd.f32 %v11845_v5, %v10327_v44  ;;  %10378 = vmatprep.mubr.msk.bf16.mxu1 %vm2583_vm2, %v3005_v25  ;;  %v2265_v45 = vrot.slane %v1928_v62, 1 }
 0x19e   : > { %2835 = vst.msk [vmem:[#allocation3 + $0xcf] sm:$0xff] %vm2583_vm2, %v2751_v27  ;;  %v2549_v35 = vmax.f32 %v1929_v23, %v2270_v48  ;;  %v1587_v2 = vpop.f32.mrf.mxu0  ;;  %v12081_v15 = vor.u32 %v4118_v29, %v4117_v11 }
 0x19f   : > { %v1931_v24 = vmax.f32 %v1803_v14, %v1807_v39  ;;  %v1810_v40 = vmax.f32 %v1596_v57, 0.0  ;;  %v1588_v13 = vadd.f32 %v11845_v5, %v1587_v2  ;;  %v2266_v16 = vsel %vm2087_vm3, %v2263_v54, %v2265_v45 }
 0x1a0   : > { %2674 = vst.msk [vmem:[#allocation2 + $0x2d0] sm:$0xff] %vm2583_vm2, %v2549_v35  ;;  %v2268_v4 = vsel %vm2087_vm3, %v2265_v45, %v2267_v28  ;;  %v10330_v18 = vpop.f32.mrf.mxu0  ;;  %v2547_v42 = vmax.f32 %v1927_v41, %v2266_v16  ;;  %v4120_v14 = vsel %vm4077_vm5, %v12041_v43, %v12081_v15  ;;  %v12102_v16 = vld [vmem:[%s14942_s2] ss:$0 sm:$0xff] }
 0x1a1   : > { %v2548_v44 = vmax.f32 %v1928_v62, %v2268_v4  ;;  %v2271_v25 = vrot.slane %v1931_v24, 1  ;;  %v1808_v27 = vmax.f32 %v1588_v13, 0.0  ;;  %v1609_v23 = vadd.f32 %v11845_v5, %v10330_v18  ;;  %10527 = vmatmul.mubr.msk.bf16.gmra.mxu0 %vm2583_vm2, %v4120_v14 }
 0x1a2   : > { %v1600_v48 = vpop.f32.mrf.mxu0  ;;  %2672 = vst.msk [vmem:[#allocation2 + $0x2c0] sm:$0xff] %vm2583_vm2, %v2547_v42  ;;  %v2870_v43 = vld [vmem:[#allocation3 + $0xc0] sm:$0xff]  ;;  %v3008_v4 = vor.u32 %v12069_v22, %v3004_v37 }
 0x1a3   : > { %2673 = vst.msk [vmem:[#allocation2 + $0x2c8] sm:$0xff] %vm2583_vm2, %v2548_v44  ;;  %v2272_v54 = vsel %vm2087_vm3, %v2269_v20, %v2271_v25  ;;  %v1601_v41 = vadd.f32 %v11845_v5, %v1600_v48  ;;  %v1813_v29 = vmax.f32 %v1609_v23, 0.0 }
 0x1a4   : > { %v2550_v28 = vmax.f32 %v1930_v10, %v2272_v54  ;;  %v10331_v62 = vpop.f32.mrf.mxu0 }
 0x1a5   : > { %v1811_v57 = vmax.f32 %v1601_v41, 0.0  ;;  %v1612_v11 = vadd.f32 %v11845_v5, %v10331_v62  ;;  %v2871_v35 = vld [vmem:[#allocation3 + $0xc8] sm:$0xff]  ;;  %v1937_v45 = vmax.f32 %v1809_v47, %v1813_v29 }
 0x1a6   : > { %2675 = vst.msk [vmem:[#allocation2 + $0x2d8] sm:$0xff] %vm2583_vm2, %v2550_v28  ;;  %v1603_v2 = vpop.f32.mrf.mxu0  ;;  %v12097_v24 = vpack.c.bf16 %v2871_v35, %v2870_v43 }
 0x1a7   : > { %v1935_v13 = vmax.f32 %v1807_v39, %v1811_v57  ;;  %v1814_v20 = vmax.f32 %v1612_v11, 0.0  ;;  %v1604_v10 = vadd.f32 %v12102_v16, %v1603_v2  ;;  %v2283_v5 = vrot.slane %v1937_v45, 1 }
 0x1a8   : > { %v10334_v18 = vpop.f32.mrf.mxu0  ;;  %v12107_v42 = vshll.u32 %v12097_v24, 16  ;;  %v12112_v54 = vshrl.u32 %v12097_v24, 16 }
 0x1a9   : > { %v2279_v47 = vrot.slane %v1935_v13, 1  ;;  %v1938_v44 = vmax.f32 %v1810_v40, %v1814_v20  ;;  %v1812_v14 = vmax.f32 %v1604_v10, 0.0  ;;  %v1625_v39 = vadd.f32 %v12102_v16, %v10334_v18 }
 0x1aa   : > { %15023 = vst [vmem:[#allocation29_spill] sm:$0xff] %v12107_v42  ;;  %v2753_v25 = vld [vmem:[#allocation2 + $0x2c0] ss:$2 sm:$0xff]  ;;  %v1616_v23 = vpop.f32.mrf.mxu0  ;;  %v3012_v48 = vrot.slane %v12107_v42, 1  ;;  %15024 = vst [vmem:[#allocation30_spill] sm:$0xff] %v12112_v54  ;;  %v4122_v28 = vrot.slane %v12107_v42, 2 }
 0x1ab   : > { %2836 = vst.msk [vmem:[#allocation3 + $0xd9] sm:$0xff] %vm2583_vm2, %v2753_v25  ;;  %v2285_v37 = vrot.slane %v1938_v44, 1  ;;  %v1617_v41 = vadd.f32 %v12102_v16, %v1616_v23  ;;  %v1936_v29 = vmax.f32 %v1808_v27, %v1812_v14  ;;  %v1817_v62 = vmax.f32 %v1625_v39, 0.0 }
 0x1ac   : > { %v10335_v40 = vpop.f32.mrf.mxu0  ;;  %v3013_v11 = vsel %vm2913_vm4, %v3008_v4, %v3012_v48  ;;  %v4121_v10 = vrot.slane %v12112_v54, 1 }
 0x1ad   : > { %v2755_v43 = vld [vmem:[#allocation2 + $0x2d0] ss:$2 sm:$0xff]  ;;  %v2286_v35 = vsel %vm2087_vm3, %v2283_v5, %v2285_v37  ;;  %v1815_v2 = vmax.f32 %v1617_v41, 0.0  ;;  %v1628_v20 = vadd.f32 %v12102_v16, %v10335_v40  ;;  %10379 = vmatmul.mubr.msk.bf16.gmra.mxu1 %vm2583_vm2, %v3013_v11  ;;  %v2281_v25 = vrot.slane %v1936_v29, 1 }
 0x1ae   : > { %2837 = vst.msk [vmem:[#allocation3 + $0xe1] sm:$0xff] %vm2583_vm2, %v2755_v43  ;;  %v2557_v18 = vmax.f32 %v1937_v45, %v2286_v35  ;;  %v1619_v23 = vpop.f32.mrf.mxu0  ;;  %v12124_v4 = vor.u32 %v4122_v28, %v4121_v10  ;;  %v2872_v28 = vld [vmem:[#allocation3 + $0xd0] sm:$0xff] }
 0x1af   : > { %v1939_v27 = vmax.f32 %v1811_v57, %v1815_v2  ;;  %v1818_v14 = vmax.f32 %v1628_v20, 0.0  ;;  %v1620_v39 = vadd.f32 %v12102_v16, %v1619_v23  ;;  %v2282_v41 = vsel %vm2087_vm3, %v2279_v47, %v2281_v25 }
 0x1b0   : > { %2682 = vst.msk [vmem:[#allocation2 + $0x310] sm:$0xff] %vm2583_vm2, %v2557_v18  ;;  %v2284_v40 = vsel %vm2087_vm3, %v2281_v25, %v2283_v5  ;;  %v10338_v11 = vpop.f32.mrf.mxu0  ;;  %v2555_v31 = vmax.f32 %v1935_v13, %v2282_v41  ;;  %v4124_v57 = vsel %vm4077_vm5, %v12081_v15, %v12124_v4 }
 0x1b1   : > { %v2556_v42 = vmax.f32 %v1936_v29, %v2284_v40  ;;  %v2287_v50 = vrot.slane %v1939_v27, 1  ;;  %v1816_v43 = vmax.f32 %v1620_v39, 0.0  ;;  %v1641_v45 = vadd.f32 %v12102_v16, %v10338_v11  ;;  %10530 = vmatprep.mubr.msk.bf16.mxu0 %vm2583_vm2, %v4124_v57 }
 0x1b2   : > { %v1632_v35 = vpop.f32.mrf.mxu0  ;;  %v2873_v20 = vld [vmem:[#allocation3 + $0xd8] sm:$0xff]  ;;  %2680 = vst.msk [vmem:[#allocation2 + $0x300] sm:$0xff] %vm2583_vm2, %v2555_v31  ;;  %v3016_v40 = vor.u32 %v12112_v54, %v3012_v48 }
 0x1b3   : > { %2681 = vst.msk [vmem:[#allocation2 + $0x308] sm:$0xff] %vm2583_vm2, %v2556_v42  ;;  %v2288_v5 = vsel %vm2087_vm3, %v2285_v37, %v2287_v50  ;;  %v1633_v13 = vadd.f32 %v12102_v16, %v1632_v35  ;;  %v12138_v47 = vpack.c.bf16 %v2873_v20, %v2872_v28  ;;  %v1821_v10 = vmax.f32 %v1641_v45, 0.0 }
 0x1b4   : > { %v2558_v29 = vmax.f32 %v1938_v44, %v2288_v5  ;;  %v10339_v15 = vpop.f32.mrf.mxu0 }
 0x1b5   : > { %v1819_v18 = vmax.f32 %v1633_v13, 0.0  ;;  %v1644_v25 = vadd.f32 %v12102_v16, %v10339_v15  ;;  %v12142_v23 = vshll.u32 %v12138_v47, 16  ;;  %v1945_v31 = vmax.f32 %v1817_v62, %v1821_v10 }
 0x1b6   : > { %2683 = vst.msk [vmem:[#allocation2 + $0x318] sm:$0xff] %vm2583_vm2, %v2558_v29  ;;  %v1635_v42 = vpop.f32.mrf.mxu0  ;;  %v12146_v50 = vshrl.u32 %v12138_v47, 16 }
 0x1b7   : > { %15025 = vst [vmem:[#allocation31_spill] sm:$0xff] %v12142_v23  ;;  %v1943_v37 = vmax.f32 %v1815_v2, %v1819_v18  ;;  %v1822_v27 = vmax.f32 %v1644_v25, 0.0  ;;  %v1636_v39 = vadd.f32 %v12102_v16, %v1635_v42  ;;  %v14960_v44 = vrot.slane %v12142_v23, 1 }
 0x1b8   : > { %15026 = vst [vmem:[#allocation32_spill] sm:$0xff] %v12146_v50  ;;  %v10342_v41 = vpop.f32.mrf.mxu0  ;;  %v4125_v11 = vrot.slane %v12146_v50, 1  ;;  %v4126_v5 = vrot.slane %v12142_v23, 2  ;;  %v2299_v13 = vrot.slane %v1945_v31, 1 }
 0x1b9   : > { %v2295_v57 = vrot.slane %v1943_v37, 1  ;;  %v1946_v45 = vmax.f32 %v1818_v14, %v1822_v27  ;;  %v1820_v28 = vmax.f32 %v1636_v39, 0.0  ;;  %v1657_v62 = vadd.f32 %v12102_v16, %v10342_v41  ;;  %v12163_v14 = vld [vmem:[%s14943_s3 + $0x40] sm:$0xff]  }
 0x1ba   : > { %v2757_v35 = vld [vmem:[#allocation2 + $0x300] ss:$2 sm:$0xff]  ;;  %v3021_v2 = vsel %vm2913_vm4, %v3016_v40, %v14960_v44  ;;  %v1648_v20 = vpop.f32.mrf.mxu0  ;;  %v12165_v25 = vor.u32 %v4126_v5, %v4125_v11  ;;  %10660 = vmatprep.subr.bf16.mxu0 %v12163_v14 }
 0x1bb   : > { %2838 = vst.msk [vmem:[#allocation3 + $0xeb] sm:$0xff] %vm2583_vm2, %v2757_v35  ;;  %v2301_v29 = vrot.slane %v1946_v45, 1  ;;  %10382 = vmatprep.mubr.msk.bf16.mxu1 %vm2583_vm2, %v3021_v2  ;;  %v1649_v48 = vadd.f32 %v12102_v16, %v1648_v20  ;;  %v1944_v10 = vmax.f32 %v1816_v43, %v1820_v28  ;;  %v1825_v15 = vmax.f32 %v1657_v62, 0.0 }
 0x1bc   : > { %v10343_v42 = vpop.f32.mrf.mxu0  ;;  %v4128_v43 = vsel %vm4077_vm5, %v12124_v4, %v12165_v25 }
 0x1bd   : > { %v2759_v27 = vld [vmem:[#allocation2 + $0x310] ss:$2 sm:$0xff]  ;;  %v2302_v39 = vsel %vm2087_vm3, %v2299_v13, %v2301_v29  ;;  %v1823_v41 = vmax.f32 %v1649_v48, 0.0  ;;  %v1660_v40 = vadd.f32 %v12102_v16, %v10343_v42  ;;  %v2297_v2 = vrot.slane %v1944_v10, 1  ;;  %10531 = vmatmul.mubr.msk.bf16.gmra.mxu0 %vm2583_vm2, %v4128_v43 }
 0x1be   : > { %2839 = vst.msk [vmem:[#allocation3 + $0xf3] sm:$0xff] %vm2583_vm2, %v2759_v27  ;;  %v2565_v35 = vmax.f32 %v1945_v31, %v2302_v39  ;;  %v1651_v28 = vpop.f32.mrf.mxu0 }
 0x1bf   : > { %v1947_v11 = vmax.f32 %v1819_v18, %v1823_v41  ;;  %v1826_v62 = vmax.f32 %v1660_v40, 0.0  ;;  %v1652_v20 = vadd.f32 %v12102_v16, %v1651_v28  ;;  %v2298_v5 = vsel %vm2087_vm3, %v2295_v57, %v2297_v2  ;;  %v2874_v18 = vld [vmem:[#allocation3 + $0xe0] sm:$0xff] }
 0x1c0   : > { %2690 = vst.msk [vmem:[#allocation2 + $0x350] sm:$0xff] %vm2583_vm2, %v2565_v35  ;;  %v2300_v48 = vsel %vm2087_vm3, %v2297_v2, %v2299_v13  ;;  %v10346_v42 = vpop.f32.mrf.mxu0  ;;  %v2563_v31 = vmax.f32 %v1943_v37, %v2298_v5 }
 0x1c1   : > { %v2564_v27 = vmax.f32 %v1944_v10, %v2300_v48  ;;  %v2303_v39 = vrot.slane %v1947_v11, 1  ;;  %v1824_v44 = vmax.f32 %v1652_v20, 0.0  ;;  %v1673_v4 = vadd.f32 %v12102_v16, %v10346_v42 }
 0x1c2   : > { %v1664_v54 = vpop.f32.mrf.mxu0  ;;  %v2875_v22 = vld [vmem:[#allocation3 + $0xe8] sm:$0xff]  ;;  %2688 = vst.msk [vmem:[#allocation2 + $0x340] sm:$0xff] %vm2583_vm2, %v2563_v31  ;;  %v15029_v42 = vrot.slane %v12142_v23, 1 }
 0x1c3   : > { %2689 = vst.msk [vmem:[#allocation2 + $0x348] sm:$0xff] %vm2583_vm2, %v2564_v27  ;;  %v2304_v40 = vsel %vm2087_vm3, %v2301_v29, %v2303_v39  ;;  %v1665_v57 = vadd.f32 %v12102_v16, %v1664_v54  ;;  %v12184_v35 = vpack.c.bf16 %v2875_v22, %v2874_v18  ;;  %v1829_v37 = vmax.f32 %v1673_v4, 0.0 }
 0x1c4   : > { %v2566_v13 = vmax.f32 %v1946_v45, %v2304_v40  ;;  %v10347_v10 = vpop.f32.mrf.mxu0  ;;  %v3024_v31 = vor.u32 %v12146_v50, %v15029_v42 }
 0x1c5   : > { %v1827_v2 = vmax.f32 %v1665_v57, 0.0  ;;  %v1676_v43 = vadd.f32 %v12102_v16, %v10347_v10  ;;  %v12188_v28 = vshll.u32 %v12184_v35, 16  ;;  %v1953_v11 = vmax.f32 %v1825_v15, %v1829_v37 }
 0x1c6   : > { %2691 = vst.msk [vmem:[#allocation2 + $0x358] sm:$0xff] %vm2583_vm2, %v2566_v13  ;;  %v1667_v20 = vpop.f32.mrf.mxu0  ;;  %v12192_v5 = vshrl.u32 %v12184_v35, 16 }
 0x1c7   : > { %15027 = vst [vmem:[#allocation33_spill] sm:$0xff] %v12188_v28  ;;  %v1951_v29 = vmax.f32 %v1823_v41, %v1827_v2  ;;  %v1830_v54 = vmax.f32 %v1676_v43, 0.0  ;;  %v1668_v22 = vadd.f32 %v12102_v16, %v1667_v20  ;;  %v14963_v45 = vrot.slane %v12188_v28, 1 }
 0x1c8   : > { %15028 = vst [vmem:[#allocation34_spill] sm:$0xff] %v12192_v5  ;;  %v10350_v48 = vpop.f32.mrf.mxu0  ;;  %v4129_v27 = vrot.slane %v12192_v5, 1  ;;  %v4130_v13 = vrot.slane %v12188_v28, 2  ;;  %v2315_v37 = vrot.slane %v1953_v11, 1 }
 0x1c9   : > { %v2311_v39 = vrot.slane %v1951_v29, 1  ;;  %v1954_v4 = vmax.f32 %v1826_v62, %v1830_v54  ;;  %v1828_v18 = vmax.f32 %v1668_v22, 0.0  ;;  %v1689_v40 = vadd.f32 %v12102_v16, %v10350_v48 }
 0x1ca   : > { %v2761_v15 = vld [vmem:[#allocation2 + $0x340] ss:$2 sm:$0xff]  ;;  %v3029_v41 = vsel %vm2913_vm4, %v3024_v31, %v14963_v45  ;;  %v1680_v57 = vpop.f32.mrf.mxu0  ;;  %v12208_v54 = vor.u32 %v4130_v13, %v4129_v27 }
 0x1cb   : > { %2840 = vst.msk [vmem:[#allocation3 + $0xfd] sm:$0xff] %vm2583_vm2, %v2761_v15  ;;  %v2317_v10 = vrot.slane %v1954_v4, 1  ;;  %10383 = vmatmul.mubr.msk.bf16.gmra.mxu1 %vm2583_vm2, %v3029_v41  ;;  %v1681_v43 = vadd.f32 %v12102_v16, %v1680_v57  ;;  %v1952_v62 = vmax.f32 %v1824_v44, %v1828_v18  ;;  %v1833_v20 = vmax.f32 %v1689_v40, 0.0 }
 0x1cc   : > { %v10351_v22 = vpop.f32.mrf.mxu0  ;;  %v4132_v41 = vsel %vm4077_vm5, %v12165_v25, %v12208_v54 }
 0x1cd   : > { %v2763_v48 = vld [vmem:[#allocation2 + $0x350] ss:$2 sm:$0xff]  ;;  %v2318_v42 = vsel %vm2087_vm3, %v2315_v37, %v2317_v10  ;;  %v1831_v31 = vmax.f32 %v1681_v43, 0.0  ;;  %v1692_v45 = vadd.f32 %v12102_v16, %v10351_v22  ;;  %v2313_v23 = vrot.slane %v1952_v62, 1  ;;  %10534 = vmatprep.mubr.msk.bf16.mxu0 %vm2583_vm2, %v4132_v41 }
 0x1ce   : > { %2841 = vst.msk [vmem:[#allocation3 + $0x105] sm:$0xff] %vm2583_vm2, %v2763_v48  ;;  %v2573_v15 = vmax.f32 %v1953_v11, %v2318_v42  ;;  %v1683_v57 = vpop.f32.mrf.mxu0 }
 0x1cf   : > { %v1955_v44 = vmax.f32 %v1827_v2, %v1831_v31  ;;  %v1834_v27 = vmax.f32 %v1692_v45, 0.0  ;;  %v1684_v18 = vadd.f32 %v12102_v16, %v1683_v57  ;;  %v2314_v40 = vsel %vm2087_vm3, %v2311_v39, %v2313_v23  ;;  %v2876_v2 = vld [vmem:[#allocation3 + $0xf0] sm:$0xff] }
 0x1d0   : > { %2698 = vst.msk [vmem:[#allocation2 + $0x390] sm:$0xff] %vm2583_vm2, %v2573_v15  ;;  %v2316_v13 = vsel %vm2087_vm3, %v2313_v23, %v2315_v37  ;;  %v10354_v43 = vpop.f32.mrf.mxu0  ;;  %v2571_v11 = vmax.f32 %v1951_v29, %v2314_v40 }
 0x1d1   : > { %v2572_v22 = vmax.f32 %v1952_v62, %v2316_v13  ;;  %v2319_v48 = vrot.slane %v1955_v44, 1  ;;  %v1832_v42 = vmax.f32 %v1684_v18, 0.0  ;;  %v1705_v25 = vadd.f32 %v12102_v16, %v10354_v43 }
 0x1d2   : > { %v1696_v50 = vpop.f32.mrf.mxu0  ;;  %v2877_v58 = vld [vmem:[#allocation3 + $0xf8] sm:$0xff]  ;;  %2696 = vst.msk [vmem:[#allocation2 + $0x380] sm:$0xff] %vm2583_vm2, %v2571_v11  ;;  %v15032_v13 = vrot.slane %v12188_v28, 1 }
 0x1d3   : > { %2697 = vst.msk [vmem:[#allocation2 + $0x388] sm:$0xff] %vm2583_vm2, %v2572_v22  ;;  %v2320_v45 = vsel %vm2087_vm3, %v2317_v10, %v2319_v48  ;;  %v1697_v39 = vadd.f32 %v12102_v16, %v1696_v50  ;;  %v12226_v15 = vpack.c.bf16 %v2877_v58, %v2876_v2  ;;  %v1837_v29 = vmax.f32 %v1705_v25, 0.0 }
 0x1d4   : > { %v2574_v23 = vmax.f32 %v1954_v4, %v2320_v45  ;;  %v10355_v37 = vpop.f32.mrf.mxu0  ;;  %v3032_v43 = vor.u32 %v12192_v5, %v15032_v13 }
 0x1d5   : > { %v1835_v62 = vmax.f32 %v1697_v39, 0.0  ;;  %v1708_v41 = vadd.f32 %v12102_v16, %v10355_v37  ;;  %v12230_v57 = vshll.u32 %v12226_v15, 16  ;;  %v1961_v44 = vmax.f32 %v1833_v20, %v1837_v29 }
 0x1d6   : > { %2699 = vst.msk [vmem:[#allocation2 + $0x398] sm:$0xff] %vm2583_vm2, %v2574_v23  ;;  %v1699_v18 = vpop.f32.mrf.mxu0  ;;  %v12234_v40 = vshrl.u32 %v12226_v15, 16 }
 0x1d7   : > { %15030 = vst [vmem:[#allocation35_spill] sm:$0xff] %v12230_v57  ;;  %v1959_v10 = vmax.f32 %v1831_v31, %v1835_v62  ;;  %v1838_v50 = vmax.f32 %v1708_v41, 0.0  ;;  %v1700_v58 = vadd.f32 %v12102_v16, %v1699_v18  ;;  %v3036_v4 = vrot.slane %v12230_v57, 1 }
 0x1d8   : > { %15031 = vst [vmem:[#allocation36_spill] sm:$0xff] %v12234_v40  ;;  %v4133_v11 = vrot.slane %v12234_v40, 1  ;;  %v4134_v45 = vrot.slane %v12230_v57, 2  ;;  %v2331_v31 = vrot.slane %v1961_v44, 1 }
 0x1d9   : > { %v2327_v22 = vrot.slane %v1959_v10, 1  ;;  %v1962_v48 = vmax.f32 %v1834_v27, %v1838_v50  ;;  %v1836_v20 = vmax.f32 %v1700_v58, 0.0  ;;  %v3037_v2 = vsel %vm2913_vm4, %v3032_v43, %v3036_v4  ;;  %v2878_v43 = vld [vmem:[#allocation3 + $0x100] sm:$0xff] }
 0x1da   : > { %v2765_v25 = vld [vmem:[#allocation2 + $0x380] ss:$2 sm:$0xff]  ;;  %10386 = vmatprep.mubr.msk.bf16.mxu1 %vm2583_vm2, %v3037_v2  ;;  %v4135_v23 = vor.u32 %v4134_v45, %v4133_v11  ;;  %v3040_v2 = vor.u32 %v12234_v40, %v3036_v4 }
 0x1db   : > { %2842 = vst.msk [vmem:[#allocation3 + $0x10f] sm:$0xff] %vm2583_vm2, %v2765_v25  ;;  %v2333_v16 = vrot.slane %v1962_v48, 1  ;;  %v1960_v39 = vmax.f32 %v1832_v42, %v1836_v20 }
 0x1dc   : > { %v4136_v18 = vsel %vm4077_vm5, %v12208_v54, %v4135_v23 }
 0x1dd   : > { %v2767_v29 = vld [vmem:[#allocation2 + $0x390] ss:$2 sm:$0xff]  ;;  %v2334_v37 = vsel %vm2087_vm3, %v2331_v31, %v2333_v16  ;;  %v2582_v62 = vmax.f32 %v1962_v48, %v2333_v16  ;;  %v2329_v41 = vrot.slane %v1960_v39, 1  ;;  %10535 = vmatmul.mubr.msk.bf16.gmra.mxu0 %vm2583_vm2, %v4136_v18 }
 0x1de   : > { %2843 = vst.msk [vmem:[#allocation3 + $0x117] sm:$0xff] %vm2583_vm2, %v2767_v29  ;;  %v2581_v27 = vmax.f32 %v1961_v44, %v2334_v37 }
 0x1df   : > { %2708 = vst.msk [vmem:[#allocation2 + $0x3d8] sm:$0x7f] %vm2707_vm7, %v2582_v62  ;;  %v2330_v50 = vsel %vm2087_vm3, %v2327_v22, %v2329_v41  ;;  %v2332_v42 = vsel %vm2087_vm3, %v2329_v41, %v2331_v31  ;;  %vm8049_vm7 = vcmask 1040384  }
 0x1e0   : > { %2706 = vst.msk [vmem:[#allocation2 + $0x3d0] sm:$0xff] %vm2583_vm2, %v2581_v27  ;;  %v2579_v58 = vmax.f32 %v1959_v10, %v2330_v50  ;;  %v2580_v13 = vmax.f32 %v1960_v39, %v2332_v42 }
 0x1e2   : > { %v2879_v11 = vld [vmem:[#allocation3 + $0x108] sm:$0xff]  ;;  %2704 = vst.msk [vmem:[#allocation2 + $0x3c0] sm:$0xff] %vm2583_vm2, %v2579_v58  ;;  %2705 = vst.msk [vmem:[#allocation2 + $0x3c8] sm:$0xff] %vm2583_vm2, %v2580_v13  ;;  %v4440_v58 = vrot.slane %v11753_v53, 2 }
 0x1e3   : > { %v12256_v44 = vpack.c.bf16 %v2879_v11, %v2878_v43  ;;  %v14967_v11 = vrot.slane %v11717_v56, 2 }
 0x1e5   : > { %v12259_v54 = vshll.u32 %v12256_v44, 16  ;;  %v12262_v48 = vshrl.u32 %v12256_v44, 16  ;;  %v2880_v25 = vld [vmem:[#allocation3 + $0x110] sm:$0xff]  ;;  %v2881_v22 = vld [vmem:[#allocation3 + $0x118] sm:$0xff] }
 0x1e6   : > { %v12264_v20 = vpack.c.bf16 %v2881_v22, %v2880_v25 }
 0x1e7   : > { %15033 = vst [vmem:[#allocation37_spill] sm:$0xff] %v12259_v54  ;;  %15034 = vst [vmem:[#allocation38_spill] sm:$0xff] %v12262_v48  ;;  %v2771_v10 = vld [vmem:[#allocation2 + $0x3d0] ss:$2 sm:$0xff]  ;;  %v3044_v45 = vrot.slane %v12259_v54, 1  ;;  %v4137_v31 = vrot.slane %v12262_v48, 1 }
 0x1e8   : > { %v4138_v16 = vrot.slane %v12259_v54, 2  ;;  %2845 = vst.msk [vmem:[#allocation3 + $0x129] sm:$0xff] %vm2583_vm2, %v2771_v10  ;;  %v12272_v39 = vshll.u32 %v12264_v20, 16  ;;  %v12275_v29 = vshrl.u32 %v12264_v20, 16  ;;  %v4442_v10 = vrot.slane %v11789_v46, 2 }
 0x1e9   : > { %v3045_v37 = vsel %vm2913_vm4, %v3040_v2, %v3044_v45  ;;  %v2769_v27 = vld [vmem:[#allocation2 + $0x3c0] ss:$2 sm:$0xff]  ;;  %v3048_v4 = vor.u32 %v12262_v48, %v3044_v45  ;;  %v4444_v2 = vrot.slane %v11832_v49, 2  ;;  %v2885_v48 = vld [vmem:[#allocation3 + $0x138] sm:$0xff] }
 0x1ea   : > { %15035 = vst [vmem:[#allocation39_spill] sm:$0xff] %v12272_v39  ;;  %15036 = vst [vmem:[#allocation40_spill] sm:$0xff] %v12275_v29  ;;  %v4139_v62 = vor.u32 %v4138_v16, %v4137_v31  ;;  %10387 = vmatmul.mubr.msk.bf16.gmra.mxu1 %vm2583_vm2, %v3045_v37  ;;  %v3052_v41 = vrot.slane %v12272_v39, 1  ;;  %v4141_v18 = vrot.slane %v12275_v29, 1  ;;  %v4142_v50 = vrot.slane %v12272_v39, 2  ;;  %v12322_v16 = vld [vmem:[%s14943_s3 + $0x18] sm:$0xff]  }
 0x1eb   : > { %2844 = vst.msk [vmem:[#allocation3 + $0x121] sm:$0xff] %vm2583_vm2, %v2769_v27  ;;  %v12309_v45 = vsel %vm4436_vm8, %v4440_v58, %v4442_v10  ;;  %v12314_v31 = vsel %vm4436_vm8, %v4442_v10, %v4444_v2  ;;  %v15037_v37 = vmov 0.0   ;;  %v11284_v27 = vld [vmem:[%s14943_s3 + $0x10] sm:$0xff]  }
 0x1ec   : > { %v4140_v42 = vsel %vm4077_vm5, %v4135_v23, %v4139_v62  ;;  %v3053_v13 = vsel %vm2913_vm4, %v3048_v4, %v3052_v41  ;;  %v12288_v43 = vor.u32 %v4142_v50, %v4141_v18  ;;  %v12298_v23 = vsel %vm4436_vm8, %v14967_v11, %v4440_v58 }
 0x1ed   : > { %10538 = vmatprep.mubr.msk.bf16.mxu0 %vm2583_vm2, %v4140_v42  ;;  %10390 = vmatprep.mubr.msk.bf16.mxu1 %vm2583_vm2, %v3053_v13  ;;  %v3056_v22 = vor.u32 %v12275_v29, %v3052_v41  ;;  %v4450_v18 = vrot.slane %v11939_v52, 2  ;;  %v4452_v50 = vrot.slane %v11974_v30, 2  ;;  %v4454_v13 = vrot.slane %v12019_v38, 2 }
 0x1ee   : > { %v4144_v25 = vsel %vm4077_vm5, %v4139_v62, %v12288_v43  ;;  %v4446_v62 = vrot.slane %v11879_v0, 2 }
 0x1ef   : > { %10539 = vmatmul.mubr.msk.bf16.gmra.mxu0 %vm2583_vm2, %v4144_v25  ;;  %v12357_v58 = vsel %vm4436_vm8, %v4450_v18, %v4452_v50  ;;  %v4456_v25 = vrot.slane %v12059_v60, 2  ;;  %v2884_v54 = vld [vmem:[#allocation3 + $0x130] sm:$0xff] }
 0x1f0   : > { %10586 = vmatprep.mubr.msk.bf16.mxu0 %vm2583_vm2, %v12298_v23  ;;  %v12336_v4 = vsel %vm4436_vm8, %v4444_v2, %v4446_v62  ;;  %v4458_v2 = vrot.slane %v12097_v24, 2  ;;  %v12427_v40 = vpack.c.bf16 %v2885_v48, %v2884_v54 }
 0x1f1   : > { %v12373_v10 = vsel %vm4436_vm8, %v4454_v13, %v4456_v25 }
 0x1f2   : > { %10391 = vmatmul.mubr.msk.bf16.gmra.mxu1 %vm2583_vm2, %v3056_v22  ;;  %v12368_v22 = vsel %vm4436_vm8, %v4452_v50, %v4454_v13  ;;  %v4464_v50 = vrot.slane %v12226_v15, 2  ;;  %v2882_v11 = vld [vmem:[#allocation3 + $0x120] sm:$0xff]  ;;  %v2883_v39 = vld [vmem:[#allocation3 + $0x128] sm:$0xff]  ;;  %15039 = vst [vmem:[#allocation42_spill] sm:$0xff] %v12427_v40 }
 0x1f3   : > { %10396 = vmatprep.mubr.msk.bf16.mxu1 %vm2583_vm2, %v11664_v17 }
 0x1f7   : > { %10587 = vmatmul.mubr.msk.bf16.vlgmr.msra.gmra.mxu0 %vm2583_vm2, %v12309_v45 }
 0x1f8   : > { %10590 = vmatprep.mubr.msk.bf16.mxu0 %vm2583_vm2, %v12314_v31  ;;  %10661 = vmatpush3.bf16.msra.mxu0 %v12163_v14  ;;  %v4448_v14 = vrot.slane %v11919_v19, 2 }
 0x1f9   : > { %10742 = vmatprep.subr.bf16.mxu0 %v15037_v37 }
 0x1fa   : > { %10397 = vmatmul.mubr.msk.bf16.vlgmr.msra.gmra.mxu1 %vm2583_vm2, %v11689_v61  ;;  %v12341_v41 = vsel %vm4436_vm8, %v4446_v62, %v4448_v14  ;;  %v12352_v42 = vsel %vm4436_vm8, %v4448_v14, %v4450_v18  ;;  %v4460_v62 = vrot.slane %v12138_v47, 2  ;;  %v4462_v18 = vrot.slane %v12184_v35, 2 }
 0x1fb   : > { %10433 = vmatpush3.bf16.msra.mxu1 %v11284_v27  ;;  %10400 = vmatprep.mubr.msk.bf16.mxu1 %vm2583_vm2, %v11717_v56  ;;  %v12384_v27 = vsel %vm4436_vm8, %v4456_v25, %v4458_v2 }
 0x1fc   : > { %10470 = vmatprep.subr.bf16.mxu1 %v12322_v16  ;;  %v12389_v14 = vsel %vm4436_vm8, %v4458_v2, %v4460_v62  ;;  %v12400_v13 = vsel %vm4436_vm8, %v4460_v62, %v4462_v18  ;;  %v12405_v25 = vsel %vm4436_vm8, %v4462_v18, %v4464_v50  ;;  %v4466_v2 = vrot.slane %v12256_v44, 2 }
 0x1fd   : > { %v4468_v62 = vrot.slane %v12264_v20, 2  ;;  %v12418_v18 = vpack.c.bf16 %v2883_v39, %v2882_v11  ;;  %v2886_v39 = vld [vmem:[#allocation3 + $0x140] sm:$0xf]  ;;  %v4472_v11 = vrot.slane %v12427_v40, 2 }
 0x1fe   : > { %v12416_v29 = vsel %vm4436_vm8, %v4464_v50, %v4466_v2 }
 0x1ff   : > { %10591 = vmatmul.mubr.msk.bf16.gmra.mxu0 %vm2583_vm2, %v12336_v4  ;;  %15038 = vst [vmem:[#allocation41_spill] sm:$0xff] %v12418_v18  ;;  %v12423_v57 = vsel %vm4436_vm8, %v4466_v2, %v4468_v62  ;;  %v4470_v50 = vrot.slane %v12418_v18, 2  ;;  %v12438_v2 = vpack.c.bf16 %v2886_v39, %v2886_v39  ;;  %v5338_v39 = vrot.slane %v11717_v56, 3 }
 0x200   : > { %10594 = vmatprep.mubr.msk.bf16.mxu0 %vm2583_vm2, %v12341_v41 }
 0x201   : > { %v12436_v28 = vsel %vm4436_vm8, %v4468_v62, %v4470_v50  ;;  %15040 = vst [vmem:[#allocation43_spill] sm:$0xff] %v12438_v2  ;;  %v12443_v54 = vsel %vm4436_vm8, %v4470_v50, %v4472_v11  ;;  %v4751_v48 = vrot.slane %v12438_v2, 2  ;;  %v5339_v62 = vrot.slane %v11753_v53, 3 }
 0x202   : > { %10401 = vmatmul.mubr.msk.bf16.gmra.mxu1 %vm2583_vm2, %v11753_v53  ;;  %15041 = vst [vmem:[#allocation44_spill] sm:$0xff] %v12443_v54  ;;  %v3535_v50 = vrot.slane %v11664_v17, 1  ;;  %v3538_v17 = vrot.slane %v11717_v56, 1 }
 0x203   : > { %10404 = vmatprep.mubr.msk.bf16.mxu1 %vm2583_vm2, %v11789_v46  ;;  %v4752_v5 = vsel %vm4436_vm8, %v4472_v11, %v4751_v48  ;;  %v5340_v6 = vsel %vm5337_vm9, %v5338_v39, %v5339_v62  ;;  %v5343_v11 = vrot.slane %v11832_v49, 3  ;;  %v5342_v48 = vsel %vm5337_vm9, %v5339_v62, %v5341_v21 }
 0x204   : > { %v3537_v36 = vsel %vm2087_vm3, %v3535_v50, %v3536_v34  ;;  %v12473_v39 = vsel %vm2087_vm3, %v3536_v34, %v3538_v17  ;;  %v5345_v50 = vrot.slane %v11879_v0, 3  ;;  %v3542_v34 = vrot.slane %v11789_v46, 1 }
 0x206   : > { %v5346_v62 = vsel %vm5337_vm9, %v5343_v11, %v5345_v50 }
 0x207   : > { %10595 = vmatmul.mubr.msk.bf16.gmra.mxu0 %vm2583_vm2, %v12352_v42 }
 0x208   : > { %10598 = vmatprep.mubr.msk.bf16.mxu0 %vm2583_vm2, %v12357_v58 }
 0x20a   : > { %10405 = vmatmul.mubr.msk.bf16.gmra.mxu1 %vm2583_vm2, %v11832_v49 }
 0x20b   : > { %10408 = vmatprep.mubr.msk.bf16.mxu1 %vm2583_vm2, %v11879_v0 }
 0x20f   : > { %10599 = vmatmul.mubr.msk.bf16.gmra.mxu0 %vm2583_vm2, %v12368_v22 }
 0x210   : > { %10602 = vmatprep.mubr.msk.bf16.mxu0 %vm2583_vm2, %v12373_v10 }
 0x212   : > { %10409 = vmatmul.mubr.msk.bf16.gmra.mxu1 %vm2583_vm2, %v11919_v19 }
 0x213   : > { %10412 = vmatprep.mubr.msk.bf16.mxu1 %vm2583_vm2, %v11939_v52 }
 0x217   : > { %10603 = vmatmul.mubr.msk.bf16.gmra.mxu0 %vm2583_vm2, %v12384_v27 }
 0x218   : > { %10606 = vmatprep.mubr.msk.bf16.mxu0 %vm2583_vm2, %v12389_v14 }
 0x21a   : > { %10413 = vmatmul.mubr.msk.bf16.gmra.mxu1 %vm2583_vm2, %v11974_v30 }
 0x21b   : > { %10416 = vmatprep.mubr.msk.bf16.mxu1 %vm2583_vm2, %v12019_v38 }
 0x21f   : > { %10607 = vmatmul.mubr.msk.bf16.gmra.mxu0 %vm2583_vm2, %v12400_v13 }
 0x220   : > { %10610 = vmatprep.mubr.msk.bf16.mxu0 %vm2583_vm2, %v12405_v25 }
 0x222   : > { %10417 = vmatmul.mubr.msk.bf16.gmra.mxu1 %vm2583_vm2, %v12059_v60 }
 0x223   : > { %10420 = vmatprep.mubr.msk.bf16.mxu1 %vm2583_vm2, %v12097_v24 }
 0x227   : > { %10611 = vmatmul.mubr.msk.bf16.gmra.mxu0 %vm2583_vm2, %v12416_v29 }
 0x228   : > { %10614 = vmatprep.mubr.msk.bf16.mxu0 %vm2583_vm2, %v12423_v57 }
 0x22a   : > { %10421 = vmatmul.mubr.msk.bf16.gmra.mxu1 %vm2583_vm2, %v12138_v47 }
 0x22b   : > { %10424 = vmatprep.mubr.msk.bf16.mxu1 %vm2583_vm2, %v12184_v35 }
 0x22f   : > { %10615 = vmatmul.mubr.msk.bf16.gmra.mxu0 %vm2583_vm2, %v12436_v28 }
 0x230   : > { %10618 = vmatprep.mubr.msk.bf16.mxu0 %vm2583_vm2, %v12443_v54 }
 0x232   : > { %10425 = vmatmul.mubr.msk.bf16.gmra.mxu1 %vm2583_vm2, %v12226_v15 }
 0x233   : > { %10428 = vmatprep.mubr.msk.bf16.mxu1 %vm2583_vm2, %v12256_v44 }
 0x237   : > { %10619 = vmatmul.mubr.msk.bf16.gmra.mxu0 %vm2583_vm2, %v4752_v5  ;;  %v3540_v5 = vrot.slane %v11753_v53, 1  ;;  %v5347_v53 = vrot.slane %v11919_v19, 3 }
 0x238   : > { %10662 = vmatprep.mubr.msk.bf16.mxu0 %vm2583_vm2, %v5340_v6  ;;  %v5344_v6 = vsel %vm5337_vm9, %v5341_v21, %v5343_v11  ;;  %v12488_v21 = vld [vmem:[%s14943_s3 + $0x20] sm:$0xff]   ;;  %v5349_v11 = vrot.slane %v11939_v52, 3 }
 0x23a   : > { %10429 = vmatmul.mubr.msk.bf16.gmra.mxu1 %vm2583_vm2, %v12264_v20 }
 0x23b   : > { %10434 = vmatprep.mubr.msk.bf16.mxu1 %vm2583_vm2, %v3537_v36  ;;  %v12478_v36 = vsel %vm2087_vm3, %v3538_v17, %v3540_v5  ;;  %v3544_v17 = vrot.slane %v11832_v49, 1  ;;  %v5351_v49 = vrot.slane %v11974_v30, 3  ;;  %v5359_v30 = vrot.slane %v12138_v47, 3 }
 0x23d   : > { %v12505_v46 = vsel %vm2087_vm3, %v3542_v34, %v3544_v17 }
 0x23f   : > { %10663 = vmatmul.mubr.msk.bf16.vlgmr.msra.gmra.mxu0 %vm2583_vm2, %v5342_v48  ;;  %v12496_v48 = vpop.f32.mrf.mxu1 }
 0x240   : > { %10666 = vmatprep.mubr.msk.bf16.mxu0 %vm2583_vm2, %v5344_v6  ;;  %v12500_v6 = vsel %vm2087_vm3, %v3540_v5, %v3542_v34  ;;  %v5350_v5 = vsel %vm5337_vm9, %v5347_v53, %v5349_v11  ;;  %v5352_v34 = vsel %vm5337_vm9, %v5349_v11, %v5351_v49 }
 0x242   : > { %10435 = vmatmul.mubr.msk.bf16.vlgmr.msra.gmra.mxu1 %vm2583_vm2, %v12473_v39 }
 0x243   : > { %10471 = vmatpush3.bf16.msra.mxu1 %v12322_v16  ;;  %10438 = vmatprep.mubr.msk.bf16.mxu1 %vm2583_vm2, %v12478_v36  ;;  %v5348_v16 = vsel %vm5337_vm9, %v5345_v50, %v5347_v53  ;;  %v12511_v50 = vpop.f32.mrf.mxu1  ;;  %v5353_v53 = vrot.slane %v12019_v38, 3 }
 0x244   : > { %11096 = vmatprep.subr.bf16.mxu1 %v12488_v21 }
 0x245   : > { %v12518_v32 = vpop.f32.mrf.mxu1 }
 0x247   : > { %10667 = vmatmul.mubr.msk.bf16.gmra.mxu0 %vm2583_vm2, %v5346_v62  ;;  %v3546_v62 = vrot.slane %v11879_v0, 1  ;;  %v12533_v11 = vpop.f32.mrf.mxu1 }
 0x248   : > { %10670 = vmatprep.mubr.msk.bf16.mxu0 %vm2583_vm2, %v5348_v16  ;;  %v3548_v16 = vrot.slane %v11919_v19, 1  ;;  %v5355_v19 = vrot.slane %v12059_v60, 3 }
 0x249   : > { %v12522_v26 = vsel %vm2087_vm3, %v3544_v17, %v3546_v62  ;;  %v5354_v17 = vsel %vm5337_vm9, %v5351_v49, %v5353_v53  ;;  %v5357_v49 = vrot.slane %v12097_v24, 3 }
 0x24a   : > { %10439 = vmatmul.mubr.msk.bf16.gmra.mxu1 %vm2583_vm2, %v12500_v6  ;;  %v12527_v0 = vsel %vm2087_vm3, %v3546_v62, %v3548_v16  ;;  %v5356_v62 = vsel %vm5337_vm9, %v5353_v53, %v5355_v19  ;;  %v3554_v53 = vrot.slane %v12019_v38, 1 }
 0x24b   : > { %10442 = vmatprep.mubr.msk.bf16.mxu1 %vm2583_vm2, %v12505_v46 }
 0x24c   : > { %v12566_v59 = vsel %vm2087_vm3, %v3552_v33, %v3554_v53 }
 0x24f   : > { %10671 = vmatmul.mubr.msk.bf16.gmra.mxu0 %vm2583_vm2, %v5350_v5  ;;  %v3550_v5 = vrot.slane %v11939_v52, 1 }
 0x250   : > { %10674 = vmatprep.mubr.msk.bf16.mxu0 %vm2583_vm2, %v5352_v34  ;;  %v12536_v34 = vpop.f32.mrf.mxu1 }
 0x251   : > { %v12544_v8 = vsel %vm2087_vm3, %v3548_v16, %v3550_v5  ;;  %v12551_v52 = vsel %vm2087_vm3, %v3550_v5, %v3552_v33  ;;  %v5358_v16 = vsel %vm5337_vm9, %v5355_v19, %v5357_v49  ;;  %v5360_v5 = vsel %vm5337_vm9, %v5357_v49, %v5359_v30 }
 0x252   : > { %10443 = vmatmul.mubr.msk.bf16.gmra.mxu1 %vm2583_vm2, %v12522_v26  ;;  %v12546_v7 = vpop.f32.mrf.mxu1  ;;  %v5361_v19 = vrot.slane %v12184_v35, 3  ;;  %v3558_v33 = vrot.slane %v12097_v24, 1 }
 0x253   : > { %10446 = vmatprep.mubr.msk.bf16.mxu1 %vm2583_vm2, %v12527_v0 }
 0x257   : > { %10675 = vmatmul.mubr.msk.bf16.gmra.mxu0 %vm2583_vm2, %v5354_v17  ;;  %v12558_v17 = vpop.f32.mrf.mxu1 }
 0x258   : > { %10678 = vmatprep.mubr.msk.bf16.mxu0 %vm2583_vm2, %v5356_v62  ;;  %v3556_v62 = vrot.slane %v12059_v60, 1  ;;  %v5363_v60 = vrot.slane %v12226_v15, 3 }
 0x259   : > { %v12568_v3 = vpop.f32.mrf.mxu1 }
 0x25a   : > { %10447 = vmatmul.mubr.msk.bf16.gmra.mxu1 %vm2583_vm2, %v12544_v8  ;;  %v12573_v38 = vsel %vm2087_vm3, %v3554_v53, %v3556_v62  ;;  %v5364_v53 = vsel %vm5337_vm9, %v5361_v19, %v5363_v60  ;;  %v12590_v55 = vsel %vm2087_vm3, %v3556_v62, %v3558_v33 }
 0x25b   : > { %10450 = vmatprep.mubr.msk.bf16.mxu1 %vm2583_vm2, %v12551_v52  ;;  %v12579_v49 = vpop.f32.mrf.mxu1 }
 0x25d   : > { %v12586_v54 = vpop.f32.mrf.mxu1 }
 0x25f   : > { %10679 = vmatmul.mubr.msk.bf16.gmra.mxu0 %vm2583_vm2, %v5358_v16  ;;  %v5362_v16 = vsel %vm5337_vm9, %v5359_v30, %v5361_v19  ;;  %v5365_v30 = vrot.slane %v12256_v44, 3  ;;  %v12601_v19 = vpop.f32.mrf.mxu1 }
 0x260   : > { %10682 = vmatprep.mubr.msk.bf16.mxu0 %vm2583_vm2, %v5360_v5  ;;  %v3560_v5 = vrot.slane %v12138_v47, 1  ;;  %v5367_v47 = vrot.slane %v12264_v20, 3 }
 0x261   : > { %v5366_v62 = vsel %vm5337_vm9, %v5363_v60, %v5365_v30  ;;  %v12608_v51 = vpop.f32.mrf.mxu1  ;;  %v5369_v60 = vrot.slane %v12418_v18, 3 }
 0x262   : > { %10451 = vmatmul.mubr.msk.bf16.gmra.mxu1 %vm2583_vm2, %v12566_v59  ;;  %v12595_v24 = vsel %vm2087_vm3, %v3558_v33, %v3560_v5  ;;  %v5368_v33 = vsel %vm5337_vm9, %v5365_v30, %v5367_v47  ;;  %15042 = vst [vmem:[#allocation45_spill] sm:$0xff] %v12608_v51  ;;  %v3566_v30 = vrot.slane %v12256_v44, 1 }
 0x263   : > { %10454 = vmatprep.mubr.msk.bf16.mxu1 %vm2583_vm2, %v12573_v38  ;;  %v12612_v9 = vpop.f32.mrf.mxu1 }
 0x264   : > { %15043 = vst [vmem:[#allocation46_spill] sm:$0xff] %v12612_v9 }
 0x267   : > { %10683 = vmatmul.mubr.msk.bf16.gmra.mxu0 %vm2583_vm2, %v5362_v16  ;;  %v3562_v16 = vrot.slane %v12184_v35, 1 }
 0x268   : > { %10686 = vmatprep.mubr.msk.bf16.mxu0 %vm2583_vm2, %v5364_v53  ;;  %v3564_v53 = vrot.slane %v12226_v15, 1  ;;  %v5371_v15 = vrot.slane %v12427_v40, 3 }
 0x269   : > { %v3563_v1 = vsel %vm2087_vm3, %v3560_v5, %v3562_v16  ;;  %v5370_v5 = vsel %vm5337_vm9, %v5367_v47, %v5369_v60  ;;  %v5373_v47 = vrot.slane %v12438_v2, 3 }
 0x26a   : > { %10455 = vmatmul.mubr.msk.bf16.gmra.mxu1 %vm2583_vm2, %v12590_v55  ;;  %v12616_v35 = vsel %vm2087_vm3, %v3562_v16, %v3564_v53  ;;  %v5372_v16 = vsel %vm5337_vm9, %v5369_v60, %v5371_v15  ;;  %v3567_v9 = vsel %vm2087_vm3, %v3564_v53, %v3566_v30 }
 0x26b   : > { %10458 = vmatprep.mubr.msk.bf16.mxu1 %vm2583_vm2, %v12595_v24 }
 0x26f   : > { %10687 = vmatmul.mubr.msk.bf16.gmra.mxu0 %vm2583_vm2, %v5366_v62  ;;  %v12623_v62 = vpop.f32.mrf.mxu1 }
 0x270   : > { %10690 = vmatprep.mubr.msk.bf16.mxu0 %vm2583_vm2, %v5368_v33  ;;  %v12627_v33 = vrot.slane %v12264_v20, 1 }
 0x271   : > { %v12633_v51 = vpop.f32.mrf.mxu1 }
 0x272   : > { %10459 = vmatmul.mubr.msk.bf16.gmra.mxu1 %vm2583_vm2, %v3563_v1  ;;  %v3569_v44 = vsel %vm2087_vm3, %v3566_v30, %v12627_v33 }
 0x273   : > { %10462 = vmatprep.mubr.msk.bf16.mxu1 %vm2583_vm2, %v12616_v35  ;;  %v12640_v20 = vpop.f32.mrf.mxu1 }
 0x275   : > { %v12644_v60 = vpop.f32.mrf.mxu1 }
 0x277   : > { %10691 = vmatmul.mubr.msk.bf16.gmra.mxu0 %vm2583_vm2, %v5370_v5  ;;  %v5374_v5 = vsel %vm5337_vm9, %v5371_v15, %v5373_v47  ;;  %v12650_v53 = vpop.f32.mrf.mxu1 }
 0x278   : > { %10694 = vmatprep.mubr.msk.bf16.mxu0 %vm2583_vm2, %v5372_v16  ;;  %v12657_v16 = vld [vmem:[%s14943_s3 + $0x28] sm:$0xff]  }
 0x279   : > { %v12652_v30 = vpop.f32.mrf.mxu1 }
 0x27a   : > { %10463 = vmatmul.mubr.msk.bf16.gmra.mxu1 %vm2583_vm2, %v3567_v9 }
 0x27b   : > { %10466 = vmatprep.mubr.msk.bf16.mxu1 %vm2583_vm2, %v3569_v44  ;;  %v12664_v15 = vpop.f32.mrf.mxu1 }
 0x27f   : > { %10695 = vmatmul.mubr.msk.bf16.gmra.mxu0 %vm2583_vm2, %v5374_v5 }
 0x282   : > { %10467 = vmatmul.mubr.msk.bf16.gmra.mxu1 %vm2583_vm2, %v12627_v33 }
 0x283   : > { %10472 = vmatprep.mubr.msk.bf16.mxu1 %vm2583_vm2, %v12473_v39  ;;  %v12667_v39 = vpop.f32.mrf.mxu1 }
 0x285   : > { %v12669_v47 = vpop.f32.mrf.mxu1 }
 0x28a   : > { %10473 = vmatmul.mubr.msk.bf16.vlgmr.msra.gmra.mxu1 %vm2583_vm2, %v12478_v36  ;;  %v12675_v36 = vpop.f32.mrf.mxu1 }
 0x28b   : > { %11097 = vmatpush3.bf16.msra.mxu1 %v12488_v21  ;;  %10476 = vmatprep.mubr.msk.bf16.mxu1 %vm2583_vm2, %v12500_v6  ;;  %15044 = vst [vmem:[#allocation47_spill] sm:$0xff] %v12675_v36 }
 0x28c   : > { %10546 = vmatprep.subr.bf16.mxu1 %v12657_v16  ;;  %v12677_v21 = vpop.f32.mrf.mxu1 }
 0x28d   : > { %15045 = vst [vmem:[#allocation48_spill] sm:$0xff] %v12677_v21 }
 0x28e   : > { %v12683_v6 = vpop.f32.mrf.mxu1 }
 0x28f   : > { %15046 = vst [vmem:[#allocation49_spill] sm:$0xff] %v12683_v6 }
 0x290   : > { %v12685_v5 = vpop.f32.mrf.mxu1 }
 0x291   : > { %15047 = vst [vmem:[#allocation50_spill] sm:$0xff] %v12685_v5 }
 0x292   : > { %10477 = vmatmul.mubr.msk.bf16.gmra.mxu1 %vm2583_vm2, %v12505_v46  ;;  %v12693_v46 = vpop.f32.mrf.mxu0 }
 0x293   : > { %10480 = vmatprep.mubr.msk.bf16.mxu1 %vm2583_vm2, %v12522_v26  ;;  %v12691_v26 = vpop.f32.mrf.mxu1  ;;  %15049 = vst [vmem:[#allocation52_spill] sm:$0xff] %v12693_v46 }
 0x294   : > { %15048 = vst [vmem:[#allocation51_spill] sm:$0xff] %v12691_v26 }
 0x295   : > { %v12695_v2 = vpop.f32.mrf.mxu1 }
 0x296   : > { %15050 = vst [vmem:[#allocation53_spill] sm:$0xff] %v12695_v2 }
 0x29a   : > { %10481 = vmatmul.mubr.msk.bf16.gmra.mxu1 %vm2583_vm2, %v12527_v0 }
 0x29b   : > { %10484 = vmatprep.mubr.msk.bf16.mxu1 %vm2583_vm2, %v12544_v8  ;;  %v12701_v8 = vpop.f32.mrf.mxu0 }
 0x29c   : > { %15052 = vst [vmem:[#allocation55_spill] sm:$0xff] %v12701_v8 }
 0x2a2   : > { %10485 = vmatmul.mubr.msk.bf16.gmra.mxu1 %vm2583_vm2, %v12551_v52 }
 0x2a3   : > { %10488 = vmatprep.mubr.msk.bf16.mxu1 %vm2583_vm2, %v12566_v59  ;;  %v12709_v59 = vpop.f32.mrf.mxu0 }
 0x2a4   : > { %15055 = vst [vmem:[#allocation58_spill] sm:$0xff] %v12709_v59 }
 0x2aa   : > { %v12697_v0 = vpop.f32.mrf.mxu1  ;;  %10489 = vmatmul.mubr.msk.bf16.gmra.mxu1 %vm2583_vm2, %v12573_v38 }
 0x2ab   : > { %15051 = vst [vmem:[#allocation54_spill] sm:$0xff] %v12697_v0  ;;  %10492 = vmatprep.mubr.msk.bf16.mxu1 %vm2583_vm2, %v12590_v55  ;;  %v12717_v0 = vpop.f32.mrf.mxu0 }
 0x2ac   : > { %v12705_v52 = vpop.f32.mrf.mxu1  ;;  %15058 = vst [vmem:[#allocation61_spill] sm:$0xff] %v12717_v0 }
 0x2ad   : > { %15053 = vst [vmem:[#allocation56_spill] sm:$0xff] %v12705_v52  ;;  %v12722_v55 = vpop.f32.mrf.mxu0 }
 0x2ae   : > { %v12707_v5 = vpop.f32.mrf.mxu1  ;;  %15060 = vst [vmem:[#allocation63_spill] sm:$0xff] %v12722_v55  ;;  %v3847_v55 = vrot.slane %v12418_v18, 1 }
 0x2af   : > { %15054 = vst [vmem:[#allocation57_spill] sm:$0xff] %v12707_v5  ;;  %v12728_v59 = vpop.f32.mrf.mxu0 }
 0x2b0   : > { %v12711_v26 = vpop.f32.mrf.mxu1  ;;  %15063 = vst [vmem:[#allocation66_spill] sm:$0xff] %v12728_v59 }
 0x2b1   : > { %15056 = vst [vmem:[#allocation59_spill] sm:$0xff] %v12711_v26 }
 0x2b2   : > { %v12713_v46 = vpop.f32.mrf.mxu1  ;;  %10493 = vmatmul.mubr.msk.bf16.gmra.mxu1 %vm2583_vm2, %v12595_v24 }
 0x2b3   : > { %15057 = vst [vmem:[#allocation60_spill] sm:$0xff] %v12713_v46  ;;  %10496 = vmatprep.mubr.msk.bf16.mxu1 %vm2583_vm2, %v3563_v1  ;;  %v12737_v1 = vpop.f32.mrf.mxu0 }
 0x2b4   : > { %v12720_v38 = vpop.f32.mrf.mxu1  ;;  %15064 = vst [vmem:[#allocation67_spill] sm:$0xff] %v12737_v1 }
 0x2b5   : > { %15059 = vst [vmem:[#allocation62_spill] sm:$0xff] %v12720_v38  ;;  %v12746_v38 = vpop.f32.mrf.mxu0 }
 0x2b6   : > { %v12724_v8 = vpop.f32.mrf.mxu1  ;;  %15065 = vst [vmem:[#allocation68_spill] sm:$0xff] %v12746_v38 }
 0x2b7   : > { %15061 = vst [vmem:[#allocation64_spill] sm:$0xff] %v12724_v8  ;;  %v14995_v8 = vshrl.u32 %v12418_v18, 16  ;;  %v12757_v52 = vpop.f32.mrf.mxu0 }
 0x2b8   : > { %v12726_v5 = vpop.f32.mrf.mxu1  ;;  %15066 = vst [vmem:[#allocation69_spill] sm:$0xff] %v12757_v52 }
 0x2b9   : > { %15062 = vst [vmem:[#allocation65_spill] sm:$0xff] %v12726_v5  ;;  %v14994_v5 = vshll.u32 %v12418_v18, 16  ;;  %v12764_v21 = vpop.f32.mrf.mxu0 }
 0x2ba   : > { %v12730_v26 = vpop.f32.mrf.mxu1  ;;  %10497 = vmatmul.mubr.msk.bf16.gmra.mxu1 %vm2583_vm2, %v12616_v35  ;;  %v4148_v35 = vrot.slane %v14995_v8, 1  ;;  %15067 = vst [vmem:[#allocation70_spill] sm:$0xff] %v12764_v21 }
 0x2bb   : > { %10500 = vmatprep.mubr.msk.bf16.mxu1 %vm2583_vm2, %v3567_v9  ;;  %v3848_v9 = vsel %vm2087_vm3, %v12627_v33, %v3847_v55  ;;  %v4151_v1 = vrot.slane %v14994_v5, 2  ;;  %v12773_v8 = vpop.f32.mrf.mxu0 }
 0x2bc   : > { %v12735_v24 = vpop.f32.mrf.mxu1  ;;  %15068 = vst [vmem:[#allocation71_spill] sm:$0xff] %v12773_v8 }
 0x2bd   : > { %v4152_v6 = vor.u32 %v4151_v1, %v4148_v35  ;;  %v12781_v35 = vpop.f32.mrf.mxu0 }
 0x2be   : > { %v12739_v0 = vpop.f32.mrf.mxu1  ;;  %15069 = vst [vmem:[#allocation72_spill] sm:$0xff] %v12781_v35  ;;  %v15071_v35 = vrot.slane %v11717_v56, 2 }
 0x2bf   : > { %v4153_v5 = vsel %vm4077_vm5, %v12288_v43, %v4152_v6  ;;  %v11186_v43 = vld [vmem:[%s14943_s3 + $0x38] sm:$0xff]  }
 0x2c0   : > { %v12744_v59 = vpop.f32.mrf.mxu1 }
 0x2c2   : > { %v12748_v46 = vpop.f32.mrf.mxu1  ;;  %10501 = vmatmul.mubr.msk.bf16.gmra.mxu1 %vm2583_vm2, %v3569_v44 }
 0x2c3   : > { %10504 = vmatprep.mubr.msk.bf16.mxu1 %vm2583_vm2, %v3848_v9  ;;  %v14998_v9 = vshll.u32 %v12427_v40, 16 }
 0x2c4   : > { %v12760_v2 = vpop.f32.mrf.mxu1 }
 0x2c5   : > { %v4157_v21 = vrot.slane %v14998_v9, 2 }
 0x2c6   : > { %v12762_v38 = vpop.f32.mrf.mxu1 }
 0x2c7   : > { %v4158_v8 = vsel %vm4077_vm5, %v4152_v6, %v4157_v21  ;;  %vm7800_vm5 = vcmask 1043456  }
 0x2c8   : > { %v12766_v44 = vpop.f32.mrf.mxu1 }
 0x2ca   : > { %v12768_v33 = vpop.f32.mrf.mxu1  ;;  %10505 = vmatmul.mubr.msk.bf16.gmra.mxu1 %vm2583_vm2, %v3847_v55  ;;  %v4437_v55 = vrot.slane %v11689_v61, 2 }
 0x2cb   : > { %10542 = vmatprep.mubr.msk.bf16.mxu1 %vm2583_vm2, %v4153_v5  ;;  %v12791_v5 = vpop.f32.mrf.mxu0 }
 0x2cc   : > { %v12777_v52 = vpop.f32.mrf.mxu1  ;;  %15070 = vst [vmem:[#allocation73_spill] sm:$0xff] %v12791_v5  ;;  %v4439_v9 = vsel %vm4436_vm8, %v4437_v55, %v15071_v35 }
 0x2cd   : > { %v12804_v40 = vpop.f32.mrf.mxu0 }
 0x2ce   : > { %v12779_v1 = vpop.f32.mrf.mxu1  ;;  %15072 = vst [vmem:[#allocation74_spill] sm:$0xff] %v12804_v40 }
 0x2cf   : > { %v12810_v6 = vpop.f32.mrf.mxu0 }
 0x2d0   : > { %v12785_v18 = vpop.f32.mrf.mxu1  ;;  %15073 = vst [vmem:[#allocation75_spill] sm:$0xff] %v12810_v6 }
 0x2d2   : > { %v12794_v36 = vpop.f32.mrf.mxu1  ;;  %10543 = vmatmul.mubr.msk.bf16.vlgmr.msra.gmra.mxu1 %vm2583_vm2, %v4158_v8 }
 0x2d3   : > { %10547 = vmatpush3.bf16.msra.mxu1 %v12657_v16  ;;  %10548 = vmatprep.mubr.msk.bf16.mxu1 %vm2583_vm2, %v4439_v9  ;;  %v12821_v16 = vpop.f32.mrf.mxu0 }
 0x2d4   : > { %v12802_v61 = vpop.f32.mrf.mxu1  ;;  %10622 = vmatprep.subr.bf16.mxu1 %v11186_v43  ;;  %15074 = vst [vmem:[#allocation76_spill] sm:$0xff] %v12821_v16 }
 0x2d5   : > { %v12825_v35 = vpop.f32.mrf.mxu0 }
 0x2d6   : > { %v12806_v5 = vpop.f32.mrf.mxu1  ;;  %15075 = vst [vmem:[#allocation77_spill] sm:$0xff] %v12825_v35 }
 0x2d8   : > { %v12808_v21 = vpop.f32.mrf.mxu1 }
 0x2da   : > { %v12812_v8 = vpop.f32.mrf.mxu1  ;;  %10549 = vmatmul.mubr.msk.bf16.vlgmr.msra.gmra.mxu1 %vm2583_vm2, %v12298_v23  ;;  %v12833_v23 = vpop.f32.mrf.mxu0 }
 0x2db   : > { %10623 = vmatpush3.bf16.msra.mxu1 %v11186_v43  ;;  %10552 = vmatprep.mubr.msk.bf16.mxu1 %vm2583_vm2, %v12309_v45  ;;  %15076 = vst [vmem:[#allocation78_spill] sm:$0xff] %v12833_v23 }
 0x2dc   : > { %v12818_v56 = vpop.f32.mrf.mxu1  ;;  %10698 = vmatprep.subr.bf16.mxu1 %v15037_v37  ;;  %v12841_v16 = vpop.f32.mrf.mxu0 }
 0x2dd   : > { %15078 = vst [vmem:[#allocation80_spill] sm:$0xff] %v12841_v16 }
 0x2de   : > { %v12823_v9 = vpop.f32.mrf.mxu1  ;;  %v12849_v37 = vpop.f32.mrf.mxu0 }
 0x2df   : > { %15080 = vst [vmem:[#allocation82_spill] sm:$0xff] %v12849_v37 }
 0x2e0   : > { %v12827_v55 = vpop.f32.mrf.mxu1 }
 0x2e2   : > { %v12829_v6 = vpop.f32.mrf.mxu1  ;;  %10553 = vmatmul.mubr.msk.bf16.gmra.mxu1 %vm2583_vm2, %v12314_v31 }
 0x2e3   : > { %10556 = vmatprep.mubr.msk.bf16.mxu1 %vm2583_vm2, %v12336_v4  ;;  %v12855_v4 = vpop.f32.mrf.mxu0 }
 0x2e4   : > { %v12837_v45 = vpop.f32.mrf.mxu1  ;;  %15081 = vst [vmem:[#allocation83_spill] sm:$0xff] %v12855_v4 }
 0x2e5   : > { %v12861_v16 = vpop.f32.mrf.mxu0 }
 0x2e6   : > { %v12839_v43 = vpop.f32.mrf.mxu1  ;;  %15084 = vst [vmem:[#allocation86_spill] sm:$0xff] %v12861_v16 }
 0x2e7   : > { %15077 = vst [vmem:[#allocation79_spill] sm:$0xff] %v12839_v43 }
 0x2e8   : > { %v12843_v40 = vpop.f32.mrf.mxu1 }
 0x2e9   : > { %15079 = vst [vmem:[#allocation81_spill] sm:$0xff] %v12843_v40 }
 0x2ea   : > { %v12845_v35 = vpop.f32.mrf.mxu1  ;;  %10557 = vmatmul.mubr.msk.bf16.gmra.mxu1 %vm2583_vm2, %v12341_v41 }
 0x2eb   : > { %10560 = vmatprep.mubr.msk.bf16.mxu1 %vm2583_vm2, %v12352_v42  ;;  %v12871_v42 = vpop.f32.mrf.mxu0 }
 0x2ec   : > { %v12853_v31 = vpop.f32.mrf.mxu1  ;;  %15085 = vst [vmem:[#allocation87_spill] sm:$0xff] %v12871_v42 }
 0x2ee   : > { %v12857_v23 = vpop.f32.mrf.mxu1 }
 0x2ef   : > { %15082 = vst [vmem:[#allocation84_spill] sm:$0xff] %v12857_v23  ;;  %v12877_v23 = vpop.f32.mrf.mxu0 }
 0x2f0   : > { %v12859_v43 = vpop.f32.mrf.mxu1  ;;  %15087 = vst [vmem:[#allocation89_spill] sm:$0xff] %v12877_v23  ;;  %v3379_v23 = vadd.f32 %v12730_v26, %v12496_v48 }
 0x2f1   : > { %15083 = vst [vmem:[#allocation85_spill] sm:$0xff] %v12859_v43  ;;  %v12883_v16 = vpop.f32.mrf.mxu0 }
 0x2f2   : > { %v12863_v40 = vpop.f32.mrf.mxu1  ;;  %10561 = vmatmul.mubr.msk.bf16.gmra.mxu1 %vm2583_vm2, %v12357_v58  ;;  %15089 = vst [vmem:[#allocation91_spill] sm:$0xff] %v12883_v16 }
 0x2f3   : > { %10564 = vmatprep.mubr.msk.bf16.mxu1 %vm2583_vm2, %v12368_v22  ;;  %v12891_v42 = vpop.f32.mrf.mxu0 }
 0x2f4   : > { %v12869_v41 = vpop.f32.mrf.mxu1  ;;  %15091 = vst [vmem:[#allocation93_spill] sm:$0xff] %v12891_v42 }
 0x2f6   : > { %v12873_v37 = vpop.f32.mrf.mxu1 }
 0x2f7   : > { %15086 = vst [vmem:[#allocation88_spill] sm:$0xff] %v12873_v37 }
 0x2f8   : > { %v12875_v4 = vpop.f32.mrf.mxu1 }
 0x2fa   : > { %v12879_v43 = vpop.f32.mrf.mxu1  ;;  %10565 = vmatmul.mubr.msk.bf16.gmra.mxu1 %vm2583_vm2, %v12373_v10  ;;  %v12899_v10 = vpop.f32.mrf.mxu0 }
 0x2fb   : > { %15088 = vst [vmem:[#allocation90_spill] sm:$0xff] %v12879_v43  ;;  %10568 = vmatprep.mubr.msk.bf16.mxu1 %vm2583_vm2, %v12384_v27  ;;  %15093 = vst [vmem:[#allocation95_spill] sm:$0xff] %v12899_v10  ;;  %v3371_v27 = vadd.f32 %v12735_v24, %v12511_v50 }
 0x2fc   : > { %v12887_v58 = vpop.f32.mrf.mxu1  ;;  %v12911_v26 = vpop.f32.mrf.mxu0 }
 0x2fe   : > { %v12889_v22 = vpop.f32.mrf.mxu1  ;;  %v12917_v24 = vpop.f32.mrf.mxu0 }
 0x2ff   : > { %15090 = vst [vmem:[#allocation92_spill] sm:$0xff] %v12889_v22 }
 0x300   : > { %v12893_v37 = vpop.f32.mrf.mxu1 }
 0x301   : > { %15092 = vst [vmem:[#allocation94_spill] sm:$0xff] %v12893_v37  ;;  %v3382_v37 = vadd.f32 %v12739_v0, %v12518_v32  ;;  %v3387_v32 = vadd.f32 %v12760_v2, %v12546_v7 }
 0x302   : > { %v10436_v43 = vpop.f32.mrf.mxu1  ;;  %10569 = vmatmul.mubr.msk.bf16.gmra.mxu1 %vm2583_vm2, %v12389_v14  ;;  %v3374_v14 = vadd.f32 %v12744_v59, %v12533_v11  ;;  %v12931_v11 = vpop.f32.mrf.mxu0 }
 0x303   : > { %v12903_v16 = vadd.f32 %v10436_v43, %v3379_v23  ;;  %10572 = vmatprep.mubr.msk.bf16.mxu1 %vm2583_vm2, %v12400_v13  ;;  %v3395_v13 = vadd.f32 %v12748_v46, %v12536_v34  ;;  %v3398_v34 = vadd.f32 %v12762_v38, %v12558_v17  ;;  %v4982_v17 = vrot.slane %v11766_v12, 2 }
 0x304   : > { %v3664_v42 = vpop.f32.mrf.mxu1  ;;  %v12941_v2 = vpop.f32.mrf.mxu0  ;;  %v4983_v38 = vrot.slane %v11758_v63, 3  ;;  %v3414_v12 = vadd.f32 %v12779_v1, %v12601_v19  ;;  %v15101_v1 = vld [vmem:[#allocation14_spill] sm:$0xff] }
 0x305   : > { %v12909_v22 = vadd.f32 %v3664_v42, %v3371_v27 }
 0x306   : > { %v10437_v48 = vpop.f32.mrf.mxu1 }
 0x307   : > { %v12915_v10 = vadd.f32 %v10437_v48, %v3382_v37 }
 0x308   : > { %v3667_v50 = vpop.f32.mrf.mxu1 }
 0x309   : > { %v12921_v23 = vadd.f32 %v3667_v50, %v3374_v14  ;;  %v15095_v50 = vld [vmem:[#allocation11_spill] sm:$0xff] }
 0x30a   : > { %v10440_v43 = vpop.f32.mrf.mxu1  ;;  %10573 = vmatmul.mubr.msk.bf16.gmra.mxu1 %vm2583_vm2, %v12405_v25  ;;  %v3390_v25 = vadd.f32 %v12766_v44, %v12568_v3  ;;  %v3403_v3 = vadd.f32 %v12777_v52, %v12586_v54  ;;  %v15097_v54 = vld [vmem:[#allocation45_spill] sm:$0xff] }
 0x30b   : > { %v12927_v0 = vadd.f32 %v10440_v43, %v3395_v13  ;;  %10576 = vmatprep.mubr.msk.bf16.mxu1 %vm2583_vm2, %v12416_v29  ;;  %v3411_v29 = vadd.f32 %v12768_v33, %v12579_v49  ;;  %v15094_v49 = vld [vmem:[#allocation12_spill] sm:$0xff]  ;;  %v4980_v13 = vrot.slane %v15095_v50, 3  ;;  %v12959_v43 = vpop.f32.mrf.mxu0  ;;  %v3406_v52 = vadd.f32 %v12785_v18, %v15097_v54 }
 0x30c   : > { %v3680_v37 = vpop.f32.mrf.mxu1  ;;  %v4979_v33 = vrot.slane %v15094_v49, 2  ;;  %15096 = vst [vmem:[#allocation12_spill] sm:$0xff] %v12959_v43  ;;  %v3430_v54 = vadd.f32 %v12806_v5, %v12633_v51  ;;  %v3443_v51 = vadd.f32 %v12812_v8, %v12644_v60 }
 0x30d   : > { %v12935_v46 = vadd.f32 %v3680_v37, %v3387_v32  ;;  %v4984_v32 = vor.u32 %v4983_v38, %v4982_v17  ;;  %v15102_v38 = vld [vmem:[#allocation44_spill] sm:$0xff] }
 0x30e   : > { %v10441_v59 = vpop.f32.mrf.mxu1 }
 0x30f   : > { %v12939_v42 = vadd.f32 %v10441_v59, %v3398_v34  ;;  %v4981_v34 = vor.u32 %v4980_v13, %v4979_v33  ;;  %v15098_v59 = vld [vmem:[#allocation13_spill] sm:$0xff]  ;;  %v15104_v33 = vld [vmem:[#allocation15_spill] sm:$0xff]  ;;  %v3419_v13 = vadd.f32 %v12802_v61, %v12623_v62  ;;  %v15106_v61 = vld [vmem:[#allocation18_spill] sm:$0xff] }
 0x310   : > { %v3683_v7 = vpop.f32.mrf.mxu1  ;;  %v4991_v50 = vrot.slane %v15104_v33, 3 }
 0x311   : > { %v12945_v27 = vadd.f32 %v3683_v7, %v3390_v25  ;;  %v4987_v25 = vrot.slane %v15098_v59, 3  ;;  %v12970_v7 = vpop.f32.mrf.mxu0  ;;  %v4985_v18 = vsel %vm4978_vm10, %v4981_v34, %v4984_v32 }
 0x312   : > { %v10444_v48 = vpop.f32.mrf.mxu1  ;;  %10577 = vmatmul.mubr.msk.bf16.gmra.mxu1 %vm2583_vm2, %v12423_v57  ;;  %15099 = vst [vmem:[#allocation11_spill] sm:$0xff] %v12970_v7 }
 0x313   : > { %v12953_v44 = vadd.f32 %v10444_v48, %v3411_v29  ;;  %10580 = vmatprep.mubr.msk.bf16.mxu1 %vm2583_vm2, %v12436_v28  ;;  %v15100_v29 = vld [vmem:[#allocation46_spill] sm:$0xff] }
 0x314   : > { %v3696_v14 = vpop.f32.mrf.mxu1  ;;  %v3427_v48 = vadd.f32 %v12794_v36, %v15100_v29  ;;  %v3422_v29 = vadd.f32 %v12808_v21, %v12640_v20  ;;  %v15109_v21 = vld [vmem:[#allocation20_spill] sm:$0xff] }
 0x315   : > { %v12963_v57 = vadd.f32 %v3696_v14, %v3403_v3  ;;  %v4986_v3 = vrot.slane %v15101_v1, 2  ;;  %v15103_v14 = vld [vmem:[#allocation16_spill] sm:$0xff] }
 0x316   : > { %v10445_v63 = vpop.f32.mrf.mxu1  ;;  %v4990_v49 = vrot.slane %v15103_v14, 2  ;;  %v4998_v14 = vrot.slane %v15109_v21, 2  ;;  %v3451_v21 = vadd.f32 %v12837_v45, %v12669_v47  ;;  %v15122_v45 = vld [vmem:[#allocation26_spill] sm:$0xff] }
 0x317   : > { %v12967_v37 = vadd.f32 %v10445_v63, %v3414_v12  ;;  %v12987_v63 = vpop.f32.mrf.mxu0 }
 0x318   : > { %v3699_v28 = vpop.f32.mrf.mxu1  ;;  %15105 = vst [vmem:[#allocation45_spill] sm:$0xff] %v12987_v63  ;;  %v4992_v59 = vor.u32 %v4991_v50, %v4990_v49  ;;  %v15110_v49 = vld [vmem:[#allocation19_spill] sm:$0xff]  ;;  %v3435_v50 = vadd.f32 %v12818_v56, %v12650_v53 }
 0x319   : > { %v12974_v19 = vadd.f32 %v3699_v28, %v3406_v52  ;;  %v4988_v28 = vor.u32 %v4987_v25, %v4986_v3  ;;  %v4999_v33 = vrot.slane %v15110_v49, 3  ;;  %v15118_v49 = vld [vmem:[#allocation47_spill] sm:$0xff] }
 0x31a   : > { %v10448_v17 = vpop.f32.mrf.mxu1  ;;  %10581 = vmatmul.mubr.msk.bf16.gmra.mxu1 %vm2583_vm2, %v15102_v38 }
 0x31b   : > { %v12984_v12 = vadd.f32 %v10448_v17, %v3427_v48  ;;  %10624 = vmatprep.mubr.msk.bf16.mxu1 %vm2583_vm2, %v4985_v18  ;;  %v4994_v48 = vrot.slane %v15106_v61, 2  ;;  %v15107_v17 = vld [vmem:[#allocation17_spill] sm:$0xff]  ;;  %v12999_v18 = vpop.f32.mrf.mxu0  ;;  %v4989_v25 = vsel %vm4978_vm10, %v4984_v32, %v4988_v28  ;;  %v4993_v20 = vsel %vm4978_vm10, %v4988_v28, %v4992_v59 }
 0x31c   : > { %v3712_v36 = vpop.f32.mrf.mxu1  ;;  %v4995_v38 = vrot.slane %v15107_v17, 3  ;;  %15108 = vst [vmem:[#allocation13_spill] sm:$0xff] %v12999_v18  ;;  %v3446_v32 = vadd.f32 %v12823_v9, %v12652_v30  ;;  %v15113_v30 = vld [vmem:[#allocation22_spill] sm:$0xff] }
 0x31d   : > { %v12991_v52 = vadd.f32 %v3712_v36, %v3419_v13  ;;  %v13015_v36 = vpop.f32.mrf.mxu0  ;;  %v5002_v9 = vrot.slane %v15113_v30, 2 }
 0x31e   : > { %v10449_v34 = vpop.f32.mrf.mxu1  ;;  %v4996_v8 = vor.u32 %v4995_v38, %v4994_v48  ;;  %15111 = vst [vmem:[#allocation46_spill] sm:$0xff] %v13015_v36  ;;  %v3459_v48 = vadd.f32 %v12829_v6, %v12667_v39  ;;  %v15114_v38 = vld [vmem:[#allocation21_spill] sm:$0xff] }
 0x31f   : > { %v12995_v1 = vadd.f32 %v10449_v34, %v3430_v54  ;;  %v5000_v34 = vor.u32 %v4999_v33, %v4998_v14  ;;  %v13026_v61 = vpop.f32.mrf.mxu0  ;;  %v15119_v33 = vld [vmem:[#allocation79_spill] sm:$0xff] }
 0x320   : > { %v3715_v62 = vpop.f32.mrf.mxu1  ;;  %v4997_v56 = vsel %vm4978_vm10, %v4992_v59, %v4996_v8  ;;  %15112 = vst [vmem:[#allocation14_spill] sm:$0xff] %v13026_v61  ;;  %v15156_v61 = vld [vmem:[#allocation65_spill] sm:$0xff] }
 0x321   : > { %v13003_v5 = vadd.f32 %v3715_v62, %v3422_v29  ;;  %v3438_v29 = vadd.f32 %v12827_v55, %v12664_v15  ;;  %v5001_v15 = vsel %vm4978_vm10, %v4996_v8, %v5000_v34  ;;  %v15115_v55 = vld [vmem:[#allocation24_spill] sm:$0xff]  ;;  %v13043_v6 = vpop.f32.mrf.mxu0 }
 0x322   : > { %v10452_v3 = vpop.f32.mrf.mxu1  ;;  %10625 = vmatmul.mubr.msk.bf16.vlgmr.msra.gmra.mxu1 %vm2583_vm2, %v4989_v25  ;;  %15117 = vst [vmem:[#allocation44_spill] sm:$0xff] %v13043_v6 }
 0x323   : > { %v13012_v13 = vadd.f32 %v10452_v3, %v3443_v51  ;;  %10628 = vmatprep.mubr.msk.bf16.mxu1 %vm2583_vm2, %v4993_v20  ;;  %v5003_v51 = vrot.slane %v15114_v38, 3  ;;  %v5006_v3 = vrot.slane %v15115_v55, 2  ;;  %v15116_v20 = vld [vmem:[#allocation23_spill] sm:$0xff]  ;;  %v13054_v38 = vpop.f32.mrf.mxu0 }
 0x324   : > { %v3728_v60 = vpop.f32.mrf.mxu1  ;;  %v5007_v59 = vrot.slane %v15116_v20, 3  ;;  %15123 = vst [vmem:[#allocation16_spill] sm:$0xff] %v13054_v38 }
 0x325   : > { %v13019_v54 = vadd.f32 %v3728_v60, %v3435_v50  ;;  %v3462_v50 = vadd.f32 %v15119_v33, %v15118_v49  ;;  %v5004_v8 = vor.u32 %v5003_v51, %v5002_v9  ;;  %v15125_v9 = vld [vmem:[#allocation25_spill] sm:$0xff]  ;;  %v15127_v49 = vld [vmem:[#allocation27_spill] sm:$0xff] }
 0x326   : > { %v10453_v28 = vpop.f32.mrf.mxu1  ;;  %v5011_v51 = vrot.slane %v15125_v9, 3  ;;  %v5015_v33 = vrot.slane %v15127_v49, 3  ;;  %v15132_v9 = vld [vmem:[#allocation53_spill] sm:$0xff] }
 0x327   : > { %v13023_v62 = vadd.f32 %v10453_v28, %v3446_v32  ;;  %v5008_v28 = vor.u32 %v5007_v59, %v5006_v3  ;;  %v5005_v20 = vsel %vm4978_vm10, %v5000_v34, %v5004_v8  ;;  %v13071_v34 = vpop.f32.mrf.mxu0 }
 0x328   : > { %v3731_v53 = vpop.f32.mrf.mxu1  ;;  %15129 = vst [vmem:[#allocation15_spill] sm:$0xff] %v13071_v34  ;;  %v15137_v34 = vld [vmem:[#allocation54_spill] sm:$0xff] }
 0x329   : > { %v13030_v17 = vadd.f32 %v3731_v53, %v3438_v29  ;;  %v15120_v29 = vld [vmem:[#allocation48_spill] sm:$0xff]  ;;  %v15121_v53 = vld [vmem:[#allocation81_spill] sm:$0xff]  ;;  %v5009_v59 = vsel %vm4978_vm10, %v5004_v8, %v5008_v28  ;;  %v13083_v6 = vpop.f32.mrf.mxu0 }
 0x32a   : > { %v10456_v25 = vpop.f32.mrf.mxu1  ;;  %10629 = vmatmul.mubr.msk.bf16.gmra.mxu1 %vm2583_vm2, %v4997_v56  ;;  %v3454_v56 = vadd.f32 %v15121_v53, %v15120_v29  ;;  %v15130_v53 = vld [vmem:[#allocation51_spill] sm:$0xff]  ;;  %15136 = vst [vmem:[#allocation18_spill] sm:$0xff] %v13083_v6 }
 0x32b   : > { %v13040_v14 = vadd.f32 %v10456_v25, %v3459_v48  ;;  %10632 = vmatprep.mubr.msk.bf16.mxu1 %vm2583_vm2, %v5001_v15  ;;  %v5010_v48 = vrot.slane %v15122_v45, 2  ;;  %v15124_v25 = vld [vmem:[#allocation49_spill] sm:$0xff] }
 0x32c   : > { %v3744_v39 = vpop.f32.mrf.mxu1  ;;  %v3475_v15 = vadd.f32 %v12845_v35, %v15124_v25 }
 0x32d   : > { %v13047_v60 = vadd.f32 %v3744_v39, %v3451_v21  ;;  %v15126_v21 = vld [vmem:[#allocation28_spill] sm:$0xff]  ;;  %v5012_v8 = vor.u32 %v5011_v51, %v5010_v48 }
 0x32e   : > { %v10457_v32 = vpop.f32.mrf.mxu1  ;;  %v5014_v39 = vrot.slane %v15126_v21, 2  ;;  %v15133_v21 = vld [vmem:[#allocation85_spill] sm:$0xff] }
 0x32f   : > { %v13051_v30 = vadd.f32 %v10457_v32, %v3462_v50  ;;  %v15128_v50 = vld [vmem:[#allocation50_spill] sm:$0xff]  ;;  %v3470_v49 = vadd.f32 %v15133_v21, %v15132_v9  ;;  %v5013_v48 = vsel %vm4978_vm10, %v5008_v28, %v5012_v8  ;;  %v15142_v28 = vld [vmem:[#allocation57_spill] sm:$0xff] }
 0x330   : > { %v3747_v47 = vpop.f32.mrf.mxu1  ;;  %v3467_v32 = vadd.f32 %v12853_v31, %v15128_v50 }
 0x331   : > { %v13058_v55 = vadd.f32 %v3747_v47, %v3454_v56  ;;  %v15131_v56 = vld [vmem:[#allocation84_spill] sm:$0xff] }
 0x332   : > { %v10460_v3 = vpop.f32.mrf.mxu1  ;;  %10633 = vmatmul.mubr.msk.bf16.gmra.mxu1 %vm2583_vm2, %v5005_v20  ;;  %v3478_v47 = vadd.f32 %v15131_v56, %v15130_v53  ;;  %v5016_v20 = vor.u32 %v5015_v33, %v5014_v39  ;;  %v3491_v53 = vadd.f32 %v12863_v40, %v15137_v34  ;;  %v15138_v33 = vld [vmem:[#allocation32_spill] sm:$0xff]  ;;  %v15139_v56 = vld [vmem:[#allocation31_spill] sm:$0xff] }
 0x333   : > { %v13068_v29 = vadd.f32 %v10460_v3, %v3475_v15  ;;  %10636 = vmatprep.mubr.msk.bf16.mxu1 %vm2583_vm2, %v5009_v59  ;;  %v15134_v15 = vld [vmem:[#allocation30_spill] sm:$0xff]  ;;  %v15135_v59 = vld [vmem:[#allocation29_spill] sm:$0xff] }
 0x334   : > { %v3760_v35 = vpop.f32.mrf.mxu1  ;;  %v5018_v3 = vrot.slane %v15134_v15, 2  ;;  %v5019_v50 = vrot.slane %v15135_v59, 3  ;;  %v5017_v39 = vsel %vm4978_vm10, %v5012_v8, %v5016_v20 }
 0x335   : > { %v13075_v45 = vadd.f32 %v3760_v35, %v3467_v32  ;;  %v5022_v35 = vrot.slane %v15138_v33, 2  ;;  %v15144_v33 = vld [vmem:[#allocation59_spill] sm:$0xff] }
 0x336   : > { %v10461_v25 = vpop.f32.mrf.mxu1  ;;  %v5020_v34 = vor.u32 %v5019_v50, %v5018_v3  ;;  %v15146_v3 = vld [vmem:[#allocation60_spill] sm:$0xff]  ;;  %v15147_v50 = vld [vmem:[#allocation90_spill] sm:$0xff] }
 0x337   : > { %v13079_v38 = vadd.f32 %v10461_v25, %v3478_v47  ;;  %v5023_v47 = vrot.slane %v15139_v56, 3  ;;  %v15140_v25 = vld [vmem:[#allocation56_spill] sm:$0xff]  ;;  %v3486_v56 = vadd.f32 %v12875_v4, %v15144_v33  ;;  %v15152_v33 = vld [vmem:[#allocation62_spill] sm:$0xff] }
 0x338   : > { %v3763_v31 = vpop.f32.mrf.mxu1  ;;  %v3483_v9 = vadd.f32 %v12869_v41, %v15140_v25 }
 0x339   : > { %v13087_v32 = vadd.f32 %v3763_v31, %v3470_v49  ;;  %v13099_v49 = vpop.f32.mrf.mxu0  ;;  %v15143_v31 = vld [vmem:[#allocation88_spill] sm:$0xff] }
 0x33a   : > { %v10464_v51 = vpop.f32.mrf.mxu1  ;;  %10637 = vmatmul.mubr.msk.bf16.gmra.mxu1 %vm2583_vm2, %v5013_v48  ;;  %15141 = vst [vmem:[#allocation17_spill] sm:$0xff] %v13099_v49  ;;  %v3494_v15 = vadd.f32 %v15143_v31, %v15142_v28  ;;  %v5024_v48 = vor.u32 %v5023_v47, %v5022_v35  ;;  %v15148_v28 = vld [vmem:[#allocation34_spill] sm:$0xff]  ;;  %v15150_v47 = vld [vmem:[#allocation36_spill] sm:$0xff] }
 0x33b   : > { %v13096_v21 = vadd.f32 %v10464_v51, %v3491_v53  ;;  %10640 = vmatprep.mubr.msk.bf16.mxu1 %vm2583_vm2, %v5017_v39  ;;  %v5021_v53 = vsel %vm4978_vm10, %v5016_v20, %v5020_v34  ;;  %v13110_v51 = vpop.f32.mrf.mxu0  ;;  %v3507_v39 = vadd.f32 %v15147_v50, %v15146_v3  ;;  %v15154_v3 = vld [vmem:[#allocation64_spill] sm:$0xff] }
 0x33c   : > { %v3776_v40 = vpop.f32.mrf.mxu1  ;;  %15145 = vst [vmem:[#allocation20_spill] sm:$0xff] %v13110_v51  ;;  %v5025_v4 = vsel %vm4978_vm10, %v5020_v34, %v5024_v48  ;;  %v3499_v51 = vadd.f32 %v12887_v58, %v15152_v33  ;;  %v15155_v50 = vld [vmem:[#allocation92_spill] sm:$0xff]  ;;  %v15159_v33 = vld [vmem:[#allocation38_spill] sm:$0xff] }
 0x33d   : > { %v13103_v59 = vadd.f32 %v3776_v40, %v3483_v9  ;;  %v5026_v9 = vrot.slane %v15148_v28, 2  ;;  %v15149_v40 = vld [vmem:[#allocation33_spill] sm:$0xff]  ;;  %v3510_v28 = vadd.f32 %v15155_v50, %v15154_v3 }
 0x33e   : > { %v10465_v8 = vpop.f32.mrf.mxu1  ;;  %v5027_v31 = vrot.slane %v15149_v40, 3  ;;  %v15160_v3 = vld [vmem:[#allocation37_spill] sm:$0xff] }
 0x33f   : > { %v13107_v6 = vadd.f32 %v10465_v8, %v3494_v15  ;;  %v5030_v15 = vrot.slane %v15150_v47, 2  ;;  %v15151_v8 = vld [vmem:[#allocation35_spill] sm:$0xff] }
 0x340   : > { %v3779_v41 = vpop.f32.mrf.mxu1  ;;  %v5031_v20 = vrot.slane %v15151_v8, 3  ;;  %v5028_v34 = vor.u32 %v5027_v31, %v5026_v9  ;;  %v15157_v8 = vld [vmem:[#allocation94_spill] sm:$0xff]  ;;  %v15161_v31 = vld [vmem:[#allocation40_spill] sm:$0xff] }
 0x341   : > { %v13114_v25 = vadd.f32 %v3779_v41, %v3486_v56  ;;  %v13127_v41 = vpop.f32.mrf.mxu0  ;;  %v3502_v36 = vadd.f32 %v15157_v8, %v15156_v61  ;;  %v5038_v61 = vrot.slane %v15161_v31, 2 }
 0x342   : > { %v10468_v35 = vpop.f32.mrf.mxu1  ;;  %10641 = vmatmul.mubr.msk.bf16.gmra.mxu1 %vm2583_vm2, %v5021_v53  ;;  %15153 = vst [vmem:[#allocation19_spill] sm:$0xff] %v13127_v41  ;;  %v5032_v47 = vor.u32 %v5031_v20, %v5030_v15  ;;  %v5034_v41 = vrot.slane %v15159_v33, 2  ;;  %v15162_v15 = vld [vmem:[#allocation39_spill] sm:$0xff]  ;;  %v15164_v33 = vld [vmem:[#allocation42_spill] sm:$0xff] }
 0x343   : > { %v13124_v49 = vadd.f32 %v10468_v35, %v3507_v39  ;;  %10644 = vmatprep.mubr.msk.bf16.mxu1 %vm2583_vm2, %v5025_v4  ;;  %v13137_v39 = vpop.f32.mrf.mxu0  ;;  %v5029_v4 = vsel %vm4978_vm10, %v5024_v48, %v5028_v34  ;;  %v5039_v20 = vrot.slane %v15162_v15, 3 }
 0x344   : > { %v3792_v56 = vpop.f32.mrf.mxu1  ;;  %15158 = vst [vmem:[#allocation22_spill] sm:$0xff] %v13137_v39  ;;  %v5033_v9 = vsel %vm4978_vm10, %v5028_v34, %v5032_v47 }
 0x345   : > { %v13131_v53 = vadd.f32 %v3792_v56, %v3499_v51  ;;  %v5035_v51 = vrot.slane %v15160_v3, 3  ;;  %v13152_v48 = vpop.f32.mrf.mxu0  ;;  %v5046_v3 = vshrl.u32 %v15164_v33, 16 }
 0x346   : > { %v10469_v40 = vpop.f32.mrf.mxu1  ;;  %15163 = vst [vmem:[#allocation21_spill] sm:$0xff] %v13152_v48 }
 0x347   : > { %v13135_v18 = vadd.f32 %v10469_v40, %v3510_v28  ;;  %v5036_v40 = vor.u32 %v5035_v51, %v5034_v41 }
 0x348   : > { %v3795_v58 = vpop.f32.mrf.mxu1 }
 0x349   : > { %v13139_v35 = vadd.f32 %v3795_v58, %v3502_v36  ;;  %v5040_v58 = vor.u32 %v5039_v20, %v5038_v61  ;;  %v5048_v20 = vrot.slane %v5046_v3, 2 }
 0x34a   : > { %v10474_v56 = vpop.f32.mrf.mxu1  ;;  %10645 = vmatmul.mubr.msk.bf16.gmra.mxu1 %vm2583_vm2, %v5029_v4 }
 0x34b   : > { %v13149_v50 = vadd.f32 %v10474_v56, %v12903_v16  ;;  %10648 = vmatprep.mubr.msk.bf16.mxu1 %vm2583_vm2, %v5033_v9  ;;  %v13163_v16 = vpop.f32.mrf.mxu0  ;;  %v5037_v56 = vsel %vm4978_vm10, %v5032_v47, %v5036_v40  ;;  %v15166_v9 = vld [vmem:[#allocation41_spill] sm:$0xff]  ;;  %v15169_v47 = vshll.u32 %v15164_v33, 16 }
 0x34c   : > { %v3895_v36 = vpop.f32.mrf.mxu1  ;;  %15165 = vst [vmem:[#allocation24_spill] sm:$0xff] %v13163_v16  ;;  %v15167_v31 = vshrl.u32 %v15166_v9, 16 }
 0x34d   : > { %v13155_v28 = vadd.f32 %v3895_v36, %v12909_v22  ;;  %v15168_v22 = vshll.u32 %v15166_v9, 16  ;;  %v13178_v16 = vpop.f32.mrf.mxu0 }
 0x34e   : > { %v10475_v8 = vpop.f32.mrf.mxu1  ;;  %v5042_v15 = vrot.slane %v15167_v31, 2  ;;  %15170 = vst [vmem:[#allocation23_spill] sm:$0xff] %v13178_v16 }
 0x34f   : > { %v13158_v34 = vadd.f32 %v10475_v8, %v12915_v10  ;;  %v5043_v36 = vrot.slane %v15168_v22, 3  ;;  %v5041_v10 = vsel %vm4978_vm10, %v5036_v40, %v5040_v58  ;;  %v5049_v8 = vrot.slane %v15169_v47, 3  ;;  %v15171_v22 = vld [vmem:[#allocation43_spill] sm:$0xff] }
 0x350   : > { %v13160_v4 = vpop.f32.mrf.mxu1  ;;  %v5056_v40 = vshll.u32 %v15171_v22, 16 }
 0x351   : > { %v5044_v31 = vor.u32 %v5043_v36, %v5042_v15  ;;  %v5050_v3 = vor.u32 %v5049_v8, %v5048_v20 }
 0x352   : > { %v10478_v41 = vpop.f32.mrf.mxu1  ;;  %10649 = vmatmul.mubr.msk.bf16.gmra.mxu1 %vm2583_vm2, %v5037_v56  ;;  %v5053_v56 = vshrl.u32 %v15171_v22, 16  ;;  %v5058_v16 = vrot.slane %v5056_v40, 3 }
 0x353   : > { %v13173_v51 = vadd.f32 %v10478_v41, %v12927_v0  ;;  %10652 = vmatprep.mubr.msk.bf16.mxu1 %vm2583_vm2, %v5041_v10  ;;  %v13190_v10 = vpop.f32.mrf.mxu0  ;;  %v5045_v33 = vsel %vm4978_vm10, %v5040_v58, %v5044_v31  ;;  %v5051_v15 = vsel %vm4978_vm10, %v5044_v31, %v5050_v3 }
 0x354   : > { %v3911_v61 = vpop.f32.mrf.mxu1  ;;  %15172 = vst [vmem:[#allocation47_spill] sm:$0xff] %v13190_v10  ;;  %v5055_v47 = vrot.slane %v5053_v56, 2 }
 0x355   : > { %v13181_v9 = vadd.f32 %v3911_v61, %v12935_v46 }
 0x356   : > { %v10479_v48 = vpop.f32.mrf.mxu1  ;;  %v5059_v20 = vor.u32 %v5058_v16, %v5055_v47 }
 0x357   : > { %v13186_v0 = vadd.f32 %v10479_v48, %v12939_v42  ;;  %v13199_v48 = vpop.f32.mrf.mxu0 }
 0x358   : > { %v13188_v41 = vpop.f32.mrf.mxu1  ;;  %15173 = vst [vmem:[#allocation79_spill] sm:$0xff] %v13199_v48 }
 0x359   : > { %v13209_v56 = vpop.f32.mrf.mxu0 }
 0x35a   : > { %v10482_v46 = vpop.f32.mrf.mxu1  ;;  %10653 = vmatmul.mubr.msk.bf16.gmra.mxu1 %vm2583_vm2, %v5045_v33  ;;  %15174 = vst [vmem:[#allocation48_spill] sm:$0xff] %v13209_v56 }
 0x35b   : > { %v13196_v36 = vadd.f32 %v10482_v46, %v12953_v44  ;;  %10656 = vmatprep.mubr.msk.bf16.mxu1 %vm2583_vm2, %v5051_v15  ;;  %v5060_v44 = vsel %vm4978_vm10, %v5050_v3, %v5059_v20 }
 0x35c   : > { %v3927_v42 = vpop.f32.mrf.mxu1 }
 0x35d   : > { %v13202_v61 = vadd.f32 %v3927_v42, %v12963_v57  ;;  %v13216_v57 = vpop.f32.mrf.mxu0 }
 0x35e   : > { %v10483_v58 = vpop.f32.mrf.mxu1  ;;  %15175 = vst [vmem:[#allocation81_spill] sm:$0xff] %v13216_v57 }
 0x35f   : > { %v13205_v8 = vadd.f32 %v10483_v58, %v12967_v37  ;;  %v13226_v15 = vpop.f32.mrf.mxu0 }
 0x360   : > { %v13207_v22 = vpop.f32.mrf.mxu1  ;;  %15176 = vst [vmem:[#allocation26_spill] sm:$0xff] %v13226_v15 }
 0x361   : > { %v13231_v20 = vpop.f32.mrf.mxu0 }
 0x362   : > { %v10486_v31 = vpop.f32.mrf.mxu1  ;;  %10657 = vmatmul.mubr.msk.bf16.gmra.mxu1 %vm2583_vm2, %v5060_v44  ;;  %15177 = vst [vmem:[#allocation49_spill] sm:$0xff] %v13231_v20 }
 0x363   : > { %v13214_v40 = vadd.f32 %v10486_v31, %v12984_v12  ;;  %v13241_v31 = vpop.f32.mrf.mxu0 }
 0x364   : > { %v3943_v33 = vpop.f32.mrf.mxu1  ;;  %15178 = vst [vmem:[#allocation25_spill] sm:$0xff] %v13241_v31 }
 0x365   : > { %v13219_v16 = vadd.f32 %v3943_v33, %v12991_v52 }
 0x366   : > { %v10487_v37 = vpop.f32.mrf.mxu1 }
 0x367   : > { %v13222_v47 = vadd.f32 %v10487_v37, %v12995_v1 }
 0x368   : > { %v13224_v46 = vpop.f32.mrf.mxu1 }
 0x36a   : > { %v10490_v3 = vpop.f32.mrf.mxu1 }
 0x36b   : > { %v13229_v42 = vadd.f32 %v10490_v3, %v13012_v13  ;;  %v13246_v3 = vpop.f32.mrf.mxu0 }
 0x36c   : > { %v3959_v12 = vpop.f32.mrf.mxu1  ;;  %15179 = vst [vmem:[#allocation28_spill] sm:$0xff] %v13246_v3 }
 0x36d   : > { %v13234_v58 = vadd.f32 %v3959_v12, %v13019_v54 }
 0x36e   : > { %v10491_v52 = vpop.f32.mrf.mxu1 }
 0x36f   : > { %v13237_v44 = vadd.f32 %v10491_v52, %v13023_v62  ;;  %v13256_v52 = vpop.f32.mrf.mxu0 }
 0x370   : > { %v13239_v1 = vpop.f32.mrf.mxu1  ;;  %15180 = vst [vmem:[#allocation27_spill] sm:$0xff] %v13256_v52 }
 0x372   : > { %v10494_v33 = vpop.f32.mrf.mxu1 }
 0x373   : > { %v13244_v37 = vadd.f32 %v10494_v33, %v13040_v14  ;;  %v13261_v33 = vpop.f32.mrf.mxu0 }
 0x374   : > { %v3975_v13 = vpop.f32.mrf.mxu1  ;;  %15181 = vst [vmem:[#allocation50_spill] sm:$0xff] %v13261_v33 }
 0x375   : > { %v13249_v20 = vadd.f32 %v3975_v13, %v13047_v60  ;;  %v13274_v52 = vpop.f32.mrf.mxu0 }
 0x376   : > { %v10495_v54 = vpop.f32.mrf.mxu1  ;;  %15182 = vst [vmem:[#allocation51_spill] sm:$0xff] %v13274_v52 }
 0x377   : > { %v13252_v12 = vadd.f32 %v10495_v54, %v13051_v30  ;;  %v11187_v30 = vld [vmem:[%s14945_s5 + $0x8] sm:$0xff]  }
 0x378   : > { %v13254_v62 = vpop.f32.mrf.mxu1  ;;  %10699 = vmatpush3.bf16.msra.mxu1 %v11187_v30 }
 0x37a   : > { %v10498_v15 = vpop.f32.mrf.mxu1 }
 0x37b   : > { %v13259_v31 = vadd.f32 %v10498_v15, %v13068_v29  ;;  %v15183_v15 = vmov 0.0  }
 0x37c   : > { %v3991_v14 = vpop.f32.mrf.mxu1  ;;  %10720 = vmatprep.subr.bf16.mxu1 %v15183_v15  ;;  %10744 = vmatprep.mubr.msk.bf16.mxu0 %vm11295_vm11, %v15183_v15 }
 0x37d   : > { %v13264_v3 = vadd.f32 %v3991_v14, %v13075_v45  ;;  %v13280_v14 = vpop.f32.mrf.mxu0  ;;  %10700 = vmatprep.mubr.msk.bf16.mxu1 %vm11295_vm11, %v15183_v15 }
 0x37e   : > { %v10499_v60 = vpop.f32.mrf.mxu1  ;;  %15184 = vst [vmem:[#allocation84_spill] sm:$0xff] %v13280_v14 }
 0x37f   : > { %v13267_v13 = vadd.f32 %v10499_v60, %v13079_v38  ;;  %v13290_v52 = vpop.f32.mrf.mxu0 }
 0x380   : > { %v13272_v54 = vpop.f32.mrf.mxu1  ;;  %15185 = vst [vmem:[#allocation53_spill] sm:$0xff] %v13290_v52 }
 0x382   : > { %v10502_v29 = vpop.f32.mrf.mxu1 }
 0x383   : > { %v13278_v33 = vadd.f32 %v10502_v29, %v13096_v21  ;;  %v13293_v21 = vpop.f32.mrf.mxu0 }
 0x384   : > { %v4007_v45 = vpop.f32.mrf.mxu1  ;;  %15186 = vst [vmem:[#allocation85_spill] sm:$0xff] %v13293_v21 }
 0x385   : > { %v13283_v38 = vadd.f32 %v4007_v45, %v13103_v59  ;;  %v13299_v39 = vpop.f32.mrf.mxu0 }
 0x386   : > { %v10503_v60 = vpop.f32.mrf.mxu1  ;;  %15187 = vst [vmem:[#allocation30_spill] sm:$0xff] %v13299_v39 }
 0x387   : > { %v13286_v57 = vadd.f32 %v10503_v60, %v13107_v6  ;;  %v13303_v52 = vpop.f32.mrf.mxu0 }
 0x388   : > { %v13288_v56 = vpop.f32.mrf.mxu1  ;;  %15188 = vst [vmem:[#allocation29_spill] sm:$0xff] %v13303_v52 }
 0x38a   : > { %v10506_v30 = vpop.f32.mrf.mxu1 }
 0x38b   : > { %v4072_v48 = vadd.f32 %v10506_v30, %v13124_v49 }
 0x38c   : > { %v4023_v10 = vpop.f32.mrf.mxu1 }
 0x38d   : > { %v4070_v29 = vadd.f32 %v4023_v10, %v13131_v53  ;;  %v13311_v53 = vpop.f32.mrf.mxu0 }
 0x38e   : > { %v10507_v14 = vpop.f32.mrf.mxu1  ;;  %15190 = vst [vmem:[#allocation32_spill] sm:$0xff] %v13311_v53 }
 0x38f   : > { %v4073_v59 = vadd.f32 %v10507_v14, %v13135_v18  ;;  %v15191_v18 = vld [vmem:[#allocation52_spill] sm:$0xff]  ;;  %v13319_v52 = vpop.f32.mrf.mxu0 }
 0x390   : > { %v13297_v45 = vpop.f32.mrf.mxu1  ;;  %v4398_v10 = vadd.f32 %v15191_v18, %v13149_v50  ;;  %15193 = vst [vmem:[#allocation31_spill] sm:$0xff] %v13319_v52  ;;  %v15197_v18 = vld [vmem:[#allocation63_spill] sm:$0xff] }
 0x391   : > { %v13329_v50 = vpop.f32.mrf.mxu0 }
 0x392   : > { %v10544_v6 = vpop.f32.mrf.mxu1  ;;  %15196 = vst [vmem:[#allocation57_spill] sm:$0xff] %v13329_v50 }
 0x393   : > { %v13301_v60 = vadd.f32 %v10544_v6, %v4072_v48  ;;  %v15192_v48 = vld [vmem:[#allocation55_spill] sm:$0xff]  ;;  %v13337_v52 = vpop.f32.mrf.mxu0 }
 0x394   : > { %v4381_v63 = vpop.f32.mrf.mxu1  ;;  %v4396_v6 = vadd.f32 %v15192_v48, %v13155_v28  ;;  %v15198_v48 = vld [vmem:[#allocation66_spill] sm:$0xff]  ;;  %15199 = vst [vmem:[#allocation88_spill] sm:$0xff] %v13337_v52 }
 0x395   : > { %v13305_v43 = vadd.f32 %v4381_v63, %v4070_v29  ;;  %v15194_v29 = vld [vmem:[#allocation58_spill] sm:$0xff] }
 0x396   : > { %v10545_v49 = vpop.f32.mrf.mxu1 }
 0x397   : > { %v13307_v30 = vadd.f32 %v10545_v49, %v4073_v59  ;;  %v4399_v59 = vadd.f32 %v15194_v29, %v13158_v34  ;;  %v15200_v29 = vld [vmem:[#allocation67_spill] sm:$0xff] }
 0x398   : > { %v13309_v21 = vpop.f32.mrf.mxu1 }
 0x399   : > { %15189 = vst [vmem:[#allocation54_spill] sm:$0xff] %v13309_v21 }
 0x39a   : > { %v10550_v14 = vpop.f32.mrf.mxu1 }
 0x39b   : > { %v13315_v39 = vadd.f32 %v10550_v14, %v4398_v10  ;;  %v4402_v10 = vadd.f32 %v15197_v18, %v13173_v51  ;;  %v13347_v51 = vpop.f32.mrf.mxu0  ;;  %v15203_v18 = vld [vmem:[#allocation69_spill] sm:$0xff] }
 0x39c   : > { %v4568_v7 = vpop.f32.mrf.mxu1  ;;  %15202 = vst [vmem:[#allocation60_spill] sm:$0xff] %v13347_v51 }
 0x39d   : > { %v13321_v63 = vadd.f32 %v4568_v7, %v4396_v6  ;;  %v4400_v7 = vadd.f32 %v15198_v48, %v13181_v9  ;;  %v15204_v48 = vld [vmem:[#allocation70_spill] sm:$0xff]  ;;  %v13355_v52 = vpop.f32.mrf.mxu0 }
 0x39e   : > { %v10551_v49 = vpop.f32.mrf.mxu1  ;;  %15205 = vst [vmem:[#allocation90_spill] sm:$0xff] %v13355_v52 }
 0x39f   : > { %v13325_v21 = vadd.f32 %v10551_v49, %v4399_v59  ;;  %v4403_v59 = vadd.f32 %v15200_v29, %v13186_v0  ;;  %v15206_v29 = vld [vmem:[#allocation71_spill] sm:$0xff] }
 0x3a0   : > { %v13327_v53 = vpop.f32.mrf.mxu1 }
 0x3a1   : > { %15195 = vst [vmem:[#allocation56_spill] sm:$0xff] %v13325_v21 }
 0x3a2   : > { %v10554_v14 = vpop.f32.mrf.mxu1 }
 0x3a3   : > { %v13333_v28 = vadd.f32 %v10554_v14, %v4402_v10  ;;  %v4406_v10 = vadd.f32 %v15203_v18, %v13196_v36  ;;  %v13365_v36 = vpop.f32.mrf.mxu0  ;;  %v15208_v18 = vld [vmem:[#allocation73_spill] sm:$0xff] }
 0x3a4   : > { %v4584_v6 = vpop.f32.mrf.mxu1  ;;  %15207 = vst [vmem:[#allocation34_spill] sm:$0xff] %v13365_v36 }
 0x3a5   : > { %v13339_v34 = vadd.f32 %v4584_v6, %v4400_v7  ;;  %v4404_v7 = vadd.f32 %v15204_v48, %v13202_v61  ;;  %v15209_v48 = vld [vmem:[#allocation74_spill] sm:$0xff] }
 0x3a6   : > { %v10555_v49 = vpop.f32.mrf.mxu1 }
 0x3a7   : > { %v13343_v21 = vadd.f32 %v10555_v49, %v4403_v59  ;;  %v4407_v59 = vadd.f32 %v15206_v29, %v13205_v8  ;;  %v11188_v8 = vld [vmem:[%s14945_s5 + $0x10] sm:$0xff]   ;;  %v13376_v29 = vpop.f32.mrf.mxu0 }
 0x3a8   : > { %v13345_v50 = vpop.f32.mrf.mxu1  ;;  %15210 = vst [vmem:[#allocation33_spill] sm:$0xff] %v13376_v29  ;;  %10743 = vmatpush3.bf16.msra.mxu0 %v11188_v8 }
 0x3a9   : > { %15201 = vst [vmem:[#allocation59_spill] sm:$0xff] %v13343_v21  ;;  %10786 = vmatprep.subr.bf16.mxu0 %v15183_v15  ;;  %v15276_v15 = vld [vmem:[#allocation53_spill] sm:$0xff] }
 0x3aa   : > { %v10558_v14 = vpop.f32.mrf.mxu1 }
 0x3ab   : > { %v13351_v9 = vadd.f32 %v10558_v14, %v4406_v10  ;;  %v4410_v10 = vadd.f32 %v15208_v18, %v13214_v40 }
 0x3ac   : > { %v4600_v6 = vpop.f32.mrf.mxu1 }
 0x3ad   : > { %v13357_v0 = vadd.f32 %v4600_v6, %v4404_v7  ;;  %v4408_v7 = vadd.f32 %v15209_v48, %v13219_v16  ;;  %v13387_v16 = vpop.f32.mrf.mxu0 }
 0x3ae   : > { %v10559_v49 = vpop.f32.mrf.mxu1  ;;  %15214 = vst [vmem:[#allocation62_spill] sm:$0xff] %v13387_v16 }
 0x3af   : > { %v13361_v21 = vadd.f32 %v10559_v49, %v4407_v59  ;;  %v15212_v49 = vld [vmem:[#allocation75_spill] sm:$0xff] }
 0x3b0   : > { %v13363_v51 = vpop.f32.mrf.mxu1  ;;  %v4411_v36 = vadd.f32 %v15212_v49, %v13222_v47  ;;  %v13395_v49 = vpop.f32.mrf.mxu0 }
 0x3b1   : > { %15217 = vst [vmem:[#allocation64_spill] sm:$0xff] %v13395_v49 }
 0x3b2   : > { %v10562_v14 = vpop.f32.mrf.mxu1 }
 0x3b3   : > { %v13369_v61 = vadd.f32 %v10562_v14, %v4410_v10  ;;  %v15215_v10 = vld [vmem:[#allocation77_spill] sm:$0xff] }
 0x3b4   : > { %v4616_v6 = vpop.f32.mrf.mxu1  ;;  %v4414_v14 = vadd.f32 %v15215_v10, %v13229_v42  ;;  %v13405_v42 = vpop.f32.mrf.mxu0  ;;  %v15221_v10 = vld [vmem:[#allocation83_spill] sm:$0xff] }
 0x3b5   : > { %v13378_v59 = vadd.f32 %v4616_v6, %v4408_v7  ;;  %v15216_v7 = vld [vmem:[#allocation78_spill] sm:$0xff]  ;;  %15220 = vst [vmem:[#allocation65_spill] sm:$0xff] %v13405_v42 }
 0x3b6   : > { %v10563_v52 = vpop.f32.mrf.mxu1  ;;  %v4412_v6 = vadd.f32 %v15216_v7, %v13234_v58  ;;  %v15222_v7 = vld [vmem:[#allocation86_spill] sm:$0xff]  ;;  %v13413_v49 = vpop.f32.mrf.mxu0 }
 0x3b7   : > { %15211 = vst [vmem:[#allocation36_spill] sm:$0xff] %v13378_v59  ;;  %v13382_v40 = vadd.f32 %v10563_v52, %v4411_v36  ;;  %v15218_v36 = vld [vmem:[#allocation80_spill] sm:$0xff]  ;;  %15223 = vst [vmem:[#allocation94_spill] sm:$0xff] %v13413_v49 }
 0x3b8   : > { %v13385_v18 = vpop.f32.mrf.mxu1  ;;  %v4415_v8 = vadd.f32 %v15218_v36, %v13237_v44 }
 0x3b9   : > { %15213 = vst [vmem:[#allocation35_spill] sm:$0xff] %v13382_v40 }
 0x3ba   : > { %v10566_v48 = vpop.f32.mrf.mxu1 }
 0x3bb   : > { %v13391_v29 = vadd.f32 %v10566_v48, %v4414_v14  ;;  %v4418_v14 = vadd.f32 %v15221_v10, %v13244_v37  ;;  %v13423_v37 = vpop.f32.mrf.mxu0  ;;  %v15226_v10 = vld [vmem:[#allocation91_spill] sm:$0xff] }
 0x3bc   : > { %v4632_v47 = vpop.f32.mrf.mxu1 }
 0x3bd   : > { %v13397_v52 = vadd.f32 %v4632_v47, %v4412_v6  ;;  %v4416_v6 = vadd.f32 %v15222_v7, %v13249_v20  ;;  %v15227_v7 = vld [vmem:[#allocation93_spill] sm:$0xff]  ;;  %v13431_v49 = vpop.f32.mrf.mxu0 }
 0x3be   : > { %v10567_v40 = vpop.f32.mrf.mxu1 }
 0x3bf   : > { %v13401_v59 = vadd.f32 %v10567_v40, %v4415_v8  ;;  %v15224_v40 = vld [vmem:[#allocation87_spill] sm:$0xff] }
 0x3c0   : > { %v13403_v16 = vpop.f32.mrf.mxu1  ;;  %v4419_v36 = vadd.f32 %v15224_v40, %v13252_v12  ;;  %v15228_v40 = vld [vmem:[#allocation95_spill] sm:$0xff] }
 0x3c1   : > { %15219 = vst [vmem:[#allocation92_spill] sm:$0xff] %v13401_v59 }
 0x3c2   : > { %v10570_v48 = vpop.f32.mrf.mxu1 }
 0x3c3   : > { %v13409_v58 = vadd.f32 %v10570_v48, %v4418_v14  ;;  %v4422_v14 = vadd.f32 %v15226_v10, %v13259_v31  ;;  %v4426_v10 = vadd.f32 %v12917_v24, %v13278_v33  ;;  %v4039_v24 = vadd.f32 %v13160_v4, %v12921_v23 }
 0x3c4   : > { %v4648_v47 = vpop.f32.mrf.mxu1 }
 0x3c5   : > { %v13415_v44 = vadd.f32 %v4648_v47, %v4416_v6  ;;  %v4420_v6 = vadd.f32 %v15227_v7, %v13264_v3  ;;  %v13445_v3 = vpop.f32.mrf.mxu0 }
 0x3c6   : > { %v10571_v8 = vpop.f32.mrf.mxu1 }
 0x3c7   : > { %v13419_v59 = vadd.f32 %v10571_v8, %v4419_v36  ;;  %v4423_v36 = vadd.f32 %v15228_v40, %v13267_v13  ;;  %v4424_v13 = vadd.f32 %v12931_v11, %v13283_v38  ;;  %v4427_v40 = vadd.f32 %v12941_v2, %v13286_v57 }
 0x3c8   : > { %v13421_v42 = vpop.f32.mrf.mxu1  ;;  %v4043_v11 = vadd.f32 %v13188_v41, %v12945_v27  ;;  %v4047_v2 = vadd.f32 %v13207_v22, %v12974_v19  ;;  %v4051_v57 = vadd.f32 %v13224_v46, %v13003_v5  ;;  %v4059_v27 = vadd.f32 %v13254_v62, %v13058_v55  ;;  %v15230_v5 = vld [vmem:[#allocation68_spill] sm:$0xff] }
 0x3c9   : > { %15225 = vst [vmem:[#allocation38_spill] sm:$0xff] %v13419_v59  ;;  %v4063_v41 = vadd.f32 %v13272_v54, %v13087_v32  ;;  %v4067_v19 = vadd.f32 %v13288_v56, %v13114_v25  ;;  %v15231_v32 = vld [vmem:[#allocation72_spill] sm:$0xff]  ;;  %v15233_v56 = vld [vmem:[#allocation82_spill] sm:$0xff] }
 0x3ca   : > { %v10574_v48 = vpop.f32.mrf.mxu1  ;;  %v4401_v22 = vadd.f32 %v15230_v5, %v4043_v11  ;;  %v15238_v5 = vld [vmem:[#allocation45_spill] sm:$0xff] }
 0x3cb   : > { %v13427_v20 = vadd.f32 %v10574_v48, %v4422_v14 }
 0x3cc   : > { %v4664_v47 = vpop.f32.mrf.mxu1  ;;  %v4716_v55 = vadd.f32 %v13345_v50, %v4401_v22  ;;  %v4939_v22 = vadd.f32 %v15238_v5, %v13321_v63  ;;  %v15249_v5 = vld [vmem:[#allocation17_spill] sm:$0xff] }
 0x3cd   : > { %v13433_v12 = vadd.f32 %v4664_v47, %v4420_v6  ;;  %v13453_v6 = vpop.f32.mrf.mxu0 }
 0x3ce   : > { %v10575_v8 = vpop.f32.mrf.mxu1 }
 0x3cf   : > { %v13437_v59 = vadd.f32 %v10575_v8, %v4423_v36 }
 0x3d0   : > { %v13443_v31 = vpop.f32.mrf.mxu1 }
 0x3d2   : > { %v10578_v14 = vpop.f32.mrf.mxu1 }
 0x3d3   : > { %v13449_v48 = vadd.f32 %v10578_v14, %v4426_v10  ;;  %v13465_v10 = vpop.f32.mrf.mxu0 }
 0x3d4   : > { %v4680_v7 = vpop.f32.mrf.mxu1 }
 0x3d5   : > { %v13455_v47 = vadd.f32 %v4680_v7, %v4424_v13  ;;  %v15229_v13 = vld [vmem:[#allocation61_spill] sm:$0xff]  ;;  %v13477_v4 = vpop.f32.mrf.mxu0 }
 0x3d6   : > { %v10579_v36 = vpop.f32.mrf.mxu1  ;;  %v4397_v7 = vadd.f32 %v15229_v13, %v4039_v24  ;;  %v15235_v13 = vld [vmem:[#allocation11_spill] sm:$0xff] }
 0x3d7   : > { %v13459_v8 = vadd.f32 %v10579_v36, %v4427_v40  ;;  %v4055_v40 = vadd.f32 %v13239_v1, %v13030_v17  ;;  %v4071_v17 = vadd.f32 %v13297_v45, %v13139_v35  ;;  %v4405_v1 = vadd.f32 %v15231_v32, %v4047_v2  ;;  %v13502_v25 = vpop.f32.mrf.mxu0  ;;  %v15236_v35 = vld [vmem:[#allocation54_spill] sm:$0xff]  ;;  %v15237_v2 = vld [vmem:[#allocation12_spill] sm:$0xff] }
 0x3d8   : > { %v13463_v33 = vpop.f32.mrf.mxu1  ;;  %v4712_v36 = vadd.f32 %v13327_v53, %v4397_v7  ;;  %v4941_v7 = vadd.f32 %v15235_v13, %v13315_v39  ;;  %v15242_v39 = vld [vmem:[#allocation14_spill] sm:$0xff] }
 0x3d9   : > { %v4413_v11 = vadd.f32 %v15233_v56, %v4055_v40  ;;  %v13510_v45 = vadd.f32 %v15236_v35, %v4071_v17  ;;  %v4720_v50 = vadd.f32 %v13363_v51, %v4405_v1  ;;  %v13527_v51 = vld [vmem:[%s14944_s4] ss:$0 sm:$0xff]  ;;  %v15244_v56 = vld [vmem:[#allocation59_spill] sm:$0xff] }
 0x3da   : > { %v10582_v38 = vpop.f32.mrf.mxu1  ;;  %v15243_v1 = vld [vmem:[#allocation44_spill] sm:$0xff] }
 0x3db   : > { %v13470_v14 = vadd.f32 %v10582_v38, %v13301_v60  ;;  %v15234_v38 = vld [vmem:[#allocation89_spill] sm:$0xff]  ;;  %v4943_v63 = vadd.f32 %v15243_v1, %v13339_v34  ;;  %v4728_v34 = vadd.f32 %v13403_v16, %v4413_v11 }
 0x3dc   : > { %v4696_v23 = vpop.f32.mrf.mxu1  ;;  %v4417_v53 = vadd.f32 %v15234_v38, %v4059_v27  ;;  %v15240_v27 = vld [vmem:[#allocation13_spill] sm:$0xff]  ;;  %v15245_v38 = vld [vmem:[#allocation16_spill] sm:$0xff] }
 0x3dd   : > { %v13486_v60 = vadd.f32 %v4696_v23, %v13305_v43  ;;  %v15232_v43 = vld [vmem:[#allocation76_spill] sm:$0xff]  ;;  %v4946_v13 = vadd.f32 %v15245_v38, %v15244_v56  ;;  %v15254_v16 = vld [vmem:[#allocation21_spill] sm:$0xff]  ;;  %v15255_v38 = vld [vmem:[#allocation90_spill] sm:$0xff] }
 0x3de   : > { %v10583_v46 = vpop.f32.mrf.mxu1  ;;  %v4409_v62 = vadd.f32 %v15232_v43, %v4051_v57  ;;  %v13514_v57 = vadd.f32 %v15237_v2, %v4067_v19  ;;  %v4945_v43 = vadd.f32 %v15242_v39, %v13333_v28  ;;  %v15247_v2 = vld [vmem:[#allocation60_spill] sm:$0xff] }
 0x3df   : > { %v13493_v24 = vadd.f32 %v10583_v46, %v13307_v30  ;;  %v4421_v30 = vadd.f32 %v12911_v26, %v4063_v41  ;;  %v15239_v46 = vld [vmem:[#allocation56_spill] sm:$0xff]  ;;  %v15241_v26 = vld [vmem:[#allocation46_spill] sm:$0xff] }
 0x3e0   : > { %v13500_v54 = vpop.f32.mrf.mxu1  ;;  %v4942_v32 = vadd.f32 %v15240_v27, %v15239_v46  ;;  %v4940_v41 = vadd.f32 %v15241_v26, %v4712_v36  ;;  %v4724_v17 = vadd.f32 %v13385_v18, %v4409_v62  ;;  %v13534_v36 = vpop.f32.mrf.mxu0  ;;  %v15248_v18 = vld [vmem:[#allocation18_spill] sm:$0xff]  ;;  %v13543_v46 = vadd.f32 %v15249_v5, %v13357_v0  ;;  %v15250_v26 = vld [vmem:[#allocation20_spill] sm:$0xff]  ;;  %v15258_v5 = vld [vmem:[#allocation23_spill] sm:$0xff] }
 0x3e1   : > { %v13539_v62 = vadd.f32 %v15248_v18, %v13351_v9  ;;  %v13548_v39 = vadd.f32 %v15250_v26, %v13361_v21  ;;  %v4732_v9 = vadd.f32 %v13421_v42, %v4417_v53  ;;  %v15253_v56 = vld [vmem:[#allocation36_spill] sm:$0xff]  ;;  %v15259_v42 = vld [vmem:[#allocation47_spill] sm:$0xff] }
 0x3e2   : > { %v10626_v23 = vpop.f32.mrf.mxu1  ;;  %v13563_v11 = vadd.f32 %v15254_v16, %v15253_v56  ;;  %v13575_v53 = vadd.f32 %v15259_v42, %v13391_v29  ;;  %v15263_v56 = vld [vmem:[#allocation48_spill] sm:$0xff]  ;;  %v15265_v29 = vld [vmem:[#allocation26_spill] sm:$0xff] }
 0x3e3   : > { %v5300_v40 = vadd.f32 %v10626_v23, %v4941_v7  ;;  %v15246_v7 = vld [vmem:[#allocation15_spill] sm:$0xff]  ;;  %v15267_v42 = vld [vmem:[#allocation38_spill] sm:$0xff] }
 0x3e4   : > { %v5155_v19 = vpop.f32.mrf.mxu1  ;;  %v4944_v35 = vadd.f32 %v15246_v7, %v4716_v55  ;;  %v15251_v55 = vld [vmem:[#allocation19_spill] sm:$0xff] }
 0x3e5   : > { %v5614_v28 = vadd.f32 %v15247_v2, %v5300_v40  ;;  %v5298_v23 = vadd.f32 %v5155_v19, %v4939_v22  ;;  %v13551_v1 = vadd.f32 %v15251_v55, %v4720_v50  ;;  %v15252_v22 = vld [vmem:[#allocation22_spill] sm:$0xff]  ;;  %v15256_v2 = vld [vmem:[#allocation35_spill] sm:$0xff]  ;;  %v15257_v50 = vld [vmem:[#allocation24_spill] sm:$0xff] }
 0x3e6   : > { %v10627_v27 = vpop.f32.mrf.mxu1  ;;  %v13555_v40 = vadd.f32 %v15252_v22, %v13369_v61  ;;  %v13568_v18 = vadd.f32 %v15257_v50, %v15256_v2  ;;  %v13571_v61 = vadd.f32 %v15258_v5, %v4724_v17  ;;  %v15262_v22 = vld [vmem:[#allocation92_spill] sm:$0xff]  ;;  %v15264_v2 = vld [vmem:[#allocation81_spill] sm:$0xff]  ;;  %v13594_v5 = vadd.f32 %v15265_v29, %v13409_v58 }
 0x3e7   : > { %v13559_v19 = vadd.f32 %v13527_v51, %v5614_v28  ;;  %v5301_v0 = vadd.f32 %v10627_v27, %v4942_v32  ;;  %v5612_v21 = vadd.f32 %v15255_v38, %v5298_v23  ;;  %v13577_v28 = vpop.f32.mrf.mxu0  ;;  %v4736_v32 = vadd.f32 %v13443_v31, %v4421_v30  ;;  %v15260_v27 = vld [vmem:[#allocation34_spill] sm:$0xff]  ;;  %v15261_v23 = vld [vmem:[#allocation79_spill] sm:$0xff]  ;;  %v15266_v31 = vld [vmem:[#allocation49_spill] sm:$0xff] }
 0x3e8   : > { %v5158_v7 = vpop.f32.mrf.mxu1  ;;  %v13583_v55 = vadd.f32 %v15261_v23, %v13397_v52  ;;  %v13587_v16 = vadd.f32 %v15263_v56, %v15262_v22  ;;  %v13590_v50 = vadd.f32 %v15264_v2, %v4728_v34  ;;  %v13598_v30 = vadd.f32 %v15266_v31, %v13415_v44  ;;  %v15270_v56 = vld [vmem:[#allocation27_spill] sm:$0xff]  ;;  %v15271_v44 = vld [vmem:[#allocation50_spill] sm:$0xff] }
 0x3e9   : > { %v5615_v26 = vadd.f32 %v15260_v27, %v5301_v0  ;;  %v5299_v17 = vadd.f32 %v5158_v7, %v4940_v41  ;;  %v15268_v27 = vld [vmem:[#allocation25_spill] sm:$0xff]  ;;  %v15269_v41 = vld [vmem:[#allocation28_spill] sm:$0xff]  ;;  %v5655_v34 = vadd.f32 %v13527_v51, %v5612_v21  ;;  %v13612_v2 = vadd.f32 %v15270_v56, %v13427_v20  ;;  %v15275_v52 = vld [vmem:[#allocation62_spill] sm:$0xff] }
 0x3ea   : > { %v10630_v38 = vpop.f32.mrf.mxu1  ;;  %v13604_v23 = vadd.f32 %v15268_v27, %v15267_v42  ;;  %v13607_v7 = vadd.f32 %v15269_v41, %v4732_v9  ;;  %v13616_v29 = vadd.f32 %v15271_v44, %v13433_v12  ;;  %v15272_v27 = vld [vmem:[#allocation51_spill] sm:$0xff]  ;;  %v15273_v41 = vld [vmem:[#allocation84_spill] sm:$0xff]  ;;  %v13631_v12 = vadd.f32 %v15276_v15, %v13449_v48  ;;  %v15277_v44 = vld [vmem:[#allocation85_spill] sm:$0xff] }
 0x3eb   : > { %v5658_v0 = vadd.f32 %v13527_v51, %v5615_v26  ;;  %v5304_v22 = vadd.f32 %v10630_v38, %v4945_v43  ;;  %v13618_v26 = vpop.f32.mrf.mxu0  ;;  %v13622_v9 = vadd.f32 %v15272_v27, %v13437_v59  ;;  %v13625_v21 = vadd.f32 %v15273_v41, %v4736_v32  ;;  %v15274_v43 = vld [vmem:[#allocation33_spill] sm:$0xff]  ;;  %v15279_v27 = vld [vmem:[#allocation64_spill] sm:$0xff]  ;;  %v15280_v48 = vld [vmem:[#allocation30_spill] sm:$0xff] }
 0x3ec   : > { %v5171_v58 = vpop.f32.mrf.mxu1  ;;  %v5613_v38 = vadd.f32 %v15274_v43, %v5299_v17  ;;  %v4740_v17 = vadd.f32 %v13463_v33, %v13514_v57  ;;  %v13647_v43 = vadd.f32 %v15280_v48, %v13459_v8  ;;  %v4744_v33 = vadd.f32 %v13500_v54, %v13510_v45  ;;  %v15283_v48 = vld [vmem:[#allocation94_spill] sm:$0xff]  ;;  %v15285_v54 = vld [vmem:[#allocation32_spill] sm:$0xff] }
 0x3ed   : > { %v5694_v31 = vmax.f32 %v5658_v0, 0.0  ;;  %v5302_v42 = vadd.f32 %v5171_v58, %v4943_v63  ;;  %v5618_v20 = vadd.f32 %v15275_v52, %v5304_v22  ;;  %v13635_v0 = vadd.f32 %v15277_v44, %v13455_v47  ;;  %v13649_v47 = vpop.f32.mrf.mxu0 }
 0x3ee   : > { %v10631_v56 = vpop.f32.mrf.mxu1  ;;  %v15278_v63 = vmax.f32 %v13559_v19, 0.0  ;;  %v5691_v52 = vmax.f32 %v5655_v34, 0.0  ;;  %15281 = vst [vmem:[#allocation37_spill] sm:$0xff] %v13647_v43  ;;  %v5656_v34 = vadd.f32 %v13527_v51, %v5613_v38  ;;  %v13668_v45 = vadd.f32 %v15285_v54, %v13470_v14  ;;  %v15286_v38 = vld [vmem:[#allocation31_spill] sm:$0xff] }
 0x3ef   : > { %v5763_v58 = vrot.slane %v5694_v31, 2  ;;  %v5616_v32 = vadd.f32 %v15279_v27, %v5302_v42  ;;  %v5305_v41 = vadd.f32 %v10631_v56, %v4946_v13  ;;  %v13643_v22 = vadd.f32 %v13527_v51, %v5618_v20  ;;  %v15282_v42 = vld [vmem:[#allocation65_spill] sm:$0xff] }
 0x3f0   : > { %v5762_v59 = vrot.slane %v15278_v63, 2  ;;  %v5174_v15 = vpop.f32.mrf.mxu1 }
 0x3f1   : > { %v5659_v31 = vadd.f32 %v13527_v51, %v5616_v32  ;;  %v5619_v13 = vadd.f32 %v15282_v42, %v5305_v41  ;;  %v5303_v56 = vadd.f32 %v5174_v15, %v4944_v35  ;;  %v15004_v20 = vmax.f32 %v13643_v22, 0.0  ;;  %v15284_v41 = vld [vmem:[#allocation29_spill] sm:$0xff] }
 0x3f2   : > { %v5764_v44 = vsel %vm4436_vm8, %v5762_v59, %v5763_v58  ;;  %v10634_v63 = vpop.f32.mrf.mxu1  ;;  %v13664_v35 = vadd.f32 %v15284_v41, %v4740_v17  ;;  %v15287_v15 = vld [vmem:[#allocation57_spill] sm:$0xff] }
 0x3f3   : > { %v5863_v57 = vmax.f32 %v5691_v52, %v5764_v44  ;;  %v5695_v8 = vmax.f32 %v5659_v31, 0.0  ;;  %v13659_v27 = vadd.f32 %v13527_v51, %v5619_v13  ;;  %v5617_v59 = vadd.f32 %v15283_v48, %v5303_v56  ;;  %v13678_v31 = vpop.f32.mrf.mxu0  ;;  %v15288_v48 = vld [vmem:[#allocation88_spill] sm:$0xff] }
 0x3f4   : > { %v5308_v32 = vadd.f32 %v10634_v63, %v13539_v62  ;;  %v5187_v43 = vpop.f32.mrf.mxu1  ;;  %v13672_v52 = vadd.f32 %v15286_v38, %v13486_v60  ;;  %v13676_v44 = vadd.f32 %v15287_v15, %v13493_v24  ;;  %v5692_v56 = vmax.f32 %v5656_v34, 0.0 }
 0x3f5   : > { %v5765_v42 = vrot.slane %v5695_v8, 2  ;;  %v15003_v62 = vmax.f32 %v13659_v27, 0.0  ;;  %v5660_v17 = vadd.f32 %v13527_v51, %v5617_v59  ;;  %v5769_v14 = vrot.slane %v15004_v20, 2 }
 0x3f6   : > { %v5622_v13 = vadd.f32 %v13423_v37, %v5308_v32  ;;  %v5306_v60 = vadd.f32 %v5187_v43, %v13543_v46  ;;  %v10635_v63 = vpop.f32.mrf.mxu1  ;;  %v13687_v41 = vadd.f32 %v15288_v48, %v4744_v33  ;;  %v5931_v37 = vrot.slane %v5863_v57, 1  ;;  %v13697_v43 = vpop.f32.mrf.mxu0 }
 0x3f7   : > { %v5766_v24 = vsel %vm4436_vm8, %v5763_v58, %v5765_v42  ;;  %v5771_v54 = vrot.slane %v15003_v62, 2  ;;  %v5696_v38 = vmax.f32 %v5660_v17, 0.0  ;;  %v5309_v15 = vadd.f32 %v10635_v63, %v13548_v39 }
 0x3f8   : > { %v13693_v59 = vadd.f32 %v13527_v51, %v5622_v13  ;;  %v5864_v34 = vmax.f32 %v5692_v56, %v5766_v24  ;;  %v5620_v32 = vadd.f32 %v13431_v49, %v5306_v60  ;;  %v5190_v46 = vpop.f32.mrf.mxu1 }
 0x3f9   : > { %v5772_v33 = vsel %vm4436_vm8, %v5769_v14, %v5771_v54  ;;  %v5767_v48 = vrot.slane %v5696_v38, 2  ;;  %v5307_v62 = vadd.f32 %v5190_v46, %v13551_v1  ;;  %v5623_v56 = vadd.f32 %v13445_v3, %v5309_v15 }
 0x3fa   : > { %v5701_v58 = vmax.f32 %v13693_v59, 0.0  ;;  %v5932_v17 = vrot.slane %v5864_v34, 1  ;;  %v13702_v20 = vmax.f32 %v5695_v8, %v5772_v33  ;;  %v5663_v13 = vadd.f32 %v13527_v51, %v5620_v32  ;;  %v10638_v49 = vpop.f32.mrf.mxu1  ;;  %v13714_v33 = vpop.f32.mrf.mxu0 }
 0x3fb   : > { %v5768_v39 = vsel %vm4436_vm8, %v5765_v42, %v5767_v48  ;;  %v5621_v14 = vadd.f32 %v13453_v6, %v5307_v62  ;;  %v15289_v1 = vmax.f32 %v13559_v19, 0.0  ;;  %v13717_v15 = vadd.f32 %v13527_v51, %v5623_v56 }
 0x3fc   : > { %v5777_v60 = vrot.slane %v5701_v58, 2  ;;  %v5933_v63 = vsel %vm2087_vm3, %v5931_v37, %v5932_v17  ;;  %v5938_v24 = vrot.slane %v13702_v20, 1  ;;  %v5203_v46 = vpop.f32.mrf.mxu1  ;;  %v5699_v3 = vmax.f32 %v5663_v13, 0.0 }
 0x3fd   : > { %v5865_v8 = vmax.f32 %v15289_v1, %v5768_v39  ;;  %v6032_v32 = vmax.f32 %v5863_v57, %v5933_v63  ;;  %v13720_v42 = vadd.f32 %v13527_v51, %v5621_v14  ;;  %v5312_v6 = vadd.f32 %v10638_v49, %v13555_v40  ;;  %v13730_v1 = vpop.f32.mrf.mxu0 }
 0x3fe   : > { %v5310_v62 = vadd.f32 %v5203_v46, %v13563_v11  ;;  %v10639_v37 = vpop.f32.mrf.mxu1  ;;  %v5773_v19 = vrot.slane %v5699_v3, 2  ;;  %v5702_v39 = vmax.f32 %v13717_v15, 0.0 }
 0x3ff   : > { %v5934_v48 = vrot.slane %v5865_v8, 1  ;;  %6066 = vst.msk [vmem:[#allocation4] sm:$0xff] %vm2583_vm2, %v6032_v32  ;;  %v5700_v57 = vmax.f32 %v13720_v42, 0.0  ;;  %v5313_v13 = vadd.f32 %v10639_v37, %v13568_v18  ;;  %v5626_v14 = vadd.f32 %v13465_v10, %v5312_v6  ;;  %v13745_v6 = vpop.f32.mrf.mxu0 }
 0x400   : > { %v5206_v63 = vpop.f32.mrf.mxu1  ;;  %v5774_v11 = vsel %vm4436_vm8, %v5771_v54, %v5773_v19  ;;  %v5779_v8 = vrot.slane %v5702_v39, 2  ;;  %v5624_v18 = vadd.f32 %v13477_v4, %v5310_v62  ;;  %v15290_v37 = vmax.f32 %v13643_v22, 0.0 }
 0x401   : > { %v5935_v56 = vsel %vm2087_vm3, %v5932_v17, %v5934_v48  ;;  %v5868_v49 = vmax.f32 %v5696_v38, %v5774_v11  ;;  %v5775_v46 = vrot.slane %v5700_v57, 2  ;;  %v13736_v32 = vadd.f32 %v13527_v51, %v5626_v14 }
 0x402   : > { %v6033_v40 = vmax.f32 %v5864_v34, %v5935_v56  ;;  %v10642_v3 = vpop.f32.mrf.mxu1  ;;  %v5627_v10 = vadd.f32 %v13502_v25, %v5313_v13  ;;  %v5311_v17 = vadd.f32 %v5206_v63, %v13571_v61  ;;  %v15291_v14 = vmax.f32 %v13659_v27, 0.0 }
 0x403   : > { %v5316_v34 = vadd.f32 %v10642_v3, %v13575_v53  ;;  %v5940_v54 = vrot.slane %v5868_v49, 1  ;;  %v5776_v38 = vsel %vm4436_vm8, %v5773_v19, %v5775_v46  ;;  %v5778_v42 = vsel %vm4436_vm8, %v5775_v46, %v5777_v60  ;;  %v13765_v3 = vpop.f32.mrf.mxu0 }
 0x404   : > { %6067 = vst.msk [vmem:[#allocation4 + $0x8] sm:$0xff] %vm2583_vm2, %v6033_v40  ;;  %v5219_v48 = vpop.f32.mrf.mxu1  ;;  %v5869_v56 = vmax.f32 %v15290_v37, %v5776_v38  ;;  %v5870_v4 = vmax.f32 %v15291_v14, %v5778_v42  ;;  %v5705_v25 = vmax.f32 %v13736_v32, 0.0  ;;  %v5667_v53 = vadd.f32 %v13527_v51, %v5624_v18 }
 0x405   : > { %v5941_v61 = vsel %vm2087_vm3, %v5938_v24, %v5940_v54  ;;  %v13755_v62 = vadd.f32 %v13527_v51, %v5627_v10  ;;  %v5625_v60 = vadd.f32 %v13534_v36, %v5311_v17  ;;  %v5630_v18 = vadd.f32 %v13577_v28, %v5316_v34 }
 0x406   : > { %v10643_v19 = vpop.f32.mrf.mxu1  ;;  %v6036_v13 = vmax.f32 %v13702_v20, %v5941_v61  ;;  %v5942_v63 = vrot.slane %v5869_v56, 1  ;;  %v5944_v22 = vrot.slane %v5870_v4, 1  ;;  %v5785_v27 = vrot.slane %v5705_v25, 2 }
 0x407   : > { %v5703_v40 = vmax.f32 %v5667_v53, 0.0  ;;  %v5706_v11 = vmax.f32 %v13755_v62, 0.0  ;;  %v13763_v24 = vadd.f32 %v13527_v51, %v5625_v60  ;;  %v13776_v61 = vadd.f32 %v13527_v51, %v5630_v18  ;;  %v13785_v60 = vpop.f32.mrf.mxu0 }
 0x408   : > { %v5222_v46 = vpop.f32.mrf.mxu1  ;;  %6070 = vst.msk [vmem:[#allocation4 + $0x20] sm:$0xff] %vm2583_vm2, %v6036_v13  ;;  %v5943_v36 = vsel %vm2087_vm3, %v5940_v54, %v5942_v63  ;;  %v5945_v20 = vsel %vm2087_vm3, %v5942_v63, %v5944_v22  ;;  %v5314_v54 = vadd.f32 %v5219_v48, %v13583_v55 }
 0x409   : > { %v6037_v17 = vmax.f32 %v5868_v49, %v5943_v36  ;;  %v6038_v38 = vmax.f32 %v5869_v56, %v5945_v20  ;;  %v5781_v42 = vrot.slane %v5703_v40, 2  ;;  %v5787_v14 = vrot.slane %v5706_v11, 2 }
 0x40a   : > { %v10646_v37 = vpop.f32.mrf.mxu1  ;;  %v5704_v4 = vmax.f32 %v13763_v24, 0.0  ;;  %v5317_v49 = vadd.f32 %v10643_v19, %v13587_v16  ;;  %v5315_v34 = vadd.f32 %v5222_v46, %v13590_v50  ;;  %v5709_v22 = vmax.f32 %v13776_v61, 0.0  ;;  %v13800_v46 = vpop.f32.mrf.mxu0 }
 0x40b   : > { %v6101_v10 = vld [vmem:[#allocation4] ss:$2 sm:$0xff]  ;;  %6071 = vst.msk [vmem:[#allocation4 + $0x28] sm:$0xff] %vm2583_vm2, %v6037_v17  ;;  %6072 = vst.msk [vmem:[#allocation4 + $0x30] sm:$0xff] %vm2583_vm2, %v6038_v38  ;;  %v5782_v28 = vsel %vm4436_vm8, %v5779_v8, %v5781_v42  ;;  %v5320_v56 = vadd.f32 %v10646_v37, %v13594_v5  ;;  %v5628_v55 = vadd.f32 %v13618_v26, %v5314_v54 }
 0x40c   : > { %6129 = vst.msk [vmem:[#allocation5 + $0xb] sm:$0xff] %vm2583_vm2, %v6101_v10  ;;  %v5235_v53 = vpop.f32.mrf.mxu1  ;;  %v5872_v13 = vmax.f32 %v5700_v57, %v5782_v28  ;;  %v5783_v63 = vrot.slane %v5704_v4, 2  ;;  %v5631_v48 = vadd.f32 %v13649_v47, %v5317_v49  ;;  %v5629_v40 = vadd.f32 %v13678_v31, %v5315_v34  ;;  %v13815_v28 = vpop.f32.mrf.mxu0 }
 0x40d   : > { %v5793_v5 = vrot.slane %v5709_v22, 2  ;;  %v5671_v26 = vadd.f32 %v13527_v51, %v5628_v55  ;;  %v5318_v38 = vadd.f32 %v5235_v53, %v13598_v30 }
 0x40e   : > { %v10647_v8 = vpop.f32.mrf.mxu1  ;;  %v5948_v24 = vrot.slane %v5872_v13, 1  ;;  %v5784_v16 = vsel %vm4436_vm8, %v5781_v42, %v5783_v63  ;;  %v5786_v50 = vsel %vm4436_vm8, %v5783_v63, %v5785_v27  ;;  %v13803_v31 = vadd.f32 %v13527_v51, %v5631_v48 }
 0x40f   : > { %v5873_v57 = vmax.f32 %v5701_v58, %v5784_v16  ;;  %v5874_v19 = vmax.f32 %v5702_v39, %v5786_v50  ;;  %v5672_v36 = vadd.f32 %v13527_v51, %v5629_v40  ;;  %v5634_v27 = vadd.f32 %v13697_v43, %v5320_v56 }
 0x410   : > { %v5238_v47 = vpop.f32.mrf.mxu1  ;;  %v5707_v10 = vmax.f32 %v5671_v26, 0.0  ;;  %v5710_v15 = vmax.f32 %v13803_v31, 0.0  ;;  %v5632_v53 = vadd.f32 %v13714_v33, %v5318_v38  ;;  %v10692_v26 = vpop.f32.mrf.mxu0 }
 0x411   : > { %v5950_v20 = vrot.slane %v5873_v57, 1  ;;  %v5952_v18 = vrot.slane %v5874_v19, 1  ;;  %v5708_v39 = vmax.f32 %v5672_v36, 0.0  ;;  %v13809_v17 = vadd.f32 %v13527_v51, %v5634_v27 }
 0x412   : > { %v10650_v59 = vpop.f32.mrf.mxu1  ;;  %v6103_v58 = vld [vmem:[#allocation4 + $0x24] ss:$2 sm:$0xff]  ;;  %v5789_v43 = vrot.slane %v5707_v10, 2  ;;  %v5795_v56 = vrot.slane %v5710_v15, 2  ;;  %v5319_v16 = vadd.f32 %v5238_v47, %v13607_v7 }
 0x413   : > { %6130 = vst.msk [vmem:[#allocation5 + $0x15] sm:$0xff] %vm2583_vm2, %v6103_v58  ;;  %v5951_v42 = vsel %vm2087_vm3, %v5948_v24, %v5950_v20  ;;  %v5953_v37 = vsel %vm2087_vm3, %v5950_v20, %v5952_v18  ;;  %v5791_v55 = vrot.slane %v5708_v39, 2  ;;  %v5713_v30 = vmax.f32 %v13809_v17, 0.0 }
 0x414   : > { %v5251_v54 = vpop.f32.mrf.mxu1  ;;  %v6041_v49 = vmax.f32 %v5872_v13, %v5951_v42  ;;  %v6042_v34 = vmax.f32 %v5873_v57, %v5953_v37  ;;  %v5790_v63 = vsel %vm4436_vm8, %v5787_v14, %v5789_v43  ;;  %v5796_v24 = vsel %vm4436_vm8, %v5793_v5, %v5795_v56 }
 0x415   : > { %v5876_v40 = vmax.f32 %v5704_v4, %v5790_v63  ;;  %v5321_v13 = vadd.f32 %v10647_v8, %v13604_v23  ;;  %v5879_v50 = vmax.f32 %v5707_v10, %v5796_v24  ;;  %v5792_v14 = vsel %vm4436_vm8, %v5789_v43, %v5791_v55 }
 0x416   : > { %v10651_v48 = vpop.f32.mrf.mxu1  ;;  %6075 = vst.msk [vmem:[#allocation4 + $0x48] sm:$0xff] %vm2583_vm2, %v6041_v49  ;;  %6076 = vst.msk [vmem:[#allocation4 + $0x50] sm:$0xff] %vm2583_vm2, %v6042_v34  ;;  %v5794_v57 = vsel %vm4436_vm8, %v5791_v55, %v5793_v5  ;;  %v5801_v33 = vrot.slane %v5713_v30, 2  ;;  %v5877_v4 = vmax.f32 %v5705_v25, %v5792_v14  ;;  %v5675_v23 = vadd.f32 %v13527_v51, %v5632_v53 }
 0x417   : > { %v5956_v36 = vrot.slane %v5876_v40, 1  ;;  %v5878_v27 = vmax.f32 %v5706_v11, %v5794_v57  ;;  %v5962_v7 = vrot.slane %v5879_v50, 1  ;;  %v5635_v8 = vadd.f32 %v13730_v1, %v5321_v13  ;;  %v5581_v11 = vpop.f32.mrf.mxu0 }
 0x418   : > { %v5254_v19 = vpop.f32.mrf.mxu1  ;;  %v5633_v47 = vadd.f32 %v13745_v6, %v5319_v16  ;;  %v5324_v5 = vadd.f32 %v10650_v59, %v13612_v2  ;;  %v5958_v18 = vrot.slane %v5877_v4, 1  ;;  %v5711_v58 = vmax.f32 %v5675_v23, 0.0 }
 0x419   : > { %v5960_v10 = vrot.slane %v5878_v27, 1  ;;  %v13840_v39 = vadd.f32 %v13527_v51, %v5635_v8  ;;  %v5322_v63 = vadd.f32 %v5251_v54, %v13616_v29  ;;  %v5325_v53 = vadd.f32 %v10651_v48, %v13622_v9  ;;  %v10693_v24 = vpop.f32.mrf.mxu0 }
 0x41a   : > { %v10654_v20 = vpop.f32.mrf.mxu1  ;;  %v5676_v32 = vadd.f32 %v13527_v51, %v5633_v47  ;;  %v5638_v25 = vadd.f32 %v13765_v3, %v5324_v5  ;;  %v5959_v38 = vsel %vm2087_vm3, %v5956_v36, %v5958_v18  ;;  %v5797_v2 = vrot.slane %v5711_v58, 2 }
 0x41b   : > { %v5961_v1 = vsel %vm2087_vm3, %v5958_v18, %v5960_v10  ;;  %v5963_v6 = vsel %vm2087_vm3, %v5960_v10, %v5962_v7  ;;  %v6045_v42 = vmax.f32 %v5876_v40, %v5959_v38  ;;  %v5714_v49 = vmax.f32 %v13840_v39, 0.0 }
 0x41c   : > { %v5267_v62 = vpop.f32.mrf.mxu1  ;;  %v6046_v37 = vmax.f32 %v5877_v4, %v5961_v1  ;;  %v6047_v43 = vmax.f32 %v5878_v27, %v5963_v6  ;;  %v5712_v56 = vmax.f32 %v5676_v32, 0.0  ;;  %v5681_v3 = vadd.f32 %v13527_v51, %v5638_v25 }
 0x41d   : > { %v6105_v59 = vld [vmem:[#allocation4 + $0x48] ss:$2 sm:$0xff]  ;;  %6079 = vst.msk [vmem:[#allocation4 + $0x68] sm:$0xff] %vm2583_vm2, %v6045_v42  ;;  %v5803_v55 = vrot.slane %v5714_v49, 2  ;;  %v5323_v40 = vadd.f32 %v5254_v19, %v13625_v21  ;;  %v5636_v50 = vadd.f32 %v13785_v60, %v5322_v63  ;;  %v5328_v29 = vadd.f32 %v10654_v20, %v13631_v12  ;;  %v5584_v19 = vpop.f32.mrf.mxu0  ;;  %v15292_v20 = vld [vmem:[#allocation37_spill] sm:$0xff] }
 0x41e   : > { %v10655_v34 = vpop.f32.mrf.mxu1  ;;  %6131 = vst.msk [vmem:[#allocation5 + $0x1f] sm:$0xff] %vm2583_vm2, %v6105_v59  ;;  %6080 = vst.msk [vmem:[#allocation4 + $0x70] sm:$0xff] %vm2583_vm2, %v6046_v37  ;;  %v5799_v13 = vrot.slane %v5712_v56, 2  ;;  %v5717_v16 = vmax.f32 %v5681_v3, 0.0  ;;  %v5639_v57 = vadd.f32 %v13800_v46, %v5325_v53 }
 0x41f   : > { %6081 = vst.msk [vmem:[#allocation4 + $0x78] sm:$0xff] %vm2583_vm2, %v6047_v43  ;;  %v5804_v14 = vsel %vm4436_vm8, %v5801_v33, %v5803_v55  ;;  %v5637_v36 = vadd.f32 %v13815_v28, %v5323_v40  ;;  %v5679_v12 = vadd.f32 %v13527_v51, %v5636_v50  ;;  %v5642_v5 = vadd.f32 %v10692_v26, %v5328_v29  ;;  %v10696_v25 = vpop.f32.mrf.mxu0 }
 0x420   : > { %v5270_v54 = vpop.f32.mrf.mxu1  ;;  %v5883_v4 = vmax.f32 %v5711_v58, %v5804_v14  ;;  %v5800_v27 = vsel %vm4436_vm8, %v5797_v2, %v5799_v13  ;;  %v5802_v9 = vsel %vm4436_vm8, %v5799_v13, %v5801_v33  ;;  %v5809_v21 = vrot.slane %v5717_v16, 2 }
 0x421   : > { %v5881_v48 = vmax.f32 %v5709_v22, %v5800_v27  ;;  %v5882_v60 = vmax.f32 %v5710_v15, %v5802_v9  ;;  %v13871_v46 = vadd.f32 %v13527_v51, %v5639_v57  ;;  %v13874_v28 = vadd.f32 %v13527_v51, %v5637_v36  ;;  %v5597_v63 = vpop.f32.mrf.mxu0 }
 0x422   : > { %v5970_v23 = vrot.slane %v5883_v4, 1  ;;  %v10658_v7 = vpop.f32.mrf.mxu1  ;;  %v5715_v47 = vmax.f32 %v5679_v12, 0.0  ;;  %v5326_v15 = vadd.f32 %v5267_v62, %v13635_v0  ;;  %v5329_v18 = vadd.f32 %v10655_v34, %v15292_v20 }
 0x423   : > { %v5966_v8 = vrot.slane %v5881_v48, 1  ;;  %v5968_v33 = vrot.slane %v5882_v60, 1  ;;  %v5718_v22 = vmax.f32 %v13871_v46, 0.0  ;;  %v5716_v31 = vmax.f32 %v13874_v28, 0.0  ;;  %v10697_v39 = vpop.f32.mrf.mxu0  ;;  %v6138_v28 = vld [vmem:[#allocation5 + $0x8] sm:$0xff] }
 0x424   : > { %v5805_v32 = vrot.slane %v5715_v47, 2  ;;  %v5283_v6 = vpop.f32.mrf.mxu1  ;;  %v5685_v59 = vadd.f32 %v13527_v51, %v5642_v5  ;;  %v5640_v0 = vadd.f32 %v5581_v11, %v5326_v15  ;;  %v5643_v42 = vadd.f32 %v10693_v24, %v5329_v18 }
 0x425   : > { %v5969_v10 = vsel %vm2087_vm3, %v5966_v8, %v5968_v33  ;;  %v5971_v58 = vsel %vm2087_vm3, %v5968_v33, %v5970_v23  ;;  %v5811_v26 = vrot.slane %v5718_v22, 2  ;;  %v5807_v2 = vrot.slane %v5716_v31, 2  ;;  %v6137_v23 = vld [vmem:[#allocation5] sm:$0xff]  ;;  %v5600_v5 = vpop.f32.mrf.mxu0 }
 0x426   : > { %v6107_v61 = vld [vmem:[#allocation4 + $0x6c] ss:$2 sm:$0xff]  ;;  %v6050_v38 = vmax.f32 %v5881_v48, %v5969_v10  ;;  %v6051_v1 = vmax.f32 %v5882_v60, %v5971_v58  ;;  %v5327_v37 = vadd.f32 %v5270_v54, %v13664_v35  ;;  %v5721_v3 = vmax.f32 %v5685_v59, 0.0  ;;  %v10659_v40 = vpop.f32.mrf.mxu1 }
 0x427   : > { %6132 = vst.msk [vmem:[#allocation5 + $0x29] sm:$0xff] %vm2583_vm2, %v6107_v61  ;;  %v5812_v62 = vsel %vm4436_vm8, %v5809_v21, %v5811_v26  ;;  %v5808_v34 = vsel %vm4436_vm8, %v5805_v32, %v5807_v2  ;;  %v5810_v56 = vsel %vm4436_vm8, %v5807_v2, %v5809_v21  ;;  %v5683_v53 = vadd.f32 %v13527_v51, %v5640_v0 }
 0x428   : > { %6084 = vst.msk [vmem:[#allocation4 + $0x90] sm:$0xff] %vm2583_vm2, %v6050_v38  ;;  %6085 = vst.msk [vmem:[#allocation4 + $0x98] sm:$0xff] %vm2583_vm2, %v6051_v1  ;;  %v13890_v43 = vmax.f32 %v5715_v47, %v5812_v62  ;;  %v5885_v11 = vmax.f32 %v5713_v30, %v5808_v34  ;;  %v5886_v55 = vmax.f32 %v5714_v49, %v5810_v56  ;;  %v5817_v35 = vrot.slane %v5721_v3, 2  ;;  %v5286_v4 = vpop.f32.mrf.mxu1  ;;  %v6139_v62 = vld [vmem:[#allocation5 + $0x10] sm:$0xff] }
 0x429   : > { %v13901_v13 = vadd.f32 %v13527_v51, %v5643_v42  ;;  %v5641_v16 = vadd.f32 %v5584_v19, %v5327_v37  ;;  %v5719_v54 = vmax.f32 %v5683_v53, 0.0  ;;  %v5332_v30 = vadd.f32 %v10658_v7, %v13668_v45 }
 0x42a   : > { %v5978_v24 = vrot.slane %v13890_v43, 1  ;;  %v5974_v50 = vrot.slane %v5885_v11, 1  ;;  %v5976_v29 = vrot.slane %v5886_v55, 1  ;;  %v5330_v19 = vadd.f32 %v5283_v6, %v13672_v52 }
 0x42b   : > { %v5722_v14 = vmax.f32 %v13901_v13, 0.0  ;;  %v13905_v17 = vadd.f32 %v13527_v51, %v5641_v16  ;;  %v5813_v36 = vrot.slane %v5719_v54, 2  ;;  %v5646_v45 = vadd.f32 %v10696_v25, %v5332_v30 }
 0x42c   : > { %v5977_v49 = vsel %vm2087_vm3, %v5974_v50, %v5976_v29  ;;  %v5979_v57 = vsel %vm2087_vm3, %v5976_v29, %v5978_v24  ;;  %v5333_v33 = vadd.f32 %v10659_v40, %v13676_v44  ;;  %v5331_v47 = vadd.f32 %v5286_v4, %v13687_v41  ;;  %v6140_v44 = vld [vmem:[#allocation5 + $0x18] sm:$0xff] }
 0x42d   : > { %v6054_v9 = vmax.f32 %v5885_v11, %v5977_v49  ;;  %v6055_v21 = vmax.f32 %v5886_v55, %v5979_v57  ;;  %v5819_v48 = vrot.slane %v5722_v14, 2  ;;  %v5814_v60 = vsel %vm4436_vm8, %v5811_v26, %v5813_v36 }
 0x42e   : > { %v5720_v12 = vmax.f32 %v13905_v17, 0.0  ;;  %v5888_v7 = vmax.f32 %v5716_v31, %v5814_v60  ;;  %v5689_v20 = vadd.f32 %v13527_v51, %v5646_v45  ;;  %v5644_v52 = vadd.f32 %v5597_v63, %v5330_v19  ;;  %v6142_v17 = vld [vmem:[#allocation5 + $0x28] sm:$0xff] }
 0x42f   : > { %v6109_v27 = vld [vmem:[#allocation4 + $0x90] ss:$2 sm:$0xff]  ;;  %6088 = vst.msk [vmem:[#allocation4 + $0xb0] sm:$0xff] %vm2583_vm2, %v6054_v9  ;;  %6089 = vst.msk [vmem:[#allocation4 + $0xb8] sm:$0xff] %vm2583_vm2, %v6055_v21  ;;  %v5820_v8 = vsel %vm4436_vm8, %v5817_v35, %v5819_v48  ;;  %v5647_v10 = vadd.f32 %v10697_v39, %v5333_v33  ;;  %v5645_v58 = vadd.f32 %v5600_v5, %v5331_v47 }
 0x430   : > { %6133 = vst.msk [vmem:[#allocation5 + $0x33] sm:$0xff] %vm2583_vm2, %v6109_v27  ;;  %v13921_v61 = vmax.f32 %v5719_v54, %v5820_v8  ;;  %v5815_v15 = vrot.slane %v5720_v12, 2  ;;  %v5980_v18 = vrot.slane %v5888_v7, 1  ;;  %v13924_v32 = vpack.c.bf16 %v6138_v28, %v6137_v23  ;;  %v6141_v27 = vld [vmem:[#allocation5 + $0x20] sm:$0xff]  ;;  %v11189_v33 = vld [vmem:[%s14945_s5] sm:$0xff]  }
 0x431   : > { %v5725_v38 = vmax.f32 %v5689_v20, 0.0  ;;  %v5687_v26 = vadd.f32 %v13527_v51, %v5644_v52  ;;  %v5690_v59 = vadd.f32 %v13527_v51, %v5647_v10  ;;  %v5688_v0 = vadd.f32 %v13527_v51, %v5645_v58 }
 0x432   : > { %v5986_v31 = vrot.slane %v13921_v61, 1  ;;  %v5818_v25 = vsel %vm4436_vm8, %v5815_v15, %v5817_v35  ;;  %v5981_v41 = vsel %vm2087_vm3, %v5978_v24, %v5980_v18  ;;  %v13935_v34 = vpack.c.bf16 %v6140_v44, %v6139_v62  ;;  %v11190_v35 = vld [vmem:[%s14945_s5 + $0x20] sm:$0xff]  }
 0x433   : > { %v5890_v1 = vmax.f32 %v5718_v22, %v5818_v25  ;;  %v6056_v6 = vmax.f32 %v13890_v43, %v5981_v41  ;;  %v5825_v2 = vrot.slane %v5725_v38, 2  ;;  %v5723_v37 = vmax.f32 %v5687_v26, 0.0 }
 0x434   : > { %v5726_v56 = vmax.f32 %v5690_v59, 0.0  ;;  %v5724_v46 = vmax.f32 %v5688_v0, 0.0  ;;  %v6392_v22 = vrot.slane %v13924_v32, 1  ;;  %v6163_v3 = vshrl.u32 %v13924_v32, 16 }
 0x435   : > { %v5984_v42 = vrot.slane %v5890_v1, 1  ;;  %6090 = vst.msk [vmem:[#allocation4 + $0xc0] sm:$0xff] %vm2583_vm2, %v6056_v6  ;;  %v5821_v63 = vrot.slane %v5723_v37, 2  ;;  %v6393_v40 = vrot.slane %v13935_v34, 1  ;;  %v6165_v24 = vshll.u32 %v13924_v32, 16 }
 0x436   : > { %v5827_v55 = vrot.slane %v5726_v56, 2  ;;  %v5823_v53 = vrot.slane %v5724_v46, 2  ;;  %v13950_v54 = vshll.u32 %v13935_v34, 16  ;;  %v13962_v45 = vpack.c.bf16 %v6142_v17, %v6141_v27 }
 0x437   : > { %v5987_v43 = vsel %vm2087_vm3, %v5984_v42, %v5986_v31  ;;  %v5822_v51 = vsel %vm4436_vm8, %v5819_v48, %v5821_v63  ;;  %v6394_v49 = vsel %vm2087_vm3, %v6392_v22, %v6393_v40  ;;  %v6167_v48 = vrot.slane %v6165_v24, 1 }
 0x438   : > { %v6059_v11 = vmax.f32 %v5890_v1, %v5987_v43  ;;  %v5892_v16 = vmax.f32 %v5720_v12, %v5822_v51  ;;  %v5828_v50 = vsel %vm4436_vm8, %v5825_v2, %v5827_v55  ;;  %v5896_v29 = vmax.f32 %v5724_v46, %v5827_v55  ;;  %10745 = vmatmul.mubr.msk.bf16.vlgmr.msra.gmra.mxu0 %vm2583_vm2, %v6394_v49 }
 0x439   : > { %v5895_v30 = vmax.f32 %v5723_v37, %v5828_v50  ;;  %v5826_v39 = vsel %vm4436_vm8, %v5823_v53, %v5825_v2  ;;  %v6172_v60 = vrot.slane %v13950_v54, 1  ;;  %v15293_v12 = vmov 0.0   ;;  %10787 = vmatpush3.bf16.msra.mxu0 %v11190_v35 }
 0x43a   : > { %6093 = vst.msk [vmem:[#allocation4 + $0xd8] sm:$0xff] %vm2583_vm2, %v6059_v11  ;;  %v5988_v57 = vrot.slane %v5892_v16, 1  ;;  %v5894_v36 = vmax.f32 %v5722_v14, %v5826_v39  ;;  %v5996_v4 = vrot.slane %v5896_v29, 1  ;;  %10748 = vmatprep.mubr.msk.bf16.mxu0 %vm11295_vm11, %v15293_v12  ;;  %10830 = vmatprep.subr.bf16.mxu0 %v15293_v12  ;;  %v6168_v7 = vor.u32 %v6167_v48, %v6163_v3 }
 0x43b   : > { %v5994_v21 = vrot.slane %v5895_v30, 1  ;;  %v6395_v8 = vrot.slane %v13962_v45, 1  ;;  %v13983_v52 = vshll.u32 %v13962_v45, 16  ;;  %v13989_v18 = vshrl.u32 %v13935_v34, 16  ;;  %7385 = vst.msk [vmem:[#allocation7] sm:$0xff] %vm7367_vm15, %v15293_v12  ;;  %7386 = vst.msk [vmem:[#allocation7 + $0x8] sm:$0xff] %vm7367_vm15, %v15293_v12 }
 0x43c   : > { %v6111_v9 = vld [vmem:[#allocation4 + $0xb4] ss:$2 sm:$0xff]  ;;  %v5989_v13 = vsel %vm2087_vm3, %v5986_v31, %v5988_v57  ;;  %v5992_v14 = vrot.slane %v5894_v36, 1  ;;  %v6065_v19 = vmax.f32 %v5896_v29, %v5996_v4  ;;  %v6884_v38 = vrot.slane %v13935_v34, 2  ;;  %7387 = vst.msk [vmem:[#allocation7 + $0x10] sm:$0xff] %vm7367_vm15, %v15293_v12  ;;  %7388 = vst.msk [vmem:[#allocation7 + $0x18] sm:$0xff] %vm7367_vm15, %v15293_v12 }
 0x43d   : > { %6134 = vst.msk [vmem:[#allocation5 + $0x3d] sm:$0xff] %vm2583_vm2, %v6111_v9  ;;  %v6060_v23 = vmax.f32 %v13921_v61, %v5989_v13  ;;  %v5997_v28 = vsel %vm2087_vm3, %v5994_v21, %v5996_v4  ;;  %v6173_v61 = vsel %vm2913_vm4, %v6168_v7, %v6172_v60  ;;  %v6396_v20 = vsel %vm2087_vm3, %v6393_v40, %v6395_v8  ;;  %v6143_v31 = vld [vmem:[#allocation5 + $0x30] sm:$0xff] }
 0x43e   : > { %v5995_v47 = vsel %vm2087_vm3, %v5992_v14, %v5994_v21  ;;  %v6064_v5 = vmax.f32 %v5895_v30, %v5997_v28  ;;  %6100 = vst.msk [vmem:[#allocation4 + $0x108] sm:$0x7] %vm6099_vm12, %v6065_v19  ;;  %10701 = vmatmul.mubr.msk.bf16.vlgmr.msra.gmra.mxu1 %vm2583_vm2, %v6173_v61  ;;  %v6180_v10 = vrot.slane %v13983_v52, 1  ;;  %v6176_v58 = vor.u32 %v13989_v18, %v6172_v60 }
 0x43f   : > { %6094 = vst.msk [vmem:[#allocation4 + $0xe0] sm:$0xff] %vm2583_vm2, %v6060_v23  ;;  %v6063_v15 = vmax.f32 %v5894_v36, %v5995_v47  ;;  %10704 = vmatprep.mubr.msk.bf16.mxu1 %vm11295_vm11, %v15293_v12  ;;  %10721 = vmatpush3.bf16.msra.mxu1 %v11189_v33  ;;  %v6885_v44 = vrot.slane %v13962_v45, 2  ;;  %v6510_v6 = vrot.slane %v13924_v32, 5  ;;  %v6511_v2 = vrot.slane %v13935_v34, 5 }
 0x440   : > { %6098 = vst.msk [vmem:[#allocation4 + $0x100] sm:$0xff] %vm2583_vm2, %v6064_v5  ;;  %10749 = vmatmul.mubr.msk.bf16.gmra.mxu0 %vm2583_vm2, %v6396_v20  ;;  %10764 = vmatprep.subr.bf16.mxu1 %v15293_v12  ;;  %v6181_v1 = vsel %vm2913_vm4, %v6176_v58, %v6180_v10  ;;  %v6513_v56 = vrot.slane %v13962_v45, 5  ;;  %v14020_v43 = vshrl.u32 %v13962_v45, 16  ;;  %v7137_v35 = vrot.slane %v13935_v34, 3 }
 0x441   : > { %6097 = vst.msk [vmem:[#allocation4 + $0xf8] sm:$0xff] %vm2583_vm2, %v6063_v15  ;;  %10752 = vmatprep.mubr.msk.bf16.mxu0 %vm11295_vm11, %v15293_v12  ;;  %v14003_v26 = vsel %vm4436_vm8, %v6884_v38, %v6885_v44  ;;  %v14013_v42 = vsel %vm6509_vm13, %v6510_v6, %v6511_v2  ;;  %v7138_v16 = vrot.slane %v13962_v45, 3  ;;  %v6765_v50 = vrot.slane %v13924_v32, 6 }
 0x442   : > { %v14030_v55 = vsel %vm6509_vm13, %v6511_v2, %v6513_v56  ;;  %v6184_v53 = vor.u32 %v14020_v43, %v6180_v10  ;;  %v6766_v29 = vrot.slane %v13935_v34, 6  ;;  %v6768_v30 = vrot.slane %v13962_v45, 6  ;;  %7390 = vst.msk [vmem:[#allocation7 + $0x20] sm:$0xf] %vm7389_vm1, %v15293_v12 }
 0x443   : > { %v14048_v49 = vsel %vm5337_vm9, %v7137_v35, %v7138_v16  ;;  %v7002_v2 = vrot.slane %v13989_v18, 2  ;;  %v6630_v35 = vrot.slane %v6165_v24, 6 }
 0x444   : > { %v6144_v25 = vld [vmem:[#allocation5 + $0x38] sm:$0xff]  ;;  %v14052_v27 = vsel %vm1162_vm0, %v6765_v50, %v6766_v29  ;;  %v14058_v21 = vsel %vm1162_vm0, %v6766_v29, %v6768_v30 }
 0x445   : > { %v13999_v41 = vpack.c.bf16 %v6144_v25, %v6143_v31 }
 0x446   : > { %v6113_v59 = vld [vmem:[#allocation4 + $0xd8] ss:$2 sm:$0xff]  ;;  %10705 = vmatmul.mubr.msk.bf16.gmra.mxu1 %vm2583_vm2, %v6181_v1 }
 0x447   : > { %v6397_v0 = vrot.slane %v13999_v41, 1  ;;  %v14009_v62 = vshll.u32 %v13999_v41, 16  ;;  %6135 = vst.msk [vmem:[#allocation5 + $0x47] sm:$0xff] %vm2583_vm2, %v6113_v59  ;;  %v6887_v37 = vrot.slane %v13999_v41, 2  ;;  %10708 = vmatprep.mubr.msk.bf16.mxu1 %vm11295_vm11, %v15293_v12  ;;  %v6515_v51 = vrot.slane %v13999_v41, 5 }
 0x448   : > { %v6115_v46 = vld [vmem:[#allocation4 + $0xfc] ss:$2 sm:$0xff]  ;;  %v7140_v17 = vrot.slane %v13999_v41, 3  ;;  %v6770_v57 = vrot.slane %v13999_v41, 6  ;;  %v14067_v13 = vshrl.u32 %v13999_v41, 16 }
 0x449   : > { %v6398_v22 = vsel %vm2087_vm3, %v6395_v8, %v6397_v0  ;;  %6136 = vst.msk [vmem:[#allocation5 + $0x51] sm:$0xff] %vm2583_vm2, %v6115_v46  ;;  %v6188_v63 = vrot.slane %v14009_v62, 1  ;;  %v14027_v11 = vsel %vm4436_vm8, %v6885_v44, %v6887_v37  ;;  %v14038_v40 = vsel %vm6509_vm13, %v6513_v56, %v6515_v51 }
 0x44a   : > { %10753 = vmatmul.mubr.msk.bf16.gmra.mxu0 %vm2583_vm2, %v6398_v22  ;;  %v14055_v9 = vsel %vm5337_vm9, %v7138_v16, %v7140_v17  ;;  %v14063_v60 = vsel %vm1162_vm0, %v6768_v30, %v6770_v57  ;;  %v6632_v56 = vrot.slane %v13989_v18, 5  ;;  %v6633_v46 = vrot.slane %v13950_v54, 6 }
 0x44b   : > { %10756 = vmatprep.mubr.msk.bf16.mxu0 %vm11295_vm11, %v15293_v12  ;;  %v6189_v39 = vsel %vm2913_vm4, %v6184_v53, %v6188_v63  ;;  %v6192_v7 = vor.u32 %v14067_v13, %v6188_v63  ;;  %v7006_v22 = vrot.slane %v13983_v52, 3  ;;  %v6629_v53 = vrot.slane %v6163_v3, 5  ;;  %v11192_v3 = vld [vmem:[%s14945_s5 + $0x30] sm:$0xff]  }
 0x44c   : > { %v6634_v50 = vor.u32 %v6633_v46, %v6632_v56  ;;  %v7010_v24 = vrot.slane %v14009_v62, 3 }
 0x44d   : > { %v6631_v29 = vor.u32 %v6630_v35, %v6629_v53 }
 0x44e   : > { %v6145_v36 = vld [vmem:[#allocation5 + $0x40] sm:$0xff]  ;;  %v6146_v4 = vld [vmem:[#allocation5 + $0x48] sm:$0xff]  ;;  %10709 = vmatmul.mubr.msk.bf16.gmra.mxu1 %vm2583_vm2, %v6189_v39  ;;  %v6636_v39 = vrot.slane %v14020_v43, 5 }
 0x44f   : > { %v14060_v48 = vpack.c.bf16 %v6146_v4, %v6145_v36  ;;  %10712 = vmatprep.mubr.msk.bf16.mxu1 %vm11295_vm11, %v15293_v12  ;;  %v6635_v30 = vsel %vm6628_vm14, %v6631_v29, %v6634_v50  ;;  %v11191_v4 = vld [vmem:[%s14945_s5 + $0x18] sm:$0xff]  }
 0x450   : > { %v6147_v14 = vld [vmem:[#allocation5 + $0x50] sm:$0xff]  ;;  %v6148_v19 = vld [vmem:[#allocation5 + $0x58] sm:$0xff] }
 0x451   : > { %v6399_v23 = vrot.slane %v14060_v48, 1  ;;  %v14073_v28 = vshll.u32 %v14060_v48, 16  ;;  %v6889_v8 = vrot.slane %v14060_v48, 2  ;;  %v6517_v33 = vrot.slane %v14060_v48, 5 }
 0x452   : > { %v14080_v15 = vpack.c.bf16 %v6148_v19, %v6147_v14  ;;  %v7142_v61 = vrot.slane %v14060_v48, 3  ;;  %v6772_v10 = vrot.slane %v14060_v48, 6  ;;  %v6198_v63 = vshrl.u32 %v14060_v48, 16 }
 0x453   : > { %v6400_v47 = vsel %vm2087_vm3, %v6397_v0, %v6399_v23  ;;  %v6196_v5 = vrot.slane %v14073_v28, 1  ;;  %v14087_v20 = vsel %vm4436_vm8, %v6887_v37, %v6889_v8  ;;  %v14096_v31 = vsel %vm6509_vm13, %v6515_v51, %v6517_v33 }
 0x454   : > { %10757 = vmatmul.mubr.msk.bf16.gmra.mxu0 %vm2583_vm2, %v6400_v47  ;;  %v14099_v25 = vsel %vm5337_vm9, %v7140_v17, %v7142_v61  ;;  %v7144_v38 = vrot.slane %v14080_v15, 3  ;;  %v14104_v44 = vsel %vm1162_vm0, %v6770_v57, %v6772_v10  ;;  %v6774_v1 = vrot.slane %v14080_v15, 6 }
 0x455   : > { %v6197_v58 = vsel %vm2913_vm4, %v6192_v7, %v6196_v5  ;;  %10760 = vmatprep.mubr.msk.bf16.mxu0 %vm11295_vm11, %v15293_v12  ;;  %v7003_v0 = vrot.slane %v13950_v54, 3  ;;  %v7005_v37 = vrot.slane %v14020_v43, 2  ;;  %v6200_v18 = vor.u32 %v6198_v63, %v6196_v5 }
 0x456   : > { %10713 = vmatmul.mubr.msk.bf16.gmra.mxu1 %vm2583_vm2, %v6197_v58  ;;  %v14112_v6 = vsel %vm5337_vm9, %v7142_v61, %v7144_v38  ;;  %v14116_v59 = vsel %vm1162_vm0, %v6772_v10, %v6774_v1  ;;  %v7009_v17 = vrot.slane %v14067_v13, 2  ;;  %v6637_v57 = vrot.slane %v13983_v52, 6 }
 0x457   : > { %10716 = vmatprep.mubr.msk.bf16.mxu1 %vm11295_vm11, %v15293_v12  ;;  %v7004_v51 = vor.u32 %v7003_v0, %v7002_v2  ;;  %v7007_v16 = vor.u32 %v7006_v22, %v7005_v37  ;;  %v7013_v52 = vrot.slane %v6198_v63, 2  ;;  %v7014_v43 = vrot.slane %v14073_v28, 3 }
 0x458   : > { %v7011_v36 = vor.u32 %v7010_v24, %v7009_v17  ;;  %v6638_v19 = vor.u32 %v6637_v57, %v6636_v39  ;;  %v6640_v7 = vrot.slane %v14067_v13, 5  ;;  %v6641_v47 = vrot.slane %v14009_v62, 6 }
 0x459   : > { %v14132_v54 = vsel %vm4978_vm10, %v7004_v51, %v7007_v16  ;;  %v7015_v5 = vor.u32 %v7014_v43, %v7013_v52  ;;  %v6644_v10 = vrot.slane %v6198_v63, 5  ;;  %v6645_v62 = vrot.slane %v14073_v28, 6  ;;  %v11194_v63 = vld [vmem:[%s14945_s5 + $0x40] sm:$0xff]   ;;  %v11193_v51 = vld [vmem:[%s14945_s5 + $0x28] sm:$0xff]  }
 0x45a   : > { %v14152_v14 = vsel %vm4978_vm10, %v7007_v16, %v7011_v36  ;;  %v6642_v61 = vor.u32 %v6641_v47, %v6640_v7  ;;  %v6649_v1 = vshrl.u32 %v14080_v15, 16  ;;  %v6652_v2 = vshll.u32 %v14080_v15, 16 }
 0x45b   : > { %v6646_v58 = vor.u32 %v6645_v62, %v6644_v10  ;;  %v6519_v53 = vrot.slane %v14080_v15, 5 }
 0x45c   : > { %10761 = vmatmul.mubr.msk.bf16.gmra.mxu0 %vm2583_vm2, %v6399_v23  ;;  %v6639_v23 = vsel %vm6628_vm14, %v6634_v50, %v6638_v19  ;;  %v6643_v13 = vsel %vm6628_vm14, %v6638_v19, %v6642_v61  ;;  %v6651_v0 = vrot.slane %v6649_v1, 5  ;;  %v6654_v28 = vrot.slane %v6652_v2, 6 }
 0x45d   : > { %10788 = vmatprep.mubr.msk.bf16.mxu0 %vm11295_vm11, %v15293_v12  ;;  %v7017_v56 = vrot.slane %v6649_v1, 2  ;;  %v7018_v46 = vrot.slane %v6652_v2, 3 }
 0x45e   : > { %10717 = vmatmul.mubr.msk.bf16.gmra.mxu1 %vm2583_vm2, %v6200_v18  ;;  %v6655_v37 = vor.u32 %v6654_v28, %v6651_v0 }
 0x45f   : > { %10722 = vmatprep.mubr.msk.bf16.mxu1 %vm11295_vm11, %v15293_v12  ;;  %v14197_v22 = vor.u32 %v7018_v46, %v7017_v56 }
 0x464   : > { %10789 = vmatmul.mubr.msk.bf16.vlgmr.msra.gmra.mxu0 %vm2583_vm2, %v6635_v30 }
 0x465   : > { %10792 = vmatprep.mubr.msk.bf16.mxu0 %vm11295_vm11, %v15293_v12  ;;  %10831 = vmatpush3.bf16.msra.mxu0 %v11192_v3 }
 0x466   : > { %10874 = vmatprep.subr.bf16.mxu0 %v15293_v12  ;;  %10723 = vmatmul.mubr.msk.bf16.vlgmr.msra.gmra.mxu1 %vm2583_vm2, %v13924_v32  ;;  %v14168_v32 = vsel %vm4978_vm10, %v7011_v36, %v7015_v5 }
 0x467   : > { %10765 = vmatpush3.bf16.msra.mxu1 %v11191_v4  ;;  %10726 = vmatprep.mubr.msk.bf16.mxu1 %vm11295_vm11, %v15293_v12 }
 0x468   : > { %10808 = vmatprep.subr.bf16.mxu1 %v15293_v12 }
 0x46c   : > { %10793 = vmatmul.mubr.msk.bf16.gmra.mxu0 %vm2583_vm2, %v6639_v23 }
 0x46d   : > { %10796 = vmatprep.mubr.msk.bf16.mxu0 %vm11295_vm11, %v15293_v12 }
 0x46e   : > { %10727 = vmatmul.mubr.msk.bf16.gmra.mxu1 %vm2583_vm2, %v13935_v34  ;;  %v6647_v34 = vsel %vm6628_vm14, %v6642_v61, %v6646_v58 }
 0x46f   : > { %10730 = vmatprep.mubr.msk.bf16.mxu1 %vm11295_vm11, %v15293_v12 }
 0x474   : > { %10797 = vmatmul.mubr.msk.bf16.gmra.mxu0 %vm2583_vm2, %v6643_v13 }
 0x475   : > { %10800 = vmatprep.mubr.msk.bf16.mxu0 %vm11295_vm11, %v15293_v12 }
 0x476   : > { %10731 = vmatmul.mubr.msk.bf16.gmra.mxu1 %vm2583_vm2, %v13962_v45  ;;  %v6656_v45 = vsel %vm6628_vm14, %v6646_v58, %v6655_v37 }
 0x477   : > { %10734 = vmatprep.mubr.msk.bf16.mxu1 %vm11295_vm11, %v15293_v12 }
 0x47c   : > { %10801 = vmatmul.mubr.msk.bf16.gmra.mxu0 %vm2583_vm2, %v6647_v34 }
 0x47d   : > { %10804 = vmatprep.mubr.msk.bf16.mxu0 %vm11295_vm11, %v15293_v12 }
 0x47e   : > { %10735 = vmatmul.mubr.msk.bf16.gmra.mxu1 %vm2583_vm2, %v13999_v41  ;;  %v14203_v41 = vsel %vm4978_vm10, %v7015_v5, %v14197_v22 }
 0x47f   : > { %10738 = vmatprep.mubr.msk.bf16.mxu1 %vm11295_vm11, %v15293_v12 }
 0x484   : > { %10805 = vmatmul.mubr.msk.bf16.gmra.mxu0 %vm2583_vm2, %v6656_v45 }
 0x485   : > { %10832 = vmatprep.mubr.msk.bf16.mxu0 %vm11295_vm11, %v15293_v12 }
 0x486   : > { %10739 = vmatmul.mubr.msk.bf16.gmra.mxu1 %vm2583_vm2, %v14060_v48 }
 0x487   : > { %10766 = vmatprep.mubr.msk.bf16.mxu1 %vm11295_vm11, %v15293_v12 }
 0x48c   : > { %10833 = vmatmul.mubr.msk.bf16.vlgmr.msra.gmra.mxu0 %vm2583_vm2, %v14003_v26  ;;  %v6891_v26 = vrot.slane %v14080_v15, 2 }
 0x48d   : > { %10836 = vmatprep.mubr.msk.bf16.mxu0 %vm11295_vm11, %v15293_v12  ;;  %10875 = vmatpush3.bf16.msra.mxu0 %v11194_v63 }
 0x48e   : > { %10767 = vmatmul.mubr.msk.bf16.vlgmr.msra.gmra.mxu1 %vm2583_vm2, %v14013_v42  ;;  %v6149_v42 = vld [vmem:[#allocation5 + $0x60] sm:$0xf] }
 0x48f   : > { %10809 = vmatpush3.bf16.msra.mxu1 %v11193_v51  ;;  %10770 = vmatprep.mubr.msk.bf16.mxu1 %vm11295_vm11, %v15293_v12 }
 0x490   : > { %10852 = vmatprep.subr.bf16.mxu1 %v15293_v12 }
 0x494   : > { %10837 = vmatmul.mubr.msk.bf16.gmra.mxu0 %vm2583_vm2, %v14027_v11  ;;  %v6892_v11 = vsel %vm4436_vm8, %v6889_v8, %v6891_v26  ;;  %v6520_v8 = vsel %vm6509_vm13, %v6517_v33, %v6519_v53 }
 0x495   : > { %10840 = vmatprep.mubr.msk.bf16.mxu0 %vm11295_vm11, %v15293_v12 }
 0x496   : > { %10771 = vmatmul.mubr.msk.bf16.gmra.mxu1 %vm2583_vm2, %v14030_v55  ;;  %v6156_v55 = vpack.c.bf16 %v6149_v42, %v6149_v42 }
 0x497   : > { %10774 = vmatprep.mubr.msk.bf16.mxu1 %vm11295_vm11, %v15293_v12 }
 0x49c   : > { %10841 = vmatmul.mubr.msk.bf16.gmra.mxu0 %vm2583_vm2, %v14087_v20  ;;  %v6893_v20 = vrot.slane %v6156_v55, 2 }
 0x49d   : > { %10844 = vmatprep.mubr.msk.bf16.mxu0 %vm11295_vm11, %v15293_v12 }
 0x49e   : > { %10775 = vmatmul.mubr.msk.bf16.gmra.mxu1 %vm2583_vm2, %v14038_v40  ;;  %v6894_v40 = vsel %vm4436_vm8, %v6891_v26, %v6893_v20 }
 0x49f   : > { %10778 = vmatprep.mubr.msk.bf16.mxu1 %vm11295_vm11, %v15293_v12 }
 0x4a4   : > { %10845 = vmatmul.mubr.msk.bf16.gmra.mxu0 %vm2583_vm2, %v6892_v11 }
 0x4a5   : > { %10848 = vmatprep.mubr.msk.bf16.mxu0 %vm11295_vm11, %v15293_v12 }
 0x4a6   : > { %10779 = vmatmul.mubr.msk.bf16.gmra.mxu1 %vm2583_vm2, %v14096_v31  ;;  %v11195_v31 = vld [vmem:[%s14945_s5 + $0x38] sm:$0xff]  }
 0x4a7   : > { %10782 = vmatprep.mubr.msk.bf16.mxu1 %vm11295_vm11, %v15293_v12 }
 0x4ac   : > { %10849 = vmatmul.mubr.msk.bf16.gmra.mxu0 %vm2583_vm2, %v6894_v40 }
 0x4ad   : > { %10876 = vmatprep.mubr.msk.bf16.mxu0 %vm11295_vm11, %v15293_v12 }
 0x4ae   : > { %10783 = vmatmul.mubr.msk.bf16.gmra.mxu1 %vm2583_vm2, %v6520_v8 }
 0x4af   : > { %10810 = vmatprep.mubr.msk.bf16.mxu1 %vm11295_vm11, %v15293_v12 }
 0x4b4   : > { %10877 = vmatmul.mubr.msk.bf16.vlgmr.msra.gmra.mxu0 %vm2583_vm2, %v14048_v49  ;;  %v7146_v49 = vrot.slane %v6156_v55, 3 }
 0x4b5   : > { %10880 = vmatprep.mubr.msk.bf16.mxu0 %vm11295_vm11, %v15293_v12 }
 0x4b6   : > { %10811 = vmatmul.mubr.msk.bf16.vlgmr.msra.gmra.mxu1 %vm2583_vm2, %v14052_v27  ;;  %v7147_v27 = vsel %vm5337_vm9, %v7144_v38, %v7146_v49 }
 0x4b7   : > { %10853 = vmatpush3.bf16.msra.mxu1 %v11195_v31  ;;  %10814 = vmatprep.mubr.msk.bf16.mxu1 %vm11295_vm11, %v15293_v12 }
 0x4bc   : > { %10881 = vmatmul.mubr.msk.bf16.gmra.mxu0 %vm2583_vm2, %v14055_v9  ;;  %v7022_v9 = vshrl.u32 %v6156_v55, 16 }
 0x4bd   : > { %10884 = vmatprep.mubr.msk.bf16.mxu0 %vm11295_vm11, %v15293_v12 }
 0x4be   : > { %10815 = vmatmul.mubr.msk.bf16.gmra.mxu1 %vm2583_vm2, %v14058_v21  ;;  %v7025_v21 = vshll.u32 %v6156_v55, 16  ;;  %v7024_v48 = vrot.slane %v7022_v9, 2 }
 0x4bf   : > { %10818 = vmatprep.mubr.msk.bf16.mxu1 %vm11295_vm11, %v15293_v12 }
 0x4c4   : > { %10885 = vmatmul.mubr.msk.bf16.gmra.mxu0 %vm2583_vm2, %v14099_v25 }
 0x4c5   : > { %10888 = vmatprep.mubr.msk.bf16.mxu0 %vm11295_vm11, %v15293_v12 }
 0x4c6   : > { %10819 = vmatmul.mubr.msk.bf16.gmra.mxu1 %vm2583_vm2, %v14063_v60  ;;  %v7027_v60 = vrot.slane %v7025_v21, 3 }
 0x4c7   : > { %10822 = vmatprep.mubr.msk.bf16.mxu1 %vm11295_vm11, %v15293_v12 }
 0x4c8   : > { %v7028_v15 = vor.u32 %v7027_v60, %v7024_v48 }
 0x4cc   : > { %10889 = vmatmul.mubr.msk.bf16.gmra.mxu0 %vm2583_vm2, %v14112_v6 }
 0x4cd   : > { %10892 = vmatprep.mubr.msk.bf16.mxu0 %vm11295_vm11, %v15293_v12 }
 0x4ce   : > { %10823 = vmatmul.mubr.msk.bf16.gmra.mxu1 %vm2583_vm2, %v14104_v44  ;;  %v7029_v44 = vsel %vm4978_vm10, %v14197_v22, %v7028_v15  ;;  %vm8167_vm10 = vcmask 517120  }
 0x4cf   : > { %10826 = vmatprep.mubr.msk.bf16.mxu1 %vm11295_vm11, %v15293_v12 }
 0x4d4   : > { %10893 = vmatmul.mubr.msk.bf16.gmra.mxu0 %vm2583_vm2, %v7147_v27 }
 0x4d6   : > { %10827 = vmatmul.mubr.msk.bf16.gmra.mxu1 %vm2583_vm2, %v14116_v59 }
 0x4d7   : > { %10854 = vmatprep.mubr.msk.bf16.mxu1 %vm11295_vm11, %v15293_v12 }
 0x4de   : > { %10855 = vmatmul.mubr.msk.bf16.vlgmr.msra.gmra.mxu1 %vm2583_vm2, %v14132_v54 }
 0x4df   : > { %10858 = vmatprep.mubr.msk.bf16.mxu1 %vm11295_vm11, %v15293_v12 }
 0x4e6   : > { %10859 = vmatmul.mubr.msk.bf16.gmra.mxu1 %vm2583_vm2, %v14152_v14 }
 0x4e7   : > { %10862 = vmatprep.mubr.msk.bf16.mxu1 %vm11295_vm11, %v15293_v12 }
 0x4ee   : > { %10863 = vmatmul.mubr.msk.bf16.gmra.mxu1 %vm2583_vm2, %v14168_v32 }
 0x4ef   : > { %10866 = vmatprep.mubr.msk.bf16.mxu1 %vm11295_vm11, %v15293_v12 }
 0x4f6   : > { %10867 = vmatmul.mubr.msk.bf16.gmra.mxu1 %vm2583_vm2, %v14203_v41 }
 0x4f7   : > { %10870 = vmatprep.mubr.msk.bf16.mxu1 %vm11295_vm11, %v15293_v12 }
 0x4f8   : > { %v6456_v33 = vpop.f32.mrf.mxu0 }
 0x4fa   : > { %v10746_v25 = vpop.f32.mrf.mxu0 }
 0x4fc   : > { %v6459_v38 = vpop.f32.mrf.mxu0 }
 0x4fe   : > { %v6256_v6 = vpop.f32.mrf.mxu1  ;;  %v10747_v59 = vpop.f32.mrf.mxu0  ;;  %10871 = vmatmul.mubr.msk.bf16.gmra.mxu1 %vm2583_vm2, %v7029_v44  ;;  %vm7376_vm2 = vcmask 256000  }
 0x500   : > { %v10702_v35 = vpop.f32.mrf.mxu1  ;;  %v6464_v16 = vpop.f32.mrf.mxu0 }
 0x502   : > { %v6259_v18 = vpop.f32.mrf.mxu1  ;;  %v10750_v50 = vpop.f32.mrf.mxu0 }
 0x504   : > { %v10703_v54 = vpop.f32.mrf.mxu1  ;;  %v6467_v29 = vpop.f32.mrf.mxu0 }
 0x506   : > { %v6264_v3 = vpop.f32.mrf.mxu1  ;;  %v10751_v17 = vpop.f32.mrf.mxu0 }
 0x508   : > { %v10706_v24 = vpop.f32.mrf.mxu1 }
 0x50a   : > { %v6472_v30 = vpop.f32.mrf.mxu0  ;;  %v6267_v39 = vpop.f32.mrf.mxu1 }
 0x50c   : > { %v10754_v57 = vpop.f32.mrf.mxu0  ;;  %v10707_v36 = vpop.f32.mrf.mxu1 }
 0x50e   : > { %v14322_v4 = vpop.f32.mrf.mxu0  ;;  %v6272_v14 = vpop.f32.mrf.mxu1 }
 0x510   : > { %v10755_v19 = vpop.f32.mrf.mxu0  ;;  %v10710_v52 = vpop.f32.mrf.mxu1 }
 0x512   : > { %v6275_v43 = vpop.f32.mrf.mxu1 }
 0x514   : > { %v14324_v23 = vpop.f32.mrf.mxu0  ;;  %v10711_v7 = vpop.f32.mrf.mxu1 }
 0x516   : > { %v10758_v47 = vpop.f32.mrf.mxu0  ;;  %v6280_v5 = vpop.f32.mrf.mxu1 }
 0x518   : > { %v14326_v32 = vpop.f32.mrf.mxu0  ;;  %v10714_v61 = vpop.f32.mrf.mxu1 }
 0x51a   : > { %v10759_v13 = vpop.f32.mrf.mxu0  ;;  %v6283_v10 = vpop.f32.mrf.mxu1 }
 0x51c   : > { %v14328_v62 = vpop.f32.mrf.mxu0  ;;  %v10715_v58 = vpop.f32.mrf.mxu1 }
 0x51e   : > { %v10762_v1 = vpop.f32.mrf.mxu0  ;;  %v14330_v2 = vpop.f32.mrf.mxu1 }
 0x520   : > { %v14332_v34 = vpop.f32.mrf.mxu0  ;;  %v10718_v0 = vpop.f32.mrf.mxu1 }
 0x522   : > { %v10763_v28 = vpop.f32.mrf.mxu0  ;;  %v14334_v37 = vpop.f32.mrf.mxu1 }
 0x524   : > { %v14336_v45 = vpop.f32.mrf.mxu0  ;;  %v10719_v56 = vpop.f32.mrf.mxu1 }
 0x526   : > { %v10790_v46 = vpop.f32.mrf.mxu0  ;;  %v6345_v22 = vpop.f32.mrf.mxu1 }
 0x527   : > { %v6346_v63 = vadd.f32 %v6345_v22, %v6256_v6 }
 0x528   : > { %v14338_v41 = vpop.f32.mrf.mxu0  ;;  %v10724_v51 = vpop.f32.mrf.mxu1 }
 0x529   : > { %v6495_v42 = vadd.f32 %v6456_v33, %v6346_v63 }
 0x52a   : > { %v10791_v26 = vpop.f32.mrf.mxu0  ;;  %v6348_v11 = vpop.f32.mrf.mxu1 }
 0x52b   : > { %v6349_v20 = vadd.f32 %v6348_v11, %v6259_v18 }
 0x52c   : > { %v14340_v55 = vpop.f32.mrf.mxu0  ;;  %v10725_v40 = vpop.f32.mrf.mxu1 }
 0x52d   : > { %v6496_v8 = vadd.f32 %v6459_v38, %v6349_v20 }
 0x52e   : > { %v10794_v53 = vpop.f32.mrf.mxu0  ;;  %v6353_v31 = vpop.f32.mrf.mxu1 }
 0x52f   : > { %v6354_v27 = vadd.f32 %v6353_v31, %v6264_v3 }
 0x530   : > { %v14342_v49 = vpop.f32.mrf.mxu0  ;;  %v10728_v9 = vpop.f32.mrf.mxu1 }
 0x531   : > { %v6497_v48 = vadd.f32 %v6464_v16, %v6354_v27 }
 0x532   : > { %v10795_v21 = vpop.f32.mrf.mxu0  ;;  %v6356_v60 = vpop.f32.mrf.mxu1 }
 0x533   : > { %v6357_v25 = vadd.f32 %v6356_v60, %v6267_v39 }
 0x534   : > { %v14344_v15 = vpop.f32.mrf.mxu0  ;;  %v10729_v44 = vpop.f32.mrf.mxu1 }
 0x535   : > { %v6498_v6 = vadd.f32 %v6467_v29, %v6357_v25 }
 0x536   : > { %v10798_v33 = vpop.f32.mrf.mxu0  ;;  %v6361_v59 = vpop.f32.mrf.mxu1 }
 0x537   : > { %v6362_v18 = vadd.f32 %v6361_v59, %v6272_v14 }
 0x538   : > { %v14346_v35 = vpop.f32.mrf.mxu0  ;;  %v10732_v50 = vpop.f32.mrf.mxu1 }
 0x539   : > { %v14348_v54 = vadd.f32 %v6472_v30, %v6362_v18 }
 0x53a   : > { %v10799_v38 = vpop.f32.mrf.mxu0  ;;  %v6364_v17 = vpop.f32.mrf.mxu1 }
 0x53b   : > { %v6365_v24 = vadd.f32 %v6364_v17, %v6275_v43 }
 0x53c   : > { %v14350_v3 = vpop.f32.mrf.mxu0  ;;  %v10733_v16 = vpop.f32.mrf.mxu1 }
 0x53d   : > { %v14361_v29 = vadd.f32 %v14322_v4, %v6365_v24 }
 0x53e   : > { %v10802_v57 = vpop.f32.mrf.mxu0  ;;  %v6369_v30 = vpop.f32.mrf.mxu1 }
 0x53f   : > { %v6370_v36 = vadd.f32 %v6369_v30, %v6280_v5 }
 0x540   : > { %v14363_v39 = vpop.f32.mrf.mxu0  ;;  %v10736_v14 = vpop.f32.mrf.mxu1 }
 0x541   : > { %v14366_v52 = vadd.f32 %v14324_v23, %v6370_v36 }
 0x542   : > { %v10803_v19 = vpop.f32.mrf.mxu0  ;;  %v6372_v43 = vpop.f32.mrf.mxu1 }
 0x543   : > { %v6373_v47 = vadd.f32 %v6372_v43, %v6283_v10 }
 0x544   : > { %v14368_v7 = vpop.f32.mrf.mxu0  ;;  %v10737_v61 = vpop.f32.mrf.mxu1 }
 0x545   : > { %v14371_v58 = vadd.f32 %v14326_v32, %v6373_v47 }
 0x546   : > { %v10806_v13 = vpop.f32.mrf.mxu0  ;;  %v6377_v4 = vpop.f32.mrf.mxu1 }
 0x547   : > { %v6378_v0 = vadd.f32 %v6377_v4, %v14330_v2 }
 0x548   : > { %v14373_v1 = vpop.f32.mrf.mxu0  ;;  %v10740_v5 = vpop.f32.mrf.mxu1 }
 0x549   : > { %v14377_v56 = vadd.f32 %v14328_v62, %v6378_v0 }
 0x54a   : > { %v10807_v28 = vpop.f32.mrf.mxu0  ;;  %v6380_v23 = vpop.f32.mrf.mxu1 }
 0x54b   : > { %v6381_v10 = vadd.f32 %v6380_v23, %v14334_v37 }
 0x54c   : > { %v14379_v46 = vpop.f32.mrf.mxu0  ;;  %v10741_v22 = vpop.f32.mrf.mxu1 }
 0x54d   : > { %v14383_v32 = vadd.f32 %v14332_v34, %v6381_v10 }
 0x54e   : > { %v10834_v63 = vpop.f32.mrf.mxu0  ;;  %v6576_v51 = vpop.f32.mrf.mxu1 }
 0x54f   : > { %v6615_v11 = vadd.f32 %v6576_v51, %v6495_v42 }
 0x550   : > { %v14385_v26 = vpop.f32.mrf.mxu0  ;;  %v10768_v2 = vpop.f32.mrf.mxu1 }
 0x551   : > { %v14388_v40 = vadd.f32 %v14336_v45, %v6615_v11 }
 0x552   : > { %v10835_v20 = vpop.f32.mrf.mxu0  ;;  %v6579_v62 = vpop.f32.mrf.mxu1 }
 0x553   : > { %v6616_v31 = vadd.f32 %v6579_v62, %v6496_v8 }
 0x554   : > { %v14390_v53 = vpop.f32.mrf.mxu0  ;;  %v10769_v27 = vpop.f32.mrf.mxu1 }
 0x555   : > { %v14393_v9 = vadd.f32 %v14338_v41, %v6616_v31  ;;  %v11196_v41 = vld [vmem:[%s14947_s7 + $0x18] sm:$0xff]  }
 0x556   : > { %v10838_v37 = vpop.f32.mrf.mxu0  ;;  %v6584_v34 = vpop.f32.mrf.mxu1  ;;  %10896 = vmatprep.subr.bf16.mxu1 %v11196_v41 }
 0x557   : > { %v6617_v60 = vadd.f32 %v6584_v34, %v6497_v48  ;;  %v11198_v48 = vld [vmem:[%s14947_s7 + $0x10] sm:$0xff]   ;;  %10897 = vmatpush3.bf16.msra.mxu1 %v11196_v41 }
 0x558   : > { %v14395_v21 = vpop.f32.mrf.mxu0  ;;  %v10772_v25 = vpop.f32.mrf.mxu1  ;;  %10898 = vmatprep.subr.bf16.mxu1 %v11198_v48 }
 0x559   : > { %v14398_v44 = vadd.f32 %v14340_v55, %v6617_v60  ;;  %v11197_v55 = vld [vmem:[%s14947_s7 + $0x8] sm:$0xff]  }
 0x55a   : > { %v10839_v42 = vpop.f32.mrf.mxu0  ;;  %v6587_v45 = vpop.f32.mrf.mxu1  ;;  %10904 = vmatprep.subr.bf16.mxu0 %v11197_v55 }
 0x55b   : > { %v6618_v59 = vadd.f32 %v6587_v45, %v6498_v6  ;;  %10905 = vmatpush3.bf16.msra.mxu0 %v11197_v55  ;;  %10899 = vmatpush3.bf16.msra.mxu1 %v11198_v48 }
 0x55c   : > { %v14400_v33 = vpop.f32.mrf.mxu0  ;;  %v10773_v18 = vpop.f32.mrf.mxu1 }
 0x55d   : > { %v14403_v50 = vadd.f32 %v14342_v49, %v6618_v59  ;;  %v11199_v49 = vld [vmem:[%s14947_s7] sm:$0xff]  }
 0x55e   : > { %v10842_v8 = vpop.f32.mrf.mxu0  ;;  %v6592_v6 = vpop.f32.mrf.mxu1  ;;  %10906 = vmatprep.subr.bf16.mxu0 %v11199_v49 }
 0x55f   : > { %v6619_v17 = vadd.f32 %v6592_v6, %v14348_v54  ;;  %10907 = vmatpush3.bf16.msra.mxu0 %v11199_v49 }
 0x560   : > { %v14416_v38 = vpop.f32.mrf.mxu0  ;;  %v10776_v24 = vpop.f32.mrf.mxu1 }
 0x561   : > { %v14423_v57 = vadd.f32 %v14344_v15, %v6619_v17  ;;  %v14435_v15 = vld [vmem:[%s14947_s7 + $0x38] sm:$0xff]  }
 0x562   : > { %v10843_v16 = vpop.f32.mrf.mxu0  ;;  %v6595_v30 = vpop.f32.mrf.mxu1  ;;  %10920 = vmatprep.subr.bf16.mxu0 %v14435_v15 }
 0x563   : > { %v6620_v14 = vadd.f32 %v6595_v30, %v14361_v29 }
 0x564   : > { %v14425_v36 = vpop.f32.mrf.mxu0  ;;  %v10777_v19 = vpop.f32.mrf.mxu1 }
 0x565   : > { %v6756_v54 = vadd.f32 %v14346_v35, %v6620_v14 }
 0x566   : > { %v10846_v43 = vpop.f32.mrf.mxu0  ;;  %v6600_v47 = vpop.f32.mrf.mxu1 }
 0x567   : > { %v6621_v13 = vadd.f32 %v6600_v47, %v14366_v52  ;;  %v14445_v52 = vld [vmem:[%s14947_s7 + $0x28] sm:$0xff]  }
 0x568   : > { %v14429_v61 = vpop.f32.mrf.mxu0  ;;  %v10780_v4 = vpop.f32.mrf.mxu1  ;;  %10912 = vmatprep.subr.bf16.mxu1 %v14445_v52 }
 0x569   : > { %v6757_v29 = vadd.f32 %v14350_v3, %v6621_v13 }
 0x56a   : > { %v10847_v0 = vpop.f32.mrf.mxu0  ;;  %v6603_v5 = vpop.f32.mrf.mxu1 }
 0x56b   : > { %v6622_v35 = vadd.f32 %v6603_v5, %v14371_v58 }
 0x56c   : > { %v14439_v28 = vpop.f32.mrf.mxu0  ;;  %v10781_v23 = vpop.f32.mrf.mxu1 }
 0x56d   : > { %v6758_v22 = vadd.f32 %v14363_v39, %v6622_v35 }
 0x56e   : > { %v10850_v10 = vpop.f32.mrf.mxu0  ;;  %v6608_v63 = vpop.f32.mrf.mxu1 }
 0x56f   : > { %v6623_v3 = vadd.f32 %v6608_v63, %v14377_v56 }
 0x570   : > { %v14448_v51 = vpop.f32.mrf.mxu0  ;;  %v10784_v11 = vpop.f32.mrf.mxu1 }
 0x571   : > { %v6759_v58 = vadd.f32 %v14368_v7, %v6623_v3 }
 0x572   : > { %v10851_v2 = vpop.f32.mrf.mxu0  ;;  %v6611_v20 = vpop.f32.mrf.mxu1 }
 0x573   : > { %v6624_v31 = vadd.f32 %v6611_v20, %v14383_v32 }
 0x574   : > { %v14453_v62 = vpop.f32.mrf.mxu0  ;;  %v10785_v27 = vpop.f32.mrf.mxu1 }
 0x575   : > { %v6760_v39 = vadd.f32 %v14373_v1, %v6624_v31 }
 0x576   : > { %v10878_v37 = vpop.f32.mrf.mxu0  ;;  %v6831_v34 = vpop.f32.mrf.mxu1 }
 0x577   : > { %v6870_v25 = vadd.f32 %v6831_v34, %v14388_v40 }
 0x578   : > { %v14457_v60 = vpop.f32.mrf.mxu0  ;;  %v10812_v42 = vpop.f32.mrf.mxu1 }
 0x579   : > { %v6989_v45 = vadd.f32 %v14379_v46, %v6870_v25 }
 0x57a   : > { %v10879_v56 = vpop.f32.mrf.mxu0  ;;  %v6834_v59 = vpop.f32.mrf.mxu1 }
 0x57b   : > { %v6871_v18 = vadd.f32 %v6834_v59, %v14393_v9 }
 0x57c   : > { %v14461_v7 = vpop.f32.mrf.mxu0  ;;  %v10813_v8 = vpop.f32.mrf.mxu1 }
 0x57d   : > { %v6990_v41 = vadd.f32 %v14385_v26, %v6871_v18 }
 0x57e   : > { %v10882_v32 = vpop.f32.mrf.mxu0  ;;  %v6839_v55 = vpop.f32.mrf.mxu1 }
 0x57f   : > { %v6872_v48 = vadd.f32 %v6839_v55, %v14398_v44 }
 0x580   : > { %v14465_v1 = vpop.f32.mrf.mxu0  ;;  %v10816_v6 = vpop.f32.mrf.mxu1 }
 0x581   : > { %v6991_v49 = vadd.f32 %v14390_v53, %v6872_v48 }
 0x582   : > { %v10883_v40 = vpop.f32.mrf.mxu0  ;;  %v6842_v17 = vpop.f32.mrf.mxu1 }
 0x583   : > { %v6873_v24 = vadd.f32 %v6842_v17, %v14403_v50 }
 0x584   : > { %v14469_v46 = vpop.f32.mrf.mxu0  ;;  %v10817_v16 = vpop.f32.mrf.mxu1 }
 0x585   : > { %v6992_v30 = vadd.f32 %v14395_v21, %v6873_v24 }
 0x586   : > { %v10886_v9 = vpop.f32.mrf.mxu0  ;;  %v6847_v14 = vpop.f32.mrf.mxu1 }
 0x587   : > { %v6874_v19 = vadd.f32 %v6847_v14, %v14423_v57 }
 0x588   : > { %v14473_v26 = vpop.f32.mrf.mxu0  ;;  %v10820_v43 = vpop.f32.mrf.mxu1 }
 0x589   : > { %v6993_v47 = vadd.f32 %v14400_v33, %v6874_v19 }
 0x58a   : > { %v10887_v44 = vpop.f32.mrf.mxu0  ;;  %v6850_v13 = vpop.f32.mrf.mxu1 }
 0x58b   : > { %v6875_v4 = vadd.f32 %v6850_v13, %v6756_v54 }
 0x58c   : > { %v14477_v53 = vpop.f32.mrf.mxu0  ;;  %v10821_v0 = vpop.f32.mrf.mxu1 }
 0x58d   : > { %v6994_v50 = vadd.f32 %v14416_v38, %v6875_v4 }
 0x58e   : > { %v10890_v5 = vpop.f32.mrf.mxu0  ;;  %v6855_v35 = vpop.f32.mrf.mxu1 }
 0x58f   : > { %v6876_v21 = vadd.f32 %v6855_v35, %v6757_v29 }
 0x590   : > { %v14480_v23 = vpop.f32.mrf.mxu0  ;;  %v10824_v10 = vpop.f32.mrf.mxu1 }
 0x591   : > { %v6995_v57 = vadd.f32 %v14425_v36, %v6876_v21 }
 0x592   : > { %v10891_v63 = vpop.f32.mrf.mxu0  ;;  %v6858_v3 = vpop.f32.mrf.mxu1 }
 0x593   : > { %v6877_v33 = vadd.f32 %v6858_v3, %v6758_v22 }
 0x594   : > { %v14483_v11 = vpop.f32.mrf.mxu0  ;;  %v10825_v2 = vpop.f32.mrf.mxu1 }
 0x595   : > { %v14486_v54 = vadd.f32 %v14429_v61, %v6877_v33 }
 0x596   : > { %v10894_v20 = vpop.f32.mrf.mxu0  ;;  %v6863_v31 = vpop.f32.mrf.mxu1 }
 0x597   : > { %v6878_v38 = vadd.f32 %v6863_v31, %v6759_v58  ;;  %v14500_v58 = vld [vmem:[%s14946_s6] ss:$0 sm:$0xff] }
 0x598   : > { %v14488_v27 = vpop.f32.mrf.mxu0  ;;  %v10828_v37 = vpop.f32.mrf.mxu1 }
 0x599   : > { %v14491_v29 = vadd.f32 %v14439_v28, %v6878_v38 }
 0x59a   : > { %v10895_v34 = vpop.f32.mrf.mxu0  ;;  %v6866_v25 = vpop.f32.mrf.mxu1 }
 0x59b   : > { %v6879_v36 = vadd.f32 %v6866_v25, %v6760_v39 }
 0x59c   : > { %v10829_v42 = vpop.f32.mrf.mxu1 }
 0x59d   : > { %v14494_v56 = vadd.f32 %v14448_v51, %v6879_v36 }
 0x59e   : > { %v7085_v22 = vpop.f32.mrf.mxu1 }
 0x59f   : > { %v7124_v8 = vadd.f32 %v7085_v22, %v6989_v45 }
 0x5a0   : > { %v10856_v59 = vpop.f32.mrf.mxu1 }
 0x5a1   : > { %v7242_v51 = vadd.f32 %v14453_v62, %v7124_v8 }
 0x5a2   : > { %v7088_v18 = vpop.f32.mrf.mxu1 }
 0x5a3   : > { %v7125_v61 = vadd.f32 %v7088_v18, %v6990_v41 }
 0x5a4   : > { %v10857_v32 = vpop.f32.mrf.mxu1 }
 0x5a5   : > { %v7243_v55 = vadd.f32 %v14457_v60, %v7125_v61  ;;  %v7259_v60 = vadd.f32 %v14500_v58, %v7242_v51 }
 0x5a6   : > { %v7093_v28 = vpop.f32.mrf.mxu1 }
 0x5a7   : > { %v7260_v39 = vadd.f32 %v14500_v58, %v7243_v55  ;;  %v7126_v48 = vadd.f32 %v7093_v28, %v6991_v49  ;;  %v7269_v13 = vmax.f32 %v7259_v60, 0.0 }
 0x5a8   : > { %v10860_v6 = vpop.f32.mrf.mxu1 }
 0x5a9   : > { %v7244_v40 = vadd.f32 %v14461_v7, %v7126_v48  ;;  %v7270_v41 = vmax.f32 %v7260_v39, 0.0 }
 0x5aa   : > { %v7096_v17 = vpop.f32.mrf.mxu1 }
 0x5ab   : > { %v7261_v45 = vadd.f32 %v14500_v58, %v7244_v40  ;;  %v7127_v24 = vadd.f32 %v7096_v17, %v6992_v30  ;;  %v7288_v43 = vrot.slane %v7270_v41, 2 }
 0x5ac   : > { %v10861_v16 = vpop.f32.mrf.mxu1 }
 0x5ad   : > { %v7271_v9 = vmax.f32 %v7261_v45, 0.0  ;;  %v7245_v14 = vadd.f32 %v14465_v1, %v7127_v24 }
 0x5ae   : > { %v7101_v19 = vpop.f32.mrf.mxu1 }
 0x5af   : > { %v7289_v44 = vrot.slane %v7271_v9, 2  ;;  %v7262_v49 = vadd.f32 %v14500_v58, %v7245_v14  ;;  %v7128_v62 = vadd.f32 %v7101_v19, %v6993_v47 }
 0x5b0   : > { %v10864_v4 = vpop.f32.mrf.mxu1 }
 0x5b1   : > { %v7290_v7 = vsel %vm4436_vm8, %v7288_v43, %v7289_v44  ;;  %v7272_v0 = vmax.f32 %v7262_v49, 0.0  ;;  %v7246_v5 = vadd.f32 %v14469_v46, %v7128_v62 }
 0x5b2   : > { %v7314_v30 = vmax.f32 %v7269_v13, %v7290_v7  ;;  %v7104_v35 = vpop.f32.mrf.mxu1 }
 0x5b3   : > { %v7291_v21 = vrot.slane %v7272_v0, 2  ;;  %v7263_v10 = vadd.f32 %v14500_v58, %v7246_v5  ;;  %v7129_v63 = vadd.f32 %v7104_v35, %v6994_v50 }
 0x5b4   : > { %v10865_v1 = vpop.f32.mrf.mxu1  ;;  %v7332_v34 = vrot.slane %v7314_v30, 1 }
 0x5b5   : > { %v7292_v3 = vsel %vm4436_vm8, %v7289_v44, %v7291_v21  ;;  %v7273_v33 = vmax.f32 %v7263_v10, 0.0  ;;  %v7247_v2 = vadd.f32 %v14473_v26, %v7129_v63 }
 0x5b6   : > { %v7315_v47 = vmax.f32 %v7270_v41, %v7292_v3  ;;  %v7109_v20 = vpop.f32.mrf.mxu1 }
 0x5b7   : > { %v7293_v31 = vrot.slane %v7273_v33, 2  ;;  %v7264_v38 = vadd.f32 %v14500_v58, %v7247_v2  ;;  %v7130_v37 = vadd.f32 %v7109_v20, %v6995_v57 }
 0x5b8   : > { %v7333_v46 = vrot.slane %v7315_v47, 1  ;;  %v10868_v25 = vpop.f32.mrf.mxu1 }
 0x5b9   : > { %v7294_v36 = vsel %vm4436_vm8, %v7291_v21, %v7293_v31  ;;  %v7274_v42 = vmax.f32 %v7264_v38, 0.0  ;;  %v7248_v50 = vadd.f32 %v14477_v53, %v7130_v37 }
 0x5ba   : > { %v7334_v22 = vsel %vm2087_vm3, %v7332_v34, %v7333_v46  ;;  %v7316_v59 = vmax.f32 %v7271_v9, %v7294_v36  ;;  %v7112_v18 = vpop.f32.mrf.mxu1 }
 0x5bb   : > { %v7358_v61 = vmax.f32 %v7314_v30, %v7334_v22  ;;  %v7295_v26 = vrot.slane %v7274_v42, 2  ;;  %v7265_v8 = vadd.f32 %v14500_v58, %v7248_v50  ;;  %v7131_v32 = vadd.f32 %v7112_v18, %v14486_v54 }
 0x5bc   : > { %v7335_v55 = vrot.slane %v7316_v59, 1  ;;  %v10869_v57 = vpop.f32.mrf.mxu1 }
 0x5bd   : > { %7368 = vst.msk [vmem:[#allocation6] sm:$0xff] %vm7367_vm15, %v7358_v61  ;;  %v7296_v28 = vsel %vm4436_vm8, %v7293_v31, %v7295_v26  ;;  %v7275_v39 = vmax.f32 %v7265_v8, 0.0  ;;  %v7249_v48 = vadd.f32 %v14480_v23, %v7131_v32  ;;  %v11201_v32 = vld [vmem:[%s14947_s7 + $0x30] sm:$0xff]  }
 0x5be   : > { %v7317_v53 = vmax.f32 %v7272_v0, %v7296_v28  ;;  %v7117_v51 = vpop.f32.mrf.mxu1 }
 0x5bf   : > { %v7297_v6 = vrot.slane %v7275_v39, 2  ;;  %v7266_v40 = vadd.f32 %v14500_v58, %v7249_v48  ;;  %v7132_v17 = vadd.f32 %v7117_v51, %v14491_v29 }
 0x5c0   : > { %v7337_v41 = vrot.slane %v7317_v53, 1  ;;  %v10872_v45 = vpop.f32.mrf.mxu1 }
 0x5c1   : > { %v7298_v54 = vsel %vm4436_vm8, %v7295_v26, %v7297_v6  ;;  %v7276_v24 = vmax.f32 %v7266_v40, 0.0  ;;  %v7250_v60 = vadd.f32 %v14483_v11, %v7132_v17  ;;  %v11203_v17 = vld [vmem:[%s14947_s7 + $0x58] sm:$0xff]  }
 0x5c2   : > { %v7338_v16 = vsel %vm2087_vm3, %v7335_v55, %v7337_v41  ;;  %v7318_v9 = vmax.f32 %v7273_v33, %v7298_v54  ;;  %v7120_v14 = vpop.f32.mrf.mxu1  ;;  %v11204_v54 = vld [vmem:[%s14947_s7 + $0x20] sm:$0xff]  }
 0x5c3   : > { %v7360_v19 = vmax.f32 %v7316_v59, %v7338_v16  ;;  %v7299_v23 = vrot.slane %v7276_v24, 2  ;;  %v7267_v43 = vadd.f32 %v14500_v58, %v7250_v60  ;;  %v7133_v44 = vadd.f32 %v7120_v14, %v14494_v56  ;;  %v7399_v60 = vld [vmem:[#allocation7 + $0x20] sm:$0xf]  ;;  %v11205_v14 = vld [vmem:[%s14947_s7 + $0x50] sm:$0xff]  }
 0x5c4   : > { %v7378_v49 = vld [vmem:[#allocation6] ss:$2 sm:$0xf]  ;;  %v7339_v62 = vrot.slane %v7318_v9, 1  ;;  %v10873_v29 = vpop.f32.mrf.mxu1 }
 0x5c5   : > { %7370 = vst.msk [vmem:[#allocation6 + $0x10] sm:$0xff] %vm7367_vm15, %v7360_v19  ;;  %v7300_v13 = vsel %vm4436_vm8, %v7297_v6, %v7299_v23  ;;  %v7277_v4 = vmax.f32 %v7267_v43, 0.0  ;;  %v7251_v11 = vadd.f32 %v14488_v27, %v7133_v44  ;;  %v14588_v44 = vpack.c.bf16 %v7399_v60, %v7399_v60 }
 0x5c6   : > { %7391 = vst.msk [vmem:[#allocation7 + $0x7] sm:$0xf] %vm7389_vm1, %v7378_v49  ;;  %v7340_v7 = vsel %vm2087_vm3, %v7337_v41, %v7339_v62  ;;  %v7319_v0 = vmax.f32 %v7274_v42, %v7300_v13  ;;  %v11206_v62 = vld [vmem:[%s14947_s7 + $0x48] sm:$0xff]  }
 0x5c7   : > { %v7361_v5 = vmax.f32 %v7317_v53, %v7340_v7  ;;  %v7301_v30 = vrot.slane %v7277_v4, 2  ;;  %v7268_v35 = vadd.f32 %v14500_v58, %v7251_v11  ;;  %v11207_v11 = vld [vmem:[%s14947_s7 + $0x78] sm:$0xff]  }
 0x5c8   : > { %v7341_v56 = vrot.slane %v7319_v0, 1 }
 0x5c9   : > { %7371 = vst.msk [vmem:[#allocation6 + $0x18] sm:$0xff] %vm7367_vm15, %v7361_v5  ;;  %v7302_v21 = vsel %vm4436_vm8, %v7299_v23, %v7301_v30  ;;  %v7278_v10 = vmax.f32 %v7268_v35, 0.0  ;;  %v7967_v5 = vshrl.u32 %v14588_v44, 16 }
 0x5ca   : > { %v7320_v63 = vmax.f32 %v7275_v39, %v7302_v21 }
 0x5cb   : > { %v7303_v1 = vrot.slane %v7278_v10, 2 }
 0x5cc   : > { %v7343_v3 = vrot.slane %v7320_v63, 1 }
 0x5cd   : > { %v7304_v27 = vsel %vm4436_vm8, %v7301_v30, %v7303_v1  ;;  %v7322_v33 = vmax.f32 %v7277_v4, %v7303_v1  ;;  %v7395_v36 = vld [vmem:[#allocation7] sm:$0xff]  ;;  %v7970_v30 = vshll.u32 %v14588_v44, 16  ;;  %v11209_v1 = vld [vmem:[%s14947_s7 + $0x70] sm:$0xff]   ;;  %vm8158_vm8 = vcmask 523264  }
 0x5ce   : > { %v7344_v2 = vsel %vm2087_vm3, %v7341_v56, %v7343_v3  ;;  %v7321_v47 = vmax.f32 %v7276_v24, %v7304_v27  ;;  %v11208_v56 = vld [vmem:[%s14947_s7 + $0x40] sm:$0xff]   ;;  %v7969_v3 = vrot.slane %v7967_v5, 6  ;;  %8165 = vst.msk [vmem:[#allocation9] sm:$0xff] %vm8158_vm8, %v15293_v12  ;;  %8166 = vst.msk [vmem:[#allocation9 + $0x8] sm:$0xff] %vm8158_vm8, %v15293_v12 }
 0x5cf   : > { %v7363_v20 = vmax.f32 %v7319_v0, %v7344_v2  ;;  %v7347_v31 = vrot.slane %v7322_v33, 1  ;;  %v7972_v27 = vrot.slane %v7970_v30, 7  ;;  %v11210_v2 = vld [vmem:[%s14947_s7 + $0x68] sm:$0xff]  }
 0x5d0   : > { %v7380_v38 = vld [vmem:[#allocation6 + $0x14] ss:$2 sm:$0xf]  ;;  %v7345_v37 = vrot.slane %v7321_v47, 1 }
 0x5d1   : > { %7373 = vst.msk [vmem:[#allocation6 + $0x28] sm:$0xff] %vm7367_vm15, %v7363_v20  ;;  %v7366_v58 = vmax.f32 %v7322_v33, %v7347_v31  ;;  %v7973_v20 = vor.u32 %v7972_v27, %v7969_v3 }
 0x5d2   : > { %7392 = vst.msk [vmem:[#allocation7 + $0xd] sm:$0xf] %vm7389_vm1, %v7380_v38  ;;  %v7348_v34 = vsel %vm2087_vm3, %v7345_v37, %v7347_v31  ;;  %v11211_v38 = vld [vmem:[%s14947_s7 + $0x60] sm:$0xff]  }
 0x5d3   : > { %v7365_v46 = vmax.f32 %v7321_v47, %v7348_v34  ;;  %7377 = vst.msk [vmem:[#allocation6 + $0x40] sm:$0x7] %vm7376_vm2, %v7366_v58  ;;  %v11212_v34 = vld [vmem:[%s14947_s7 + $0x88] sm:$0xff]  }
 0x5d5   : > { %7375 = vst.msk [vmem:[#allocation6 + $0x38] sm:$0xff] %vm7367_vm15, %v7365_v46  ;;  %v7882_v46 = vrot.slane %v14588_v44, 6 }
 0x5d8   : > { %v7382_v25 = vld [vmem:[#allocation6 + $0x28] ss:$2 sm:$0xf] }
 0x5d9   : > { %v7396_v42 = vld [vmem:[#allocation7 + $0x8] sm:$0xff]  ;;  %7393 = vst.msk [vmem:[#allocation7 + $0x13] sm:$0xf] %vm7389_vm1, %v7382_v25 }
 0x5da   : > { %v14545_v50 = vpack.c.bf16 %v7396_v42, %v7395_v36  ;;  %v11213_v42 = vld [vmem:[%s14947_s7 + $0x80] sm:$0xff]  }
 0x5dc   : > { %10908 = vmatprep.mubr.msk.bf16.mxu0 %vm7367_vm15, %v14545_v50  ;;  %v7384_v22 = vld [vmem:[#allocation6 + $0x3c] ss:$2 sm:$0xf]  ;;  %v14551_v59 = vshll.u32 %v14545_v50, 16  ;;  %v7413_v55 = vshrl.u32 %v14545_v50, 16  ;;  %v7641_v57 = vrot.slane %v14545_v50, 3 }
 0x5dd   : > { %7394 = vst.msk [vmem:[#allocation7 + $0x19] sm:$0xf] %vm7389_vm1, %v7384_v22  ;;  %v7801_v9 = vrot.slane %v14545_v50, 4  ;;  %v7879_v31 = vrot.slane %v14545_v50, 6  ;;  %v8050_v36 = vrot.slane %v14545_v50, 7 }
 0x5de   : > { %v7417_v26 = vrot.slane %v14551_v59, 1  ;;  %v7719_v43 = vrot.slane %v7413_v55, 3  ;;  %v7720_v29 = vrot.slane %v14551_v59, 4  ;;  %v7959_v7 = vrot.slane %v7413_v55, 6 }
 0x5df   : > { %v7960_v0 = vrot.slane %v14551_v59, 7 }
 0x5e0   : > { %v7397_v18 = vld [vmem:[#allocation7 + $0x10] sm:$0xff]  ;;  %v7418_v48 = vor.u32 %v7417_v26, %v7413_v55  ;;  %v7721_v35 = vor.u32 %v7720_v29, %v7719_v43  ;;  %v11217_v55 = vld [vmem:[%s14949_s9 + $0x8] sm:$0xff]  }
 0x5e1   : > { %v7961_v63 = vor.u32 %v7960_v0, %v7959_v7  ;;  %v11216_v26 = vld [vmem:[%s14949_s9 + $0x38] sm:$0xff]  }
 0x5e4   : > { %v7398_v61 = vld [vmem:[#allocation7 + $0x18] sm:$0xff] }
 0x5e5   : > { %v14554_v8 = vpack.c.bf16 %v7398_v61, %v7397_v18  ;;  %v8053_v18 = vrot.slane %v14588_v44, 7 }
 0x5e7   : > { %10909 = vmatmul.mubr.msk.bf16.vlgmr.msra.gmra.mxu0 %vm7367_vm15, %v14554_v8  ;;  %v7642_v28 = vrot.slane %v14554_v8, 3  ;;  %v7420_v39 = vshll.u32 %v14554_v8, 16  ;;  %v7424_v6 = vshrl.u32 %v14554_v8, 16  ;;  %v7565_v40 = vrot.slane %v14554_v8, 1 }
 0x5e8   : > { %10921 = vmatpush3.bf16.msra.mxu0 %v14435_v15  ;;  %v7564_v15 = vrot.slane %v14545_v50, 1  ;;  %v7802_v24 = vrot.slane %v14554_v8, 4  ;;  %v7880_v47 = vrot.slane %v14554_v8, 6  ;;  %v8051_v25 = vrot.slane %v14554_v8, 7  ;;  %v11214_v50 = vld [vmem:[%s14949_s9 + $0x18] sm:$0xff]   ;;  %v11215_v8 = vld [vmem:[%s14949_s9 + $0x10] sm:$0xff]  }
 0x5e9   : > { %v7643_v53 = vsel %vm5337_vm9, %v7641_v57, %v7642_v28  ;;  %10922 = vmatprep.subr.bf16.mxu0 %v11201_v32  ;;  %v7422_v51 = vrot.slane %v7420_v39, 1  ;;  %v7722_v19 = vrot.slane %v7424_v6, 3  ;;  %v7723_v23 = vrot.slane %v7420_v39, 4  ;;  %v11220_v57 = vld [vmem:[%s14949_s9 + $0x28] sm:$0xff]  }
 0x5ea   : > { %10924 = vmatprep.mubr.msk.bf16.mxu0 %vm7367_vm15, %v7643_v53  ;;  %v7566_v16 = vsel %vm2087_vm3, %v7564_v15, %v7565_v40  ;;  %v7803_v49 = vsel %vm7800_vm5, %v7801_v9, %v7802_v24  ;;  %v7962_v13 = vrot.slane %v7424_v6, 6  ;;  %v7963_v4 = vrot.slane %v7420_v39, 7  ;;  %v11222_v39 = vld [vmem:[%s14949_s9 + $0x20] sm:$0xff]  }
 0x5eb   : > { %v7423_v41 = vsel %vm2913_vm4, %v7418_v48, %v7422_v51  ;;  %v7426_v45 = vor.u32 %v7424_v6, %v7422_v51  ;;  %vm7718_vm4 = vsmask.f32 4352  ;;  %v7881_v37 = vsel %vm1162_vm0, %v7879_v31, %v7880_v47 }
 0x5ec   : > { %10900 = vmatprep.mubr.msk.bf16.mxu1 %vm7367_vm15, %v7423_v41  ;;  %10923 = vmatpush3.bf16.msra.mxu0 %v11201_v32  ;;  %v7964_v21 = vor.u32 %v7963_v4, %v7962_v13  ;;  %v7883_v22 = vsel %vm1162_vm0, %v7880_v47, %v7882_v46  ;;  %v8052_v59 = vsel %vm8049_vm7, %v8050_v36, %v8051_v25  ;;  %v11218_v32 = vld [vmem:[%s14949_s9 + $0x30] sm:$0xff]   ;;  %vm8160_vm9 = vcmask 522240  }
 0x5ed   : > { %10901 = vmatmul.mubr.msk.bf16.vlgmr.msra.gmra.mxu1 %vm7367_vm15, %v7426_v45  ;;  %10936 = vmatprep.subr.bf16.mxu0 %v11203_v17  ;;  %v8054_v61 = vsel %vm8049_vm7, %v8051_v25, %v8053_v18  ;;  %v9702_v18 = vld [vmem:[%s14948_s8] ss:$0 sm:$0xff] }
 0x5ee   : > { %10913 = vmatpush3.bf16.msra.mxu1 %v14445_v52  ;;  %10916 = vmatprep.mubr.msk.bf16.mxu1 %vm7367_vm15, %v7566_v16  ;;  %v7724_v52 = vor.u32 %v7723_v23, %v7722_v19  ;;  %v7965_v33 = vsel %vm7958_vm6, %v7961_v63, %v7964_v21  ;;  %v7974_v58 = vsel %vm7958_vm6, %v7964_v21, %v7973_v20 }
 0x5ef   : > { %10925 = vmatmul.mubr.msk.bf16.vlgmr.msra.gmra.mxu0 %vm7367_vm15, %v7642_v28  ;;  %10914 = vmatprep.subr.bf16.mxu1 %v11204_v54  ;;  %v11219_v28 = vld [vmem:[%s14949_s9] sm:$0xff]  }
 0x5f0   : > { %10937 = vmatpush3.bf16.msra.mxu0 %v11203_v17  ;;  %10940 = vmatprep.mubr.msk.bf16.mxu0 %vm7367_vm15, %v7803_v49  ;;  %v7725_v10 = vsel %vm7718_vm4, %v7721_v35, %v7724_v52 }
 0x5f1   : > { %10938 = vmatprep.subr.bf16.mxu0 %v11205_v14 }
 0x5f2   : > { %10915 = vmatpush3.bf16.msra.mxu1 %v11204_v54 }
 0x5f3   : > { %10928 = vmatprep.subr.bf16.mxu1 %v11206_v62 }
 0x5f4   : > { %10939 = vmatpush3.bf16.msra.mxu0 %v11205_v14 }
 0x5f5   : > { %10917 = vmatmul.mubr.msk.bf16.vlgmr.msra.gmra.mxu1 %vm7367_vm15, %v7565_v40  ;;  %10952 = vmatprep.subr.bf16.mxu0 %v11207_v11 }
 0x5f6   : > { %10929 = vmatpush3.bf16.msra.mxu1 %v11206_v62  ;;  %10932 = vmatprep.mubr.msk.bf16.mxu1 %vm7367_vm15, %v7725_v10 }
 0x5f7   : > { %10941 = vmatmul.mubr.msk.bf16.vlgmr.msra.gmra.mxu0 %vm7367_vm15, %v7802_v24  ;;  %10930 = vmatprep.subr.bf16.mxu1 %v11208_v56 }
 0x5f8   : > { %10953 = vmatpush3.bf16.msra.mxu0 %v11207_v11  ;;  %10956 = vmatprep.mubr.msk.bf16.mxu0 %vm7367_vm15, %v7965_v33 }
 0x5f9   : > { %10954 = vmatprep.subr.bf16.mxu0 %v11209_v1 }
 0x5fa   : > { %10931 = vmatpush3.bf16.msra.mxu1 %v11208_v56 }
 0x5fb   : > { %10944 = vmatprep.subr.bf16.mxu1 %v11210_v2 }
 0x5fc   : > { %10955 = vmatpush3.bf16.msra.mxu0 %v11209_v1 }
 0x5fd   : > { %10933 = vmatmul.mubr.msk.bf16.vlgmr.msra.gmra.mxu1 %vm7367_vm15, %v7724_v52  ;;  %10968 = vmatprep.subr.bf16.mxu0 %v15293_v12 }
 0x5fe   : > { %10945 = vmatpush3.bf16.msra.mxu1 %v11210_v2  ;;  %10948 = vmatprep.mubr.msk.bf16.mxu1 %vm7367_vm15, %v7881_v37 }
 0x5ff   : > { %10957 = vmatmul.mubr.msk.bf16.vlgmr.msra.gmra.mxu0 %vm7367_vm15, %v7974_v58  ;;  %10946 = vmatprep.subr.bf16.mxu1 %v11211_v38 }
 0x600   : > { %10976 = vmatprep.mubr.msk.bf16.mxu0 %vm11295_vm11, %v15293_v12  ;;  %10969 = vmatpush3.bf16.msra.mxu0 %v11216_v26 }
 0x601   : > { %10970 = vmatprep.subr.bf16.mxu0 %v15293_v12 }
 0x602   : > { %10947 = vmatpush3.bf16.msra.mxu1 %v11211_v38 }
 0x603   : > { %10960 = vmatprep.subr.bf16.mxu1 %v11212_v34 }
 0x604   : > { %10971 = vmatpush3.bf16.msra.mxu0 %v11218_v32 }
 0x605   : > { %10949 = vmatmul.mubr.msk.bf16.vlgmr.msra.gmra.mxu1 %vm7367_vm15, %v7883_v22  ;;  %10972 = vmatprep.subr.bf16.mxu0 %v15293_v12 }
 0x606   : > { %10961 = vmatpush3.bf16.msra.mxu1 %v11212_v34  ;;  %10964 = vmatprep.mubr.msk.bf16.mxu1 %vm7367_vm15, %v8052_v59 }
 0x607   : > { %10962 = vmatprep.subr.bf16.mxu1 %v11213_v42 }
 0x608   : > { %10973 = vmatpush3.bf16.msra.mxu0 %v11220_v57 }
 0x609   : > { %10974 = vmatprep.subr.bf16.mxu0 %v15293_v12 }
 0x60a   : > { %10963 = vmatpush3.bf16.msra.mxu1 %v11213_v42 }
 0x60b   : > { %10980 = vmatprep.subr.bf16.mxu1 %v15293_v12 }
 0x60c   : > { %10975 = vmatpush3.bf16.msra.mxu0 %v11222_v39 }
 0x60d   : > { %10965 = vmatmul.mubr.msk.bf16.vlgmr.msra.gmra.mxu1 %vm7367_vm15, %v8054_v61  ;;  %10992 = vmatprep.subr.bf16.mxu0 %v15293_v12 }
 0x60e   : > { %10988 = vmatprep.mubr.msk.bf16.mxu1 %vm11295_vm11, %v15293_v12  ;;  %10981 = vmatpush3.bf16.msra.mxu1 %v11214_v50 }
 0x60f   : > { %10982 = vmatprep.subr.bf16.mxu1 %v15293_v12 }
 0x612   : > { %10983 = vmatpush3.bf16.msra.mxu1 %v11215_v8 }
 0x613   : > { %10984 = vmatprep.subr.bf16.mxu1 %v15293_v12 }
 0x616   : > { %10985 = vmatpush3.bf16.msra.mxu1 %v11217_v55 }
 0x617   : > { %10986 = vmatprep.subr.bf16.mxu1 %v15293_v12 }
 0x61a   : > { %10987 = vmatpush3.bf16.msra.mxu1 %v11219_v28 }
 0x61b   : > { %11004 = vmatprep.subr.bf16.mxu1 %v15293_v12 }
 0x6a7   : > { %v10910_v48 = vpop.f32.mrf.mxu0 }
 0x6a9   : > { %v7543_v53 = vpop.f32.mrf.mxu0 }
 0x6ab   : > { %v10911_v51 = vpop.f32.mrf.mxu0 }
 0x6ad   : > { %v10902_v6 = vpop.f32.mrf.mxu1  ;;  %v7546_v40 = vpop.f32.mrf.mxu0 }
 0x6ae   : > { %v7552_v43 = vadd.f32 %v10910_v48, %v10902_v6 }
 0x6af   : > { %v7479_v17 = vpop.f32.mrf.mxu1  ;;  %v10926_v41 = vpop.f32.mrf.mxu0 }
 0x6b0   : > { %v7544_v62 = vadd.f32 %v7543_v53, %v7479_v17 }
 0x6b1   : > { %v10903_v45 = vpop.f32.mrf.mxu1  ;;  %v7696_v15 = vpop.f32.mrf.mxu0 }
 0x6b3   : > { %v7482_v54 = vpop.f32.mrf.mxu1  ;;  %v10927_v24 = vpop.f32.mrf.mxu0 }
 0x6b4   : > { %v7547_v0 = vadd.f32 %v7546_v40, %v7482_v54 }
 0x6b5   : > { %v10918_v60 = vpop.f32.mrf.mxu1  ;;  %v7699_v16 = vpop.f32.mrf.mxu0 }
 0x6b6   : > { %v7635_v29 = vadd.f32 %v10918_v60, %v7552_v43 }
 0x6b7   : > { %v7619_v9 = vpop.f32.mrf.mxu1  ;;  %v10942_v14 = vpop.f32.mrf.mxu0 }
 0x6b8   : > { %v7633_v52 = vadd.f32 %v7619_v9, %v7544_v62  ;;  %v7712_v5 = vadd.f32 %v10926_v41, %v7635_v29  ;;  %v11221_v62 = vld [vmem:[%s14949_s9 + $0x78] sm:$0xff]  }
 0x6b9   : > { %v10919_v19 = vpop.f32.mrf.mxu1  ;;  %v7856_v23 = vpop.f32.mrf.mxu0 }
 0x6ba   : > { %v7710_v10 = vadd.f32 %v7696_v15, %v7633_v52 }
 0x6bb   : > { %v7622_v44 = vpop.f32.mrf.mxu1  ;;  %v10943_v49 = vpop.f32.mrf.mxu0 }
 0x6bc   : > { %v7634_v56 = vadd.f32 %v7622_v44, %v7547_v0 }
 0x6bd   : > { %v10934_v13 = vpop.f32.mrf.mxu1  ;;  %v7859_v4 = vpop.f32.mrf.mxu0 }
 0x6be   : > { %v7794_v21 = vadd.f32 %v10934_v13, %v7712_v5  ;;  %v7711_v33 = vadd.f32 %v7699_v16, %v7634_v56  ;;  %v11225_v5 = vld [vmem:[%s14949_s9 + $0x68] sm:$0xff]  }
 0x6bf   : > { %v7778_v11 = vpop.f32.mrf.mxu1  ;;  %v10958_v7 = vpop.f32.mrf.mxu0  ;;  %v11228_v56 = vld [vmem:[%s14949_s9 + $0x48] sm:$0xff]  }
 0x6c0   : > { %v7792_v3 = vadd.f32 %v7778_v11, %v7710_v10  ;;  %v7872_v2 = vadd.f32 %v10942_v14, %v7794_v21  ;;  %v11229_v21 = vld [vmem:[%s14949_s9 + $0xb8] sm:$0xff]  }
 0x6c1   : > { %v10935_v30 = vpop.f32.mrf.mxu1  ;;  %v8027_v35 = vpop.f32.mrf.mxu0 }
 0x6c2   : > { %v7870_v38 = vadd.f32 %v7856_v23, %v7792_v3  ;;  %v11226_v30 = vld [vmem:[%s14949_s9 + $0x50] sm:$0xff]   ;;  %v11232_v3 = vld [vmem:[%s14949_s9 + $0x98] sm:$0xff]  }
 0x6c3   : > { %v7781_v63 = vpop.f32.mrf.mxu1  ;;  %v10959_v1 = vpop.f32.mrf.mxu0 }
 0x6c4   : > { %v7793_v20 = vadd.f32 %v7781_v63, %v7711_v33  ;;  %v11230_v63 = vld [vmem:[%s14949_s9 + $0x40] sm:$0xff]   ;;  %v11231_v1 = vld [vmem:[%s14949_s9 + $0xb0] sm:$0xff]   ;;  %v11233_v33 = vld [vmem:[%s14949_s9 + $0xa8] sm:$0xff]  }
 0x6c5   : > { %v10950_v27 = vpop.f32.mrf.mxu1  ;;  %v8030_v26 = vpop.f32.mrf.mxu0 }
 0x6c6   : > { %v7952_v31 = vadd.f32 %v10950_v27, %v7872_v2  ;;  %v7871_v46 = vadd.f32 %v7859_v4, %v7793_v20  ;;  %v11223_v4 = vld [vmem:[%s14949_s9 + $0x70] sm:$0xff]   ;;  %v11236_v20 = vld [vmem:[%s14949_s9 + $0x88] sm:$0xff]  }
 0x6c7   : > { %v7936_v47 = vpop.f32.mrf.mxu1  ;;  %v11234_v2 = vld [vmem:[%s14949_s9 + $0x90] sm:$0xff]  }
 0x6c8   : > { %v7950_v58 = vadd.f32 %v7936_v47, %v7870_v38  ;;  %v8043_v25 = vadd.f32 %v10958_v7, %v7952_v31  ;;  %v11224_v7 = vld [vmem:[%s14949_s9 + $0x58] sm:$0xff]   ;;  %v11235_v47 = vld [vmem:[%s14949_s9 + $0xa0] sm:$0xff]  }
 0x6c9   : > { %v10951_v37 = vpop.f32.mrf.mxu1  ;;  %v11237_v31 = vld [vmem:[%s14949_s9 + $0xf8] sm:$0xff]  }
 0x6ca   : > { %v8041_v59 = vadd.f32 %v8027_v35, %v7950_v58  ;;  %v11227_v35 = vld [vmem:[%s14949_s9 + $0x60] sm:$0xff]  }
 0x6cb   : > { %v7939_v34 = vpop.f32.mrf.mxu1  ;;  %v11238_v37 = vld [vmem:[%s14949_s9 + $0x80] sm:$0xff]  }
 0x6cc   : > { %v7951_v42 = vadd.f32 %v7939_v34, %v7871_v46  ;;  %v11239_v46 = vld [vmem:[%s14949_s9 + $0xf0] sm:$0xff]  }
 0x6cd   : > { %v10966_v36 = vpop.f32.mrf.mxu1 }
 0x6ce   : > { %v8123_v22 = vadd.f32 %v10966_v36, %v8043_v25  ;;  %v8042_v57 = vadd.f32 %v8030_v26, %v7951_v42  ;;  %v11240_v25 = vld [vmem:[%s14949_s9 + $0xd8] sm:$0xff]   ;;  %v11241_v42 = vld [vmem:[%s14949_s9 + $0xe8] sm:$0xff]  }
 0x6cf   : > { %v8107_v61 = vpop.f32.mrf.mxu1 }
 0x6d0   : > { %v8121_v50 = vadd.f32 %v8107_v61, %v8041_v59  ;;  %v8133_v32 = vadd.f32 %v9702_v18, %v8123_v22  ;;  %v11242_v22 = vld [vmem:[%s14949_s9 + $0xd0] sm:$0xff]   ;;  %v11243_v59 = vld [vmem:[%s14949_s9 + $0xe0] sm:$0xff]  }
 0x6d1   : > { %v10967_v8 = vpop.f32.mrf.mxu1 }
 0x6d2   : > { %v8131_v55 = vadd.f32 %v9702_v18, %v8121_v50  ;;  %v8136_v48 = vmax.f32 %v8133_v32, 0.0  ;;  %v11244_v50 = vld [vmem:[%s14949_s9 + $0xc8] sm:$0xff]   ;;  %v11245_v8 = vld [vmem:[%s14949_s9 + $0xc0] sm:$0xff]   ;;  %v11246_v32 = vld [vmem:[%s14949_s9 + $0x118] sm:$0xff]  }
 0x6d3   : > { %v8110_v28 = vpop.f32.mrf.mxu1 }
 0x6d4   : > { %v8122_v39 = vadd.f32 %v8110_v28, %v8042_v57  ;;  %v8134_v53 = vmax.f32 %v8131_v55, 0.0  ;;  %v8143_v40 = vrot.slane %v8136_v48, 6  ;;  %v11247_v57 = vld [vmem:[%s14949_s9 + $0x110] sm:$0xff]   ;;  %v11248_v28 = vld [vmem:[%s14949_s9 + $0x108] sm:$0xff]  }
 0x6d6   : > { %v8132_v51 = vadd.f32 %v9702_v18, %v8122_v39  ;;  %v8140_v17 = vrot.slane %v8134_v53, 6  ;;  %v11249_v39 = vld [vmem:[%s14949_s9 + $0x100] sm:$0xff]  }
 0x6d8   : > { %v8135_v6 = vmax.f32 %v8132_v51, 0.0  ;;  %v11251_v51 = vld [vmem:[%s14951_s11 + $0x30] sm:$0xff]  }
 0x6da   : > { %v8141_v41 = vrot.slane %v8135_v6, 6 }
 0x6dc   : > { %v8142_v45 = vsel %vm1162_vm0, %v8140_v17, %v8141_v41  ;;  %v8144_v15 = vsel %vm1162_vm0, %v8141_v41, %v8143_v40  ;;  %v11253_v40 = vld [vmem:[%s14951_s11 + $0x20] sm:$0xff]   ;;  %v11254_v17 = vld [vmem:[%s14951_s11 + $0x18] sm:$0xff]   ;;  %v11255_v41 = vld [vmem:[%s14951_s11 + $0x10] sm:$0xff]  }
 0x6dd   : > { %v8147_v54 = vmax.f32 %v8134_v53, %v8142_v45  ;;  %v8148_v24 = vmax.f32 %v8135_v6, %v8144_v15  ;;  %v11250_v53 = vld [vmem:[%s14951_s11 + $0x38] sm:$0xff]   ;;  %v11252_v6 = vld [vmem:[%s14951_s11 + $0x28] sm:$0xff]  }
 0x6de   : > { %v11258_v45 = vld [vmem:[%s14953_s13 + $0x70] ss:$8 sps:$4 sm:$0xff]   ;;  %v11260_v15 = vld [vmem:[%s14953_s13 + $0x74] ss:$8 sps:$4 sm:$0xff]  }
 0x6df   : > { %v8151_v60 = vrot.slane %v8147_v54, 1  ;;  %v8152_v16 = vrot.slane %v8148_v24, 1 }
 0x6e1   : > { %v8153_v9 = vsel %vm2087_vm3, %v8151_v60, %v8152_v16  ;;  %v8157_v14 = vmax.f32 %v8148_v24, %v8152_v16  ;;  %v11261_v24 = vld [vmem:[%s14953_s13 + $0x60] ss:$8 sps:$4 sm:$0xff]   ;;  %v11266_v16 = vld [vmem:[%s14953_s13 + $0x54] ss:$8 sps:$4 sm:$0xff]  }
 0x6e2   : > { %v8156_v19 = vmax.f32 %v8147_v54, %v8153_v9  ;;  %v11263_v54 = vld [vmem:[%s14953_s13 + $0x64] ss:$8 sps:$4 sm:$0xff]   ;;  %v11264_v9 = vld [vmem:[%s14953_s13 + $0x50] ss:$8 sps:$4 sm:$0xff]  }
 0x6e3   : > { %8161 = vst.msk [vmem:[#allocation8 + $0x8] sm:$0x7f] %vm8160_vm9, %v8157_v14  ;;  %v11256_v60 = vld [vmem:[%s14951_s11 + $0x8] sm:$0xff]   ;;  %v11257_v14 = vld [vmem:[%s14951_s11] sm:$0xff]  }
 0x6e4   : > { %8159 = vst.msk [vmem:[#allocation8] sm:$0xff] %vm8158_vm8, %v8156_v19  ;;  %v11269_v19 = vld [vmem:[%s14953_s13 + $0x44] ss:$8 sps:$4 sm:$0xff]  }
 0x6ea   : > { %v8164_v23 = vld [vmem:[#allocation8 + $0xc] ss:$2 sm:$0x3] }
 0x6eb   : > { %v8162_v43 = vld [vmem:[#allocation8] ss:$2 sm:$0x3]  ;;  %8169 = vst.msk [vmem:[#allocation9 + $0x9] sm:$0x3] %vm8167_vm10, %v8164_v23 }
 0x6ec   : > { %8168 = vst.msk [vmem:[#allocation9 + $0x5] sm:$0x3] %vm8167_vm10, %v8162_v43  ;;  %v11267_v23 = vld [vmem:[%s14953_s13 + $0x40] ss:$8 sps:$4 sm:$0xff]   ;;  %v11272_v43 = vld [vmem:[%s14953_s13 + $0x34] ss:$8 sps:$4 sm:$0xff]  }
 0x6f2   : > { %v8171_v44 = vld [vmem:[#allocation9 + $0x8] sm:$0xff] }
 0x6f3   : > { %v8170_v49 = vld [vmem:[#allocation9] sm:$0xff] }
 0x6f4   : > { %v14692_v29 = vpack.c.bf16 %v8171_v44, %v8170_v49  ;;  %v11270_v44 = vld [vmem:[%s14953_s13 + $0x30] ss:$8 sps:$4 sm:$0xff]   ;;  %v11273_v49 = vld [vmem:[%s14953_s13 + $0x20] ss:$8 sps:$4 sm:$0xff]  }
 0x6f6   : > { %10989 = vmatmul.mubr.msk.bf16.vlgmr.msra.gmra.mxu1 %vm8158_vm8, %v14692_v29  ;;  %v14697_v13 = vshll.u32 %v14692_v29, 16  ;;  %v14706_v52 = vshrl.u32 %v14692_v29, 16  ;;  %v8418_v10 = vrot.slane %v14692_v29, 2  ;;  %v8340_v27 = vrot.slane %v14692_v29, 1 }
 0x6f7   : > { %11005 = vmatpush3.bf16.msra.mxu1 %v11221_v62  ;;  %11012 = vmatprep.mubr.msk.bf16.mxu1 %vm11295_vm11, %v15293_v12  ;;  %v8576_v38 = vrot.slane %v14692_v29, 3  ;;  %v8654_v55 = vrot.slane %v14692_v29, 4  ;;  %v8812_v48 = vrot.slane %v14692_v29, 5  ;;  %v11278_v62 = vld [vmem:[%s14953_s13 + $0x14] ss:$8 sps:$4 sm:$0xff]  }
 0x6f8   : > { %11006 = vmatprep.subr.bf16.mxu1 %v15293_v12  ;;  %v8195_v11 = vrot.slane %v14697_v13, 1  ;;  %v8496_v58 = vrot.slane %v14706_v52, 2  ;;  %v8497_v34 = vrot.slane %v14697_v13, 3  ;;  %v8732_v18 = vrot.slane %v14706_v52, 4  ;;  %v11276_v29 = vld [vmem:[%s14953_s13 + $0x10] ss:$8 sps:$4 sm:$0xff]  }
 0x6f9   : > { %v8733_v61 = vrot.slane %v14697_v13, 5 }
 0x6fa   : > { %v8196_v0 = vor.u32 %v8195_v11, %v14706_v52  ;;  %v8498_v36 = vor.u32 %v8497_v34, %v8496_v58 }
 0x6fb   : > { %11007 = vmatpush3.bf16.msra.mxu1 %v11223_v4  ;;  %v8734_v26 = vor.u32 %v8733_v61, %v8732_v18 }
 0x6fc   : > { %10977 = vmatmul.mubr.msk.bf16.vlgmr.msra.gmra.mxu0 %vm8158_vm8, %v8196_v0  ;;  %11008 = vmatprep.subr.bf16.mxu1 %v15293_v12 }
 0x6fd   : > { %10993 = vmatpush3.bf16.msra.mxu0 %v11224_v7  ;;  %11000 = vmatprep.mubr.msk.bf16.mxu0 %vm11295_vm11, %v15293_v12 }
 0x6fe   : > { %10994 = vmatprep.subr.bf16.mxu0 %v15293_v12 }
 0x6ff   : > { %11009 = vmatpush3.bf16.msra.mxu1 %v11225_v5 }
 0x700   : > { %11010 = vmatprep.subr.bf16.mxu1 %v15293_v12 }
 0x701   : > { %10995 = vmatpush3.bf16.msra.mxu0 %v11226_v30 }
 0x702   : > { %10996 = vmatprep.subr.bf16.mxu0 %v15293_v12 }
 0x703   : > { %11011 = vmatpush3.bf16.msra.mxu1 %v11227_v35 }
 0x704   : > { %11028 = vmatprep.subr.bf16.mxu1 %v15293_v12 }
 0x705   : > { %10997 = vmatpush3.bf16.msra.mxu0 %v11228_v56 }
 0x706   : > { %11013 = vmatmul.mubr.msk.bf16.vlgmr.msra.gmra.mxu1 %vm8158_vm8, %v8418_v10  ;;  %10998 = vmatprep.subr.bf16.mxu0 %v15293_v12 }
 0x707   : > { %11029 = vmatpush3.bf16.msra.mxu1 %v11229_v21  ;;  %11036 = vmatprep.mubr.msk.bf16.mxu1 %vm11295_vm11, %v15293_v12 }
 0x708   : > { %11030 = vmatprep.subr.bf16.mxu1 %v15293_v12 }
 0x709   : > { %10999 = vmatpush3.bf16.msra.mxu0 %v11230_v63 }
 0x70a   : > { %11016 = vmatprep.subr.bf16.mxu0 %v15293_v12 }
 0x70b   : > { %11031 = vmatpush3.bf16.msra.mxu1 %v11231_v1 }
 0x70c   : > { %11001 = vmatmul.mubr.msk.bf16.vlgmr.msra.gmra.mxu0 %vm8158_vm8, %v8340_v27  ;;  %11032 = vmatprep.subr.bf16.mxu1 %v15293_v12 }
 0x70d   : > { %11017 = vmatpush3.bf16.msra.mxu0 %v11232_v3  ;;  %11024 = vmatprep.mubr.msk.bf16.mxu0 %vm11295_vm11, %v15293_v12 }
 0x70e   : > { %11018 = vmatprep.subr.bf16.mxu0 %v15293_v12 }
 0x70f   : > { %11033 = vmatpush3.bf16.msra.mxu1 %v11233_v33 }
 0x710   : > { %11034 = vmatprep.subr.bf16.mxu1 %v15293_v12 }
 0x711   : > { %11019 = vmatpush3.bf16.msra.mxu0 %v11234_v2 }
 0x712   : > { %11020 = vmatprep.subr.bf16.mxu0 %v15293_v12 }
 0x713   : > { %11035 = vmatpush3.bf16.msra.mxu1 %v11235_v47 }
 0x714   : > { %11052 = vmatprep.subr.bf16.mxu1 %v15293_v12 }
 0x715   : > { %11021 = vmatpush3.bf16.msra.mxu0 %v11236_v20 }
 0x716   : > { %11037 = vmatmul.mubr.msk.bf16.vlgmr.msra.gmra.mxu1 %vm8158_vm8, %v8576_v38  ;;  %11022 = vmatprep.subr.bf16.mxu0 %v15293_v12 }
 0x717   : > { %11053 = vmatpush3.bf16.msra.mxu1 %v11237_v31  ;;  %11060 = vmatprep.mubr.msk.bf16.mxu1 %vm11295_vm11, %v15293_v12 }
 0x718   : > { %11054 = vmatprep.subr.bf16.mxu1 %v15293_v12 }
 0x719   : > { %11023 = vmatpush3.bf16.msra.mxu0 %v11238_v37 }
 0x71a   : > { %11040 = vmatprep.subr.bf16.mxu0 %v15293_v12 }
 0x71b   : > { %11055 = vmatpush3.bf16.msra.mxu1 %v11239_v46 }
 0x71c   : > { %11025 = vmatmul.mubr.msk.bf16.vlgmr.msra.gmra.mxu0 %vm8158_vm8, %v8498_v36  ;;  %11056 = vmatprep.subr.bf16.mxu1 %v15293_v12 }
 0x71d   : > { %11041 = vmatpush3.bf16.msra.mxu0 %v11240_v25  ;;  %11048 = vmatprep.mubr.msk.bf16.mxu0 %vm11295_vm11, %v15293_v12 }
 0x71e   : > { %11042 = vmatprep.subr.bf16.mxu0 %v15293_v12 }
 0x71f   : > { %11057 = vmatpush3.bf16.msra.mxu1 %v11241_v42 }
 0x720   : > { %11058 = vmatprep.subr.bf16.mxu1 %v15293_v12 }
 0x721   : > { %11043 = vmatpush3.bf16.msra.mxu0 %v11242_v22 }
 0x722   : > { %11044 = vmatprep.subr.bf16.mxu0 %v15293_v12 }
 0x723   : > { %11059 = vmatpush3.bf16.msra.mxu1 %v11243_v59 }
 0x724   : > { %11076 = vmatprep.subr.bf16.mxu1 %v15293_v12 }
 0x725   : > { %11045 = vmatpush3.bf16.msra.mxu0 %v11244_v50 }
 0x726   : > { %11061 = vmatmul.mubr.msk.bf16.vlgmr.msra.gmra.mxu1 %vm8158_vm8, %v8734_v26  ;;  %11046 = vmatprep.subr.bf16.mxu0 %v15293_v12 }
 0x727   : > { %11092 = vmatprep.mubr.msk.bf16.mxu1 %vm11295_vm11, %v15293_v12  ;;  %11077 = vmatpush3.bf16.msra.mxu1 %v11250_v53 }
 0x728   : > { %11078 = vmatprep.subr.bf16.mxu1 %v15293_v12 }
 0x729   : > { %11047 = vmatpush3.bf16.msra.mxu0 %v11245_v8 }
 0x72a   : > { %11064 = vmatprep.subr.bf16.mxu0 %v15293_v12 }
 0x72b   : > { %11079 = vmatpush3.bf16.msra.mxu1 %v11251_v51 }
 0x72c   : > { %11049 = vmatmul.mubr.msk.bf16.vlgmr.msra.gmra.mxu0 %vm8158_vm8, %v8654_v55  ;;  %11080 = vmatprep.subr.bf16.mxu1 %v15293_v12 }
 0x72d   : > { %11065 = vmatpush3.bf16.msra.mxu0 %v11246_v32  ;;  %11072 = vmatprep.mubr.msk.bf16.mxu0 %vm11295_vm11, %v15293_v12 }
 0x72e   : > { %11066 = vmatprep.subr.bf16.mxu0 %v15293_v12 }
 0x72f   : > { %11081 = vmatpush3.bf16.msra.mxu1 %v11252_v6 }
 0x730   : > { %11082 = vmatprep.subr.bf16.mxu1 %v15293_v12 }
 0x731   : > { %11067 = vmatpush3.bf16.msra.mxu0 %v11247_v57 }
 0x732   : > { %11068 = vmatprep.subr.bf16.mxu0 %v15293_v12 }
 0x733   : > { %11083 = vmatpush3.bf16.msra.mxu1 %v11253_v40 }
 0x734   : > { %11084 = vmatprep.subr.bf16.mxu1 %v15293_v12 }
 0x735   : > { %11069 = vmatpush3.bf16.msra.mxu0 %v11248_v28 }
 0x736   : > { %11070 = vmatprep.subr.bf16.mxu0 %v15293_v12 }
 0x737   : > { %11085 = vmatpush3.bf16.msra.mxu1 %v11254_v17 }
 0x738   : > { %11086 = vmatprep.subr.bf16.mxu1 %v15293_v12 }
 0x739   : > { %11071 = vmatpush3.bf16.msra.mxu0 %v11249_v39  ;;  %v9812_v39 = vld [vmem:[%s14950_s10] ss:$0 sm:$0xff] }
 0x73a   : > { %9116 = vmatprep.subr.bf16.mxu0 %v11260_v15 }
 0x73b   : > { %11087 = vmatpush3.bf16.msra.mxu1 %v11255_v41 }
 0x73c   : > { %11073 = vmatmul.mubr.msk.bf16.vlgmr.msra.gmra.mxu0 %vm8158_vm8, %v8812_v48  ;;  %11088 = vmatprep.subr.bf16.mxu1 %v15293_v12 }
 0x73d   : > { %9117 = vmatpush1.bf16.msra.mxu0 %v11258_v45 }
 0x73e   : > { %9118 = vmatprep.subr.bf16.mxu0 %v11263_v54 }
 0x73f   : > { %11089 = vmatpush3.bf16.msra.mxu1 %v11256_v60 }
 0x740   : > { %11090 = vmatprep.subr.bf16.mxu1 %v15293_v12  ;;  %v11275_v12 = vld [vmem:[%s14953_s13 + $0x24] ss:$8 sps:$4 sm:$0xff]  }
 0x741   : > { %9119 = vmatpush1.bf16.msra.mxu0 %v11261_v24 }
 0x742   : > { %9120 = vmatprep.subr.bf16.mxu0 %v11266_v16  ;;  %v11279_v16 = vld [vmem:[%s14953_s13] ss:$8 sps:$4 sm:$0xff]  }
 0x743   : > { %11091 = vmatpush3.bf16.msra.mxu1 %v11257_v14  ;;  %v11296_v14 = vmov 0  }
 0x744   : > { %9148 = vmatprep.mubr.bf16.mxu0 %v11296_v14 }
 0x745   : > { %9121 = vmatpush1.bf16.msra.mxu0 %v11264_v9  ;;  %v11281_v9 = vld [vmem:[%s14953_s13 + $0x4] ss:$8 sps:$4 sm:$0xff]  }
 0x746   : > { %9122 = vmatprep.subr.bf16.mxu0 %v11269_v19  ;;  %v8917_v19 = vld [vmem:[%s14952_s12] sm:$0x1] }
 0x749   : > { %9123 = vmatpush1.bf16.msra.mxu0 %v11267_v23 }
 0x74a   : > { %9124 = vmatprep.subr.bf16.mxu0 %v11272_v43 }
 0x74d   : > { %9125 = vmatpush1.bf16.msra.mxu0 %v11270_v44 }
 0x74e   : > { %9126 = vmatprep.subr.bf16.mxu0 %v11275_v12 }
 0x751   : > { %9127 = vmatpush1.bf16.msra.mxu0 %v11273_v49 }
 0x752   : > { %9128 = vmatprep.subr.bf16.mxu0 %v11278_v62 }
 0x755   : > { %9129 = vmatpush1.bf16.msra.mxu0 %v11276_v29 }
 0x756   : > { %9130 = vmatprep.subr.bf16.mxu0 %v11281_v9 }
 0x759   : > { %9131 = vmatpush1.bf16.msra.mxu0 %v11279_v16 }
 0x7b6   : > { %v8324_v13 = vpop.f32.mrf.mxu1 }
 0x7b8   : > { %v10990_v4 = vpop.f32.mrf.mxu1 }
 0x7ba   : > { %v8327_v52 = vpop.f32.mrf.mxu1 }
 0x7bc   : > { %v8258_v11 = vpop.f32.mrf.mxu0  ;;  %v10991_v7 = vpop.f32.mrf.mxu1 }
 0x7bd   : > { %v8325_v25 = vadd.f32 %v8324_v13, %v8258_v11  ;;  %v9106_v13 = vlaneseq  ;;  %v9024_v11 = vld [vmem:[%s14954_s14] sm:$0x3] }
 0x7be   : > { %v10978_v0 = vpop.f32.mrf.mxu0 }
 0x7bf   : > { %v9107_v4 = vshrl.u32 %v9106_v13, 7  ;;  %vm9179_vm0 = vcmp.lt.s32.totalorder %v9106_v13, 256 }
 0x7c0   : > { %v8261_v5 = vpop.f32.mrf.mxu0 }
 0x7c1   : > { %v9108_v52 = vsub.s32 0, %v9107_v4  ;;  %v9112_v7 = vsub.s32 1, %v9107_v4  ;;  %v11297_v5 = vmov 1966171168  }
 0x7c2   : > { %v10979_v30 = vpop.f32.mrf.mxu0 }
 0x7c3   : > { %v9109_v0 = vrot.slane %v9024_v11, %v9108_v52  ;;  %v9163_v30 = vunpack.c.l.s4 %v11297_v5 }
 0x7c6   : > { %v8480_v35 = vpop.f32.mrf.mxu1 }
 0x7c8   : > { %v11014_v56 = vpop.f32.mrf.mxu1 }
 0x7ca   : > { %v8483_v21 = vpop.f32.mrf.mxu1 }
 0x7cc   : > { %v8402_v10 = vpop.f32.mrf.mxu0  ;;  %v11015_v63 = vpop.f32.mrf.mxu1 }
 0x7cd   : > { %v8408_v42 = vadd.f32 %v8402_v10, %v8325_v25  ;;  %v9164_v10 = vunpack.c.0.s8 %v9163_v30 }
 0x7ce   : > { %v11002_v1 = vpop.f32.mrf.mxu0 }
 0x7cf   : > { %v8486_v61 = vadd.f32 %v8480_v35, %v8408_v42  ;;  %v9113_v35 = vrot.slane %v9024_v11, %v9112_v7 }
 0x7d0   : > { %v8405_v3 = vpop.f32.mrf.mxu0 }
 0x7d2   : > { %v11003_v27 = vpop.f32.mrf.mxu0 }
 0x7d6   : > { %v8638_v33 = vpop.f32.mrf.mxu1 }
 0x7d8   : > { %v11038_v2 = vpop.f32.mrf.mxu1 }
 0x7d9   : > { %v9167_v2 = vsub.s32 %v9164_v10, %v9107_v4 }
 0x7da   : > { %v8641_v47 = vpop.f32.mrf.mxu1 }
 0x7dc   : > { %v8560_v20 = vpop.f32.mrf.mxu0  ;;  %v11039_v31 = vpop.f32.mrf.mxu1 }
 0x7dd   : > { %v8566_v26 = vadd.f32 %v8560_v20, %v8486_v61 }
 0x7de   : > { %v11026_v38 = vpop.f32.mrf.mxu0 }
 0x7df   : > { %v8644_v32 = vadd.f32 %v8638_v33, %v8566_v26 }
 0x7e0   : > { %v8563_v37 = vpop.f32.mrf.mxu0 }
 0x7e2   : > { %v11027_v58 = vpop.f32.mrf.mxu0 }
 0x7e6   : > { %v8796_v34 = vpop.f32.mrf.mxu1 }
 0x7e8   : > { %v11062_v46 = vpop.f32.mrf.mxu1 }
 0x7ea   : > { %v8799_v36 = vpop.f32.mrf.mxu1 }
 0x7ec   : > { %v8716_v22 = vpop.f32.mrf.mxu0  ;;  %v11063_v59 = vpop.f32.mrf.mxu1 }
 0x7ed   : > { %v8722_v55 = vadd.f32 %v8716_v22, %v8644_v32 }
 0x7ee   : > { %v11050_v18 = vpop.f32.mrf.mxu0 }
 0x7ef   : > { %v8802_v57 = vadd.f32 %v8796_v34, %v8722_v55 }
 0x7f0   : > { %v8719_v50 = vpop.f32.mrf.mxu0 }
 0x7f2   : > { %v11051_v8 = vpop.f32.mrf.mxu0 }
 0x7fc   : > { %v8874_v28 = vpop.f32.mrf.mxu0 }
 0x7fd   : > { %v8880_v48 = vadd.f32 %v8874_v28, %v8802_v57 }
 0x7fe   : > { %v11074_v53 = vpop.f32.mrf.mxu0 }
 0x7ff   : > { %v8888_v51 = vadd.f32 %v9812_v39, %v8880_v48 }
 0x800   : > { %v8877_v6 = vpop.f32.mrf.mxu0 }
 0x801   : > { %v8889_v40 = vmax.f32 %v8888_v51, 0.0 }
 0x802   : > { %v11075_v17 = vpop.f32.mrf.mxu0 }
 0x803   : > { %v8891_v41 = vrot.slane %v8889_v40, 4 }
 0x805   : > { %v8893_v45 = vmax.f32 %v8889_v40, %v8891_v41 }
 0x807   : > { %v8895_v15 = vrot.slane %v8893_v45, 1 }
 0x809   : > { %v8897_v54 = vmax.f32 %v8893_v45, %v8895_v15 }
 0x80b   : > { %8898 = vst [vmem:[#allocation10] sm:$0x1] %v8897_v54 }
 0x812   : > { %v8899_v24 = vld [vmem:[#allocation10] sm:$0x1] }
 0x813   : > { %v8900_v60 = vpack.c.bf16 %v8899_v24, %v8899_v24 }
 0x815   : > { %11093 = vmatmul.mubr.bf16.vlgmr.msra.gmra.mxu1 %v8900_v60 }
 0x8d5   : > { %v9000_v23 = vpop.f32.mrf.mxu1 }
 0x8d6   : > { %v9001_v43 = vadd.f32 %v9000_v23, %v8917_v19 }
 0x8d7   : > { %v11094_v44 = vpop.f32.mrf.mxu1 }
 0x8d8   : > { %v9006_v12 = vmax.f32 %v9001_v43, 0.0 }
 0x8d9   : > { %v9003_v49 = vpop.f32.mrf.mxu1 }
 0x8da   : > { %v9007_v62 = vpack.c.bf16 %v9006_v12, %v9006_v12 }
 0x8db   : > { %v11095_v29 = vpop.f32.mrf.mxu1 }
 0x8dc   : > { %9149 = vmatmul.mubr.bf16.vlgmr.msra.gmra.mxu0 %v9007_v62 }
 0x99c   : > { %v9150_v56 = vpop.f32.mrf.mxu0 }
 0x99d   : > { %v9151_v21 = vadd.f32 %v9150_v56, %v9109_v0 }
 0x99e   : > { %v9152_v63 = vpop.f32.mrf.mxu0 }
 0x99f   : > { %v9153_v1 = vadd.f32 %v9152_v63, %v9113_v35  ;;  %v9157_v27 = vmax.f32 %v9151_v21, 0.0 }
 0x9a0   : > { %v9154_v3 = vpop.f32.mrf.mxu0 }
 0x9a1   : > { %v9158_v33 = vmax.f32 %v9153_v1, 0.0 }
 0x9a2   : > { %v9155_v47 = vpop.f32.mrf.mxu0 }
 0x9a3   : > { %v9161_v20 = vcombine.low %v9157_v27, %v9158_v33 }
 0x9a5   : > { %v9168_v31 = vrot.slane %v9161_v20, %v9167_v2 }
 0x9a7   : > { %v9175_v38 = vrot.slane %v9168_v31, %v9167_v2 }
 0x9a9   : > { %9181 = vst.msk [vmem:[%s492_s26] sm:$0x3] %vm9179_vm0, %v9175_v38 }
 0x9aa PF: > { %s25_s18 = sadd.s32 1, %s11292_s18  }
 0x9ab   : > { %p22_p4 = scmp.ge.s32.totalorder %s25_s18, 4  }
 0x9ad   :  { %24 = sbr.rel (!%p22_p4) target bundleno = 1 (0x1), region = 184 }

</bundles_post_ra>
